<compile_context>
chip_gen: v7x
topology: tpu7x:2x2x1
jax: 0.10.0
libtpu: 0.0.40
codegen_flags: <defaults>
</compile_context>

<pallas_src>
import jax
import jax.numpy as jnp
from jax.experimental import pallas as pl
from jax.experimental.pallas import tpu as pltpu

EPS = 1e-5
LANE = 128


def _round_up(x, m):
    return ((x + m - 1) // m) * m


def _pick_rows_per_tile(h, wpad, cap_rows=2048):
    """Largest divisor rh of h with rh*wpad rows per epilogue tile <= cap_rows."""
    best = 1
    for r in range(1, h + 1):
        if h % r == 0 and r * wpad <= cap_rows:
            best = r
    return best


def _vmem_limit_bytes():
    # v5e/v6e: 128 MiB physical VMEM -> allow big resident blocks; v7x: 64 MiB.
    try:
        cap = int(pltpu.get_tpu_info().vmem_capacity_bytes)
        return min(100 * 1024 * 1024, max(32 * 1024 * 1024, cap - 16 * 1024 * 1024))
    except Exception:
        return 48 * 1024 * 1024


def basic_block_forward(x_nchw, params, stride=1):
    """BasicBlock forward (stride=1, downsample=None), training-mode BatchNorm."""
    w1, g1, b1, w2, g2, b2 = params
    if stride != 1:
        # TODO(synk): stride != 1 / downsample projection residual not implemented.
        raise NotImplementedError("only stride=1, downsample=None is supported")

    n, cin, h, w = x_nchw.shape
    planes = int(w1.shape[0])
    assert int(w1.shape[1]) == cin, "conv1 in_channels mismatch"
    assert planes == cin, "identity residual requires in_planes == planes"

    f32, bf16 = jnp.float32, jnp.bfloat16
    cp = _round_up(planes, LANE)       # lane-dense channel dim (multiple of 128)
    c8 = _round_up(cin, 8)             # sublane-padded input channels
    wpad = _round_up(w + 2, 8)         # padded width, 8-aligned so all kh*wpad row
                                       # offsets stay sublane-tile aligned
    mwide = h * wpad                   # rows of the per-image "wide" layout
    flat = (h + 2) * wpad              # rows of the kw-folded padded layout
    m_valid = float(n * h * w)         # BN sample count (junk columns excluded)
    inv_m = 1.0 / m_valid

    # ----------------------- host-side layout prep -------------------------------
    x_nhwc = jnp.transpose(x_nchw, (0, 2, 3, 1)).astype(f32)            # (N,H,W,C)

    # conv1 input: zero-pad to (h+2, wpad+2) and fold the 3 kw taps into channels
    # (K = 3*c8) so the in-kernel conv is 3 fat, aligned matmuls per image.
    xp = jnp.pad(x_nhwc, ((0, 0), (1, 1), (1, wpad + 1 - w), (0, c8 - cin)))
    xk = jnp.concatenate([xp[:, :, 0:wpad], xp[:, :, 1:wpad + 1],
                          xp[:, :, 2:wpad + 2]], axis=-1)
    xk = xk.reshape(n, flat, 3 * c8).astype(bf16)

    # conv weights: torch (Cout, Cin, 3, 3) -> (kh, 3*Cin_pad, Cout_pad), bf16 (MXU)
    def fold_weight(wt, cin_pad):
        t = jnp.transpose(wt, (2, 3, 1, 0))                       # (kh, kw, ci, co)
        t = jnp.pad(t, ((0, 0), (0, 0), (0, cin_pad - t.shape[2]),
                        (0, cp - t.shape[3])))
        return t.reshape(3, 3 * cin_pad, cp).astype(bf16)

    w1k = fold_weight(w1, c8)          # (3, 3*c8, cp)
    w2k = fold_weight(w2, cp)          # (3, 3*cp, cp)

    # BN affine params, zero-padded so padded channels stay exactly 0
    def pad_cp(v):
        return jnp.pad(v.astype(f32), (0, cp - planes)).reshape(1, cp)

    g1p, b1p, g2p, b2p = pad_cp(g1), pad_cp(b1), pad_cp(g2), pad_cp(b2)

    # validity mask of the wide layout (columns >= w of every spatial row are junk)
    mask = ((jnp.arange(mwide) % wpad) < w).astype(f32).reshape(mwide, 1)

    vmem_limit = _vmem_limit_bytes()
    params_reduce = pltpu.CompilerParams(
        dimension_semantics=("arbitrary",), vmem_limit_bytes=vmem_limit)

    # ---------------- kernel A: conv1 (3 aligned matmuls) + BN1 statistics -------
    def conv1_kernel(x_ref, w_ref, mask_ref, y_ref, s_ref, q_ref, acc_ref):
        @pl.when(pl.program_id(0) == 0)
        def _init():
            s_ref[...] = jnp.zeros_like(s_ref)
            q_ref[...] = jnp.zeros_like(q_ref)

        acc_ref[...] = jnp.dot(x_ref[0:mwide, :], w_ref[0],
                               preferred_element_type=f32)
        acc_ref[...] += jnp.dot(x_ref[wpad:wpad + mwide, :], w_ref[1],
                                preferred_element_type=f32)
        acc_ref[...] += jnp.dot(x_ref[2 * wpad:2 * wpad + mwide, :], w_ref[2],
                                preferred_element_type=f32)
        acc = acc_ref[...] * mask_ref[...]            # zero junk columns
        y_ref[...] = acc.astype(jnp.bfloat16)         # bf16 intermediate (half HBM)
        s_ref[...] += jnp.sum(acc, axis=0, keepdims=True)
        q_ref[...] += jnp.sum(acc * acc, axis=0, keepdims=True)

    ce_a = pl.CostEstimate(
        flops=int(2 * n * mwide * (3 * c8) * cp * 3),
        transcendentals=0,
        bytes_accessed=int(xk.size * 2 + w1k.size * 2 + mask.size * 4
                           + n * mwide * cp * 2 + 2 * cp * 4))

    y1, s1, q1 = pl.pallas_call(
        conv1_kernel,
        grid=(n,),
        in_specs=[
            pl.BlockSpec((None, flat, 3 * c8), lambda i: (i, 0, 0)),
            pl.BlockSpec((3, 3 * c8, cp), lambda i: (0, 0, 0)),
            pl.BlockSpec((mwide, 1), lambda i: (0, 0)),
        ],
        out_specs=[
            pl.BlockSpec((None, mwide, cp), lambda i: (i, 0, 0)),
            pl.BlockSpec((1, cp), lambda i: (0, 0)),
            pl.BlockSpec((1, cp), lambda i: (0, 0)),
        ],
        out_shape=[
            jax.ShapeDtypeStruct((n, mwide, cp), bf16),
            jax.ShapeDtypeStruct((1, cp), f32),
            jax.ShapeDtypeStruct((1, cp), f32),
        ],
        scratch_shapes=[pltpu.VMEM((mwide, cp), f32)],
        compiler_params=params_reduce,
        cost_estimate=ce_a,
    )(xk, w1k, mask)

    # ------ kernel B: fused BN1 + ReLU + conv2 (3 aligned matmuls) + BN2 stats ---
    def bn1_conv2_kernel(y1_ref, s1_ref, q1_ref, g1_ref, b1_ref, w2_ref, mask_ref,
                         y2_ref, s2_ref, q2_ref, pad_ref, acc_ref):
        @pl.when(pl.program_id(0) == 0)
        def _init():
            s2_ref[...] = jnp.zeros_like(s2_ref)
            q2_ref[...] = jnp.zeros_like(q2_ref)
            # Zero the scratch ONCE: it persists across grid steps; every interior
            # band is fully rewritten each step, the zero borders never change.
            pad_ref[...] = jnp.zeros_like(pad_ref)

        # global BN1 stats -> single per-channel scale/shift (fused BN), then ReLU
        mean = s1_ref[...] * inv_m
        var = jnp.maximum(q1_ref[...] * inv_m - mean * mean, 0.0)
        scale = g1_ref[...] * jax.lax.rsqrt(var + EPS)
        shift = b1_ref[...] - mean * scale
        z = jnp.maximum(y1_ref[...].astype(f32) * scale + shift, 0.0)
        zb = (z * mask_ref[...]).astype(jnp.bfloat16)

        # kw-folded zero-bordered scatter: band kw (columns kw*cp:(kw+1)*cp) holds
        # z shifted by kw columns, so conv2 is 3 aligned matmuls with K = 3*cp.
        pad_ref[wpad + 1:wpad + 1 + mwide, 0:cp] = zb
        pad_ref[wpad:wpad + mwide, cp:2 * cp] = zb
        pad_ref[wpad - 1:wpad - 1 + mwide, 2 * cp:3 * cp] = zb

        acc_ref[...] = jnp.dot(pad_ref[0:mwide, :], w2_ref[0],
                               preferred_element_type=f32)
        acc_ref[...] += jnp.dot(pad_ref[wpad:wpad + mwide, :], w2_ref[1],
                                preferred_element_type=f32)
        acc_ref[...] += jnp.dot(pad_ref[2 * wpad:2 * wpad + mwide, :], w2_ref[2],
                                preferred_element_type=f32)
        acc = acc_ref[...] * mask_ref[...]
        y2_ref[...] = acc.astype(jnp.bfloat16)
        s2_ref[...] += jnp.sum(acc, axis=0, keepdims=True)
        q2_ref[...] += jnp.sum(acc * acc, axis=0, keepdims=True)

    ce_b = pl.CostEstimate(
        flops=int(2 * n * mwide * (3 * cp) * cp * 3 + 10 * n * mwide * cp),
        transcendentals=int(2 * n * cp),
        bytes_accessed=int(2 * n * mwide * cp * 2 + w2k.size * 2
                           + mask.size * 4 + 6 * cp * 4))

    y2, s2, q2 = pl.pallas_call(
        bn1_conv2_kernel,
        grid=(n,),
        in_specs=[
            pl.BlockSpec((None, mwide, cp), lambda i: (i, 0, 0)),
            pl.BlockSpec((1, cp), lambda i: (0, 0)),
            pl.BlockSpec((1, cp), lambda i: (0, 0)),
            pl.BlockSpec((1, cp), lambda i: (0, 0)),
            pl.BlockSpec((1, cp), lambda i: (0, 0)),
            pl.BlockSpec((3, 3 * cp, cp), lambda i: (0, 0, 0)),
            pl.BlockSpec((mwide, 1), lambda i: (0, 0)),
        ],
        out_specs=[
            pl.BlockSpec((None, mwide, cp), lambda i: (i, 0, 0)),
            pl.BlockSpec((1, cp), lambda i: (0, 0)),
            pl.BlockSpec((1, cp), lambda i: (0, 0)),
        ],
        out_shape=[
            jax.ShapeDtypeStruct((n, mwide, cp), bf16),
            jax.ShapeDtypeStruct((1, cp), f32),
            jax.ShapeDtypeStruct((1, cp), f32),
        ],
        scratch_shapes=[pltpu.VMEM((flat, 3 * cp), bf16),
                        pltpu.VMEM((mwide, cp), f32)],
        compiler_params=params_reduce,
        cost_estimate=ce_b,
    )(y1, s1, q1, g1p, b1p, w2k, mask)

    # -------- kernel C: BN2 (fused scale/shift) + residual add + ReLU ------------
    # Reads the residual from the original NHWC input (no inflated residual slab)
    # and writes the cropped NHWC result directly (no extra full-size crop pass).
    rh = _pick_rows_per_tile(h, wpad, cap_rows=2048)

    def bn2_add_relu_kernel(y_ref, x_ref, s_ref, q_ref, g_ref, b_ref, o_ref):
        mean = s_ref[...] * inv_m
        var = jnp.maximum(q_ref[...] * inv_m - mean * mean, 0.0)
        scale = g_ref[...] * jax.lax.rsqrt(var + EPS)
        shift = b_ref[...] - mean * scale
        # crop junk columns / padded channels first, then scale/shift/add/ReLU
        y = y_ref[...].reshape(rh, wpad, cp)[:, :w, :planes].astype(f32)
        z = y * scale[:, :planes] + shift[:, :planes]
        o_ref[...] = jnp.maximum(z + x_ref[...], 0.0)

    ce_c = pl.CostEstimate(
        flops=int(6 * n * h * w * planes),
        transcendentals=int(2 * n * (h // rh) * cp),
        bytes_accessed=int(n * mwide * cp * 2 + 2 * n * h * w * planes * 4
                           + 4 * cp * 4))

    out_nhwc = pl.pallas_call(
        bn2_add_relu_kernel,
        grid=(n, h // rh),
        in_specs=[
            pl.BlockSpec((None, rh * wpad, cp), lambda i, j: (i, j, 0)),
            pl.BlockSpec((None, rh, w, cin), lambda i, j: (i, j, 0, 0)),
            pl.BlockSpec((1, cp), lambda i, j: (0, 0)),
            pl.BlockSpec((1, cp), lambda i, j: (0, 0)),
            pl.BlockSpec((1, cp), lambda i, j: (0, 0)),
            pl.BlockSpec((1, cp), lambda i, j: (0, 0)),
        ],
        out_specs=pl.BlockSpec((None, rh, w, planes), lambda i, j: (i, j, 0, 0)),
        out_shape=jax.ShapeDtypeStruct((n, h, w, planes), f32),
        compiler_params=pltpu.CompilerParams(
            dimension_semantics=("parallel", "parallel"),
            vmem_limit_bytes=vmem_limit),
        cost_estimate=ce_c,
    )(y2, x_nhwc, s2, q2, g2p, b2p)

    # only a small cropped NHWC -> NCHW transpose remains on the host
    return jnp.transpose(out_nhwc, (0, 3, 1, 2))


def reference_forward(x_nchw, params):
    """Pure-JAX reference with matching numerics (bf16 matmul inputs, f32 BN math)."""
    w1, g1, b1, w2, g2, b2 = params

    def conv3x3(x, wt):
        return jax.lax.conv_general_dilated(
            x.astype(jnp.bfloat16), wt.astype(jnp.bfloat16),
            window_strides=(1, 1), padding=((1, 1), (1, 1)),
            dimension_numbers=("NCHW", "OIHW", "NCHW"),
            preferred_element_type=jnp.float32)

    def bn(y, g, b):
        mean = jnp.mean(y, axis=(0, 2, 3), keepdims=True)
        var = jnp.mean((y - mean) ** 2, axis=(0, 2, 3), keepdims=True)
        yhat = (y - mean) * jax.lax.rsqrt(var + EPS)
        return yhat * g.reshape(1, -1, 1, 1) + b.reshape(1, -1, 1, 1)

    out = jax.nn.relu(bn(conv3x3(x_nchw.astype(jnp.float32), w1), g1, b1))
    out = bn(conv3x3(out, w2), g2, b2) + x_nchw.astype(jnp.float32)
    return jax.nn.relu(out)


def init_params(key, in_planes, planes):
    k1, k2 = jax.random.split(key)
    # deterministic synthetic conv weights, PyTorch layout (Cout, Cin, kh, kw)
    w1 = 0.1 * jax.random.normal(k1, (planes, in_planes, 3, 3), jnp.float32)
    w2 = 0.1 * jax.random.normal(k2, (planes, planes, 3, 3), jnp.float32)
    # BatchNorm2d default init: weight (gamma)=1, bias (beta)=0
    g1 = jnp.ones((planes,), jnp.float32)
    b1 = jnp.zeros((planes,), jnp.float32)
    g2 = jnp.ones((planes,), jnp.float32)
    b2 = jnp.zeros((planes,), jnp.float32)
    return (w1, g1, b1, w2, g2, b2)


if __name__ == "__main__":
    key = jax.random.PRNGKey(0)
    kx, kp = jax.random.split(key)

    N, C, H, W = 2, 4, 16, 16          # in_planes = planes = 4, stride = 1
    x = jax.random.normal(kx, (N, C, H, W), jnp.float32)
    params = init_params(kp, C, C)

    fwd = jax.jit(basic_block_forward)
    out = jax.block_until_ready(fwd(x, params))
    assert out.shape == (N, C, H, W)

    ref = jax.block_until_ready(jax.jit(reference_forward)(x, params))
    max_err = float(jnp.max(jnp.abs(out - ref)))
    assert max_err < 5e-2, f"mismatch vs reference: max_abs_err={max_err}"
    print("KERNEL_OK")
</pallas_src>

<mosaic_0001>
module attributes {stable_mosaic.version = 11 : i64} {
  func.func @conv1_kernel(%arg0: i32, %arg1: memref<1x432x24xbf16, #tpu.memory_space<vmem>>, %arg2: memref<3x24x128xbf16, #tpu.memory_space<vmem>>, %arg3: memref<384x1xf32, #tpu.memory_space<vmem>>, %arg4: memref<1x384x128xbf16, #tpu.memory_space<vmem>>, %arg5: memref<1x128xf32, #tpu.memory_space<vmem>>, %arg6: memref<1x128xf32, #tpu.memory_space<vmem>>, %arg7: memref<384x128xf32, #tpu.memory_space<vmem>>) attributes {dimension_semantics = [#tpu.dimension_semantics<arbitrary>], iteration_bounds = array<i64: 2>, scalar_prefetch = 0 : i64, scratch_operands = 1 : i64, tpu.core_type = #tpu.core_type<tc>, window_params = [{transform_indices = @transform_0, window_bounds = array<i64: 1, 432, 24>}, {pipeline_mode = #tpu.pipeline_mode<synchronous>, transform_indices = @transform_1, window_bounds = array<i64: 3, 24, 128>}, {pipeline_mode = #tpu.pipeline_mode<synchronous>, transform_indices = @transform_2, window_bounds = array<i64: 384, 1>}, {transform_indices = @transform_3, window_bounds = array<i64: 1, 384, 128>}, {pipeline_mode = #tpu.pipeline_mode<synchronous>, transform_indices = @transform_4, window_bounds = array<i64: 1, 128>}, {pipeline_mode = #tpu.pipeline_mode<synchronous>, transform_indices = @transform_5, window_bounds = array<i64: 1, 128>}]} {
    %c0_i32 = arith.constant 0 : i32
    %0 = arith.cmpi eq, %arg0, %c0_i32 : i32
    %1 = arith.extui %0 : i1 to i32
    %c0_i32_0 = arith.constant 0 : i32
    %2 = arith.cmpi ne, %1, %c0_i32_0 : i32
    scf.if %2 {
      %cst_43 = arith.constant 0.000000e+00 : f32
      %44 = vector.broadcast %cst_43 : f32 to vector<1x128xf32>
      %c0_44 = arith.constant 0 : index
      %c0_45 = arith.constant 0 : index
      %45 = vector.load %arg5[%c0_44, %c0_45] : memref<1x128xf32, #tpu.memory_space<vmem>>, vector<1x128xf32>
      tpu.vector_store %arg5[%c0_44, %c0_45], %44 {strides = array<i32>} : memref<1x128xf32, #tpu.memory_space<vmem>>, vector<1x128xf32>,
      %cst_46 = arith.constant 0.000000e+00 : f32
      %46 = vector.broadcast %cst_46 : f32 to vector<1x128xf32>
      %c0_47 = arith.constant 0 : index
      %c0_48 = arith.constant 0 : index
      %47 = vector.load %arg6[%c0_47, %c0_48] : memref<1x128xf32, #tpu.memory_space<vmem>>, vector<1x128xf32>
      tpu.vector_store %arg6[%c0_47, %c0_48], %46 {strides = array<i32>} : memref<1x128xf32, #tpu.memory_space<vmem>>, vector<1x128xf32>,
    } else {
    }
    %c0 = arith.constant 0 : index
    %c0_1 = arith.constant 0 : index
    %c0_2 = arith.constant 0 : index
    %3 = vector.load %arg1[%c0, %c0_1, %c0_2] : memref<1x432x24xbf16, #tpu.memory_space<vmem>>, vector<1x384x24xbf16>
    %4 = vector.shape_cast %3 : vector<1x384x24xbf16> to vector<384x24xbf16>
    %c0_3 = arith.constant 0 : index
    %c0_4 = arith.constant 0 : index
    %c0_5 = arith.constant 0 : index
    %5 = vector.load %arg2[%c0_3, %c0_4, %c0_5] : memref<3x24x128xbf16, #tpu.memory_space<vmem>>, vector<1x24x128xbf16>
    %6 = vector.shape_cast %5 : vector<1x24x128xbf16> to vector<24x128xbf16>
    %cst = arith.constant dense<0.000000e+00> : vector<384x128xf32>
    %7 = tpu.matmul %4, %6, %cst {dimension_numbers = #tpu.dot_dimension_numbers<[1], [0], [0], [1], [0, 0, 1, 1], [], []>} : vector<384x24xbf16>, vector<24x128xbf16>, vector<384x128xf32> -> vector<384x128xf32>
    %c0_6 = arith.constant 0 : index
    %c0_7 = arith.constant 0 : index
    %8 = vector.load %arg7[%c0_6, %c0_7] : memref<384x128xf32, #tpu.memory_space<vmem>>, vector<384x128xf32>
    tpu.vector_store %arg7[%c0_6, %c0_7], %7 {strides = array<i32>} : memref<384x128xf32, #tpu.memory_space<vmem>>, vector<384x128xf32>,
    %c0_8 = arith.constant 0 : index
    %c0_9 = arith.constant 0 : index
    %9 = vector.load %arg7[%c0_8, %c0_9] : memref<384x128xf32, #tpu.memory_space<vmem>>, vector<384x128xf32>
    %c0_10 = arith.constant 0 : index
    %c24 = arith.constant 24 : index
    %c0_11 = arith.constant 0 : index
    %10 = vector.load %arg1[%c0_10, %c24, %c0_11] : memref<1x432x24xbf16, #tpu.memory_space<vmem>>, vector<1x384x24xbf16>
    %11 = vector.shape_cast %10 : vector<1x384x24xbf16> to vector<384x24xbf16>
    %c1 = arith.constant 1 : index
    %c0_12 = arith.constant 0 : index
    %c0_13 = arith.constant 0 : index
    %12 = vector.load %arg2[%c1, %c0_12, %c0_13] : memref<3x24x128xbf16, #tpu.memory_space<vmem>>, vector<1x24x128xbf16>
    %13 = vector.shape_cast %12 : vector<1x24x128xbf16> to vector<24x128xbf16>
    %cst_14 = arith.constant dense<0.000000e+00> : vector<384x128xf32>
    %14 = tpu.matmul %11, %13, %cst_14 {dimension_numbers = #tpu.dot_dimension_numbers<[1], [0], [0], [1], [0, 0, 1, 1], [], []>} : vector<384x24xbf16>, vector<24x128xbf16>, vector<384x128xf32> -> vector<384x128xf32>
    %15 = arith.addf %9, %14 : vector<384x128xf32>
    %c0_15 = arith.constant 0 : index
    %c0_16 = arith.constant 0 : index
    %16 = vector.load %arg7[%c0_15, %c0_16] : memref<384x128xf32, #tpu.memory_space<vmem>>, vector<384x128xf32>
    tpu.vector_store %arg7[%c0_15, %c0_16], %15 {strides = array<i32>} : memref<384x128xf32, #tpu.memory_space<vmem>>, vector<384x128xf32>,
    %c0_17 = arith.constant 0 : index
    %c0_18 = arith.constant 0 : index
    %17 = vector.load %arg7[%c0_17, %c0_18] : memref<384x128xf32, #tpu.memory_space<vmem>>, vector<384x128xf32>
    %c0_19 = arith.constant 0 : index
    %c48 = arith.constant 48 : index
    %c0_20 = arith.constant 0 : index
    %18 = vector.load %arg1[%c0_19, %c48, %c0_20] : memref<1x432x24xbf16, #tpu.memory_space<vmem>>, vector<1x384x24xbf16>
    %19 = vector.shape_cast %18 : vector<1x384x24xbf16> to vector<384x24xbf16>
    %c2 = arith.constant 2 : index
    %c0_21 = arith.constant 0 : index
    %c0_22 = arith.constant 0 : index
    %20 = vector.load %arg2[%c2, %c0_21, %c0_22] : memref<3x24x128xbf16, #tpu.memory_space<vmem>>, vector<1x24x128xbf16>
    %21 = vector.shape_cast %20 : vector<1x24x128xbf16> to vector<24x128xbf16>
    %cst_23 = arith.constant dense<0.000000e+00> : vector<384x128xf32>
    %22 = tpu.matmul %19, %21, %cst_23 {dimension_numbers = #tpu.dot_dimension_numbers<[1], [0], [0], [1], [0, 0, 1, 1], [], []>} : vector<384x24xbf16>, vector<24x128xbf16>, vector<384x128xf32> -> vector<384x128xf32>
    %23 = arith.addf %17, %22 : vector<384x128xf32>
    %c0_24 = arith.constant 0 : index
    %c0_25 = arith.constant 0 : index
    %24 = vector.load %arg7[%c0_24, %c0_25] : memref<384x128xf32, #tpu.memory_space<vmem>>, vector<384x128xf32>
    tpu.vector_store %arg7[%c0_24, %c0_25], %23 {strides = array<i32>} : memref<384x128xf32, #tpu.memory_space<vmem>>, vector<384x128xf32>,
    %c0_26 = arith.constant 0 : index
    %c0_27 = arith.constant 0 : index
    %25 = vector.load %arg7[%c0_26, %c0_27] : memref<384x128xf32, #tpu.memory_space<vmem>>, vector<384x128xf32>
    %c0_28 = arith.constant 0 : index
    %c0_29 = arith.constant 0 : index
    %26 = vector.load %arg3[%c0_28, %c0_29] : memref<384x1xf32, #tpu.memory_space<vmem>>, vector<384x1xf32>
    %27 = vector.broadcast %26 : vector<384x1xf32> to vector<384x128xf32>
    %28 = arith.mulf %25, %27 : vector<384x128xf32>
    %29 = arith.truncf %28 : vector<384x128xf32> to vector<384x128xbf16>
    %c0_30 = arith.constant 0 : index
    %c0_31 = arith.constant 0 : index
    %c0_32 = arith.constant 0 : index
    %30 = vector.load %arg4[%c0_30, %c0_31, %c0_32] : memref<1x384x128xbf16, #tpu.memory_space<vmem>>, vector<1x384x128xbf16>
    %31 = vector.shape_cast %30 : vector<1x384x128xbf16> to vector<384x128xbf16>
    %32 = vector.shape_cast %29 : vector<384x128xbf16> to vector<1x384x128xbf16>
    tpu.vector_store %arg4[%c0_30, %c0_31, %c0_32], %32 {strides = array<i32>} : memref<1x384x128xbf16, #tpu.memory_space<vmem>>, vector<1x384x128xbf16>,
    %c0_33 = arith.constant 0 : index
    %c0_34 = arith.constant 0 : index
    %33 = vector.load %arg5[%c0_33, %c0_34] : memref<1x128xf32, #tpu.memory_space<vmem>>, vector<1x128xf32>
    %cst_35 = arith.constant dense<0.000000e+00> : vector<128xf32>
    %34 = vector.multi_reduction <add>, %28, %cst_35 [0] : vector<384x128xf32> to vector<128xf32>
    %35 = vector.shape_cast %34 : vector<128xf32> to vector<1x128xf32>
    %36 = arith.addf %33, %35 : vector<1x128xf32>
    %c0_36 = arith.constant 0 : index
    %c0_37 = arith.constant 0 : index
    %37 = vector.load %arg5[%c0_36, %c0_37] : memref<1x128xf32, #tpu.memory_space<vmem>>, vector<1x128xf32>
    tpu.vector_store %arg5[%c0_36, %c0_37], %36 {strides = array<i32>} : memref<1x128xf32, #tpu.memory_space<vmem>>, vector<1x128xf32>,
    %c0_38 = arith.constant 0 : index
    %c0_39 = arith.constant 0 : index
    %38 = vector.load %arg6[%c0_38, %c0_39] : memref<1x128xf32, #tpu.memory_space<vmem>>, vector<1x128xf32>
    %39 = arith.mulf %28, %28 : vector<384x128xf32>
    %cst_40 = arith.constant dense<0.000000e+00> : vector<128xf32>
    %40 = vector.multi_reduction <add>, %39, %cst_40 [0] : vector<384x128xf32> to vector<128xf32>
    %41 = vector.shape_cast %40 : vector<128xf32> to vector<1x128xf32>
    %42 = arith.addf %38, %41 : vector<1x128xf32>
    %c0_41 = arith.constant 0 : index
    %c0_42 = arith.constant 0 : index
    %43 = vector.load %arg6[%c0_41, %c0_42] : memref<1x128xf32, #tpu.memory_space<vmem>>, vector<1x128xf32>
    tpu.vector_store %arg6[%c0_41, %c0_42], %42 {strides = array<i32>} : memref<1x128xf32, #tpu.memory_space<vmem>>, vector<1x128xf32>,
    return
  }
  func.func @transform_0(%arg0: i32) -> (i32, i32, i32) {
    %c0_i32 = arith.constant 0 : i32
    %c0_i32_0 = arith.constant 0 : i32
    %c0_i32_1 = arith.constant 0 : i32
    return %arg0, %c0_i32, %c0_i32_0 : i32, i32, i32
  }
  func.func @transform_1(%arg0: i32) -> (i32, i32, i32) {
    %c0_i32 = arith.constant 0 : i32
    %c0_i32_0 = arith.constant 0 : i32
    %c0_i32_1 = arith.constant 0 : i32
    %c0_i32_2 = arith.constant 0 : i32
    return %c0_i32, %c0_i32_0, %c0_i32_1 : i32, i32, i32
  }
  func.func @transform_2(%arg0: i32) -> (i32, i32) {
    %c0_i32 = arith.constant 0 : i32
    %c0_i32_0 = arith.constant 0 : i32
    %c0_i32_1 = arith.constant 0 : i32
    return %c0_i32, %c0_i32_0 : i32, i32
  }
  func.func @transform_3(%arg0: i32) -> (i32, i32, i32) {
    %c0_i32 = arith.constant 0 : i32
    %c0_i32_0 = arith.constant 0 : i32
    %c0_i32_1 = arith.constant 0 : i32
    return %arg0, %c0_i32, %c0_i32_0 : i32, i32, i32
  }
  func.func @transform_4(%arg0: i32) -> (i32, i32) {
    %c0_i32 = arith.constant 0 : i32
    %c0_i32_0 = arith.constant 0 : i32
    %c0_i32_1 = arith.constant 0 : i32
    return %c0_i32, %c0_i32_0 : i32, i32
  }
  func.func @transform_5(%arg0: i32) -> (i32, i32) {
    %c0_i32 = arith.constant 0 : i32
    %c0_i32_0 = arith.constant 0 : i32
    %c0_i32_1 = arith.constant 0 : i32
    return %c0_i32, %c0_i32_0 : i32, i32
  }
}

module attributes {stable_mosaic.version = 11 : i64} {
  func.func @bn2_add_relu_kernel(%arg0: i32, %arg1: i32, %arg2: memref<1x384x128xbf16, #tpu.memory_space<vmem>>, %arg3: memref<1x16x16x4xf32, #tpu.memory_space<vmem>>, %arg4: memref<1x128xf32, #tpu.memory_space<vmem>>, %arg5: memref<1x128xf32, #tpu.memory_space<vmem>>, %arg6: memref<1x128xf32, #tpu.memory_space<vmem>>, %arg7: memref<1x128xf32, #tpu.memory_space<vmem>>, %arg8: memref<1x16x16x4xf32, #tpu.memory_space<vmem>>) attributes {dimension_semantics = [#tpu.dimension_semantics<parallel>, #tpu.dimension_semantics<parallel>], iteration_bounds = array<i64: 2, 1>, scalar_prefetch = 0 : i64, scratch_operands = 0 : i64, tpu.core_type = #tpu.core_type<tc>, window_params = [{transform_indices = @transform_0, window_bounds = array<i64: 1, 384, 128>}, {transform_indices = @transform_1, window_bounds = array<i64: 1, 16, 16, 4>}, {pipeline_mode = #tpu.pipeline_mode<synchronous>, transform_indices = @transform_2, window_bounds = array<i64: 1, 128>}, {pipeline_mode = #tpu.pipeline_mode<synchronous>, transform_indices = @transform_3, window_bounds = array<i64: 1, 128>}, {pipeline_mode = #tpu.pipeline_mode<synchronous>, transform_indices = @transform_4, window_bounds = array<i64: 1, 128>}, {pipeline_mode = #tpu.pipeline_mode<synchronous>, transform_indices = @transform_5, window_bounds = array<i64: 1, 128>}, {transform_indices = @transform_6, window_bounds = array<i64: 1, 16, 16, 4>}]} {
    %c0 = arith.constant 0 : index
    %c0_0 = arith.constant 0 : index
    %0 = vector.load %arg4[%c0, %c0_0] : memref<1x128xf32, #tpu.memory_space<vmem>>, vector<1x128xf32>
    %cst = arith.constant 0.001953125 : f32
    %1 = vector.broadcast %cst : f32 to vector<1x128xf32>
    %2 = arith.mulf %0, %1 : vector<1x128xf32>
    %c0_1 = arith.constant 0 : index
    %c0_2 = arith.constant 0 : index
    %3 = vector.load %arg5[%c0_1, %c0_2] : memref<1x128xf32, #tpu.memory_space<vmem>>, vector<1x128xf32>
    %cst_3 = arith.constant 0.001953125 : f32
    %4 = vector.broadcast %cst_3 : f32 to vector<1x128xf32>
    %5 = arith.mulf %3, %4 : vector<1x128xf32>
    %6 = arith.mulf %2, %2 : vector<1x128xf32>
    %7 = arith.subf %5, %6 : vector<1x128xf32>
    %cst_4 = arith.constant 0.000000e+00 : f32
    %8 = vector.broadcast %cst_4 : f32 to vector<1x128xf32>
    %9 = arith.maximumf %7, %8 : vector<1x128xf32>
    %c0_5 = arith.constant 0 : index
    %c0_6 = arith.constant 0 : index
    %10 = vector.load %arg6[%c0_5, %c0_6] : memref<1x128xf32, #tpu.memory_space<vmem>>, vector<1x128xf32>
    %cst_7 = arith.constant 9.99999974E-6 : f32
    %11 = vector.broadcast %cst_7 : f32 to vector<1x128xf32>
    %12 = arith.addf %9, %11 : vector<1x128xf32>
    %13 = math.rsqrt %12 : vector<1x128xf32>
    %14 = arith.mulf %10, %13 : vector<1x128xf32>
    %c0_8 = arith.constant 0 : index
    %c0_9 = arith.constant 0 : index
    %15 = vector.load %arg7[%c0_8, %c0_9] : memref<1x128xf32, #tpu.memory_space<vmem>>, vector<1x128xf32>
    %16 = arith.mulf %2, %14 : vector<1x128xf32>
    %17 = arith.subf %15, %16 : vector<1x128xf32>
    %c0_10 = arith.constant 0 : index
    %c0_11 = arith.constant 0 : index
    %c0_12 = arith.constant 0 : index
    %18 = vector.load %arg2[%c0_10, %c0_11, %c0_12] : memref<1x384x128xbf16, #tpu.memory_space<vmem>>, vector<1x384x128xbf16>
    %19 = vector.shape_cast %18 : vector<1x384x128xbf16> to vector<384x128xbf16>
    %20 = vector.shape_cast %19 : vector<384x128xbf16> to vector<16x24x128xbf16>
    %21 = vector.extract_strided_slice %20 {offsets = [0, 0, 0], sizes = [16, 16, 4], strides = [1, 1, 1]} : vector<16x24x128xbf16> to vector<16x16x4xbf16>
    %22 = arith.extf %21 : vector<16x16x4xbf16> to vector<16x16x4xf32>
    %23 = vector.extract_strided_slice %14 {offsets = [0, 0], sizes = [1, 4], strides = [1, 1]} : vector<1x128xf32> to vector<1x4xf32>
    %24 = vector.shape_cast %23 : vector<1x4xf32> to vector<1x1x4xf32>
    %25 = vector.broadcast %24 : vector<1x1x4xf32> to vector<16x16x4xf32>
    %26 = arith.mulf %22, %25 : vector<16x16x4xf32>
    %27 = vector.extract_strided_slice %17 {offsets = [0, 0], sizes = [1, 4], strides = [1, 1]} : vector<1x128xf32> to vector<1x4xf32>
    %28 = vector.shape_cast %27 : vector<1x4xf32> to vector<1x1x4xf32>
    %29 = vector.broadcast %28 : vector<1x1x4xf32> to vector<16x16x4xf32>
    %30 = arith.addf %26, %29 : vector<16x16x4xf32>
    %c0_13 = arith.constant 0 : index
    %c0_14 = arith.constant 0 : index
    %c0_15 = arith.constant 0 : index
    %c0_16 = arith.constant 0 : index
    %31 = vector.load %arg3[%c0_13, %c0_14, %c0_15, %c0_16] : memref<1x16x16x4xf32, #tpu.memory_space<vmem>>, vector<1x16x16x4xf32>
    %32 = vector.shape_cast %31 : vector<1x16x16x4xf32> to vector<16x16x4xf32>
    %33 = arith.addf %30, %32 : vector<16x16x4xf32>
    %cst_17 = arith.constant 0.000000e+00 : f32
    %34 = vector.broadcast %cst_17 : f32 to vector<16x16x4xf32>
    %35 = arith.maximumf %33, %34 : vector<16x16x4xf32>
    %c0_18 = arith.constant 0 : index
    %c0_19 = arith.constant 0 : index
    %c0_20 = arith.constant 0 : index
    %c0_21 = arith.constant 0 : index
    %36 = vector.load %arg8[%c0_18, %c0_19, %c0_20, %c0_21] : memref<1x16x16x4xf32, #tpu.memory_space<vmem>>, vector<1x16x16x4xf32>
    %37 = vector.shape_cast %36 : vector<1x16x16x4xf32> to vector<16x16x4xf32>
    %38 = vector.shape_cast %35 : vector<16x16x4xf32> to vector<1x16x16x4xf32>
    tpu.vector_store %arg8[%c0_18, %c0_19, %c0_20, %c0_21], %38 {strides = array<i32>} : memref<1x16x16x4xf32, #tpu.memory_space<vmem>>, vector<1x16x16x4xf32>,
    return
  }
  func.func @transform_0(%arg0: i32, %arg1: i32) -> (i32, i32, i32) {
    %c0_i32 = arith.constant 0 : i32
    %c0_i32_0 = arith.constant 0 : i32
    return %arg0, %arg1, %c0_i32 : i32, i32, i32
  }
  func.func @transform_1(%arg0: i32, %arg1: i32) -> (i32, i32, i32, i32) {
    %c0_i32 = arith.constant 0 : i32
    %c0_i32_0 = arith.constant 0 : i32
    %c0_i32_1 = arith.constant 0 : i32
    return %arg0, %arg1, %c0_i32, %c0_i32_0 : i32, i32, i32, i32
  }
  func.func @transform_2(%arg0: i32, %arg1: i32) -> (i32, i32) {
    %c0_i32 = arith.constant 0 : i32
    %c0_i32_0 = arith.constant 0 : i32
    %c0_i32_1 = arith.constant 0 : i32
    return %c0_i32, %c0_i32_0 : i32, i32
  }
  func.func @transform_3(%arg0: i32, %arg1: i32) -> (i32, i32) {
    %c0_i32 = arith.constant 0 : i32
    %c0_i32_0 = arith.constant 0 : i32
    %c0_i32_1 = arith.constant 0 : i32
    return %c0_i32, %c0_i32_0 : i32, i32
  }
  func.func @transform_4(%arg0: i32, %arg1: i32) -> (i32, i32) {
    %c0_i32 = arith.constant 0 : i32
    %c0_i32_0 = arith.constant 0 : i32
    %c0_i32_1 = arith.constant 0 : i32
    return %c0_i32, %c0_i32_0 : i32, i32
  }
  func.func @transform_5(%arg0: i32, %arg1: i32) -> (i32, i32) {
    %c0_i32 = arith.constant 0 : i32
    %c0_i32_0 = arith.constant 0 : i32
    %c0_i32_1 = arith.constant 0 : i32
    return %c0_i32, %c0_i32_0 : i32, i32
  }
  func.func @transform_6(%arg0: i32, %arg1: i32) -> (i32, i32, i32, i32) {
    %c0_i32 = arith.constant 0 : i32
    %c0_i32_0 = arith.constant 0 : i32
    %c0_i32_1 = arith.constant 0 : i32
    return %arg0, %arg1, %c0_i32, %c0_i32_0 : i32, i32, i32, i32
  }
}

module attributes {stable_mosaic.version = 11 : i64} {
  func.func @bn1_conv2_kernel(%arg0: i32, %arg1: memref<1x384x128xbf16, #tpu.memory_space<vmem>>, %arg2: memref<1x128xf32, #tpu.memory_space<vmem>>, %arg3: memref<1x128xf32, #tpu.memory_space<vmem>>, %arg4: memref<1x128xf32, #tpu.memory_space<vmem>>, %arg5: memref<1x128xf32, #tpu.memory_space<vmem>>, %arg6: memref<3x384x128xbf16, #tpu.memory_space<vmem>>, %arg7: memref<384x1xf32, #tpu.memory_space<vmem>>, %arg8: memref<1x384x128xbf16, #tpu.memory_space<vmem>>, %arg9: memref<1x128xf32, #tpu.memory_space<vmem>>, %arg10: memref<1x128xf32, #tpu.memory_space<vmem>>, %arg11: memref<432x384xbf16, #tpu.memory_space<vmem>>, %arg12: memref<384x128xf32, #tpu.memory_space<vmem>>) attributes {dimension_semantics = [#tpu.dimension_semantics<arbitrary>], iteration_bounds = array<i64: 2>, scalar_prefetch = 0 : i64, scratch_operands = 2 : i64, tpu.core_type = #tpu.core_type<tc>, window_params = [{transform_indices = @transform_0, window_bounds = array<i64: 1, 384, 128>}, {pipeline_mode = #tpu.pipeline_mode<synchronous>, transform_indices = @transform_1, window_bounds = array<i64: 1, 128>}, {pipeline_mode = #tpu.pipeline_mode<synchronous>, transform_indices = @transform_2, window_bounds = array<i64: 1, 128>}, {pipeline_mode = #tpu.pipeline_mode<synchronous>, transform_indices = @transform_3, window_bounds = array<i64: 1, 128>}, {pipeline_mode = #tpu.pipeline_mode<synchronous>, transform_indices = @transform_4, window_bounds = array<i64: 1, 128>}, {pipeline_mode = #tpu.pipeline_mode<synchronous>, transform_indices = @transform_5, window_bounds = array<i64: 3, 384, 128>}, {pipeline_mode = #tpu.pipeline_mode<synchronous>, transform_indices = @transform_6, window_bounds = array<i64: 384, 1>}, {transform_indices = @transform_7, window_bounds = array<i64: 1, 384, 128>}, {pipeline_mode = #tpu.pipeline_mode<synchronous>, transform_indices = @transform_8, window_bounds = array<i64: 1, 128>}, {pipeline_mode = #tpu.pipeline_mode<synchronous>, transform_indices = @transform_9, window_bounds = array<i64: 1, 128>}]} {
    %c0_i32 = arith.constant 0 : i32
    %0 = arith.cmpi eq, %arg0, %c0_i32 : i32
    %1 = arith.extui %0 : i1 to i32
    %c0_i32_0 = arith.constant 0 : i32
    %2 = arith.cmpi ne, %1, %c0_i32_0 : i32
    scf.if %2 {
      %cst_60 = arith.constant 0.000000e+00 : f32
      %75 = vector.broadcast %cst_60 : f32 to vector<1x128xf32>
      %c0_61 = arith.constant 0 : index
      %c0_62 = arith.constant 0 : index
      %76 = vector.load %arg9[%c0_61, %c0_62] : memref<1x128xf32, #tpu.memory_space<vmem>>, vector<1x128xf32>
      tpu.vector_store %arg9[%c0_61, %c0_62], %75 {strides = array<i32>} : memref<1x128xf32, #tpu.memory_space<vmem>>, vector<1x128xf32>,
      %cst_63 = arith.constant 0.000000e+00 : f32
      %77 = vector.broadcast %cst_63 : f32 to vector<1x128xf32>
      %c0_64 = arith.constant 0 : index
      %c0_65 = arith.constant 0 : index
      %78 = vector.load %arg10[%c0_64, %c0_65] : memref<1x128xf32, #tpu.memory_space<vmem>>, vector<1x128xf32>
      tpu.vector_store %arg10[%c0_64, %c0_65], %77 {strides = array<i32>} : memref<1x128xf32, #tpu.memory_space<vmem>>, vector<1x128xf32>,
      %cst_66 = arith.constant 0.000000e+00 : bf16
      %79 = vector.broadcast %cst_66 : bf16 to vector<432x384xbf16>
      %c0_67 = arith.constant 0 : index
      %c0_68 = arith.constant 0 : index
      %80 = vector.load %arg11[%c0_67, %c0_68] : memref<432x384xbf16, #tpu.memory_space<vmem>>, vector<432x384xbf16>
      tpu.vector_store %arg11[%c0_67, %c0_68], %79 {strides = array<i32>} : memref<432x384xbf16, #tpu.memory_space<vmem>>, vector<432x384xbf16>,
    } else {
    }
    %c0 = arith.constant 0 : index
    %c0_1 = arith.constant 0 : index
    %3 = vector.load %arg2[%c0, %c0_1] : memref<1x128xf32, #tpu.memory_space<vmem>>, vector<1x128xf32>
    %cst = arith.constant 0.001953125 : f32
    %4 = vector.broadcast %cst : f32 to vector<1x128xf32>
    %5 = arith.mulf %3, %4 : vector<1x128xf32>
    %c0_2 = arith.constant 0 : index
    %c0_3 = arith.constant 0 : index
    %6 = vector.load %arg3[%c0_2, %c0_3] : memref<1x128xf32, #tpu.memory_space<vmem>>, vector<1x128xf32>
    %cst_4 = arith.constant 0.001953125 : f32
    %7 = vector.broadcast %cst_4 : f32 to vector<1x128xf32>
    %8 = arith.mulf %6, %7 : vector<1x128xf32>
    %9 = arith.mulf %5, %5 : vector<1x128xf32>
    %10 = arith.subf %8, %9 : vector<1x128xf32>
    %cst_5 = arith.constant 0.000000e+00 : f32
    %11 = vector.broadcast %cst_5 : f32 to vector<1x128xf32>
    %12 = arith.maximumf %10, %11 : vector<1x128xf32>
    %c0_6 = arith.constant 0 : index
    %c0_7 = arith.constant 0 : index
    %13 = vector.load %arg4[%c0_6, %c0_7] : memref<1x128xf32, #tpu.memory_space<vmem>>, vector<1x128xf32>
    %cst_8 = arith.constant 9.99999974E-6 : f32
    %14 = vector.broadcast %cst_8 : f32 to vector<1x128xf32>
    %15 = arith.addf %12, %14 : vector<1x128xf32>
    %16 = math.rsqrt %15 : vector<1x128xf32>
    %17 = arith.mulf %13, %16 : vector<1x128xf32>
    %c0_9 = arith.constant 0 : index
    %c0_10 = arith.constant 0 : index
    %18 = vector.load %arg5[%c0_9, %c0_10] : memref<1x128xf32, #tpu.memory_space<vmem>>, vector<1x128xf32>
    %19 = arith.mulf %5, %17 : vector<1x128xf32>
    %20 = arith.subf %18, %19 : vector<1x128xf32>
    %c0_11 = arith.constant 0 : index
    %c0_12 = arith.constant 0 : index
    %c0_13 = arith.constant 0 : index
    %21 = vector.load %arg1[%c0_11, %c0_12, %c0_13] : memref<1x384x128xbf16, #tpu.memory_space<vmem>>, vector<1x384x128xbf16>
    %22 = vector.shape_cast %21 : vector<1x384x128xbf16> to vector<384x128xbf16>
    %23 = arith.extf %22 : vector<384x128xbf16> to vector<384x128xf32>
    %24 = vector.broadcast %17 : vector<1x128xf32> to vector<384x128xf32>
    %25 = arith.mulf %23, %24 : vector<384x128xf32>
    %26 = vector.broadcast %20 : vector<1x128xf32> to vector<384x128xf32>
    %27 = arith.addf %25, %26 : vector<384x128xf32>
    %cst_14 = arith.constant 0.000000e+00 : f32
    %28 = vector.broadcast %cst_14 : f32 to vector<384x128xf32>
    %29 = arith.maximumf %27, %28 : vector<384x128xf32>
    %c0_15 = arith.constant 0 : index
    %c0_16 = arith.constant 0 : index
    %30 = vector.load %arg7[%c0_15, %c0_16] : memref<384x1xf32, #tpu.memory_space<vmem>>, vector<384x1xf32>
    %31 = vector.broadcast %30 : vector<384x1xf32> to vector<384x128xf32>
    %32 = arith.mulf %29, %31 : vector<384x128xf32>
    %33 = arith.truncf %32 : vector<384x128xf32> to vector<384x128xbf16>
    %c25 = arith.constant 25 : index
    %c0_17 = arith.constant 0 : index
    %34 = vector.load %arg11[%c25, %c0_17] : memref<432x384xbf16, #tpu.memory_space<vmem>>, vector<384x128xbf16>
    tpu.vector_store %arg11[%c25, %c0_17], %33 {strides = array<i32>} : memref<432x384xbf16, #tpu.memory_space<vmem>>, vector<384x128xbf16>,
    %c24 = arith.constant 24 : index
    %c128 = arith.constant 128 : index
    %35 = vector.load %arg11[%c24, %c128] : memref<432x384xbf16, #tpu.memory_space<vmem>>, vector<384x128xbf16>
    tpu.vector_store %arg11[%c24, %c128], %33 {strides = array<i32>} : memref<432x384xbf16, #tpu.memory_space<vmem>>, vector<384x128xbf16>,
    %c23 = arith.constant 23 : index
    %c256 = arith.constant 256 : index
    %36 = vector.load %arg11[%c23, %c256] : memref<432x384xbf16, #tpu.memory_space<vmem>>, vector<384x128xbf16>
    tpu.vector_store %arg11[%c23, %c256], %33 {strides = array<i32>} : memref<432x384xbf16, #tpu.memory_space<vmem>>, vector<384x128xbf16>,
    %c0_18 = arith.constant 0 : index
    %c0_19 = arith.constant 0 : index
    %37 = vector.load %arg11[%c0_18, %c0_19] : memref<432x384xbf16, #tpu.memory_space<vmem>>, vector<384x384xbf16>
    %c0_20 = arith.constant 0 : index
    %c0_21 = arith.constant 0 : index
    %c0_22 = arith.constant 0 : index
    %38 = vector.load %arg6[%c0_20, %c0_21, %c0_22] : memref<3x384x128xbf16, #tpu.memory_space<vmem>>, vector<1x384x128xbf16>
    %39 = vector.shape_cast %38 : vector<1x384x128xbf16> to vector<384x128xbf16>
    %cst_23 = arith.constant dense<0.000000e+00> : vector<384x128xf32>
    %40 = tpu.matmul %37, %39, %cst_23 {dimension_numbers = #tpu.dot_dimension_numbers<[1], [0], [0], [1], [0, 0, 1, 1], [], []>} : vector<384x384xbf16>, vector<384x128xbf16>, vector<384x128xf32> -> vector<384x128xf32>
    %c0_24 = arith.constant 0 : index
    %c0_25 = arith.constant 0 : index
    %41 = vector.load %arg12[%c0_24, %c0_25] : memref<384x128xf32, #tpu.memory_space<vmem>>, vector<384x128xf32>
    tpu.vector_store %arg12[%c0_24, %c0_25], %40 {strides = array<i32>} : memref<384x128xf32, #tpu.memory_space<vmem>>, vector<384x128xf32>,
    %c0_26 = arith.constant 0 : index
    %c0_27 = arith.constant 0 : index
    %42 = vector.load %arg12[%c0_26, %c0_27] : memref<384x128xf32, #tpu.memory_space<vmem>>, vector<384x128xf32>
    %c24_28 = arith.constant 24 : index
    %c0_29 = arith.constant 0 : index
    %43 = vector.load %arg11[%c24_28, %c0_29] : memref<432x384xbf16, #tpu.memory_space<vmem>>, vector<384x384xbf16>
    %c1 = arith.constant 1 : index
    %c0_30 = arith.constant 0 : index
    %c0_31 = arith.constant 0 : index
    %44 = vector.load %arg6[%c1, %c0_30, %c0_31] : memref<3x384x128xbf16, #tpu.memory_space<vmem>>, vector<1x384x128xbf16>
    %45 = vector.shape_cast %44 : vector<1x384x128xbf16> to vector<384x128xbf16>
    %cst_32 = arith.constant dense<0.000000e+00> : vector<384x128xf32>
    %46 = tpu.matmul %43, %45, %cst_32 {dimension_numbers = #tpu.dot_dimension_numbers<[1], [0], [0], [1], [0, 0, 1, 1], [], []>} : vector<384x384xbf16>, vector<384x128xbf16>, vector<384x128xf32> -> vector<384x128xf32>
    %47 = arith.addf %42, %46 : vector<384x128xf32>
    %c0_33 = arith.constant 0 : index
    %c0_34 = arith.constant 0 : index
    %48 = vector.load %arg12[%c0_33, %c0_34] : memref<384x128xf32, #tpu.memory_space<vmem>>, vector<384x128xf32>
    tpu.vector_store %arg12[%c0_33, %c0_34], %47 {strides = array<i32>} : memref<384x128xf32, #tpu.memory_space<vmem>>, vector<384x128xf32>,
    %c0_35 = arith.constant 0 : index
    %c0_36 = arith.constant 0 : index
    %49 = vector.load %arg12[%c0_35, %c0_36] : memref<384x128xf32, #tpu.memory_space<vmem>>, vector<384x128xf32>
    %c48 = arith.constant 48 : index
    %c0_37 = arith.constant 0 : index
    %50 = vector.load %arg11[%c48, %c0_37] : memref<432x384xbf16, #tpu.memory_space<vmem>>, vector<384x384xbf16>
    %c2 = arith.constant 2 : index
    %c0_38 = arith.constant 0 : index
    %c0_39 = arith.constant 0 : index
    %51 = vector.load %arg6[%c2, %c0_38, %c0_39] : memref<3x384x128xbf16, #tpu.memory_space<vmem>>, vector<1x384x128xbf16>
    %52 = vector.shape_cast %51 : vector<1x384x128xbf16> to vector<384x128xbf16>
    %cst_40 = arith.constant dense<0.000000e+00> : vector<384x128xf32>
    %53 = tpu.matmul %50, %52, %cst_40 {dimension_numbers = #tpu.dot_dimension_numbers<[1], [0], [0], [1], [0, 0, 1, 1], [], []>} : vector<384x384xbf16>, vector<384x128xbf16>, vector<384x128xf32> -> vector<384x128xf32>
    %54 = arith.addf %49, %53 : vector<384x128xf32>
    %c0_41 = arith.constant 0 : index
    %c0_42 = arith.constant 0 : index
    %55 = vector.load %arg12[%c0_41, %c0_42] : memref<384x128xf32, #tpu.memory_space<vmem>>, vector<384x128xf32>
    tpu.vector_store %arg12[%c0_41, %c0_42], %54 {strides = array<i32>} : memref<384x128xf32, #tpu.memory_space<vmem>>, vector<384x128xf32>,
    %c0_43 = arith.constant 0 : index
    %c0_44 = arith.constant 0 : index
    %56 = vector.load %arg12[%c0_43, %c0_44] : memref<384x128xf32, #tpu.memory_space<vmem>>, vector<384x128xf32>
    %c0_45 = arith.constant 0 : index
    %c0_46 = arith.constant 0 : index
    %57 = vector.load %arg7[%c0_45, %c0_46] : memref<384x1xf32, #tpu.memory_space<vmem>>, vector<384x1xf32>
    %58 = vector.broadcast %57 : vector<384x1xf32> to vector<384x128xf32>
    %59 = arith.mulf %56, %58 : vector<384x128xf32>
    %60 = arith.truncf %59 : vector<384x128xf32> to vector<384x128xbf16>
    %c0_47 = arith.constant 0 : index
    %c0_48 = arith.constant 0 : index
    %c0_49 = arith.constant 0 : index
    %61 = vector.load %arg8[%c0_47, %c0_48, %c0_49] : memref<1x384x128xbf16, #tpu.memory_space<vmem>>, vector<1x384x128xbf16>
    %62 = vector.shape_cast %61 : vector<1x384x128xbf16> to vector<384x128xbf16>
    %63 = vector.shape_cast %60 : vector<384x128xbf16> to vector<1x384x128xbf16>
    tpu.vector_store %arg8[%c0_47, %c0_48, %c0_49], %63 {strides = array<i32>} : memref<1x384x128xbf16, #tpu.memory_space<vmem>>, vector<1x384x128xbf16>,
    %c0_50 = arith.constant 0 : index
    %c0_51 = arith.constant 0 : index
    %64 = vector.load %arg9[%c0_50, %c0_51] : memref<1x128xf32, #tpu.memory_space<vmem>>, vector<1x128xf32>
    %cst_52 = arith.constant dense<0.000000e+00> : vector<128xf32>
    %65 = vector.multi_reduction <add>, %59, %cst_52 [0] : vector<384x128xf32> to vector<128xf32>
    %66 = vector.shape_cast %65 : vector<128xf32> to vector<1x128xf32>
    %67 = arith.addf %64, %66 : vector<1x128xf32>
    %c0_53 = arith.constant 0 : index
    %c0_54 = arith.constant 0 : index
    %68 = vector.load %arg9[%c0_53, %c0_54] : memref<1x128xf32, #tpu.memory_space<vmem>>, vector<1x128xf32>
    tpu.vector_store %arg9[%c0_53, %c0_54], %67 {strides = array<i32>} : memref<1x128xf32, #tpu.memory_space<vmem>>, vector<1x128xf32>,
    %c0_55 = arith.constant 0 : index
    %c0_56 = arith.constant 0 : index
    %69 = vector.load %arg10[%c0_55, %c0_56] : memref<1x128xf32, #tpu.memory_space<vmem>>, vector<1x128xf32>
    %70 = arith.mulf %59, %59 : vector<384x128xf32>
    %cst_57 = arith.constant dense<0.000000e+00> : vector<128xf32>
    %71 = vector.multi_reduction <add>, %70, %cst_57 [0] : vector<384x128xf32> to vector<128xf32>
    %72 = vector.shape_cast %71 : vector<128xf32> to vector<1x128xf32>
    %73 = arith.addf %69, %72 : vector<1x128xf32>
    %c0_58 = arith.constant 0 : index
    %c0_59 = arith.constant 0 : index
    %74 = vector.load %arg10[%c0_58, %c0_59] : memref<1x128xf32, #tpu.memory_space<vmem>>, vector<1x128xf32>
    tpu.vector_store %arg10[%c0_58, %c0_59], %73 {strides = array<i32>} : memref<1x128xf32, #tpu.memory_space<vmem>>, vector<1x128xf32>,
    return
  }
  func.func @transform_0(%arg0: i32) -> (i32, i32, i32) {
    %c0_i32 = arith.constant 0 : i32
    %c0_i32_0 = arith.constant 0 : i32
    %c0_i32_1 = arith.constant 0 : i32
    return %arg0, %c0_i32, %c0_i32_0 : i32, i32, i32
  }
  func.func @transform_1(%arg0: i32) -> (i32, i32) {
    %c0_i32 = arith.constant 0 : i32
    %c0_i32_0 = arith.constant 0 : i32
    %c0_i32_1 = arith.constant 0 : i32
    return %c0_i32, %c0_i32_0 : i32, i32
  }
  func.func @transform_2(%arg0: i32) -> (i32, i32) {
    %c0_i32 = arith.constant 0 : i32
    %c0_i32_0 = arith.constant 0 : i32
    %c0_i32_1 = arith.constant 0 : i32
    return %c0_i32, %c0_i32_0 : i32, i32
  }
  func.func @transform_3(%arg0: i32) -> (i32, i32) {
    %c0_i32 = arith.constant 0 : i32
    %c0_i32_0 = arith.constant 0 : i32
    %c0_i32_1 = arith.constant 0 : i32
    return %c0_i32, %c0_i32_0 : i32, i32
  }
  func.func @transform_4(%arg0: i32) -> (i32, i32) {
    %c0_i32 = arith.constant 0 : i32
    %c0_i32_0 = arith.constant 0 : i32
    %c0_i32_1 = arith.constant 0 : i32
    return %c0_i32, %c0_i32_0 : i32, i32
  }
  func.func @transform_5(%arg0: i32) -> (i32, i32, i32) {
    %c0_i32 = arith.constant 0 : i32
    %c0_i32_0 = arith.constant 0 : i32
    %c0_i32_1 = arith.constant 0 : i32
    %c0_i32_2 = arith.constant 0 : i32
    return %c0_i32, %c0_i32_0, %c0_i32_1 : i32, i32, i32
  }
  func.func @transform_6(%arg0: i32) -> (i32, i32) {
    %c0_i32 = arith.constant 0 : i32
    %c0_i32_0 = arith.constant 0 : i32
    %c0_i32_1 = arith.constant 0 : i32
    return %c0_i32, %c0_i32_0 : i32, i32
  }
  func.func @transform_7(%arg0: i32) -> (i32, i32, i32) {
    %c0_i32 = arith.constant 0 : i32
    %c0_i32_0 = arith.constant 0 : i32
    %c0_i32_1 = arith.constant 0 : i32
    return %arg0, %c0_i32, %c0_i32_0 : i32, i32, i32
  }
  func.func @transform_8(%arg0: i32) -> (i32, i32) {
    %c0_i32 = arith.constant 0 : i32
    %c0_i32_0 = arith.constant 0 : i32
    %c0_i32_1 = arith.constant 0 : i32
    return %c0_i32, %c0_i32_0 : i32, i32
  }
  func.func @transform_9(%arg0: i32) -> (i32, i32) {
    %c0_i32 = arith.constant 0 : i32
    %c0_i32_0 = arith.constant 0 : i32
    %c0_i32_1 = arith.constant 0 : i32
    return %c0_i32, %c0_i32_0 : i32, i32
  }
}

</mosaic_0001>

<bundles_post_ra>
// kernel: basic_block_forward.5
= control target key start
LH: loop header
LB: loop body
LE: loop exit
PB: predicated region body
PF: predicated region fallthrough
CT: control target
= control target key end

     0   :  { %s868_s21 = smov 0   ;;  %s870_s22 = smov 0   ;;  %s1205_s0 = inlined_call_operand.vmem [shape: bf16[2,384,128], index: 0, kind: input, shape index: {}]   ;;  %s1206_s1 = inlined_call_operand.vmem [shape: f32[2,16,16,4], index: 1, kind: input, shape index: {}]   ;;  %s1207_s2 = inlined_call_operand.vmem [shape: f32[1,128], index: 2, kind: input, shape index: {}]   ;;  %s1208_s3 = inlined_call_operand.vmem [shape: f32[1,128], index: 3, kind: input, shape index: {}]   ;;  %s1209_s4 = inlined_call_operand.vmem [shape: f32[1,128], index: 4, kind: input, shape index: {}]   ;;  %s1210_s5 = inlined_call_operand.vmem [shape: f32[1,128], index: 5, kind: input, shape index: {}]   ;;  %s1211_s6 = inlined_call_operand.vmem [shape: f32[2,16,16,4], index: 6, kind: output, shape index: {}]  }
   0x1   :  { %s872_s23 = smov 0  }
   0x2 LB: > { %s28_s24 = sadd.s32 1, %s827_s22  ;;  %p733_p0 = scmp.ge.s32.totalorder %s831_s23, 1  ;;  %s831_s23 = sphi %s872_s23, %s16_s23   ;;  %s827_s22 = sphi %s870_s22, %s1213_s22   ;;  %s823_s21 = sphi %s868_s21, %s1212_s21  }
   0x3   : > { %p30_p1 = scmp.ge.s32.totalorder %s28_s24, 2  ;;  %p251_p2 = scmp.lt.s32.totalorder %s831_s23, 3 }
   0x5   : > { %s1215_s24 = smov (%p30_p1, %s28_s24), 0  ;;  %p252_p3 = pnand %p733_p0, %p251_p2 }
   0x6   : > { %p301_p4 = scmp.lt.s32.totalorder (!%p252_p3), %s823_s21, 1  ;;  %v332_v0 = vld [vmem:[%s1207_s2] sm:$0x1] (!%p252_p3)  ;;  %v411_v8 = vlaneseq (!%p252_p3)  ;;  %vm582_vm0 = vcmask (!%p252_p3), 31744  }
   0x7   : > { %255 = sbr.rel (%p252_p3) target bundleno = 71 (0x47), region = 44  ;;  %v334_v1 = vld [vmem:[%s1208_s3] sm:$0x1] (!%p252_p3)  ;;  %v333_v2 = vmul.f32 (!%p252_p3), 0.001953125, %v332_v0 }
   0x8   : > { %v335_v3 = vmul.f32 (!%p252_p3), 0.001953125, %v334_v1  ;;  %v900_v9 = vshrl.u32 (!%p252_p3), %v411_v8, 7  ;;  %v339_v28 = vld [vmem:[%s1209_s4] sm:$0x1] (!%p252_p3) }
   0x9   : > { %v336_v4 = vmul.f32 (!%p252_p3), %v333_v2, %v333_v2  ;;  %v343_v52 = vld [vmem:[%s1210_s5] sm:$0x1] (!%p252_p3) }
   0xa   : > { %v413_v17 = vsub.s32 (!%p252_p3), 0, %v900_v9 }
   0xb   : > { %v337_v5 = vsub.f32 (!%p252_p3), %v335_v3, %v336_v4 }
   0xd   : > { %v338_v6 = vmax.f32 (!%p252_p3), %v337_v5, 0.0 }
   0xe   : > { %s1217_s21 = smov (!%p301_p4, %s823_s21), 1 }
   0xf   : > { %s782_s29 = smul.u32 192, %s1217_s21  ;;  %v340_v7 = vadd.f32 1e-05, %v338_v6  ;;  %s741_s11 = sshll.u32 %s1217_s21, 8 }
  0x10   : > { %s985_s16 = scalar_lea.vmem %s1206_s1, %s741_s11  ;;  %s1028_s19 = scalar_lea.vmem %s1211_s6, %s741_s11 }
  0x11   : > { %s898_s8 = scalar_lea.vmem %s1205_s0, %s782_s29  ;;  %807 = vrsqrt.f32 %v340_v7 }
  0x12   : > { %v744_v10 = vld [vmem:[%s898_s8] sm:$0xff]   ;;  %v348_v11 = vld [vmem:[%s898_s8 + $0xc] sm:$0xff]   ;;  %v905_v12 = vld [vmem:[%s898_s8 + $0x18] sm:$0xff]  }
  0x13   : > { %v908_v13 = vld [vmem:[%s898_s8 + $0x24] sm:$0xff]   ;;  %v911_v14 = vld [vmem:[%s898_s8 + $0x30] sm:$0xff]   ;;  %v914_v15 = vld [vmem:[%s898_s8 + $0x3c] sm:$0xff]   ;;  %v745_v16 = vunpack.c.l.bf16 %v744_v10  ;;  %v746_v18 = vunpack.c.h.bf16 %v744_v10  ;;  %v380_v19 = vunpack.c.l.bf16 %v348_v11  ;;  %v381_v22 = vunpack.c.h.bf16 %v348_v11 }
  0x14   : > { %v918_v20 = vld [vmem:[%s898_s8 + $0x48] sm:$0xff]   ;;  %v921_v21 = vld [vmem:[%s898_s8 + $0x54] sm:$0xff]   ;;  %v749_v23 = vunpack.c.l.bf16 %v905_v12  ;;  %v750_v24 = vunpack.c.h.bf16 %v905_v12  ;;  %v384_v25 = vunpack.c.l.bf16 %v908_v13  ;;  %v927_v26 = vld [vmem:[%s898_s8 + $0x60] sm:$0xff]   ;;  %v385_v29 = vunpack.c.h.bf16 %v908_v13 }
  0x15   : > { %v930_v27 = vld [vmem:[%s898_s8 + $0x6c] sm:$0xff]   ;;  %v753_v30 = vunpack.c.l.bf16 %v911_v14  ;;  %v754_v31 = vunpack.c.h.bf16 %v911_v14  ;;  %v388_v32 = vunpack.c.l.bf16 %v914_v15  ;;  %v940_v33 = vld [vmem:[%s898_s8 + $0x78] sm:$0xff]   ;;  %v389_v34 = vunpack.c.h.bf16 %v914_v15  ;;  %v947_v38 = vld [vmem:[%s898_s8 + $0x84] sm:$0xff]  }
  0x16   : > { %v757_v35 = vunpack.c.l.bf16 %v918_v20  ;;  %v758_v36 = vunpack.c.h.bf16 %v918_v20  ;;  %v392_v37 = vunpack.c.l.bf16 %v921_v21  ;;  %v950_v39 = vld [vmem:[%s898_s8 + $0x90] sm:$0xff]   ;;  %v393_v41 = vunpack.c.h.bf16 %v921_v21  ;;  %v957_v45 = vld [vmem:[%s898_s8 + $0x9c] sm:$0xff]   ;;  %v964_v50 = vld [vmem:[%s898_s8 + $0xa8] sm:$0xff]  }
  0x17   : > { %v761_v42 = vunpack.c.l.bf16 %v927_v26  ;;  %v762_v43 = vunpack.c.h.bf16 %v927_v26  ;;  %v396_v44 = vunpack.c.l.bf16 %v930_v27  ;;  %v397_v47 = vunpack.c.h.bf16 %v930_v27  ;;  %v967_v51 = vld [vmem:[%s898_s8 + $0xb4] sm:$0xff]   ;;  %v486_v10 = vld [vmem:[%s985_s16] sm:$0xff]  ;;  %v487_v11 = vld [vmem:[%s985_s16 + $0x8] sm:$0xff] }
  0x18   : > { %v765_v48 = vunpack.c.l.bf16 %v940_v33  ;;  %v766_v49 = vunpack.c.h.bf16 %v940_v33  ;;  %v400_v53 = vunpack.c.l.bf16 %v947_v38  ;;  %v401_v54 = vunpack.c.h.bf16 %v947_v38  ;;  %v488_v15 = vld [vmem:[%s985_s16 + $0x10] sm:$0xff]  ;;  %v503_v26 = vld [vmem:[%s985_s16 + $0x88] sm:$0xff] }
  0x19   : > { %v769_v55 = vunpack.c.l.bf16 %v950_v39  ;;  %v770_v56 = vunpack.c.h.bf16 %v950_v39  ;;  %v404_v59 = vunpack.c.l.bf16 %v957_v45  ;;  %v405_v60 = vunpack.c.h.bf16 %v957_v45  ;;  %v511_v39 = vld [vmem:[%s985_s16 + $0xc8] sm:$0xff] }
  0x1a   : > { %v773_v61 = vunpack.c.l.bf16 %v964_v50  ;;  %v774_v62 = vunpack.c.h.bf16 %v964_v50  ;;  %v408_v63 = vunpack.c.l.bf16 %v967_v51  ;;  %v409_v0 = vunpack.c.h.bf16 %v967_v51 }
  0x1b   : > { %v808_v40 = vpop.eup %807 }
  0x1c   : > { %v342_v46 = vmul.f32 %v808_v40, %v339_v28 }
  0x1e   : > { %v344_v57 = vmul.f32 %v342_v46, %v333_v2  ;;  %v976_v58 = vrot.slane %v342_v46, %v413_v17 }
  0x20   : > { %v345_v1 = vsub.f32 %v343_v52, %v344_v57  ;;  %v416_v2 = vmul.f32 %v745_v16, %v976_v58  ;;  %v417_v3 = vmul.f32 %v746_v18, %v976_v58  ;;  %v418_v4 = vmul.f32 %v976_v58, %v380_v19  ;;  %v489_v16 = vld [vmem:[%s985_s16 + $0x18] sm:$0xff]  ;;  %v490_v18 = vld [vmem:[%s985_s16 + $0x20] sm:$0xff] }
  0x21   : > { %v419_v5 = vmul.f32 %v976_v58, %v381_v22  ;;  %v420_v6 = vmul.f32 %v749_v23, %v976_v58  ;;  %v421_v7 = vmul.f32 %v750_v24, %v976_v58  ;;  %v422_v8 = vmul.f32 %v976_v58, %v384_v25 }
  0x22   : > { %v998_v9 = vrot.slane %v345_v1, %v413_v17  ;;  %v423_v12 = vmul.f32 %v976_v58, %v385_v29  ;;  %v424_v13 = vmul.f32 %v753_v30, %v976_v58  ;;  %v425_v14 = vmul.f32 %v754_v31, %v976_v58  ;;  %v491_v29 = vld [vmem:[%s985_s16 + $0x28] sm:$0xff]  ;;  %v492_v30 = vld [vmem:[%s985_s16 + $0x30] sm:$0xff]  ;;  %v493_v31 = vld [vmem:[%s985_s16 + $0x38] sm:$0xff] }
  0x23   : > { %v426_v19 = vmul.f32 %v976_v58, %v388_v32  ;;  %v427_v20 = vmul.f32 %v976_v58, %v389_v34  ;;  %v428_v17 = vmul.f32 %v757_v35, %v976_v58  ;;  %v429_v22 = vmul.f32 %v758_v36, %v976_v58 }
  0x24   : > { %v454_v23 = vadd.f32 %v998_v9, %v416_v2  ;;  %v455_v24 = vadd.f32 %v998_v9, %v417_v3  ;;  %v456_v25 = vadd.f32 %v998_v9, %v418_v4  ;;  %v457_v28 = vadd.f32 %v998_v9, %v419_v5 }
  0x25   : > { %v458_v32 = vadd.f32 %v998_v9, %v420_v6  ;;  %v459_v34 = vadd.f32 %v998_v9, %v421_v7  ;;  %v460_v35 = vadd.f32 %v998_v9, %v422_v8  ;;  %v461_v36 = vadd.f32 %v998_v9, %v423_v12 }
  0x26   : > { %v518_v40 = vadd.f32 %v486_v10, %v454_v23  ;;  %v519_v46 = vadd.f32 %v487_v11, %v455_v24  ;;  %v520_v52 = vadd.f32 %v488_v15, %v456_v25  ;;  %v521_v57 = vadd.f32 %v489_v16, %v457_v28  ;;  %v494_v10 = vld [vmem:[%s985_s16 + $0x40] sm:$0xff]  ;;  %v495_v11 = vld [vmem:[%s985_s16 + $0x48] sm:$0xff]  ;;  %v496_v23 = vld [vmem:[%s985_s16 + $0x50] sm:$0xff] }
  0x27   : > { %v522_v1 = vadd.f32 %v490_v18, %v458_v32  ;;  %v523_v2 = vadd.f32 %v491_v29, %v459_v34  ;;  %v524_v3 = vadd.f32 %v492_v30, %v460_v35  ;;  %v525_v4 = vadd.f32 %v493_v31, %v461_v36  ;;  %v497_v24 = vld [vmem:[%s985_s16 + $0x58] sm:$0xff]  ;;  %v498_v31 = vld [vmem:[%s985_s16 + $0x60] sm:$0xff]  ;;  %v499_v32 = vld [vmem:[%s985_s16 + $0x68] sm:$0xff] }
  0x28   : > { %v550_v5 = vmax.f32 %v518_v40, 0.0  ;;  %v551_v6 = vmax.f32 %v519_v46, 0.0  ;;  %v552_v7 = vmax.f32 %v520_v52, 0.0  ;;  %v553_v8 = vmax.f32 %v521_v57, 0.0  ;;  %v500_v46 = vld [vmem:[%s985_s16 + $0x70] sm:$0xff]  ;;  %v501_v52 = vld [vmem:[%s985_s16 + $0x78] sm:$0xff] }
  0x29   : > { %v554_v12 = vmax.f32 %v522_v1, 0.0  ;;  %v555_v15 = vmax.f32 %v523_v2, 0.0  ;;  %v556_v16 = vmax.f32 %v524_v3, 0.0  ;;  %v557_v18 = vmax.f32 %v525_v4, 0.0 }
  0x2a   : > { %583 = vst.msk [vmem:[%s1028_s19] sm:$0xff] %vm582_vm0, %v550_v5  ;;  %584 = vst.msk [vmem:[%s1028_s19 + $0x8] sm:$0xff] %vm582_vm0, %v551_v6  ;;  %v462_v25 = vadd.f32 %v998_v9, %v424_v13  ;;  %v463_v28 = vadd.f32 %v998_v9, %v425_v14  ;;  %v464_v29 = vadd.f32 %v998_v9, %v426_v19 }
  0x2b   : > { %585 = vst.msk [vmem:[%s1028_s19 + $0x10] sm:$0xff] %vm582_vm0, %v552_v7  ;;  %586 = vst.msk [vmem:[%s1028_s19 + $0x18] sm:$0xff] %vm582_vm0, %v553_v8  ;;  %v465_v30 = vadd.f32 %v998_v9, %v427_v20  ;;  %v466_v13 = vadd.f32 %v998_v9, %v428_v17  ;;  %v467_v14 = vadd.f32 %v998_v9, %v429_v22  ;;  %v502_v8 = vld [vmem:[%s985_s16 + $0x80] sm:$0xff] }
  0x2c   : > { %587 = vst.msk [vmem:[%s1028_s19 + $0x20] sm:$0xff] %vm582_vm0, %v554_v12  ;;  %588 = vst.msk [vmem:[%s1028_s19 + $0x28] sm:$0xff] %vm582_vm0, %v555_v15  ;;  %v430_v19 = vmul.f32 %v976_v58, %v392_v37  ;;  %v431_v20 = vmul.f32 %v976_v58, %v393_v41  ;;  %v526_v34 = vadd.f32 %v494_v10, %v462_v25  ;;  %v506_v25 = vld [vmem:[%s985_s16 + $0xa0] sm:$0xff] }
  0x2d   : > { %589 = vst.msk [vmem:[%s1028_s19 + $0x30] sm:$0xff] %vm582_vm0, %v556_v16  ;;  %590 = vst.msk [vmem:[%s1028_s19 + $0x38] sm:$0xff] %vm582_vm0, %v557_v18  ;;  %v527_v35 = vadd.f32 %v495_v11, %v463_v28  ;;  %v528_v36 = vadd.f32 %v496_v23, %v464_v29  ;;  %v529_v40 = vadd.f32 %v497_v24, %v465_v30  ;;  %v505_v16 = vld [vmem:[%s985_s16 + $0x98] sm:$0xff]  ;;  %v507_v28 = vld [vmem:[%s985_s16 + $0xa8] sm:$0xff] }
  0x2e   : > { %v530_v17 = vadd.f32 %v498_v31, %v466_v13  ;;  %v531_v22 = vadd.f32 %v499_v32, %v467_v14  ;;  %v468_v57 = vadd.f32 %v998_v9, %v430_v19  ;;  %v469_v37 = vadd.f32 %v998_v9, %v431_v20  ;;  %v508_v14 = vld [vmem:[%s985_s16 + $0xb0] sm:$0xff]  ;;  %v509_v19 = vld [vmem:[%s985_s16 + $0xb8] sm:$0xff] }
  0x2f   : > { %v558_v21 = vmax.f32 %v526_v34, 0.0  ;;  %v559_v1 = vmax.f32 %v527_v35, 0.0  ;;  %v560_v41 = vmax.f32 %v528_v36, 0.0  ;;  %v561_v2 = vmax.f32 %v529_v40, 0.0 }
  0x30   : > { %v562_v3 = vmax.f32 %v530_v17, 0.0  ;;  %v563_v4 = vmax.f32 %v531_v22, 0.0  ;;  %v532_v5 = vadd.f32 %v500_v46, %v468_v57  ;;  %v533_v6 = vadd.f32 %v501_v52, %v469_v37  ;;  %v510_v37 = vld [vmem:[%s985_s16 + $0xc0] sm:$0xff] }
  0x31   : > { %591 = vst.msk [vmem:[%s1028_s19 + $0x40] sm:$0xff] %vm582_vm0, %v558_v21  ;;  %592 = vst.msk [vmem:[%s1028_s19 + $0x48] sm:$0xff] %vm582_vm0, %v559_v1  ;;  %v432_v7 = vmul.f32 %v761_v42, %v976_v58  ;;  %v433_v10 = vmul.f32 %v762_v43, %v976_v58  ;;  %v434_v11 = vmul.f32 %v976_v58, %v396_v44  ;;  %v504_v43 = vld [vmem:[%s985_s16 + $0x90] sm:$0xff] }
  0x32   : > { %593 = vst.msk [vmem:[%s1028_s19 + $0x50] sm:$0xff] %vm582_vm0, %v560_v41  ;;  %594 = vst.msk [vmem:[%s1028_s19 + $0x58] sm:$0xff] %vm582_vm0, %v561_v2  ;;  %v435_v12 = vmul.f32 %v976_v58, %v397_v47  ;;  %v564_v42 = vmax.f32 %v532_v5, 0.0  ;;  %v565_v15 = vmax.f32 %v533_v6, 0.0  ;;  %v436_v44 = vmul.f32 %v765_v48, %v976_v58 }
  0x33   : > { %595 = vst.msk [vmem:[%s1028_s19 + $0x60] sm:$0xff] %vm582_vm0, %v562_v3  ;;  %596 = vst.msk [vmem:[%s1028_s19 + $0x68] sm:$0xff] %vm582_vm0, %v563_v4  ;;  %v437_v27 = vmul.f32 %v766_v49, %v976_v58  ;;  %v470_v47 = vadd.f32 %v998_v9, %v432_v7  ;;  %v471_v18 = vadd.f32 %v998_v9, %v433_v10  ;;  %v513_v3 = vld [vmem:[%s985_s16 + $0xd8] sm:$0xff]  ;;  %v514_v7 = vld [vmem:[%s985_s16 + $0xe0] sm:$0xff] }
  0x34   : > { %v472_v23 = vadd.f32 %v998_v9, %v434_v11  ;;  %v473_v24 = vadd.f32 %v998_v9, %v435_v12  ;;  %597 = vst.msk [vmem:[%s1028_s19 + $0x70] sm:$0xff] %vm582_vm0, %v564_v42  ;;  %598 = vst.msk [vmem:[%s1028_s19 + $0x78] sm:$0xff] %vm582_vm0, %v565_v15  ;;  %v474_v48 = vadd.f32 %v998_v9, %v436_v44 }
  0x35   : > { %v475_v33 = vadd.f32 %v998_v9, %v437_v27  ;;  %v438_v49 = vmul.f32 %v976_v58, %v400_v53  ;;  %v439_v29 = vmul.f32 %v976_v58, %v401_v54  ;;  %v534_v30 = vadd.f32 %v502_v8, %v470_v47  ;;  %v515_v8 = vld [vmem:[%s985_s16 + $0xe8] sm:$0xff] }
  0x36   : > { %v535_v31 = vadd.f32 %v503_v26, %v471_v18  ;;  %v536_v32 = vadd.f32 %v504_v43, %v472_v23  ;;  %v537_v13 = vadd.f32 %v505_v16, %v473_v24  ;;  %v538_v20 = vadd.f32 %v506_v25, %v474_v48  ;;  %v516_v26 = vld [vmem:[%s985_s16 + $0xf0] sm:$0xff]  ;;  %v517_v43 = vld [vmem:[%s985_s16 + $0xf8] sm:$0xff] }
  0x37   : > { %v539_v34 = vadd.f32 %v507_v28, %v475_v33  ;;  %v476_v35 = vadd.f32 %v998_v9, %v438_v49  ;;  %v477_v53 = vadd.f32 %v998_v9, %v439_v29  ;;  %v566_v38 = vmax.f32 %v534_v30, 0.0 }
  0x38   : > { %v567_v36 = vmax.f32 %v535_v31, 0.0  ;;  %v568_v54 = vmax.f32 %v536_v32, 0.0  ;;  %v569_v40 = vmax.f32 %v537_v13, 0.0  ;;  %v570_v46 = vmax.f32 %v538_v20, 0.0 }
  0x39   : > { %v571_v52 = vmax.f32 %v539_v34, 0.0  ;;  %v540_v17 = vadd.f32 %v508_v14, %v476_v35  ;;  %v541_v22 = vadd.f32 %v509_v19, %v477_v53  ;;  %599 = vst.msk [vmem:[%s1028_s19 + $0x80] sm:$0xff] %vm582_vm0, %v566_v38  ;;  %v440_v57 = vmul.f32 %v769_v55, %v976_v58 }
  0x3a   : > { %600 = vst.msk [vmem:[%s1028_s19 + $0x88] sm:$0xff] %vm582_vm0, %v567_v36  ;;  %601 = vst.msk [vmem:[%s1028_s19 + $0x90] sm:$0xff] %vm582_vm0, %v568_v54  ;;  %v441_v21 = vmul.f32 %v770_v56, %v976_v58  ;;  %v442_v1 = vmul.f32 %v976_v58, %v404_v59  ;;  %v443_v41 = vmul.f32 %v976_v58, %v405_v60  ;;  %v512_v56 = vld [vmem:[%s985_s16 + $0xd0] sm:$0xff] }
  0x3b   : > { %602 = vst.msk [vmem:[%s1028_s19 + $0x98] sm:$0xff] %vm582_vm0, %v569_v40  ;;  %603 = vst.msk [vmem:[%s1028_s19 + $0xa0] sm:$0xff] %vm582_vm0, %v570_v46  ;;  %v572_v55 = vmax.f32 %v540_v17, 0.0  ;;  %v573_v2 = vmax.f32 %v541_v22, 0.0  ;;  %v444_v59 = vmul.f32 %v773_v61, %v976_v58  ;;  %v445_v45 = vmul.f32 %v774_v62, %v976_v58 }
  0x3c   : > { %604 = vst.msk [vmem:[%s1028_s19 + $0xa8] sm:$0xff] %vm582_vm0, %v571_v52  ;;  %v478_v60 = vadd.f32 %v998_v9, %v440_v57  ;;  %v479_v4 = vadd.f32 %v998_v9, %v441_v21  ;;  %v480_v5 = vadd.f32 %v998_v9, %v442_v1  ;;  %v481_v6 = vadd.f32 %v998_v9, %v443_v41 }
  0x3d   : > { %605 = vst.msk [vmem:[%s1028_s19 + $0xb0] sm:$0xff] %vm582_vm0, %v572_v55  ;;  %606 = vst.msk [vmem:[%s1028_s19 + $0xb8] sm:$0xff] %vm582_vm0, %v573_v2  ;;  %v482_v61 = vadd.f32 %v998_v9, %v444_v59  ;;  %v483_v50 = vadd.f32 %v998_v9, %v445_v45  ;;  %v446_v62 = vmul.f32 %v976_v58, %v408_v63 }
  0x3e   : > { %v447_v10 = vmul.f32 %v976_v58, %v409_v0  ;;  %v542_v11 = vadd.f32 %v510_v37, %v478_v60  ;;  %v543_v12 = vadd.f32 %v511_v39, %v479_v4  ;;  %v544_v42 = vadd.f32 %v512_v56, %v480_v5 }
  0x3f   : > { %v545_v15 = vadd.f32 %v513_v3, %v481_v6  ;;  %v546_v16 = vadd.f32 %v514_v7, %v482_v61  ;;  %v547_v44 = vadd.f32 %v515_v8, %v483_v50  ;;  %v484_v63 = vadd.f32 %v998_v9, %v446_v62 }
  0x40   : > { %v485_v51 = vadd.f32 %v998_v9, %v447_v10  ;;  %v574_v27 = vmax.f32 %v542_v11, 0.0  ;;  %v575_v58 = vmax.f32 %v543_v12, 0.0  ;;  %v576_v0 = vmax.f32 %v544_v42, 0.0 }
  0x41   : > { %v577_v47 = vmax.f32 %v545_v15, 0.0  ;;  %v578_v18 = vmax.f32 %v546_v16, 0.0  ;;  %v579_v23 = vmax.f32 %v547_v44, 0.0  ;;  %v548_v24 = vadd.f32 %v516_v26, %v484_v63 }
  0x42   : > { %v549_v25 = vadd.f32 %v517_v43, %v485_v51  ;;  %607 = vst.msk [vmem:[%s1028_s19 + $0xc0] sm:$0xff] %vm582_vm0, %v574_v27  ;;  %608 = vst.msk [vmem:[%s1028_s19 + $0xc8] sm:$0xff] %vm582_vm0, %v575_v58 }
  0x43   : > { %609 = vst.msk [vmem:[%s1028_s19 + $0xd0] sm:$0xff] %vm582_vm0, %v576_v0  ;;  %610 = vst.msk [vmem:[%s1028_s19 + $0xd8] sm:$0xff] %vm582_vm0, %v577_v47  ;;  %v580_v9 = vmax.f32 %v548_v24, 0.0 }
  0x44   : > { %611 = vst.msk [vmem:[%s1028_s19 + $0xe0] sm:$0xff] %vm582_vm0, %v578_v18  ;;  %612 = vst.msk [vmem:[%s1028_s19 + $0xe8] sm:$0xff] %vm582_vm0, %v579_v23  ;;  %v581_v28 = vmax.f32 %v549_v25, 0.0 }
  0x45   : > { %613 = vst.msk [vmem:[%s1028_s19 + $0xf0] sm:$0xff] %vm582_vm0, %v580_v9 }
  0x46   : > { %614 = vst.msk [vmem:[%s1028_s19 + $0xf8] sm:$0xff] %vm582_vm0, %v581_v28 }
  0x47 PF: > { %s16_s23 = sadd.s32 1, %s831_s23   ;;  %s1212_s21 = smov %s827_s22 }
  0x48   : > { %p13_p5 = scmp.ge.s32.totalorder %s16_s23, 4   ;;  %s1213_s22 = smov %s1215_s24 }
  0x4a   :  { %15 = sbr.rel (!%p13_p5) target bundleno = 2 (0x2), region = 77 }

// kernel: basic_block_forward.3
= control target key start
LH: loop header
LB: loop body
LE: loop exit
PB: predicated region body
PF: predicated region fallthrough
CT: control target
= control target key end

     0   :  { %s3733_s18 = smov 0   ;;  %s4274_s0 = inlined_call_operand.vmem [shape: bf16[2,432,24], index: 0, kind: input, shape index: {}]   ;;  %s4275_s1 = inlined_call_operand.vmem [shape: bf16[3,24,128], index: 1, kind: input, shape index: {}]   ;;  %s4276_s2 = inlined_call_operand.vmem [shape: f32[384,1], index: 2, kind: input, shape index: {}]   ;;  %s4277_s3 = inlined_call_operand.vmem [shape: bf16[2,384,128], index: 3, kind: output, shape index: {0}]   ;;  %s4278_s4 = inlined_call_operand.vmem [shape: f32[1,128], index: 4, kind: output, shape index: {1}]   ;;  %s4279_s5 = inlined_call_operand.vmem [shape: f32[1,128], index: 5, kind: output, shape index: {2}]  }
   0x1 LB: > { %s2858_s19 = sadd.s32 4294967295, %s3699_s18   ;;  %p2862_p0 = scmp.ge.s32.totalorder %s3699_s18, 1  ;;  %s3699_s18 = sphi %s3733_s18, %s16_s18  }
   0x2   : > { %p182_p1 = scmp.lt.s32.totalorder %s3699_s18, 3 }
   0x4   : > { %p183_p2 = pnand %p2862_p0, %p182_p1 }
   0x5   : > { %p210_p3 = scmp.lt.s32.totalorder (!%p183_p2), %s2858_s19, 1  ;;  %p2865_p4 = scmp.ne.s32.totalorder (!%p183_p2), %s2858_s19, 0 }
   0x6   : > { %186 = sbr.rel (%p183_p2) target bundleno = 408 (0x198), region = 32 }
   0xd   : > { %s211_s20 = scalar_select %p210_p3, %s2858_s19, 1 }
   0xe   : > { %224 = sbr.rel (%p2865_p4) target bundleno = 21 (0x15), region = 36  ;;  %v3701_v0 = vmov (!%p2865_p4), 0.0  }
   0xf   : > { %s3601_s21 = smul.u32 216, %s211_s20  ;;  %225 = vst [vmem:[%s4278_s4] sm:$0x1] (!%p2865_p4), %v3701_v0  ;;  %226 = vst [vmem:[%s4279_s5] sm:$0x1] (!%p2865_p4), %v3701_v0 }
  0x10   : > { %s3602_s22 = smul.u32 192, %s211_s20 }
  0x11   : > { %s3744_s25 = scalar_lea.vmem %s4274_s0, %s3601_s21 }
  0x12   : > { %s3749_s28 = scalar_lea.vmem %s4277_s3, %s3602_s22 }
  0x15 PF: > { %v3615_v1 = vld [vmem:[%s4275_s1] sm:$0xff]   ;;  %vm480_vm0 = vcmask 1043456   ;;  %v3616_v2 = vld [vmem:[%s4275_s1 + $0xc] sm:$0xff]   ;;  %vm407_vm1 = vcmask 195584   ;;  %v3617_v3 = vld [vmem:[%s4275_s1 + $0x8] ss:$0 sps:$4 sm:$0xff]  }
  0x16   : > { %3341 = vmatprep.subr.bf16.mxu1 %v3615_v1  ;;  %3393 = vmatprep.subr.bf16.mxu0 %v3616_v2  ;;  %v3618_v4 = vld [vmem:[%s4275_s1 + $0x14] ss:$0 sps:$4 sm:$0xff]   ;;  %v482_v5 = vsel %vm480_vm0, %v3617_v3, 0  ;;  %v3619_v6 = vld [vmem:[%s3744_s25] sm:$0xff]   ;;  %v3620_v8 = vld [vmem:[%s3744_s25 + $0xc] sm:$0xff]   ;;  %v3702_v13 = vmov 0  }
  0x17   : > { %3342 = vmatpush3.bf16.msra.mxu1 %v3615_v1  ;;  %3394 = vmatpush3.bf16.msra.mxu0 %v3616_v2  ;;  %v1059_v7 = vsel %vm480_vm0, %v3618_v4, 0  ;;  %v3621_v9 = vld [vmem:[%s3744_s25 + $0x8] sm:$0xff]   ;;  %v3622_v10 = vld [vmem:[%s3744_s25 + $0x14] sm:$0xff]   ;;  %v3625_v14 = vld [vmem:[%s3744_s25 + $0x1c] sm:$0xff]  }
  0x18   : > { %3597 = vmatprep.subr.msk.bf16.mxu1 %vm480_vm0, %v3617_v3  ;;  %3598 = vmatprep.subr.msk.bf16.mxu0 %vm480_vm0, %v3618_v4  ;;  %v3623_v11 = vld [vmem:[%s4275_s1 + $0x18] sm:$0xff]   ;;  %v3624_v12 = vld [vmem:[%s3744_s25 + $0x10] sm:$0xff]   ;;  %v3627_v16 = vld [vmem:[%s3744_s25 + $0x24] sm:$0xff]  }
  0x19   : > { %3345 = vmatprep.mubr.msk.bf16.mxu1 %vm407_vm1, %v3619_v6  ;;  %3397 = vmatprep.mubr.msk.bf16.mxu0 %vm407_vm1, %v3620_v8  ;;  %v3626_v15 = vld [vmem:[%s3744_s25 + $0x18] sm:$0xff]   ;;  %v3628_v17 = vld [vmem:[%s3744_s25 + $0x20] sm:$0xff]   ;;  %v3629_v18 = vld [vmem:[%s3744_s25 + $0x2c] sm:$0xff]  }
  0x1a   : > { %3613 = vset.pattern.permute.xlu0 %v3702_v13  ;;  %3614 = vset.pattern.permute.xlu1 %v3702_v13  ;;  %v3636_v19 = vld [vmem:[%s4275_s1 + $0x20] ss:$0 sps:$4 sm:$0xff]   ;;  %v3630_v20 = vld [vmem:[%s3744_s25 + $0x28] sm:$0xff]   ;;  %v3631_v21 = vld [vmem:[%s3744_s25 + $0x34] sm:$0xff]  }
  0x1b   : > { %3344 = vmatpush3.bf16.msra.mxu1 %v482_v5  ;;  %3396 = vmatpush3.bf16.msra.mxu0 %v1059_v7  ;;  %v1684_v22 = vsel %vm480_vm0, %v3636_v19, 0  ;;  %v3632_v23 = vld [vmem:[%s3744_s25 + $0x30] sm:$0xff]   ;;  %v3633_v24 = vld [vmem:[%s3744_s25 + $0x3c] sm:$0xff]   ;;  %v3635_v26 = vld [vmem:[%s3744_s25 + $0x44] sm:$0xff]  }
  0x1c   : > { %3497 = vmatprep.subr.bf16.mxu1 %v3616_v2  ;;  %3445 = vmatprep.subr.bf16.mxu0 %v3623_v11  ;;  %v3634_v25 = vld [vmem:[%s3744_s25 + $0x38] sm:$0xff]   ;;  %v2055_v27 = vld [vmem:[%s4276_s2] sm:$0xff]  ;;  %v2057_v28 = vld [vmem:[%s4276_s2 + $0x10] sm:$0xff] }
  0x1d   : > { %v3637_v29 = vld [vmem:[%s3744_s25 + $0x40] sm:$0xff]   ;;  %2105 = vperm.xlu0 %3613, %v2055_v27   ;;  %2115 = vperm.xlu1 %3614, %v2057_v28   ;;  %v2056_v30 = vld [vmem:[%s4276_s2 + $0x8] sm:$0xff]  ;;  %v2058_v32 = vld [vmem:[%s4276_s2 + $0x18] sm:$0xff] }
  0x1e   : > { %3346 = vmatmul.mubr.msk.bf16.vlgmr.msra.gmra.mrb[0].mxu1 %vm407_vm1, %v3621_v9  ;;  %3398 = vmatmul.mubr.msk.bf16.vlgmr.msra.gmra.mrb[0].mxu0 %vm407_vm1, %v3622_v10  ;;  %v3638_v31 = vld [vmem:[%s3744_s25 + $0x4c] sm:$0xff]   ;;  %v2059_v33 = vld [vmem:[%s4276_s2 + $0x20] sm:$0xff]  ;;  %v3640_v36 = vld [vmem:[%s3744_s25 + $0x54] sm:$0xff]  }
  0x1f   : > { %3499 = vmatpush3.bf16.msra.mxu1 %v3616_v2  ;;  %3446 = vmatpush3.bf16.msra.mxu0 %v3623_v11  ;;  %v2060_v34 = vld [vmem:[%s4276_s2 + $0x28] sm:$0xff]  ;;  %v3641_v37 = vld [vmem:[%s3744_s25 + $0x50] sm:$0xff]   ;;  %v3642_v39 = vld [vmem:[%s3744_s25 + $0x5c] sm:$0xff]  }
  0x20   : > { %3349 = vmatprep.mubr.msk.bf16.mxu1 %vm407_vm1, %v3624_v12  ;;  %3401 = vmatprep.mubr.msk.bf16.mxu0 %vm407_vm1, %v3625_v14  ;;  %v3639_v35 = vld [vmem:[%s3744_s25 + $0x48] sm:$0xff]   ;;  %v2061_v38 = vld [vmem:[%s4276_s2 + $0x30] sm:$0xff]  ;;  %v2062_v40 = vld [vmem:[%s4276_s2 + $0x38] sm:$0xff] }
  0x21   : > { %3599 = vmatprep.subr.msk.bf16.mxu1 %vm480_vm0, %v3618_v4  ;;  %3600 = vmatprep.subr.msk.bf16.mxu0 %vm480_vm0, %v3636_v19  ;;  %v2063_v41 = vld [vmem:[%s4276_s2 + $0x40] sm:$0xff]  ;;  %v3643_v42 = vld [vmem:[%s3744_s25 + $0x58] sm:$0xff]   ;;  %v2064_v44 = vld [vmem:[%s4276_s2 + $0x48] sm:$0xff] }
  0x22   : > { %2110 = vperm.xlu0 %3613, %v2056_v30   ;;  %2120 = vperm.xlu1 %3614, %v2058_v32   ;;  %v3644_v43 = vld [vmem:[%s3744_s25 + $0x64] sm:$0xff]   ;;  %v2065_v46 = vld [vmem:[%s4276_s2 + $0x50] sm:$0xff]  ;;  %v3646_v47 = vld [vmem:[%s3744_s25 + $0x18] sm:$0xff]  }
  0x23   : > { %3500 = vmatpush3.bf16.msra.mxu1 %v1059_v7  ;;  %3448 = vmatpush3.bf16.msra.mxu0 %v1684_v22  ;;  %v3645_v45 = vld [vmem:[%s3744_s25 + $0x60] sm:$0xff]   ;;  %v2066_v48 = vld [vmem:[%s4276_s2 + $0x58] sm:$0xff]  ;;  %v2068_v50 = vld [vmem:[%s4276_s2 + $0x68] sm:$0xff] }
  0x24   : > { %v2067_v49 = vld [vmem:[%s4276_s2 + $0x60] sm:$0xff]  ;;  %v3647_v51 = vld [vmem:[%s3744_s25 + $0x68] sm:$0xff]   ;;  %v3649_v53 = vld [vmem:[%s3744_s25 + $0x70] sm:$0xff]  }
  0x25   : > { %v3648_v52 = vld [vmem:[%s3744_s25 + $0x20] sm:$0xff]   ;;  %v2069_v54 = vld [vmem:[%s4276_s2 + $0x70] sm:$0xff]  ;;  %v3650_v55 = vld [vmem:[%s3744_s25 + $0x28] sm:$0xff]  }
  0x26   : > { %3350 = vmatmul.mubr.msk.bf16.gmra.mrb[4].mxu1 %vm407_vm1, %v3626_v15  ;;  %3402 = vmatmul.mubr.msk.bf16.gmra.mrb[4].mxu0 %vm407_vm1, %v3627_v16  ;;  %v2070_v56 = vld [vmem:[%s4276_s2 + $0x78] sm:$0xff]  ;;  %v2071_v57 = vld [vmem:[%s4276_s2 + $0x80] sm:$0xff]  ;;  %v3652_v59 = vld [vmem:[%s3744_s25 + $0x30] sm:$0xff]  }
  0x27   : > { %3353 = vmatprep.mubr.msk.bf16.mxu1 %vm407_vm1, %v3628_v17  ;;  %3405 = vmatprep.mubr.msk.bf16.mxu0 %vm407_vm1, %v3629_v18  ;;  %v3651_v58 = vld [vmem:[%s3744_s25 + $0x78] sm:$0xff]   ;;  %v2072_v60 = vld [vmem:[%s4276_s2 + $0x88] sm:$0xff]  ;;  %v3653_v61 = vld [vmem:[%s3744_s25 + $0x80] sm:$0xff]  }
  0x28   : > { %2125 = vperm.xlu0 %3613, %v2059_v33   ;;  %2130 = vperm.xlu1 %3614, %v2060_v34   ;;  %v2073_v62 = vld [vmem:[%s4276_s2 + $0x90] sm:$0xff]  ;;  %v3654_v63 = vld [vmem:[%s3744_s25 + $0x38] sm:$0xff]   ;;  %v2075_v1 = vld [vmem:[%s4276_s2 + $0xa0] sm:$0xff] }
  0x29   : > { %v2074_v0 = vld [vmem:[%s4276_s2 + $0x98] sm:$0xff]  ;;  %v2076_v2 = vld [vmem:[%s4276_s2 + $0xa8] sm:$0xff]  ;;  %v3656_v4 = vld [vmem:[%s3744_s25 + $0x40] sm:$0xff]  }
  0x2a   : > { %v3655_v3 = vld [vmem:[%s3744_s25 + $0x88] sm:$0xff]   ;;  %v3657_v5 = vld [vmem:[%s3744_s25 + $0x90] sm:$0xff]   ;;  %v2078_v8 = vld [vmem:[%s4276_s2 + $0xb8] sm:$0xff] }
  0x2b   : > { %v2077_v6 = vld [vmem:[%s4276_s2 + $0xb0] sm:$0xff]  ;;  %v3658_v7 = vld [vmem:[%s3744_s25 + $0x48] sm:$0xff]   ;;  %v2079_v9 = vld [vmem:[%s4276_s2 + $0xc0] sm:$0xff] }
  0x2c   : > { %2135 = vperm.xlu0 %3613, %v2061_v38   ;;  %2140 = vperm.xlu1 %3614, %v2062_v40   ;;  %v3659_v10 = vld [vmem:[%s3744_s25 + $0x98] sm:$0xff]   ;;  %v3660_v11 = vld [vmem:[%s3744_s25 + $0x50] sm:$0xff]   ;;  %v2080_v12 = vld [vmem:[%s4276_s2 + $0xc8] sm:$0xff] }
  0x2d   : > { %v3661_v13 = vld [vmem:[%s3744_s25 + $0xa0] sm:$0xff]   ;;  %v2081_v14 = vld [vmem:[%s4276_s2 + $0xd0] sm:$0xff]  ;;  %v3662_v15 = vld [vmem:[%s3744_s25 + $0x58] sm:$0xff]  }
  0x2e   : > { %3354 = vmatmul.mubr.msk.bf16.gmra.mrb[8].mxu1 %vm407_vm1, %v3630_v20  ;;  %3406 = vmatmul.mubr.msk.bf16.gmra.mrb[8].mxu0 %vm407_vm1, %v3631_v21  ;;  %v2082_v16 = vld [vmem:[%s4276_s2 + $0xd8] sm:$0xff]  ;;  %v2083_v17 = vld [vmem:[%s4276_s2 + $0xe0] sm:$0xff]  ;;  %v2084_v18 = vld [vmem:[%s4276_s2 + $0xe8] sm:$0xff] }
  0x2f   : > { %3357 = vmatprep.mubr.msk.bf16.mxu1 %vm407_vm1, %v3632_v23  ;;  %3409 = vmatprep.mubr.msk.bf16.mxu0 %vm407_vm1, %v3633_v24  ;;  %v3663_v19 = vld [vmem:[%s3744_s25 + $0xa8] sm:$0xff]   ;;  %v3664_v20 = vld [vmem:[%s3744_s25 + $0x60] sm:$0xff]   ;;  %v3665_v21 = vld [vmem:[%s3744_s25 + $0xb0] sm:$0xff]  }
  0x30   : > { %2145 = vperm.xlu0 %3613, %v2063_v41   ;;  %2150 = vperm.xlu1 %3614, %v2064_v44   ;;  %v2085_v22 = vld [vmem:[%s4276_s2 + $0xf0] sm:$0xff]  ;;  %v3666_v23 = vld [vmem:[%s3744_s25 + $0x68] sm:$0xff]   ;;  %v2086_v24 = vld [vmem:[%s4276_s2 + $0xf8] sm:$0xff] }
  0x31   : > { %v3667_v27 = vld [vmem:[%s3744_s25 + $0xb8] sm:$0xff]   ;;  %v3668_v28 = vld [vmem:[%s3744_s25 + $0x70] sm:$0xff]   ;;  %v2091_v33 = vld [vmem:[%s4276_s2 + $0x120] sm:$0xff] }
  0x32   : > { %v2089_v30 = vld [vmem:[%s4276_s2 + $0x110] sm:$0xff]  ;;  %v2090_v32 = vld [vmem:[%s4276_s2 + $0x118] sm:$0xff]  ;;  %v2092_v34 = vld [vmem:[%s4276_s2 + $0x128] sm:$0xff] }
  0x33   : > { %v2093_v38 = vld [vmem:[%s4276_s2 + $0x130] sm:$0xff]  ;;  %v2094_v40 = vld [vmem:[%s4276_s2 + $0x138] sm:$0xff]  ;;  %v2095_v41 = vld [vmem:[%s4276_s2 + $0x140] sm:$0xff] }
  0x34   : > { %2155 = vperm.xlu0 %3613, %v2065_v46   ;;  %2160 = vperm.xlu1 %3614, %v2066_v48   ;;  %v3676_v44 = vld [vmem:[%s3744_s25 + $0x90] sm:$0xff]   ;;  %v2098_v48 = vld [vmem:[%s4276_s2 + $0x158] sm:$0xff] }
  0x35   : > { %v2097_v46 = vld [vmem:[%s4276_s2 + $0x150] sm:$0xff] }
  0x36   : > { %3358 = vmatmul.mubr.msk.bf16.gmra.mrb[12].mxu1 %vm407_vm1, %v3634_v25  ;;  %3410 = vmatmul.mubr.msk.bf16.gmra.mrb[12].mxu0 %vm407_vm1, %v3635_v26  ;;  %v2087_v25 = vld [vmem:[%s4276_s2 + $0x100] sm:$0xff]  ;;  %v2088_v26 = vld [vmem:[%s4276_s2 + $0x108] sm:$0xff] }
  0x37   : > { %3361 = vmatprep.mubr.msk.bf16.mxu1 %vm407_vm1, %v3637_v29  ;;  %3413 = vmatprep.mubr.msk.bf16.mxu0 %vm407_vm1, %v3638_v31  ;;  %v3669_v29 = vld [vmem:[%s3744_s25 + $0x6c] sm:$0xff]   ;;  %v3670_v31 = vld [vmem:[%s3744_s25 + $0x78] sm:$0xff]  }
  0x38   : > { %2165 = vperm.xlu0 %3613, %v2067_v49   ;;  %2170 = vperm.xlu1 %3614, %v2068_v50   ;;  %v2099_v49 = vld [vmem:[%s4276_s2 + $0x160] sm:$0xff]  ;;  %v2100_v50 = vld [vmem:[%s4276_s2 + $0x168] sm:$0xff] }
  0x3c   : > { %2175 = vperm.xlu0 %3613, %v2069_v54   ;;  %2180 = vperm.xlu1 %3614, %v2070_v56   ;;  %v2101_v54 = vld [vmem:[%s4276_s2 + $0x170] sm:$0xff]  ;;  %v2102_v56 = vld [vmem:[%s4276_s2 + $0x178] sm:$0xff] }
  0x3e   : > { %3362 = vmatmul.mubr.msk.bf16.gmra.mrb[16].mxu1 %vm407_vm1, %v3639_v35  ;;  %3414 = vmatmul.mubr.msk.bf16.gmra.mrb[16].mxu0 %vm407_vm1, %v3640_v36  ;;  %v3671_v35 = vld [vmem:[%s3744_s25 + $0x74] sm:$0xff]   ;;  %v3672_v36 = vld [vmem:[%s3744_s25 + $0x80] sm:$0xff]  }
  0x3f   : > { %3365 = vmatprep.mubr.msk.bf16.mxu1 %vm407_vm1, %v3641_v37  ;;  %3417 = vmatprep.mubr.msk.bf16.mxu0 %vm407_vm1, %v3642_v39  ;;  %v3673_v37 = vld [vmem:[%s3744_s25 + $0x7c] sm:$0xff]   ;;  %v3674_v39 = vld [vmem:[%s3744_s25 + $0x88] sm:$0xff]  }
  0x40   : > { %2185 = vperm.xlu0 %3613, %v2071_v57   ;;  %2190 = vperm.xlu1 %3614, %v2072_v60   ;;  %v3683_v57 = vld [vmem:[%s3744_s25 + $0xa4] sm:$0xff]   ;;  %v3686_v60 = vld [vmem:[%s3744_s25 + $0xb8] sm:$0xff]  }
  0x44   : > { %2195 = vperm.xlu0 %3613, %v2073_v62   ;;  %2200 = vperm.xlu1 %3614, %v2074_v0   ;;  %v3688_v62 = vld [vmem:[%s3744_s25 + $0xc0] sm:$0xff]   ;;  %v3690_v0 = vld [vmem:[%s3744_s25 + $0xc8] sm:$0xff]  }
  0x46   : > { %3366 = vmatmul.mubr.msk.bf16.gmra.mrb[20].mxu1 %vm407_vm1, %v3643_v42  ;;  %3418 = vmatmul.mubr.msk.bf16.gmra.mrb[20].mxu0 %vm407_vm1, %v3644_v43  ;;  %v2096_v42 = vld [vmem:[%s4276_s2 + $0x148] sm:$0xff] }
  0x47   : > { %3369 = vmatprep.mubr.msk.bf16.mxu1 %vm407_vm1, %v3645_v45  ;;  %3449 = vmatprep.mubr.msk.bf16.mxu0 %vm407_vm1, %v3646_v47  ;;  %v3675_v43 = vld [vmem:[%s3744_s25 + $0x84] sm:$0xff]   ;;  %v3677_v45 = vld [vmem:[%s3744_s25 + $0x8c] sm:$0xff]   ;;  %v3678_v47 = vld [vmem:[%s3744_s25 + $0x98] sm:$0xff]  }
  0x48   : > { %2205 = vperm.xlu0 %3613, %v2075_v1   ;;  %2210 = vperm.xlu1 %3614, %v2076_v2   ;;  %v3691_v1 = vld [vmem:[%s3744_s25 + $0xc4] sm:$0xff]   ;;  %v3692_v2 = vld [vmem:[%s3744_s25 + $0xd0] sm:$0xff]  }
  0x4c   : > { %2215 = vperm.xlu0 %3613, %v2077_v6   ;;  %2220 = vperm.xlu1 %3614, %v2078_v8  }
  0x4e   : > { %3370 = vmatmul.mubr.msk.bf16.gmra.mrb[24].mxu1 %vm407_vm1, %v3647_v51  ;;  %3450 = vmatmul.mubr.msk.bf16.vlgmr.msra.gmra.mrb[0].mxu0 %vm407_vm1, %v3648_v52  ;;  %v3679_v51 = vld [vmem:[%s3744_s25 + $0x94] sm:$0xff]   ;;  %v3680_v52 = vld [vmem:[%s3744_s25 + $0xa0] sm:$0xff]  }
  0x4f   : > { %3373 = vmatprep.mubr.msk.bf16.mxu1 %vm407_vm1, %v3649_v53  ;;  %3453 = vmatprep.mubr.msk.bf16.mxu0 %vm407_vm1, %v3650_v55  ;;  %v3681_v53 = vld [vmem:[%s3744_s25 + $0x9c] sm:$0xff]   ;;  %v3682_v55 = vld [vmem:[%s3744_s25 + $0xa8] sm:$0xff]  }
  0x50   : > { %2225 = vperm.xlu0 %3613, %v2079_v9   ;;  %2230 = vperm.xlu1 %3614, %v2080_v12  }
  0x54   : > { %2235 = vperm.xlu0 %3613, %v2081_v14   ;;  %2240 = vperm.xlu1 %3614, %v2082_v16  }
  0x56   : > { %3374 = vmatmul.mubr.msk.bf16.gmra.mrb[28].mxu1 %vm407_vm1, %v3651_v58  ;;  %3454 = vmatmul.mubr.msk.bf16.gmra.mrb[4].mxu0 %vm407_vm1, %v3652_v59  ;;  %v3684_v58 = vld [vmem:[%s3744_s25 + $0xb0] sm:$0xff]  }
  0x57   : > { %3377 = vmatprep.mubr.msk.bf16.mxu1 %vm407_vm1, %v3653_v61  ;;  %3457 = vmatprep.mubr.msk.bf16.mxu0 %vm407_vm1, %v3654_v63  ;;  %v3685_v59 = vld [vmem:[%s3744_s25 + $0xac] sm:$0xff]   ;;  %v3687_v61 = vld [vmem:[%s3744_s25 + $0xb4] sm:$0xff]   ;;  %v3689_v63 = vld [vmem:[%s3744_s25 + $0xbc] sm:$0xff]  }
  0x58   : > { %2245 = vperm.xlu0 %3613, %v2083_v17   ;;  %2250 = vperm.xlu1 %3614, %v2084_v18  }
  0x5c   : > { %2255 = vperm.xlu0 %3613, %v2085_v22   ;;  %2260 = vperm.xlu1 %3614, %v2086_v24  }
  0x5e   : > { %3378 = vmatmul.mubr.msk.bf16.gmra.mrb[32].mxu1 %vm407_vm1, %v3655_v3  ;;  %3458 = vmatmul.mubr.msk.bf16.gmra.mrb[8].mxu0 %vm407_vm1, %v3656_v4 }
  0x5f   : > { %3381 = vmatprep.mubr.msk.bf16.mxu1 %vm407_vm1, %v3657_v5  ;;  %3461 = vmatprep.mubr.msk.bf16.mxu0 %vm407_vm1, %v3658_v7 }
  0x60   : > { %2265 = vperm.xlu0 %3613, %v2087_v25   ;;  %2270 = vperm.xlu1 %3614, %v2088_v26  }
  0x64   : > { %2275 = vperm.xlu0 %3613, %v2089_v30   ;;  %2280 = vperm.xlu1 %3614, %v2090_v32  }
  0x66   : > { %3382 = vmatmul.mubr.msk.bf16.gmra.mrb[36].mxu1 %vm407_vm1, %v3659_v10  ;;  %3462 = vmatmul.mubr.msk.bf16.gmra.mrb[12].mxu0 %vm407_vm1, %v3660_v11 }
  0x67   : > { %3385 = vmatprep.mubr.msk.bf16.mxu1 %vm407_vm1, %v3661_v13  ;;  %3465 = vmatprep.mubr.msk.bf16.mxu0 %vm407_vm1, %v3662_v15 }
  0x68   : > { %2285 = vperm.xlu0 %3613, %v2091_v33   ;;  %2290 = vperm.xlu1 %3614, %v2092_v34  }
  0x6c   : > { %2295 = vperm.xlu0 %3613, %v2093_v38   ;;  %2300 = vperm.xlu1 %3614, %v2094_v40  }
  0x6e   : > { %3386 = vmatmul.mubr.msk.bf16.gmra.mrb[40].mxu1 %vm407_vm1, %v3663_v19  ;;  %3466 = vmatmul.mubr.msk.bf16.gmra.mrb[16].mxu0 %vm407_vm1, %v3664_v20 }
  0x6f   : > { %3389 = vmatprep.mubr.msk.bf16.mxu1 %vm407_vm1, %v3665_v21  ;;  %3469 = vmatprep.mubr.msk.bf16.mxu0 %vm407_vm1, %v3666_v23 }
  0x70   : > { %2305 = vperm.xlu0 %3613, %v2095_v41   ;;  %2310 = vperm.xlu1 %3614, %v2096_v42  }
  0x74   : > { %2315 = vperm.xlu0 %3613, %v2097_v46   ;;  %2320 = vperm.xlu1 %3614, %v2098_v48  }
  0x76   : > { %3390 = vmatmul.mubr.msk.bf16.gmra.mrb[44].mxu1 %vm407_vm1, %v3667_v27  ;;  %3470 = vmatmul.mubr.msk.bf16.gmra.mrb[20].mxu0 %vm407_vm1, %v3668_v28 }
  0x77   : > { %3421 = vmatprep.mubr.msk.bf16.mxu1 %vm407_vm1, %v3669_v29  ;;  %3473 = vmatprep.mubr.msk.bf16.mxu0 %vm407_vm1, %v3670_v31 }
  0x78   : > { %2325 = vperm.xlu0 %3613, %v2099_v49   ;;  %2330 = vperm.xlu1 %3614, %v2100_v50  }
  0x7c   : > { %2335 = vperm.xlu0 %3613, %v2101_v54   ;;  %2340 = vperm.xlu1 %3614, %v2102_v56  }
  0x7e   : > { %3422 = vmatmul.mubr.msk.bf16.vlgmr.msra.gmra.mrb[24].mxu1 %vm407_vm1, %v3671_v35  ;;  %3474 = vmatmul.mubr.msk.bf16.gmra.mrb[24].mxu0 %vm407_vm1, %v3672_v36 }
  0x7f   : > { %3425 = vmatprep.mubr.msk.bf16.mxu1 %vm407_vm1, %v3673_v37  ;;  %3477 = vmatprep.mubr.msk.bf16.mxu0 %vm407_vm1, %v3674_v39 }
  0x86   : > { %3426 = vmatmul.mubr.msk.bf16.gmra.mrb[28].mxu1 %vm407_vm1, %v3675_v43  ;;  %3478 = vmatmul.mubr.msk.bf16.gmra.mrb[28].mxu0 %vm407_vm1, %v3676_v44 }
  0x87   : > { %3429 = vmatprep.mubr.msk.bf16.mxu1 %vm407_vm1, %v3677_v45  ;;  %3481 = vmatprep.mubr.msk.bf16.mxu0 %vm407_vm1, %v3678_v47 }
  0x8e   : > { %3430 = vmatmul.mubr.msk.bf16.gmra.mrb[32].mxu1 %vm407_vm1, %v3679_v51  ;;  %3482 = vmatmul.mubr.msk.bf16.gmra.mrb[32].mxu0 %vm407_vm1, %v3680_v52 }
  0x8f   : > { %3433 = vmatprep.mubr.msk.bf16.mxu1 %vm407_vm1, %v3681_v53  ;;  %3485 = vmatprep.mubr.msk.bf16.mxu0 %vm407_vm1, %v3682_v55 }
  0x96   : > { %3434 = vmatmul.mubr.msk.bf16.gmra.mrb[36].mxu1 %vm407_vm1, %v3683_v57  ;;  %3486 = vmatmul.mubr.msk.bf16.gmra.mrb[36].mxu0 %vm407_vm1, %v3684_v58 }
  0x97   : > { %3437 = vmatprep.mubr.msk.bf16.mxu1 %vm407_vm1, %v3685_v59  ;;  %3489 = vmatprep.mubr.msk.bf16.mxu0 %vm407_vm1, %v3686_v60 }
  0x9c   : > { %v2106_v3 = vpop.permute.xlu0 %2105  ;;  %v2116_v4 = vpop.permute.xlu1 %2115 }
  0x9e   : > { %3438 = vmatmul.mubr.msk.bf16.gmra.mrb[40].mxu1 %vm407_vm1, %v3687_v61  ;;  %3490 = vmatmul.mubr.msk.bf16.gmra.mrb[40].mxu0 %vm407_vm1, %v3688_v62 }
  0x9f   : > { %3441 = vmatprep.mubr.msk.bf16.mxu1 %vm407_vm1, %v3689_v63  ;;  %3493 = vmatprep.mubr.msk.bf16.mxu0 %vm407_vm1, %v3690_v0 }
  0xa1   : > { %v2111_v5 = vpop.permute.xlu0 %2110  ;;  %v2121_v6 = vpop.permute.xlu1 %2120 }
  0xa6   : > { %3442 = vmatmul.mubr.msk.bf16.gmra.mrb[44].mxu1 %vm407_vm1, %v3691_v1  ;;  %3494 = vmatmul.mubr.msk.bf16.gmra.mrb[44].mxu0 %vm407_vm1, %v3692_v2 }
  0xa7   : > { %v4070_v11 = vpop.permute.xlu0 %2125  ;;  %v4072_v12 = vpop.permute.xlu1 %2130 }
  0xab   : > { %v4076_v16 = vpop.permute.xlu0 %2135  ;;  %v4080_v18 = vpop.permute.xlu1 %2140 }
  0xaf   : > { %v4084_v20 = vpop.permute.xlu0 %2145  ;;  %v4088_v22 = vpop.permute.xlu1 %2150 }
  0xb3   : > { %v4094_v25 = vpop.permute.xlu0 %2155  ;;  %v4096_v26 = vpop.permute.xlu1 %2160 }
  0xb7   : > { %v4106_v31 = vpop.permute.xlu0 %2165  ;;  %v4108_v32 = vpop.permute.xlu1 %2170 }
  0xbb   : > { %v4116_v36 = vpop.permute.xlu0 %2175  ;;  %v4120_v38 = vpop.permute.xlu1 %2180 }
  0xbf   : > { %v4124_v40 = vpop.permute.xlu0 %2185  ;;  %v4128_v42 = vpop.permute.xlu1 %2190 }
  0xc3   : > { %v4134_v45 = vpop.permute.xlu0 %2195  ;;  %v4136_v46 = vpop.permute.xlu1 %2200 }
  0xc7   : > { %v4138_v54 = vpop.permute.xlu0 %2205  ;;  %v4140_v57 = vpop.permute.xlu1 %2210 }
  0xf1   : > { %v3347_v7 = vpop.f32.mrb[0].mxu1 }
  0xf2   : > { %v518_v8 = vpop.f32.mrb[1].mxu1 }
  0xf3   : > { %v3348_v9 = vpop.f32.mrb[2].mxu1 }
  0xf4   : > { %v521_v10 = vpop.f32.mrb[3].mxu1 }
  0xf9   : > { %v3351_v13 = vpop.f32.mrb[4].mxu1 }
  0xfa   : > { %v534_v14 = vpop.f32.mrb[5].mxu1 }
  0xfb   : > { %v4074_v15 = vpop.f32.mrb[6].mxu1 }
  0xfc   : > { %v4078_v17 = vpop.f32.mrb[7].mxu1 }
 0x101   : > { %v4082_v19 = vpop.f32.mrb[8].mxu1 }
 0x102   : > { %v4086_v21 = vpop.f32.mrb[9].mxu1 }
 0x103   : > { %v4090_v23 = vpop.f32.mrb[10].mxu1 }
 0x104   : > { %v4092_v24 = vpop.f32.mrb[11].mxu1 }
 0x109   : > { %v4098_v27 = vpop.f32.mrb[12].mxu1 }
 0x10a   : > { %v4100_v28 = vpop.f32.mrb[13].mxu1 }
 0x10b   : > { %v4102_v29 = vpop.f32.mrb[14].mxu1 }
 0x10c   : > { %v4104_v30 = vpop.f32.mrb[15].mxu1 }
 0x111   : > { %v4110_v33 = vpop.f32.mrb[16].mxu1 }
 0x112   : > { %v4112_v34 = vpop.f32.mrb[17].mxu1 }
 0x113   : > { %v4114_v35 = vpop.f32.mrb[18].mxu1 }
 0x114   : > { %v4118_v37 = vpop.f32.mrb[19].mxu1 }
 0x119   : > { %v4122_v39 = vpop.f32.mrb[20].mxu1 }
 0x11a   : > { %v4126_v41 = vpop.f32.mrb[21].mxu1 }
 0x11b   : > { %v4130_v43 = vpop.f32.mrb[22].mxu1 }
 0x11c   : > { %v4132_v44 = vpop.f32.mrb[23].mxu1 }
 0x121   : > { %v3451_v47 = vpop.f32.mrb[0].mxu0 }
 0x122   : > { %v3501_v48 = vadd.f32 %v3451_v47, %v3347_v7  ;;  %v1720_v49 = vpop.f32.mrb[1].mxu0 }
 0x123   : > { %v3502_v50 = vadd.f32 %v1720_v49, %v518_v8  ;;  %v3452_v51 = vpop.f32.mrb[2].mxu0 }
 0x124   : > { %v3503_v52 = vadd.f32 %v3452_v51, %v3348_v9  ;;  %v1723_v53 = vpop.f32.mrb[3].mxu0  ;;  %v2345_v58 = vmul.f32 %v3501_v48, %v2116_v4  ;;  %v4143_v9 = vpop.permute.xlu0 %2215 }
 0x125   : > { %v2343_v55 = vmul.f32 %v3502_v50, %v2106_v3  ;;  %v3504_v56 = vadd.f32 %v1723_v53, %v521_v10  ;;  %v4146_v4 = vpop.permute.xlu1 %2220 }
 0x126   : > { %v2346_v59 = vmul.f32 %v3503_v52, %v2121_v6  ;;  %v2690_v47 = vmul.f32 %v2345_v58, %v2345_v58 }
 0x127   : > { %v2344_v60 = vmul.f32 %v3504_v56, %v2111_v5  ;;  %v2688_v62 = vmul.f32 %v2343_v55, %v2343_v55 }
 0x128   : > { %v3128_v61 = vpack.c.bf16 %v2346_v59, %v2345_v58  ;;  %v2691_v5 = vmul.f32 %v2346_v59, %v2346_v59 }
 0x129   : > { %v3123_v63 = vpack.c.bf16 %v2344_v60, %v2343_v55  ;;  %v2632_v0 = vadd.f32 %v2344_v60, %v2343_v55  ;;  %v2689_v1 = vmul.f32 %v2344_v60, %v2344_v60  ;;  %v3455_v2 = vpop.f32.mrb[4].mxu0 }
 0x12a   : > { %3240 = vst [vmem:[%s3749_s28 + $0x8] sm:$0xff] %v3128_v61   ;;  %v3505_v7 = vadd.f32 %v3455_v2, %v3351_v13  ;;  %v1736_v8 = vpop.f32.mrb[5].mxu0  ;;  %v4156_v2 = vpop.permute.xlu1 %2230 }
 0x12b   : > { %3124 = vst [vmem:[%s3749_s28] sm:$0xff] %v3123_v63   ;;  %v2633_v3 = vadd.f32 %v2632_v0, %v2345_v58  ;;  %v2736_v10 = vadd.f32 %v2689_v1, %v2688_v62  ;;  %v3506_v49 = vadd.f32 %v1736_v8, %v534_v14  ;;  %v3456_v50 = vpop.f32.mrb[6].mxu0 }
 0x12c   : > { %v3507_v6 = vadd.f32 %v3456_v50, %v4074_v15  ;;  %v1739_v48 = vpop.f32.mrb[7].mxu0  ;;  %v2349_v55 = vmul.f32 %v3505_v7, %v4076_v16  ;;  %v4154_v15 = vpop.permute.xlu0 %2225 }
 0x12d   : > { %v2737_v51 = vadd.f32 %v2736_v10, %v2690_v47  ;;  %v2347_v52 = vmul.f32 %v3506_v49, %v4070_v11  ;;  %v2634_v53 = vadd.f32 %v2633_v3, %v2346_v59  ;;  %v3508_v13 = vadd.f32 %v1739_v48, %v4078_v17 }
 0x12e   : > { %v2350_v56 = vmul.f32 %v3507_v6, %v4080_v18  ;;  %v2694_v18 = vmul.f32 %v2349_v55, %v2349_v55 }
 0x12f   : > { %v2635_v58 = vadd.f32 %v2634_v53, %v2347_v52  ;;  %v2692_v14 = vmul.f32 %v2347_v52, %v2347_v52  ;;  %v2738_v60 = vadd.f32 %v2737_v51, %v2691_v5  ;;  %v2348_v61 = vmul.f32 %v3508_v13, %v4072_v12 }
 0x130   : > { %v3138_v62 = vpack.c.bf16 %v2350_v56, %v2349_v55  ;;  %v2695_v3 = vmul.f32 %v2350_v56, %v2350_v56 }
 0x131   : > { %v2739_v63 = vadd.f32 %v2738_v60, %v2692_v14  ;;  %v3133_v0 = vpack.c.bf16 %v2348_v61, %v2347_v52  ;;  %v2636_v11 = vadd.f32 %v2635_v58, %v2348_v61  ;;  %v2693_v59 = vmul.f32 %v2348_v61, %v2348_v61  ;;  %v3459_v1 = vpop.f32.mrb[8].mxu0  ;;  %v4167_v52 = vpop.permute.xlu0 %2235 }
 0x132   : > { %3242 = vst [vmem:[%s3749_s28 + $0x18] sm:$0xff] %v3138_v62   ;;  %v3509_v16 = vadd.f32 %v3459_v1, %v4082_v19  ;;  %v1752_v17 = vpop.f32.mrb[9].mxu0 }
 0x133   : > { %3241 = vst [vmem:[%s3749_s28 + $0x10] sm:$0xff] %v3133_v0   ;;  %v2637_v7 = vadd.f32 %v2636_v11, %v2349_v55  ;;  %v2740_v8 = vadd.f32 %v2739_v63, %v2693_v59  ;;  %v3510_v12 = vadd.f32 %v1752_v17, %v4086_v21  ;;  %v3460_v47 = vpop.f32.mrb[10].mxu0  ;;  %v4170_v55 = vpop.permute.xlu1 %2240 }
 0x134   : > { %v3511_v10 = vadd.f32 %v3460_v47, %v4090_v23  ;;  %v1755_v49 = vpop.f32.mrb[11].mxu0  ;;  %v2353_v19 = vmul.f32 %v3509_v16, %v4094_v25 }
 0x135   : > { %v2741_v50 = vadd.f32 %v2740_v8, %v2694_v18  ;;  %v2351_v5 = vmul.f32 %v3510_v12, %v4084_v20  ;;  %v2638_v6 = vadd.f32 %v2637_v7, %v2350_v56  ;;  %v3512_v48 = vadd.f32 %v1755_v49, %v4092_v24  ;;  %v4177_v16 = vpop.permute.xlu0 %2245 }
 0x136   : > { %v2354_v51 = vmul.f32 %v3511_v10, %v4096_v26  ;;  %v2698_v61 = vmul.f32 %v2353_v19, %v2353_v19 }
 0x137   : > { %v2639_v21 = vadd.f32 %v2638_v6, %v2351_v5  ;;  %v2696_v53 = vmul.f32 %v2351_v5, %v2351_v5  ;;  %v2742_v13 = vadd.f32 %v2741_v50, %v2695_v3  ;;  %v2352_v23 = vmul.f32 %v3512_v48, %v4088_v22  ;;  %v4181_v8 = vpop.permute.xlu1 %2250 }
 0x138   : > { %v3148_v58 = vpack.c.bf16 %v2354_v51, %v2353_v19  ;;  %v2699_v22 = vmul.f32 %v2354_v51, %v2354_v51 }
 0x139   : > { %v2743_v20 = vadd.f32 %v2742_v13, %v2696_v53  ;;  %v3143_v56 = vpack.c.bf16 %v2352_v23, %v2351_v5  ;;  %v2640_v14 = vadd.f32 %v2639_v21, %v2352_v23  ;;  %v2697_v60 = vmul.f32 %v2352_v23, %v2352_v23  ;;  %v3463_v24 = vpop.f32.mrb[12].mxu0 }
 0x13a   : > { %3244 = vst [vmem:[%s3749_s28 + $0x28] sm:$0xff] %v3148_v58   ;;  %v3513_v25 = vadd.f32 %v3463_v24, %v4098_v27  ;;  %v1768_v26 = vpop.f32.mrb[13].mxu0 }
 0x13b   : > { %3243 = vst [vmem:[%s3749_s28 + $0x20] sm:$0xff] %v3143_v56   ;;  %v2641_v62 = vadd.f32 %v2640_v14, %v2353_v19  ;;  %v2744_v63 = vadd.f32 %v2743_v20, %v2697_v60  ;;  %v3514_v0 = vadd.f32 %v1768_v26, %v4100_v28  ;;  %v3464_v11 = vpop.f32.mrb[14].mxu0 }
 0x13c   : > { %v3515_v59 = vadd.f32 %v3464_v11, %v4102_v29  ;;  %v1771_v1 = vpop.f32.mrb[15].mxu0  ;;  %v2357_v12 = vmul.f32 %v3513_v25, %v4116_v36 }
 0x13d   : > { %v2745_v17 = vadd.f32 %v2744_v63, %v2698_v61  ;;  %v2355_v18 = vmul.f32 %v3514_v0, %v4106_v31  ;;  %v2642_v7 = vadd.f32 %v2641_v62, %v2354_v51  ;;  %v3516_v27 = vadd.f32 %v1771_v1, %v4104_v30  ;;  %v4188_v51 = vpop.permute.xlu0 %2255 }
 0x13e   : > { %v2358_v28 = vmul.f32 %v3515_v59, %v4120_v38  ;;  %v2702_v36 = vmul.f32 %v2357_v12, %v2357_v12 }
 0x13f   : > { %v2643_v47 = vadd.f32 %v2642_v7, %v2355_v18  ;;  %v2700_v3 = vmul.f32 %v2355_v18, %v2355_v18  ;;  %v2746_v29 = vadd.f32 %v2745_v17, %v2699_v22  ;;  %v2356_v10 = vmul.f32 %v3516_v27, %v4108_v32  ;;  %v4192_v32 = vpop.permute.xlu1 %2260 }
 0x140   : > { %v3158_v49 = vpack.c.bf16 %v2358_v28, %v2357_v12  ;;  %v2703_v23 = vmul.f32 %v2358_v28, %v2358_v28 }
 0x141   : > { %v2747_v50 = vadd.f32 %v2746_v29, %v2700_v3  ;;  %v3153_v5 = vpack.c.bf16 %v2356_v10, %v2355_v18  ;;  %v2644_v31 = vadd.f32 %v2643_v47, %v2356_v10  ;;  %v2701_v6 = vmul.f32 %v2356_v10, %v2356_v10  ;;  %v3467_v48 = vpop.f32.mrb[16].mxu0 }
 0x142   : > { %3246 = vst [vmem:[%s3749_s28 + $0x38] sm:$0xff] %v3158_v49   ;;  %v3517_v30 = vadd.f32 %v3467_v48, %v4110_v33  ;;  %v1784_v19 = vpop.f32.mrb[17].mxu0 }
 0x143   : > { %3245 = vst [vmem:[%s3749_s28 + $0x30] sm:$0xff] %v3153_v5   ;;  %v2645_v38 = vadd.f32 %v2644_v31, %v2357_v12  ;;  %v2748_v21 = vadd.f32 %v2747_v50, %v2701_v6  ;;  %v3518_v53 = vadd.f32 %v1784_v19, %v4112_v34  ;;  %v3468_v13 = vpop.f32.mrb[18].mxu0  ;;  %v4202_v1 = vpop.permute.xlu1 %2270 }
 0x144   : > { %v3519_v58 = vadd.f32 %v3468_v13, %v4114_v35  ;;  %v1787_v20 = vpop.f32.mrb[19].mxu0  ;;  %v2361_v24 = vmul.f32 %v3517_v30, %v4134_v45  ;;  %v4200_v35 = vpop.permute.xlu0 %2265 }
 0x145   : > { %v2749_v56 = vadd.f32 %v2748_v21, %v2702_v36  ;;  %v2359_v14 = vmul.f32 %v3518_v53, %v4124_v40  ;;  %v2646_v33 = vadd.f32 %v2645_v38, %v2358_v28  ;;  %v3520_v60 = vadd.f32 %v1787_v20, %v4118_v37 }
 0x146   : > { %v2362_v25 = vmul.f32 %v3519_v58, %v4136_v46  ;;  %v2706_v46 = vmul.f32 %v2361_v24, %v2361_v24 }
 0x147   : > { %v2647_v26 = vadd.f32 %v2646_v33, %v2359_v14  ;;  %v2704_v34 = vmul.f32 %v2359_v14, %v2359_v14  ;;  %v2750_v61 = vadd.f32 %v2749_v56, %v2703_v23  ;;  %v2360_v62 = vmul.f32 %v3520_v60, %v4128_v42  ;;  %v4216_v6 = vpop.permute.xlu1 %2280 }
 0x148   : > { %v3168_v63 = vpack.c.bf16 %v2362_v25, %v2361_v24  ;;  %v2707_v27 = vmul.f32 %v2362_v25, %v2362_v25  ;;  %v4213_v50 = vpop.permute.xlu0 %2275 }
 0x149   : > { %v2751_v0 = vadd.f32 %v2750_v61, %v2704_v34  ;;  %v3163_v11 = vpack.c.bf16 %v2360_v62, %v2359_v14  ;;  %v2648_v40 = vadd.f32 %v2647_v26, %v2360_v62  ;;  %v2705_v22 = vmul.f32 %v2360_v62, %v2360_v62  ;;  %v3471_v59 = vpop.f32.mrb[20].mxu0 }
 0x14a   : > { %3248 = vst [vmem:[%s3749_s28 + $0x48] sm:$0xff] %v3168_v63   ;;  %v3521_v37 = vadd.f32 %v3471_v59, %v4122_v39  ;;  %v1800_v45 = vpop.f32.mrb[21].mxu0 }
 0x14b   : > { %3247 = vst [vmem:[%s3749_s28 + $0x40] sm:$0xff] %v3163_v11   ;;  %v2649_v17 = vadd.f32 %v2648_v40, %v2361_v24  ;;  %v2752_v18 = vadd.f32 %v2751_v0, %v2705_v22  ;;  %v3522_v42 = vadd.f32 %v1800_v45, %v4126_v41  ;;  %v3472_v7 = vpop.f32.mrb[22].mxu0  ;;  %v4226_v59 = vpop.permute.xlu1 %2290 }
 0x14c   : > { %v3523_v12 = vadd.f32 %v3472_v7, %v4130_v43  ;;  %v1803_v28 = vpop.f32.mrb[23].mxu0  ;;  %v2365_v39 = vmul.f32 %v3521_v37, %v4143_v9  ;;  %v4223_v63 = vpop.permute.xlu0 %2285 }
 0x14d   : > { %v2753_v47 = vadd.f32 %v2752_v18, %v2706_v46  ;;  %v2363_v3 = vmul.f32 %v3522_v42, %v4138_v54  ;;  %v2650_v29 = vadd.f32 %v2649_v17, %v2362_v25  ;;  %v3524_v10 = vadd.f32 %v1803_v28, %v4132_v44 }
 0x14e   : > { %v2366_v49 = vmul.f32 %v3523_v12, %v4146_v4  ;;  %v2710_v13 = vmul.f32 %v2365_v39, %v2365_v39 }
 0x14f   : > { %v2651_v5 = vadd.f32 %v2650_v29, %v2363_v3  ;;  %v2708_v41 = vmul.f32 %v2363_v3, %v2363_v3  ;;  %v2754_v31 = vadd.f32 %v2753_v47, %v2707_v27  ;;  %v2364_v43 = vmul.f32 %v3524_v10, %v4140_v57 }
 0x150   : > { %v3178_v48 = vpack.c.bf16 %v2366_v49, %v2365_v39  ;;  %v2711_v14 = vmul.f32 %v2366_v49, %v2366_v49 }
 0x151   : > { %v3423_v54 = vpop.f32.mrb[24].mxu1  ;;  %v2755_v30 = vadd.f32 %v2754_v31, %v2708_v41  ;;  %v3173_v19 = vpack.c.bf16 %v2364_v43, %v2363_v3  ;;  %v2652_v44 = vadd.f32 %v2651_v5, %v2364_v43  ;;  %v2709_v36 = vmul.f32 %v2364_v43, %v2364_v43  ;;  %v3475_v9 = vpop.f32.mrb[24].mxu0 }
 0x152   : > { %v1191_v38 = vpop.f32.mrb[25].mxu1  ;;  %3250 = vst [vmem:[%s3749_s28 + $0x58] sm:$0xff] %v3178_v48   ;;  %v3525_v4 = vadd.f32 %v3475_v9, %v3423_v54  ;;  %v1816_v21 = vpop.f32.mrb[25].mxu0 }
 0x153   : > { %v3424_v53 = vpop.f32.mrb[26].mxu1  ;;  %3249 = vst [vmem:[%s3749_s28 + $0x50] sm:$0xff] %v3173_v19   ;;  %v2653_v23 = vadd.f32 %v2652_v44, %v2365_v39  ;;  %v2756_v58 = vadd.f32 %v2755_v30, %v2709_v36  ;;  %v3526_v20 = vadd.f32 %v1816_v21, %v1191_v38  ;;  %v3476_v57 = vpop.f32.mrb[26].mxu0 }
 0x154   : > { %v1194_v56 = vpop.f32.mrb[27].mxu1  ;;  %v3527_v33 = vadd.f32 %v3476_v57, %v3424_v53  ;;  %v1819_v60 = vpop.f32.mrb[27].mxu0  ;;  %v2369_v61 = vmul.f32 %v3525_v4, %v4167_v52 }
 0x155   : > { %v2757_v24 = vadd.f32 %v2756_v58, %v2710_v13  ;;  %v2367_v25 = vmul.f32 %v3526_v20, %v4154_v15  ;;  %v2654_v26 = vadd.f32 %v2653_v23, %v2366_v49  ;;  %v3528_v34 = vadd.f32 %v1819_v60, %v1194_v56  ;;  %v4233_v30 = vpop.permute.xlu0 %2295  ;;  %v2301_v38 = vpop.permute.xlu1 %2300 }
 0x156   : > { %v2370_v62 = vmul.f32 %v3527_v33, %v4170_v55  ;;  %v2714_v12 = vmul.f32 %v2369_v61, %v2369_v61 }
 0x157   : > { %v2655_v0 = vadd.f32 %v2654_v26, %v2367_v25  ;;  %v2712_v11 = vmul.f32 %v2367_v25, %v2367_v25  ;;  %v2758_v40 = vadd.f32 %v2757_v24, %v2711_v14  ;;  %v2368_v22 = vmul.f32 %v3528_v34, %v4156_v2 }
 0x158   : > { %v3188_v37 = vpack.c.bf16 %v2370_v62, %v2369_v61  ;;  %v2715_v10 = vmul.f32 %v2370_v62, %v2370_v62 }
 0x159   : > { %v3427_v45 = vpop.f32.mrb[28].mxu1  ;;  %v2759_v15 = vadd.f32 %v2758_v40, %v2712_v11  ;;  %v3183_v46 = vpack.c.bf16 %v2368_v22, %v2367_v25  ;;  %v2656_v17 = vadd.f32 %v2655_v0, %v2368_v22  ;;  %v2713_v18 = vmul.f32 %v2368_v22, %v2368_v22  ;;  %v3479_v52 = vpop.f32.mrb[28].mxu0 }
 0x15a   : > { %v1207_v42 = vpop.f32.mrb[29].mxu1  ;;  %3252 = vst [vmem:[%s3749_s28 + $0x68] sm:$0xff] %v3188_v37   ;;  %v3529_v55 = vadd.f32 %v3479_v52, %v3427_v45  ;;  %v1832_v7 = vpop.f32.mrb[29].mxu0 }
 0x15b   : > { %v3428_v27 = vpop.f32.mrb[30].mxu1  ;;  %3251 = vst [vmem:[%s3749_s28 + $0x60] sm:$0xff] %v3183_v46   ;;  %v2657_v28 = vadd.f32 %v2656_v17, %v2369_v61  ;;  %v2760_v47 = vadd.f32 %v2759_v15, %v2713_v18  ;;  %v3530_v3 = vadd.f32 %v1832_v7, %v1207_v42  ;;  %v3480_v2 = vpop.f32.mrb[30].mxu0 }
 0x15c   : > { %v1210_v29 = vpop.f32.mrb[31].mxu1  ;;  %v3531_v39 = vadd.f32 %v3480_v2, %v3428_v27  ;;  %v1835_v49 = vpop.f32.mrb[31].mxu0  ;;  %v2373_v48 = vmul.f32 %v3529_v55, %v4188_v51 }
 0x15d   : > { %v2761_v5 = vadd.f32 %v2760_v47, %v2714_v12  ;;  %v2371_v41 = vmul.f32 %v3530_v3, %v4177_v16  ;;  %v2658_v31 = vadd.f32 %v2657_v28, %v2370_v62  ;;  %v3532_v43 = vadd.f32 %v1835_v49, %v1210_v29  ;;  %v4241_v37 = vpop.permute.xlu0 %2305  ;;  %v4244_v18 = vpop.permute.xlu1 %2310 }
 0x15e   : > { %v2374_v54 = vmul.f32 %v3531_v39, %v4192_v32  ;;  %v2718_v56 = vmul.f32 %v2373_v48, %v2373_v48 }
 0x15f   : > { %v2659_v19 = vadd.f32 %v2658_v31, %v2371_v41  ;;  %v2716_v44 = vmul.f32 %v2371_v41, %v2371_v41  ;;  %v2762_v36 = vadd.f32 %v2761_v5, %v2715_v10  ;;  %v2372_v9 = vmul.f32 %v3532_v43, %v4181_v8 }
 0x160   : > { %v3198_v4 = vpack.c.bf16 %v2374_v54, %v2373_v48  ;;  %v2719_v25 = vmul.f32 %v2374_v54, %v2374_v54 }
 0x161   : > { %v3431_v21 = vpop.f32.mrb[32].mxu1  ;;  %v2763_v53 = vadd.f32 %v2762_v36, %v2716_v44  ;;  %v3193_v16 = vpack.c.bf16 %v2372_v9, %v2371_v41  ;;  %v2660_v13 = vadd.f32 %v2659_v19, %v2372_v9  ;;  %v2717_v23 = vmul.f32 %v2372_v9, %v2372_v9  ;;  %v3483_v58 = vpop.f32.mrb[32].mxu0 }
 0x162   : > { %v1223_v51 = vpop.f32.mrb[33].mxu1  ;;  %3254 = vst [vmem:[%s3749_s28 + $0x78] sm:$0xff] %v3198_v4   ;;  %v3533_v20 = vadd.f32 %v3483_v58, %v3431_v21  ;;  %v1848_v32 = vpop.f32.mrb[33].mxu0 }
 0x163   : > { %v3432_v57 = vpop.f32.mrb[34].mxu1  ;;  %3253 = vst [vmem:[%s3749_s28 + $0x70] sm:$0xff] %v3193_v16   ;;  %v2661_v14 = vadd.f32 %v2660_v13, %v2373_v48  ;;  %v2764_v33 = vadd.f32 %v2763_v53, %v2717_v23  ;;  %v3534_v60 = vadd.f32 %v1848_v32, %v1223_v51  ;;  %v3484_v24 = vpop.f32.mrb[34].mxu0 }
 0x164   : > { %v1226_v8 = vpop.f32.mrb[35].mxu1  ;;  %v3535_v26 = vadd.f32 %v3484_v24, %v3432_v57  ;;  %v1851_v34 = vpop.f32.mrb[35].mxu0  ;;  %v2377_v40 = vmul.f32 %v3533_v20, %v4213_v50 }
 0x165   : > { %v2765_v61 = vadd.f32 %v2764_v33, %v2718_v56  ;;  %v2375_v62 = vmul.f32 %v3534_v60, %v4200_v35  ;;  %v2662_v0 = vadd.f32 %v2661_v14, %v2374_v54  ;;  %v3536_v11 = vadd.f32 %v1851_v34, %v1226_v8  ;;  %v2316_v36 = vpop.permute.xlu0 %2315  ;;  %v2321_v16 = vpop.permute.xlu1 %2320 }
 0x166   : > { %v2378_v22 = vmul.f32 %v3535_v26, %v4216_v6  ;;  %v2722_v3 = vmul.f32 %v2377_v40, %v2377_v40 }
 0x167   : > { %v2663_v45 = vadd.f32 %v2662_v0, %v2375_v62  ;;  %v2720_v15 = vmul.f32 %v2375_v62, %v2375_v62  ;;  %v2766_v46 = vadd.f32 %v2765_v61, %v2719_v25  ;;  %v2376_v17 = vmul.f32 %v3536_v11, %v4202_v1 }
 0x168   : > { %v3208_v52 = vpack.c.bf16 %v2378_v22, %v2377_v40  ;;  %v2723_v49 = vmul.f32 %v2378_v22, %v2378_v22 }
 0x169   : > { %v3435_v42 = vpop.f32.mrb[36].mxu1  ;;  %v2767_v35 = vadd.f32 %v2766_v46, %v2720_v15  ;;  %v3203_v55 = vpack.c.bf16 %v2376_v17, %v2375_v62  ;;  %v2664_v7 = vadd.f32 %v2663_v45, %v2376_v17  ;;  %v2721_v27 = vmul.f32 %v2376_v17, %v2376_v17  ;;  %v3487_v50 = vpop.f32.mrb[36].mxu0 }
 0x16a   : > { %v1239_v12 = vpop.f32.mrb[37].mxu1  ;;  %3256 = vst [vmem:[%s3749_s28 + $0x88] sm:$0xff] %v3208_v52   ;;  %v3537_v6 = vadd.f32 %v3487_v50, %v3435_v42  ;;  %v1864_v28 = vpop.f32.mrb[37].mxu0 }
 0x16b   : > { %v3436_v47 = vpop.f32.mrb[38].mxu1  ;;  %3255 = vst [vmem:[%s3749_s28 + $0x80] sm:$0xff] %v3203_v55   ;;  %v2665_v2 = vadd.f32 %v2664_v7, %v2377_v40  ;;  %v2768_v29 = vadd.f32 %v2767_v35, %v2721_v27  ;;  %v3538_v10 = vadd.f32 %v1864_v28, %v1239_v12  ;;  %v3488_v1 = vpop.f32.mrb[38].mxu0 }
 0x16c   : > { %v1242_v39 = vpop.f32.mrb[39].mxu1  ;;  %v3539_v5 = vadd.f32 %v3488_v1, %v3436_v47  ;;  %v1867_v41 = vpop.f32.mrb[39].mxu0  ;;  %v2381_v19 = vmul.f32 %v3537_v6, %v4233_v30 }
 0x16d   : > { %v2769_v31 = vadd.f32 %v2768_v29, %v2722_v3  ;;  %v2379_v43 = vmul.f32 %v3538_v10, %v4223_v63  ;;  %v2666_v48 = vadd.f32 %v2665_v2, %v2378_v22  ;;  %v3540_v54 = vadd.f32 %v1867_v41, %v1242_v39  ;;  %v2326_v45 = vpop.permute.xlu0 %2325  ;;  %v2331_v15 = vpop.permute.xlu1 %2330 }
 0x16e   : > { %v2382_v44 = vmul.f32 %v3539_v5, %v2301_v38  ;;  %v2726_v14 = vmul.f32 %v2381_v19, %v2381_v19 }
 0x16f   : > { %v2667_v9 = vadd.f32 %v2666_v48, %v2379_v43  ;;  %v2724_v4 = vmul.f32 %v2379_v43, %v2379_v43  ;;  %v2770_v21 = vadd.f32 %v2769_v31, %v2723_v49  ;;  %v2380_v53 = vmul.f32 %v3540_v54, %v4226_v59 }
 0x170   : > { %v3218_v13 = vpack.c.bf16 %v2382_v44, %v2381_v19  ;;  %v2727_v25 = vmul.f32 %v2382_v44, %v2382_v44 }
 0x171   : > { %v3439_v23 = vpop.f32.mrb[40].mxu1  ;;  %v2771_v58 = vadd.f32 %v2770_v21, %v2724_v4  ;;  %v3213_v51 = vpack.c.bf16 %v2380_v53, %v2379_v43  ;;  %v2668_v20 = vadd.f32 %v2667_v9, %v2380_v53  ;;  %v2725_v63 = vmul.f32 %v2380_v53, %v2380_v53  ;;  %v3491_v32 = vpop.f32.mrb[40].mxu0 }
 0x172   : > { %v1255_v57 = vpop.f32.mrb[41].mxu1  ;;  %3258 = vst [vmem:[%s3749_s28 + $0x98] sm:$0xff] %v3218_v13   ;;  %v3541_v30 = vadd.f32 %v3491_v32, %v3439_v23  ;;  %v1880_v56 = vpop.f32.mrb[41].mxu0 }
 0x173   : > { %v3440_v38 = vpop.f32.mrb[42].mxu1  ;;  %3257 = vst [vmem:[%s3749_s28 + $0x90] sm:$0xff] %v3213_v51   ;;  %v2669_v33 = vadd.f32 %v2668_v20, %v2381_v19  ;;  %v2772_v60 = vadd.f32 %v2771_v58, %v2725_v63  ;;  %v3542_v24 = vadd.f32 %v1880_v56, %v1255_v57  ;;  %v3492_v8 = vpop.f32.mrb[42].mxu0 }
 0x174   : > { %v1258_v59 = vpop.f32.mrb[43].mxu1  ;;  %v3543_v26 = vadd.f32 %v3492_v8, %v3440_v38  ;;  %v1883_v34 = vpop.f32.mrb[43].mxu0  ;;  %v2385_v40 = vmul.f32 %v3541_v30, %v2316_v36 }
 0x175   : > { %v2773_v61 = vadd.f32 %v2772_v60, %v2726_v14  ;;  %v2383_v62 = vmul.f32 %v3542_v24, %v4241_v37  ;;  %v2670_v0 = vadd.f32 %v2669_v33, %v2382_v44  ;;  %v3544_v11 = vadd.f32 %v1883_v34, %v1258_v59  ;;  %v2336_v31 = vpop.permute.xlu0 %2335  ;;  %v2341_v43 = vpop.permute.xlu1 %2340 }
 0x176   : > { %v2386_v22 = vmul.f32 %v3543_v26, %v2321_v16  ;;  %v2730_v2 = vmul.f32 %v2385_v40, %v2385_v40 }
 0x177   : > { %v2671_v46 = vadd.f32 %v2670_v0, %v2383_v62  ;;  %v2728_v17 = vmul.f32 %v2383_v62, %v2383_v62  ;;  %v2774_v52 = vadd.f32 %v2773_v61, %v2727_v25  ;;  %v2384_v42 = vmul.f32 %v3544_v11, %v4244_v18 }
 0x178   : > { %v3228_v35 = vpack.c.bf16 %v2386_v22, %v2385_v40  ;;  %v2731_v18 = vmul.f32 %v2386_v22, %v2386_v22 }
 0x179   : > { %v3443_v55 = vpop.f32.mrb[44].mxu1  ;;  %v2775_v7 = vadd.f32 %v2774_v52, %v2728_v17  ;;  %v3223_v27 = vpack.c.bf16 %v2384_v42, %v2383_v62  ;;  %v2672_v50 = vadd.f32 %v2671_v46, %v2384_v42  ;;  %v2729_v12 = vmul.f32 %v2384_v42, %v2384_v42  ;;  %v3495_v37 = vpop.f32.mrb[44].mxu0  ;;  %v2631_v62 = vld [vmem:[%s4278_s4] sm:$0x1] }
 0x17a   : > { %v1271_v6 = vpop.f32.mrb[45].mxu1  ;;  %3260 = vst [vmem:[%s3749_s28 + $0xa8] sm:$0xff] %v3228_v35   ;;  %v3545_v28 = vadd.f32 %v3495_v37, %v3443_v55  ;;  %v1896_v47 = vpop.f32.mrb[45].mxu0 }
 0x17b   : > { %v3444_v3 = vpop.f32.mrb[46].mxu1  ;;  %3259 = vst [vmem:[%s3749_s28 + $0xa0] sm:$0xff] %v3223_v27   ;;  %v2673_v29 = vadd.f32 %v2672_v50, %v2385_v40  ;;  %v2776_v10 = vadd.f32 %v2775_v7, %v2729_v12  ;;  %v3546_v1 = vadd.f32 %v1896_v47, %v1271_v6  ;;  %v3496_v39 = vpop.f32.mrb[46].mxu0  ;;  %v2687_v40 = vld [vmem:[%s4279_s5] sm:$0x1] }
 0x17c   : > { %v1274_v49 = vpop.f32.mrb[47].mxu1  ;;  %v3547_v5 = vadd.f32 %v3496_v39, %v3444_v3  ;;  %v1899_v41 = vpop.f32.mrb[47].mxu0  ;;  %v2389_v36 = vmul.f32 %v3545_v28, %v2336_v31 }
 0x17d   : > { %v2777_v48 = vadd.f32 %v2776_v10, %v2730_v2  ;;  %v2387_v54 = vmul.f32 %v3546_v1, %v2326_v45  ;;  %v2674_v19 = vadd.f32 %v2673_v29, %v2386_v22  ;;  %v3548_v44 = vadd.f32 %v1899_v41, %v1274_v49 }
 0x17e   : > { %v2390_v9 = vmul.f32 %v3547_v5, %v2341_v43  ;;  %v2734_v63 = vmul.f32 %v2389_v36, %v2389_v36 }
 0x17f   : > { %v2675_v4 = vadd.f32 %v2674_v19, %v2387_v54  ;;  %v2732_v21 = vmul.f32 %v2387_v54, %v2387_v54  ;;  %v2778_v53 = vadd.f32 %v2777_v48, %v2731_v18  ;;  %v2388_v16 = vmul.f32 %v3548_v44, %v2331_v15 }
 0x180   : > { %v3238_v13 = vpack.c.bf16 %v2390_v9, %v2389_v36  ;;  %v2735_v30 = vmul.f32 %v2390_v9, %v2390_v9 }
 0x181   : > { %v2779_v23 = vadd.f32 %v2778_v53, %v2732_v21  ;;  %v3233_v58 = vpack.c.bf16 %v2388_v16, %v2387_v54  ;;  %v2676_v51 = vadd.f32 %v2675_v4, %v2388_v16  ;;  %v2733_v20 = vmul.f32 %v2388_v16, %v2388_v16 }
 0x182   : > { %3262 = vst [vmem:[%s3749_s28 + $0xb8] sm:$0xff] %v3238_v13  }
 0x183   : > { %3261 = vst [vmem:[%s3749_s28 + $0xb0] sm:$0xff] %v3233_v58   ;;  %v2677_v32 = vadd.f32 %v2676_v51, %v2389_v36  ;;  %v2780_v57 = vadd.f32 %v2779_v23, %v2733_v20 }
 0x185   : > { %v2678_v56 = vadd.f32 %v2677_v32, %v2390_v9  ;;  %v2781_v38 = vadd.f32 %v2780_v57, %v2734_v63 }
 0x187   : > { %v2679_v14 = vrot.slane %v2678_v56, 4  ;;  %v2782_v33 = vadd.f32 %v2781_v38, %v2735_v30 }
 0x189   : > { %v2680_v60 = vadd.f32 %v2679_v14, %v2678_v56  ;;  %v2783_v24 = vrot.slane %v2782_v33, 4 }
 0x18b   : > { %v2681_v8 = vrot.slane %v2680_v60, 2  ;;  %v2784_v59 = vadd.f32 %v2783_v24, %v2782_v33 }
 0x18d   : > { %v2682_v25 = vadd.f32 %v2681_v8, %v2680_v60  ;;  %v2785_v26 = vrot.slane %v2784_v59, 2 }
 0x18f   : > { %v2683_v34 = vrot.slane %v2682_v25, 1  ;;  %v2786_v61 = vadd.f32 %v2785_v26, %v2784_v59 }
 0x191   : > { %v2684_v0 = vadd.f32 %v2683_v34, %v2682_v25  ;;  %v2787_v11 = vrot.slane %v2786_v61, 1 }
 0x193   : > { %v2685_v22 = vadd.f32 %v2684_v0, %v2631_v62  ;;  %v2788_v45 = vadd.f32 %v2787_v11, %v2786_v61 }
 0x195   : > { %2686 = vst [vmem:[%s4278_s4] sm:$0x1] %v2685_v22  ;;  %v2789_v15 = vadd.f32 %v2788_v45, %v2687_v40 }
 0x197   : > { %2790 = vst [vmem:[%s4279_s5] sm:$0x1] %v2789_v15 }
 0x198 PF: > { %s16_s18 = sadd.s32 1, %s3699_s18  }
 0x199   : > { %p13_p5 = scmp.ge.s32.totalorder %s16_s18, 4  }
 0x19b   :  { %15 = sbr.rel (!%p13_p5) target bundleno = 1 (0x1), region = 84 }

// kernel: basic_block_forward.4
= control target key start
LH: loop header
LB: loop body
LE: loop exit
PB: predicated region body
PF: predicated region fallthrough
CT: control target
= control target key end

     0   :  { %s6230_s30 = smov 0   ;;  %s8695_s0 = inlined_call_operand.vmem [shape: bf16[2,384,128], index: 0, kind: input, shape index: {}]   ;;  %s8696_s1 = inlined_call_operand.vmem [shape: f32[1,128], index: 1, kind: input, shape index: {}]   ;;  %s8697_s2 = inlined_call_operand.vmem [shape: f32[1,128], index: 2, kind: input, shape index: {}]   ;;  %s8698_s3 = inlined_call_operand.vmem [shape: f32[1,128], index: 3, kind: input, shape index: {}]   ;;  %s8699_s4 = inlined_call_operand.vmem [shape: f32[1,128], index: 4, kind: input, shape index: {}]   ;;  %s8700_s5 = inlined_call_operand.vmem [shape: bf16[3,384,128], index: 5, kind: input, shape index: {}]   ;;  %s8701_s6 = inlined_call_operand.vmem [shape: f32[384,1], index: 6, kind: input, shape index: {}]   ;;  %s8702_s7 = inlined_call_operand.vmem [shape: bf16[2,384,128], index: 7, kind: output, shape index: {0}]   ;;  %s8703_s8 = inlined_call_operand.vmem [shape: f32[1,128], index: 8, kind: output, shape index: {1}]   ;;  %s8704_s9 = inlined_call_operand.vmem [shape: f32[1,128], index: 9, kind: output, shape index: {2}]  }
   0x1 LB: > { %s5221_s10 = sadd.s32 4294967295, %s6175_s30   ;;  %p5225_p0 = scmp.ge.s32.totalorder %s6175_s30, 1  ;;  %s6175_s30 = sphi %s6230_s30, %s20_s30  }
   0x2   : > { %p282_p1 = scmp.lt.s32.totalorder %s6175_s30, 3 }
   0x4   : > { %p283_p2 = pnand %p5225_p0, %p282_p1 }
   0x6   : > { %286 = sbr.rel (%p283_p2) target bundleno = 912 (0x390), region = 48 }
   0xd   : > { %p318_p3 = scmp.lt.s32.totalorder %s5221_s10, 1  ;;  %p5228_p4 = scmp.ne.s32.totalorder %s5221_s10, 0 }
   0xe   : > { %v6177_v0 = vmov (!%p5228_p4), 0.0   ;;  %v6178_v1 = vmov (!%p5228_p4), 0  }
   0xf   : > { %s319_s11 = scalar_select %p318_p3, %s5221_s10, 1 }
  0x10   : > { %332 = sbr.rel (%p5228_p4) target bundleno = 57 (0x39), region = 52  ;;  %333 = vst [vmem:[%s8703_s8] sm:$0x1] (!%p5228_p4), %v6177_v0  ;;  %334 = vst [vmem:[%s8704_s9] sm:$0x1] (!%p5228_p4), %v6177_v0 }
  0x11   : > { %s6061_s12 = smul.u32 192, %s319_s11  ;;  %335 = vst [vmem:[#allocation2] sm:$0xff] (!%p5228_p4), %v6178_v1  ;;  %336 = vst [vmem:[#allocation2 + $0x8] sm:$0xff] (!%p5228_p4), %v6178_v1 }
  0x12   : > { %337 = vst [vmem:[#allocation2 + $0x10] sm:$0xff] (!%p5228_p4), %v6178_v1  ;;  %338 = vst [vmem:[#allocation2 + $0x18] sm:$0xff] (!%p5228_p4), %v6178_v1 }
  0x13   : > { %s6241_s15 = scalar_lea.vmem %s8695_s0, %s6061_s12  ;;  %s6246_s18 = scalar_lea.vmem %s8702_s7, %s6061_s12  ;;  %339 = vst [vmem:[#allocation2 + $0x20] sm:$0xff] (!%p5228_p4), %v6178_v1  ;;  %340 = vst [vmem:[#allocation2 + $0x28] sm:$0xff] (!%p5228_p4), %v6178_v1 }
  0x14   : > { %343 = vst [vmem:[#allocation2 + $0x40] sm:$0xff] (!%p5228_p4), %v6178_v1  ;;  %344 = vst [vmem:[#allocation2 + $0x48] sm:$0xff] (!%p5228_p4), %v6178_v1 }
  0x15   : > { %345 = vst [vmem:[#allocation2 + $0x50] sm:$0xff] (!%p5228_p4), %v6178_v1  ;;  %346 = vst [vmem:[#allocation2 + $0x58] sm:$0xff] (!%p5228_p4), %v6178_v1 }
  0x16   : > { %347 = vst [vmem:[#allocation2 + $0x60] sm:$0xff] (!%p5228_p4), %v6178_v1  ;;  %348 = vst [vmem:[#allocation2 + $0x68] sm:$0xff] (!%p5228_p4), %v6178_v1 }
  0x17   : > { %349 = vst [vmem:[#allocation2 + $0x70] sm:$0xff] %v6178_v1  ;;  %350 = vst [vmem:[#allocation2 + $0x78] sm:$0xff] %v6178_v1 }
  0x18   : > { %351 = vst [vmem:[#allocation2 + $0x80] sm:$0xff] %v6178_v1  ;;  %352 = vst [vmem:[#allocation2 + $0x88] sm:$0xff] %v6178_v1 }
  0x19   : > { %353 = vst [vmem:[#allocation2 + $0x90] sm:$0xff] %v6178_v1  ;;  %354 = vst [vmem:[#allocation2 + $0x98] sm:$0xff] %v6178_v1 }
  0x1a   : > { %355 = vst [vmem:[#allocation2 + $0xa0] sm:$0xff] %v6178_v1  ;;  %356 = vst [vmem:[#allocation2 + $0xa8] sm:$0xff] %v6178_v1 }
  0x1b   : > { %357 = vst [vmem:[#allocation2 + $0xb0] sm:$0xff] %v6178_v1  ;;  %358 = vst [vmem:[#allocation2 + $0xb8] sm:$0xff] %v6178_v1 }
  0x1c   : > { %359 = vst [vmem:[#allocation2 + $0xc0] sm:$0xff] %v6178_v1  ;;  %360 = vst [vmem:[#allocation2 + $0xc8] sm:$0xff] %v6178_v1 }
  0x1d   : > { %361 = vst [vmem:[#allocation2 + $0xd0] sm:$0xff] %v6178_v1  ;;  %362 = vst [vmem:[#allocation2 + $0xd8] sm:$0xff] %v6178_v1 }
  0x1e   : > { %363 = vst [vmem:[#allocation2 + $0xe0] sm:$0xff] %v6178_v1  ;;  %364 = vst [vmem:[#allocation2 + $0xe8] sm:$0xff] %v6178_v1 }
  0x1f   : > { %365 = vst [vmem:[#allocation2 + $0xf0] sm:$0xff] %v6178_v1  ;;  %366 = vst [vmem:[#allocation2 + $0xf8] sm:$0xff] %v6178_v1 }
  0x20   : > { %367 = vst [vmem:[#allocation2 + $0x100] sm:$0xff] %v6178_v1  ;;  %368 = vst [vmem:[#allocation2 + $0x108] sm:$0xff] %v6178_v1 }
  0x21   : > { %369 = vst [vmem:[#allocation2 + $0x110] sm:$0xff] %v6178_v1  ;;  %370 = vst [vmem:[#allocation2 + $0x118] sm:$0xff] %v6178_v1 }
  0x22   : > { %371 = vst [vmem:[#allocation2 + $0x120] sm:$0xff] %v6178_v1  ;;  %372 = vst [vmem:[#allocation2 + $0x128] sm:$0xff] %v6178_v1 }
  0x23   : > { %373 = vst [vmem:[#allocation2 + $0x130] sm:$0xff] %v6178_v1  ;;  %374 = vst [vmem:[#allocation2 + $0x138] sm:$0xff] %v6178_v1 }
  0x24   : > { %375 = vst [vmem:[#allocation2 + $0x140] sm:$0xff] %v6178_v1  ;;  %376 = vst [vmem:[#allocation2 + $0x148] sm:$0xff] %v6178_v1 }
  0x25   : > { %377 = vst [vmem:[#allocation2 + $0x150] sm:$0xff] %v6178_v1  ;;  %378 = vst [vmem:[#allocation2 + $0x158] sm:$0xff] %v6178_v1 }
  0x26   : > { %379 = vst [vmem:[#allocation2 + $0x160] sm:$0xff] %v6178_v1  ;;  %380 = vst [vmem:[#allocation2 + $0x168] sm:$0xff] %v6178_v1 }
  0x27   : > { %381 = vst [vmem:[#allocation2 + $0x170] sm:$0xff] %v6178_v1  ;;  %382 = vst [vmem:[#allocation2 + $0x178] sm:$0xff] %v6178_v1 }
  0x28   : > { %383 = vst [vmem:[#allocation2 + $0x180] sm:$0xff] %v6178_v1  ;;  %384 = vst [vmem:[#allocation2 + $0x188] sm:$0xff] %v6178_v1 }
  0x29   : > { %385 = vst [vmem:[#allocation2 + $0x190] sm:$0xff] %v6178_v1  ;;  %386 = vst [vmem:[#allocation2 + $0x198] sm:$0xff] %v6178_v1 }
  0x2a   : > { %387 = vst [vmem:[#allocation2 + $0x1a0] sm:$0xff] %v6178_v1  ;;  %388 = vst [vmem:[#allocation2 + $0x1a8] sm:$0xff] %v6178_v1 }
  0x2b   : > { %389 = vst [vmem:[#allocation2 + $0x1b0] sm:$0xff] %v6178_v1  ;;  %390 = vst [vmem:[#allocation2 + $0x1b8] sm:$0xff] %v6178_v1 }
  0x2c   : > { %391 = vst [vmem:[#allocation2 + $0x1c0] sm:$0xff] %v6178_v1  ;;  %392 = vst [vmem:[#allocation2 + $0x1c8] sm:$0xff] %v6178_v1 }
  0x2d   : > { %393 = vst [vmem:[#allocation2 + $0x1d0] sm:$0xff] %v6178_v1  ;;  %394 = vst [vmem:[#allocation2 + $0x1d8] sm:$0xff] %v6178_v1 }
  0x2e   : > { %395 = vst [vmem:[#allocation2 + $0x1e0] sm:$0xff] %v6178_v1  ;;  %396 = vst [vmem:[#allocation2 + $0x1e8] sm:$0xff] %v6178_v1 }
  0x2f   : > { %397 = vst [vmem:[#allocation2 + $0x1f0] sm:$0xff] %v6178_v1  ;;  %398 = vst [vmem:[#allocation2 + $0x1f8] sm:$0xff] %v6178_v1 }
  0x30   : > { %399 = vst [vmem:[#allocation2 + $0x200] sm:$0xff] %v6178_v1  ;;  %400 = vst [vmem:[#allocation2 + $0x208] sm:$0xff] %v6178_v1 }
  0x31   : > { %401 = vst [vmem:[#allocation2 + $0x210] sm:$0xff] %v6178_v1  ;;  %402 = vst [vmem:[#allocation2 + $0x218] sm:$0xff] %v6178_v1 }
  0x32   : > { %403 = vst [vmem:[#allocation2 + $0x220] sm:$0xff] %v6178_v1  ;;  %404 = vst [vmem:[#allocation2 + $0x228] sm:$0xff] %v6178_v1 }
  0x33   : > { %405 = vst [vmem:[#allocation2 + $0x230] sm:$0xff] %v6178_v1  ;;  %406 = vst [vmem:[#allocation2 + $0x238] sm:$0xff] %v6178_v1 }
  0x34   : > { %407 = vst [vmem:[#allocation2 + $0x240] sm:$0xff] %v6178_v1  ;;  %408 = vst [vmem:[#allocation2 + $0x248] sm:$0xff] %v6178_v1 }
  0x35   : > { %409 = vst [vmem:[#allocation2 + $0x250] sm:$0xff] %v6178_v1  ;;  %410 = vst [vmem:[#allocation2 + $0x258] sm:$0xff] %v6178_v1 }
  0x36   : > { %411 = vst [vmem:[#allocation2 + $0x260] sm:$0xff] %v6178_v1  ;;  %412 = vst [vmem:[#allocation2 + $0x268] sm:$0xff] %v6178_v1 }
  0x37   : > { %413 = vst [vmem:[#allocation2 + $0x270] sm:$0xff] %v6178_v1  ;;  %414 = vst [vmem:[#allocation2 + $0x278] sm:$0xff] %v6178_v1 }
  0x38   : > { %415 = vst [vmem:[#allocation2 + $0x280] sm:$0xff] %v6178_v1 }
  0x39 PF: > { %v696_v2 = vld [vmem:[%s8701_s6 + $0x70] sm:$0xff]  ;;  %v6339_v3 = vld [vmem:[%s8701_s6 + $0x60] sm:$0xff]  ;;  %v8705_v4 = vmov 0   ;;  %v697_v5 = vld [vmem:[%s8701_s6 + $0x78] sm:$0xff]  ;;  %vm1341_vm0 = vcmask 1043456   ;;  %vm1283_vm3 = vcmask 1047556  }
  0x3a   : > { %6074 = vset.pattern.permute.xlu1 %v8705_v4  ;;  %6073 = vset.pattern.permute.xlu0 %v8705_v4  ;;  %v6350_v6 = vld [vmem:[%s8701_s6 + $0x68] sm:$0xff]  ;;  %v698_v8 = vld [vmem:[%s8701_s6 + $0x80] sm:$0xff]  ;;  %v701_v9 = vld [vmem:[%s8701_s6 + $0x98] sm:$0xff]  ;;  %vm1042_vm1 = vsmask.f32 4352  ;;  %vm1560_vm5 = vcmask 1047555  }
  0x3b   : > { %802 = vperm.xlu1 %6074, %v696_v2   ;;  %792 = vperm.xlu0 %6073, %v6339_v3   ;;  %v699_v7 = vld [vmem:[%s8701_s6 + $0x88] sm:$0xff]  ;;  %v700_v10 = vld [vmem:[%s8701_s6 + $0x90] sm:$0xff]  ;;  %v702_v12 = vld [vmem:[%s8701_s6 + $0xa0] sm:$0xff]  ;;  %v527_v2 = vlaneseq  ;;  %vm1439_vm2 = vsmask.f32 3328  ;;  %vm1312_vm9 = vcmask 1044480  }
  0x3c   : > { %1857 = vmatprep.subr.bf16.mxu0 %v8705_v4  ;;  %v703_v11 = vld [vmem:[%s8701_s6 + $0xa8] sm:$0xff]  ;;  %v6075_v13 = vld [vmem:[%s8700_s5] sm:$0xff]   ;;  %v705_v14 = vld [vmem:[%s8701_s6 + $0xb8] sm:$0xff]  ;;  %vm1284_vm4 = vsmask.f32 7954 }
  0x3d   : > { %v704_v15 = vld [vmem:[%s8701_s6 + $0xb0] sm:$0xff]  ;;  %v6384_v16 = vld [vmem:[%s8700_s5 + $0x80] sm:$0xff]   ;;  %v6077_v17 = vld [vmem:[%s8700_s5 + $0x8] sm:$0xff]   ;;  %1858 = vmatpush1.bf16.msra.mxu0 %v6075_v13  ;;  %vm1561_vm6 = vsmask.f32 7950 }
  0x3e   : > { %6045 = vmatprep.subr.bf16.mxu1 %v6384_v16  ;;  %v6393_v18 = vld [vmem:[%s8700_s5 + $0x88] sm:$0xff]   ;;  %1859 = vmatprep.subr.bf16.mxu0 %v8705_v4  ;;  %v706_v20 = vld [vmem:[%s8701_s6 + $0xc0] sm:$0xff]  ;;  %v6079_v21 = vld [vmem:[%s8700_s5 + $0x10] sm:$0xff]  }
  0x3f   : > { %807 = vperm.xlu1 %6074, %v697_v5   ;;  %797 = vperm.xlu0 %6073, %v6350_v6   ;;  %v707_v19 = vld [vmem:[%s8701_s6 + $0xc8] sm:$0xff]  ;;  %v6410_v22 = vld [vmem:[%s8700_s5 + $0x90] sm:$0xff]   ;;  %v709_v23 = vld [vmem:[%s8701_s6 + $0xd8] sm:$0xff] }
  0x40   : > { %6053 = vmatpush3.bf16.msra.mxu1 %v6384_v16  ;;  %v708_v24 = vld [vmem:[%s8701_s6 + $0xd0] sm:$0xff]  ;;  %v6424_v25 = vld [vmem:[%s8700_s5 + $0x98] sm:$0xff]   ;;  %v416_v26 = vld [vmem:[%s8696_s1] sm:$0x1] }
  0x41   : > { %6046 = vmatprep.subr.bf16.mxu1 %v6393_v18  ;;  %1860 = vmatpush1.bf16.msra.mxu0 %v6077_v17  ;;  %v6081_v27 = vld [vmem:[%s8700_s5 + $0x18] sm:$0xff]   ;;  %v711_v28 = vld [vmem:[%s8701_s6 + $0xe8] sm:$0xff]  ;;  %v710_v29 = vld [vmem:[%s8701_s6 + $0xe0] sm:$0xff]  ;;  %v6440_v30 = vmul.f32 0.001953125, %v416_v26 }
  0x42   : > { %1861 = vmatprep.subr.bf16.mxu0 %v8705_v4  ;;  %v6446_v31 = vld [vmem:[%s8700_s5 + $0xa0] sm:$0xff]   ;;  %v6462_v36 = vld [vmem:[%s8700_s5 + $0xa8] sm:$0xff]   ;;  %v713_v37 = vld [vmem:[%s8701_s6 + $0xf8] sm:$0xff] }
  0x43   : > { %817 = vperm.xlu1 %6074, %v699_v7   ;;  %812 = vperm.xlu0 %6073, %v698_v8   ;;  %v418_v32 = vld [vmem:[%s8697_s2] sm:$0x1]  ;;  %v420_v35 = vmul.f32 %v6440_v30, %v6440_v30  ;;  %v712_v38 = vld [vmem:[%s8701_s6 + $0xf0] sm:$0xff]  ;;  %v6085_v39 = vld [vmem:[%s8700_s5 + $0x28] sm:$0xff]  }
  0x44   : > { %6054 = vmatpush3.bf16.msra.mxu1 %v6393_v18  ;;  %v6083_v33 = vld [vmem:[%s8700_s5 + $0x20] sm:$0xff]   ;;  %v419_v34 = vmul.f32 0.001953125, %v418_v32  ;;  %v6479_v41 = vld [vmem:[%s8700_s5 + $0xb0] sm:$0xff]   ;;  %v715_v42 = vld [vmem:[%s8701_s6 + $0x108] sm:$0xff] }
  0x45   : > { %6047 = vmatprep.subr.bf16.mxu1 %v6410_v22  ;;  %1862 = vmatpush1.bf16.msra.mxu0 %v6079_v21  ;;  %v714_v43 = vld [vmem:[%s8701_s6 + $0x100] sm:$0xff]  ;;  %v6087_v44 = vld [vmem:[%s8700_s5 + $0x30] sm:$0xff]   ;;  %v6496_v46 = vld [vmem:[%s8700_s5 + $0xb8] sm:$0xff]  }
  0x46   : > { %1863 = vmatprep.subr.bf16.mxu0 %v8705_v4  ;;  %v421_v40 = vsub.f32 %v419_v34, %v420_v35  ;;  %v6501_v47 = vld [vmem:[%s8701_s6 + $0x8] sm:$0xff]  ;;  %v6506_v48 = vld [vmem:[%s8701_s6] sm:$0xff]  ;;  %v6089_v49 = vld [vmem:[%s8700_s5 + $0x38] sm:$0xff]  }
  0x47   : > { %827 = vperm.xlu1 %6074, %v701_v9   ;;  %822 = vperm.xlu0 %6073, %v700_v10   ;;  %v717_v50 = vld [vmem:[%s8701_s6 + $0x118] sm:$0xff]  ;;  %v716_v51 = vld [vmem:[%s8701_s6 + $0x110] sm:$0xff]  ;;  %v6091_v53 = vld [vmem:[%s8700_s5 + $0x40] sm:$0xff]  }
  0x48   : > { %6055 = vmatpush3.bf16.msra.mxu1 %v6410_v22  ;;  %v422_v45 = vmax.f32 %v421_v40, 0.0  ;;  %v719_v54 = vld [vmem:[%s8701_s6 + $0x128] sm:$0xff]  ;;  %v718_v55 = vld [vmem:[%s8701_s6 + $0x120] sm:$0xff]  ;;  %v6541_v57 = vld [vmem:[%s8701_s6 + $0x18] sm:$0xff] }
  0x49   : > { %6048 = vmatprep.subr.bf16.mxu1 %v6424_v25  ;;  %1864 = vmatpush1.bf16.msra.mxu0 %v6081_v27  ;;  %v6092_v56 = vld [vmem:[%s8700_s5 + $0x48] sm:$0xff]   ;;  %v6546_v58 = vld [vmem:[%s8701_s6 + $0x10] sm:$0xff]  ;;  %v721_v60 = vld [vmem:[%s8701_s6 + $0x138] sm:$0xff] }
  0x4a   : > { %1865 = vmatprep.subr.bf16.mxu0 %v8705_v4  ;;  %v424_v52 = vadd.f32 1e-05, %v422_v45  ;;  %v6093_v59 = vld [vmem:[%s8700_s5 + $0x50] sm:$0xff]   ;;  %v1594_v61 = vld [vmem:[#allocation2 + $0x8] sm:$0xff]  ;;  %v6094_v63 = vld [vmem:[%s8700_s5 + $0x58] sm:$0xff]  }
  0x4b   : > { %837 = vperm.xlu1 %6074, %v703_v11   ;;  %832 = vperm.xlu0 %6073, %v702_v12   ;;  %v720_v62 = vld [vmem:[%s8701_s6 + $0x130] sm:$0xff]  ;;  %v423_v0 = vld [vmem:[%s8698_s3] sm:$0x1]  ;;  %v723_v5 = vld [vmem:[%s8701_s6 + $0x148] sm:$0xff]  ;;  %v528_v12 = vshrl.u32 %v527_v2, 7 }
  0x4c   : > { %6056 = vmatpush3.bf16.msra.mxu1 %v6424_v25  ;;  %6147 = vrsqrt.f32 %v424_v52  ;;  %1889 = vmatprep.mubr.bf16.mxu0 %v1594_v61  ;;  %v722_v7 = vld [vmem:[%s8701_s6 + $0x140] sm:$0xff]  ;;  %v6580_v10 = vld [vmem:[%s8701_s6 + $0x28] sm:$0xff]  ;;  %v725_v17 = vld [vmem:[%s8701_s6 + $0x158] sm:$0xff] }
  0x4d   : > { %6049 = vmatprep.subr.bf16.mxu1 %v6446_v31  ;;  %1866 = vmatpush1.bf16.msra.mxu0 %v6083_v33  ;;  %v6095_v8 = vld [vmem:[%s8700_s5 + $0x60] sm:$0xff]   ;;  %v6097_v13 = vld [vmem:[%s8700_s5 + $0x68] sm:$0xff]   ;;  %v6099_v21 = vld [vmem:[%s8700_s5 + $0x70] sm:$0xff]  }
  0x4e   : > { %1867 = vmatprep.subr.bf16.mxu0 %v8705_v4  ;;  %v6585_v11 = vld [vmem:[%s8701_s6 + $0x20] sm:$0xff]  ;;  %v5732_v27 = vld [vmem:[%s6241_s15 + $0xb0] sm:$0xff]   ;;  %v6101_v35 = vld [vmem:[%s8700_s5 + $0x78] sm:$0xff]  }
  0x4f   : > { %847 = vperm.xlu1 %6074, %v705_v14   ;;  %842 = vperm.xlu0 %6073, %v704_v15   ;;  %v427_v14 = vld [vmem:[%s8699_s4] sm:$0x1]  ;;  %v6631_v45 = vld [vmem:[%s8701_s6 + $0x38] sm:$0xff]  ;;  %vm7242_vm7 = vmand %vm1283_vm3, %vm1284_vm4 }
  0x50   : > { %6057 = vmatpush3.bf16.msra.mxu1 %v6446_v31  ;;  %v1593_v61 = vld [vmem:[#allocation2] sm:$0xff]  ;;  %vm7254_vm8 = vmand %vm1560_vm5, %vm1561_vm6 }
  0x51   : > { %6050 = vmatprep.subr.bf16.mxu1 %v6462_v36  ;;  %1868 = vmatpush1.bf16.msra.mxu0 %v6085_v39  ;;  %vm7574_vm10 = vmand %vm1312_vm9, %vm1042_vm1 }
  0x52   : > { %1869 = vmatprep.subr.bf16.mxu0 %v8705_v4  ;;  %vm7585_vm11 = vmand %vm1341_vm0, %vm1439_vm2 }
  0x53   : > { %857 = vperm.xlu1 %6074, %v707_v19   ;;  %852 = vperm.xlu0 %6073, %v706_v20   ;;  %v724_v19 = vld [vmem:[%s8701_s6 + $0x150] sm:$0xff]  ;;  %v529_v20 = vsub.s32 0, %v528_v12 }
  0x54   : > { %6058 = vmatpush3.bf16.msra.mxu1 %v6462_v36 }
  0x55   : > { %6051 = vmatprep.subr.bf16.mxu1 %v6479_v41  ;;  %1870 = vmatpush1.bf16.msra.mxu0 %v6087_v44  ;;  %v5713_v44 = vld [vmem:[%s6241_s15 + $0x18] sm:$0xff]  }
  0x56   : > { %1871 = vmatprep.subr.bf16.mxu0 %v8705_v4  ;;  %v6148_v1 = vpop.eup %6147  ;;  %v5509_v2 = vunpack.c.l.bf16 %v5713_v44 }
  0x57   : > { %867 = vperm.xlu1 %6074, %v709_v23   ;;  %862 = vperm.xlu0 %6073, %v708_v24   ;;  %v426_v9 = vmul.f32 %v6148_v1, %v423_v0  ;;  %v5712_v23 = vld [vmem:[%s6241_s15 + $0x10] sm:$0xff]   ;;  %v5731_v24 = vld [vmem:[%s6241_s15 + $0xa8] sm:$0xff]  }
  0x58   : > { %6059 = vmatpush3.bf16.msra.mxu1 %v6479_v41  ;;  %v5506_v32 = vunpack.c.h.bf16 %v5712_v23  ;;  %v5505_v33 = vunpack.c.l.bf16 %v5712_v23  ;;  %v5582_v34 = vunpack.c.h.bf16 %v5731_v24  ;;  %v6661_v0 = vld [vmem:[%s8701_s6 + $0x48] sm:$0xff] }
  0x59   : > { %6052 = vmatprep.subr.bf16.mxu1 %v6496_v46  ;;  %1872 = vmatpush1.bf16.msra.mxu0 %v6089_v49  ;;  %v428_v15 = vmul.f32 %v426_v9, %v6440_v30  ;;  %v6616_v30 = vrot.slane %v426_v9, %v529_v20  ;;  %v6672_v9 = vld [vmem:[%s8701_s6 + $0x40] sm:$0xff] }
  0x5a   : > { %1873 = vmatprep.subr.bf16.mxu0 %v8705_v4 }
  0x5b   : > { %877 = vperm.xlu1 %6074, %v711_v28   ;;  %872 = vperm.xlu0 %6073, %v710_v29   ;;  %v429_v26 = vsub.f32 %v427_v14, %v428_v15  ;;  %v727_v28 = vld [vmem:[%s8701_s6 + $0x168] sm:$0xff]  ;;  %v726_v29 = vld [vmem:[%s8701_s6 + $0x160] sm:$0xff]  ;;  %v537_v40 = vmul.f32 %v5506_v32, %v6616_v30 }
  0x5c   : > { %6060 = vmatpush3.bf16.msra.mxu1 %v6496_v46 }
  0x5d   : > { %1874 = vmatpush1.bf16.msra.mxu0 %v6091_v53  ;;  %2965 = vmatprep.subr.bf16.mxu1 %v8705_v4  ;;  %v6621_v39 = vrot.slane %v429_v26, %v529_v20  ;;  %v6702_v26 = vld [vmem:[%s8701_s6 + $0x50] sm:$0xff] }
  0x5e   : > { %1875 = vmatprep.subr.bf16.mxu0 %v8705_v4 }
  0x5f   : > { %887 = vperm.xlu1 %6074, %v713_v37   ;;  %882 = vperm.xlu0 %6073, %v712_v38   ;;  %v5581_v37 = vunpack.c.l.bf16 %v5731_v24  ;;  %v5586_v38 = vunpack.c.h.bf16 %v5732_v27 }
  0x61   : > { %1876 = vmatpush1.bf16.msra.mxu0 %v6092_v56  ;;  %v574_v49 = vmul.f32 %v5581_v37, %v6616_v30  ;;  %v728_v37 = vld [vmem:[%s8701_s6 + $0x170] sm:$0xff] }
  0x62   : > { %1877 = vmatprep.subr.bf16.mxu0 %v8705_v4 }
  0x63   : > { %897 = vperm.xlu1 %6074, %v715_v42   ;;  %892 = vperm.xlu0 %6073, %v714_v43   ;;  %v536_v42 = vmul.f32 %v5505_v33, %v6616_v30  ;;  %v575_v43 = vmul.f32 %v5582_v34, %v6616_v30  ;;  %v6650_v56 = vadd.f32 %v6621_v39, %v574_v49  ;;  %v5718_v49 = vld [vmem:[%s6241_s15 + $0x40] sm:$0xff]  }
  0x65   : > { %1878 = vmatpush1.bf16.msra.mxu0 %v6093_v59  ;;  %v6639_v52 = vadd.f32 %v6621_v39, %v536_v42  ;;  %v6642_v53 = vadd.f32 %v6621_v39, %v575_v43 }
  0x66   : > { %1879 = vmatprep.subr.bf16.mxu0 %v8705_v4 }
  0x67   : > { %737 = vperm.xlu1 %6074, %v6501_v47   ;;  %732 = vperm.xlu0 %6073, %v6506_v48  }
  0x69   : > { %1880 = vmatpush1.bf16.msra.mxu0 %v6094_v63  ;;  %v5714_v63 = vld [vmem:[%s6241_s15 + $0x20] sm:$0xff]  }
  0x6a   : > { %1881 = vmatprep.subr.bf16.mxu0 %v8705_v4 }
  0x6b   : > { %907 = vperm.xlu1 %6074, %v717_v50   ;;  %902 = vperm.xlu0 %6073, %v716_v51   ;;  %v577_v50 = vmul.f32 %v5586_v38, %v6616_v30  ;;  %v6636_v51 = vadd.f32 %v6621_v39, %v537_v40 }
  0x6d   : > { %1882 = vmatpush1.bf16.msra.mxu0 %v6095_v8  ;;  %v6653_v59 = vadd.f32 %v6621_v39, %v577_v50  ;;  %v5513_v8 = vunpack.c.l.bf16 %v5714_v63  ;;  %v5719_v50 = vld [vmem:[%s6241_s15 + $0x48] sm:$0xff]  }
  0x6e   : > { %1883 = vmatprep.subr.bf16.mxu0 %v8705_v4 }
  0x6f   : > { %917 = vperm.xlu1 %6074, %v719_v54   ;;  %912 = vperm.xlu0 %6073, %v718_v55   ;;  %v5585_v54 = vunpack.c.l.bf16 %v5732_v27  ;;  %v6647_v55 = vld [vmem:[%s8701_s6 + $0x30] sm:$0xff]  ;;  %v540_v15 = vmul.f32 %v5513_v8, %v6616_v30 }
  0x71   : > { %1884 = vmatpush1.bf16.msra.mxu0 %v6097_v13  ;;  %v538_v13 = vmul.f32 %v5509_v2, %v6616_v30  ;;  %v6697_v24 = vadd.f32 %v6621_v39, %v540_v15  ;;  %v5534_v2 = vunpack.c.h.bf16 %v5719_v50 }
  0x72   : > { %1885 = vmatprep.subr.bf16.mxu0 %v8705_v4 }
  0x73   : > { %747 = vperm.xlu1 %6074, %v6541_v57   ;;  %742 = vperm.xlu0 %6073, %v6546_v58   ;;  %v6688_v20 = vadd.f32 %v6621_v39, %v538_v13  ;;  %v6750_v13 = vld [vmem:[%s6241_s15 + $0x70] sm:$0xff]  }
  0x75   : > { %1886 = vmatpush1.bf16.msra.mxu0 %v6099_v21 }
  0x76   : > { %1887 = vmatprep.subr.bf16.mxu0 %v8705_v4 }
  0x77   : > { %927 = vperm.xlu1 %6074, %v721_v60   ;;  %922 = vperm.xlu0 %6073, %v720_v62   ;;  %v5510_v60 = vunpack.c.h.bf16 %v5713_v44  ;;  %v576_v62 = vmul.f32 %v5585_v54, %v6616_v30  ;;  %v5716_v44 = vld [vmem:[%s6241_s15 + $0x30] sm:$0xff]  }
  0x78   : > { %v5720_v54 = vld [vmem:[%s6241_s15 + $0x50] sm:$0xff]  }
  0x79   : > { %1888 = vmatpush1.bf16.msra.mxu0 %v6101_v35  ;;  %v539_v1 = vmul.f32 %v5510_v60, %v6616_v30  ;;  %v5721_v60 = vld [vmem:[%s6241_s15 + $0x58] sm:$0xff]   ;;  %v5538_v8 = vunpack.c.h.bf16 %v5720_v54 }
  0x7a   : > { %5853 = vmatprep.subr.bf16.mxu0 %v6384_v16 }
  0x7b   : > { %937 = vperm.xlu1 %6074, %v723_v5   ;;  %932 = vperm.xlu0 %6073, %v722_v7   ;;  %v6667_v5 = vadd.f32 %v6621_v39, %v576_v62  ;;  %v5514_v7 = vunpack.c.h.bf16 %v5714_v63  ;;  %v6675_v12 = vadd.f32 %v6621_v39, %v539_v1  ;;  %v5522_v62 = vunpack.c.h.bf16 %v5716_v44  ;;  %v5723_v1 = vld [vmem:[%s6241_s15 + $0x68] sm:$0xff]  }
  0x7c   : > { %1890 = vmatmul.mubr.bf16.vlgmr.msra.gmra.mrb[0].mxu0 %v1593_v61  ;;  %v5530_v63 = vunpack.c.h.bf16 %v5718_v49 }
  0x7d   : > { %5854 = vmatpush3.bf16.msra.mxu0 %v6384_v16  ;;  %v541_v14 = vmul.f32 %v5514_v7, %v6616_v30  ;;  %v5533_v7 = vunpack.c.l.bf16 %v5719_v50 }
  0x7e   : > { %5855 = vmatprep.subr.bf16.mxu0 %v6393_v18 }
  0x7f   : > { %757 = vperm.xlu1 %6074, %v6580_v10   ;;  %752 = vperm.xlu0 %6073, %v6585_v11   ;;  %v6694_v16 = vadd.f32 %v6621_v39, %v541_v14  ;;  %v5541_v14 = vunpack.c.l.bf16 %v5721_v60 }
  0x81   : > { %5856 = vmatpush3.bf16.msra.mxu0 %v6393_v18  ;;  %v729_v18 = vld [vmem:[%s8701_s6 + $0x178] sm:$0xff] }
  0x82   : > { %5857 = vmatprep.subr.bf16.mxu0 %v6410_v22 }
  0x83   : > { %947 = vperm.xlu1 %6074, %v725_v17   ;;  %942 = vperm.xlu0 %6073, %v724_v19   ;;  %v5715_v17 = vld [vmem:[%s6241_s15 + $0x28] sm:$0xff]   ;;  %v6685_v19 = vld [vmem:[%s8701_s6 + $0x58] sm:$0xff] }
  0x84   : > { %v5518_v21 = vunpack.c.h.bf16 %v5715_v17  ;;  %v5517_v23 = vunpack.c.l.bf16 %v5715_v17  ;;  %v6754_v17 = vld [vmem:[%s6241_s15 + $0x78] sm:$0xff]  }
  0x85   : > { %5858 = vmatpush3.bf16.msra.mxu0 %v6410_v22  ;;  %v5717_v22 = vld [vmem:[%s6241_s15 + $0x38] sm:$0xff]  }
  0x86   : > { %v543_v27 = vmul.f32 %v5518_v21, %v6616_v30  ;;  %5859 = vmatprep.subr.bf16.mxu0 %v6424_v25  ;;  %v5526_v61 = vunpack.c.h.bf16 %v5717_v22  ;;  %v6757_v21 = vld [vmem:[%s6241_s15 + $0x80] sm:$0xff]  }
  0x87   : > { %957 = vperm.xlu1 %6074, %v727_v28   ;;  %952 = vperm.xlu0 %6073, %v726_v29   ;;  %v542_v28 = vmul.f32 %v5517_v23, %v6616_v30  ;;  %v5733_v29 = vld [vmem:[%s6241_s15 + $0xb8] sm:$0xff]  }
  0x88   : > { %v6709_v32 = vadd.f32 %v6621_v39, %v543_v27  ;;  %v5590_v34 = vunpack.c.h.bf16 %v5733_v29  ;;  %v5589_v35 = vunpack.c.l.bf16 %v5733_v29  ;;  %v6764_v29 = vld [vmem:[%s6241_s15] sm:$0xff]  }
  0x89   : > { %v6712_v33 = vadd.f32 %v6621_v39, %v542_v28  ;;  %5860 = vmatpush3.bf16.msra.mxu0 %v6424_v25  ;;  %v5525_v25 = vunpack.c.l.bf16 %v5717_v22  ;;  %v5550_v28 = vunpack.c.h.bf16 %v5723_v1  ;;  %v545_v22 = vmul.f32 %v5522_v62, %v6616_v30 }
  0x8a   : > { %v579_v38 = vmul.f32 %v5590_v34, %v6616_v30  ;;  %v578_v40 = vmul.f32 %v5589_v35, %v6616_v30  ;;  %5861 = vmatprep.subr.bf16.mxu0 %v6446_v31  ;;  %v547_v35 = vmul.f32 %v5526_v61, %v6616_v30  ;;  %v5498_v50 = vunpack.c.h.bf16 %v6764_v29 }
  0x8b   : > { %767 = vperm.xlu1 %6074, %v6631_v45   ;;  %762 = vperm.xlu0 %6073, %v6647_v55   ;;  %v546_v23 = vmul.f32 %v5525_v25, %v6616_v30  ;;  %v553_v62 = vmul.f32 %v5538_v8, %v6616_v30 }
  0x8c   : > { %v6727_v42 = vadd.f32 %v6621_v39, %v579_v38  ;;  %v6730_v43 = vadd.f32 %v6621_v39, %v578_v40  ;;  %v5562_v38 = vunpack.c.h.bf16 %v6757_v21  ;;  %v5561_v40 = vunpack.c.l.bf16 %v6757_v21 }
  0x8d   : > { %5862 = vmatpush3.bf16.msra.mxu0 %v6446_v31  ;;  %v5529_v31 = vunpack.c.l.bf16 %v5718_v49  ;;  %v6786_v25 = vadd.f32 %v6621_v39, %v546_v23  ;;  %v6795_v61 = vadd.f32 %v6621_v39, %v547_v35 }
  0x8e   : > { %8713 = vst [vmem:[#allocation4_spill] sm:$0xff] %v6730_v43  ;;  %5863 = vmatprep.subr.bf16.mxu0 %v6462_v36 }
  0x8f   : > { %777 = vperm.xlu1 %6074, %v6661_v0   ;;  %772 = vperm.xlu0 %6073, %v6672_v9   ;;  %v548_v49 = vmul.f32 %v5529_v31, %v6616_v30  ;;  %v649_v23 = vmax.f32 %v6795_v61, 0.0 }
  0x91   : > { %5864 = vmatpush3.bf16.msra.mxu0 %v6462_v36  ;;  %v5549_v36 = vunpack.c.l.bf16 %v5723_v1 }
  0x92   : > { %5865 = vmatprep.subr.bf16.mxu0 %v6479_v41 }
  0x93   : > { %787 = vperm.xlu1 %6074, %v6685_v19   ;;  %782 = vperm.xlu0 %6073, %v6702_v26  }
  0x95   : > { %5866 = vmatpush3.bf16.msra.mxu0 %v6479_v41  ;;  %v551_v41 = vmul.f32 %v5534_v2, %v6616_v30  ;;  %v6805_v2 = vadd.f32 %v6621_v39, %v545_v22 }
  0x96   : > { %5867 = vmatprep.subr.bf16.mxu0 %v6496_v46 }
  0x97   : > { %967 = vperm.xlu1 %6074, %v729_v18   ;;  %962 = vperm.xlu0 %6073, %v728_v37   ;;  %v5554_v18 = vunpack.c.h.bf16 %v6750_v13  ;;  %v5553_v37 = vunpack.c.l.bf16 %v6750_v13  ;;  %v559_v13 = vmul.f32 %v5550_v28, %v6616_v30 }
  0x99   : > { %5868 = vmatpush3.bf16.msra.mxu0 %v6496_v46  ;;  %v6819_v46 = vadd.f32 %v6621_v39, %v551_v41 }
  0x9b   : > { %4473 = vperm.xlu1 %6074, %v6501_v47   ;;  %4468 = vperm.xlu0 %6073, %v6506_v48   ;;  %v5722_v47 = vld [vmem:[%s6241_s15 + $0x60] sm:$0xff]   ;;  %v5521_v48 = vunpack.c.l.bf16 %v5716_v44  ;;  %v549_v44 = vmul.f32 %v5530_v63, %v6616_v30  ;;  %v554_v63 = vmul.f32 %v5541_v14, %v6616_v30  ;;  %v558_v14 = vmul.f32 %v5549_v36, %v6616_v30 }
  0x9c   : > { %v5546_v15 = vunpack.c.h.bf16 %v5722_v47  ;;  %v5545_v27 = vunpack.c.l.bf16 %v5722_v47  ;;  %v5497_v47 = vunpack.c.l.bf16 %v6764_v29 }
  0x9d   : > { %v544_v34 = vmul.f32 %v5521_v48, %v6616_v30 }
  0x9e   : > { %v557_v1 = vmul.f32 %v5546_v15, %v6616_v30  ;;  %v556_v8 = vmul.f32 %v5545_v27, %v6616_v30 }
  0x9f   : > { %4483 = vperm.xlu1 %6074, %v6541_v57   ;;  %4478 = vperm.xlu0 %6073, %v6546_v58   ;;  %v5537_v57 = vunpack.c.l.bf16 %v5720_v54  ;;  %v5542_v58 = vunpack.c.h.bf16 %v5721_v60  ;;  %v6780_v54 = vld [vmem:[%s6241_s15 + $0x88] sm:$0xff]   ;;  %v550_v60 = vmul.f32 %v5533_v7, %v6616_v30  ;;  %v6792_v48 = vadd.f32 %v6621_v39, %v544_v34 }
  0xa0   : > { %v5566_v31 = vunpack.c.h.bf16 %v6780_v54  ;;  %v6808_v7 = vadd.f32 %v6621_v39, %v549_v44  ;;  %v6837_v34 = vadd.f32 %v6621_v39, %v554_v63  ;;  %v6840_v36 = vadd.f32 %v6621_v39, %v557_v1 }
  0xa1   : > { %v646_v15 = vmax.f32 %v6792_v48, 0.0  ;;  %v6825_v27 = vadd.f32 %v6621_v39, %v550_v60  ;;  %v6844_v22 = vadd.f32 %v6621_v39, %v556_v8  ;;  %v6847_v44 = vadd.f32 %v6621_v39, %v559_v13 }
  0xa3   : > { %4493 = vperm.xlu1 %6074, %v6580_v10   ;;  %4488 = vperm.xlu0 %6073, %v6585_v11   ;;  %v5558_v10 = vunpack.c.h.bf16 %v6754_v17  ;;  %v5557_v11 = vunpack.c.l.bf16 %v6754_v17  ;;  %v564_v17 = vmul.f32 %v5561_v40, %v6616_v30 }
  0xa7   : > { %4503 = vperm.xlu1 %6074, %v6631_v45   ;;  %4498 = vperm.xlu0 %6073, %v6647_v55   ;;  %v552_v45 = vmul.f32 %v5537_v57, %v6616_v30  ;;  %v555_v55 = vmul.f32 %v5542_v58, %v6616_v30  ;;  %v648_v57 = vmax.f32 %v6786_v25, 0.0  ;;  %v6816_v58 = vadd.f32 %v6621_v39, %v548_v49 }
  0xa8   : > { %v561_v49 = vmul.f32 %v5554_v18, %v6616_v30  ;;  %v5729_v18 = vld [vmem:[%s6241_s15 + $0x98] sm:$0xff]   ;;  %v8718_v25 = vmax.f32 %v6805_v2, 0.0 }
  0xa9   : > { %v6834_v28 = vadd.f32 %v6621_v39, %v555_v55  ;;  %v5574_v55 = vunpack.c.h.bf16 %v5729_v18  ;;  %v5573_v40 = vunpack.c.l.bf16 %v5729_v18  ;;  %v532_v18 = vmul.f32 %v5497_v47, %v6616_v30 }
  0xaa   : > { %v6870_v63 = vadd.f32 %v6621_v39, %v561_v49  ;;  %v565_v49 = vmul.f32 %v5562_v38, %v6616_v30 }
  0xab   : > { %4513 = vperm.xlu1 %6074, %v6661_v0   ;;  %4508 = vperm.xlu0 %6073, %v6672_v9   ;;  %v6828_v0 = vadd.f32 %v6621_v39, %v553_v62  ;;  %v6831_v9 = vadd.f32 %v6621_v39, %v552_v45  ;;  %v6855_v62 = vadd.f32 %v6621_v39, %v558_v14  ;;  %v5728_v14 = vld [vmem:[%s6241_s15 + $0x90] sm:$0xff]  }
  0xac   : > { %v560_v45 = vmul.f32 %v5553_v37, %v6616_v30  ;;  %v5569_v37 = vunpack.c.l.bf16 %v5728_v14  ;;  %v571_v29 = vmul.f32 %v5574_v55, %v6616_v30 }
  0xae   : > { %v6881_v8 = vadd.f32 %v6621_v39, %v560_v45  ;;  %v533_v45 = vmul.f32 %v5498_v50, %v6616_v30  ;;  %v568_v50 = vmul.f32 %v5569_v37, %v6616_v30  ;;  %v6151_v37 = vld [vmem:[%s8701_s6 + $0x88] sm:$0xff] }
  0xaf   : > { %4523 = vperm.xlu1 %6074, %v6685_v19   ;;  %4518 = vperm.xlu0 %6073, %v6702_v26   ;;  %v563_v19 = vmul.f32 %v5558_v10, %v6616_v30  ;;  %v562_v10 = vmul.f32 %v5557_v11, %v6616_v30  ;;  %v5711_v26 = vld [vmem:[%s6241_s15 + $0x8] sm:$0xff]   ;;  %v5730_v11 = vld [vmem:[%s6241_s15 + $0xa0] sm:$0xff]  }
  0xb0   : > { %v5502_v13 = vunpack.c.h.bf16 %v5711_v26  ;;  %v5501_v1 = vunpack.c.l.bf16 %v5711_v26  ;;  %v5578_v60 = vunpack.c.h.bf16 %v5730_v11  ;;  %v6909_v26 = vadd.f32 %v6621_v39, %v565_v49 }
  0xb1   : > { %v6891_v4 = vadd.f32 %v6621_v39, %v563_v19  ;;  %v6899_v21 = vadd.f32 %v6621_v39, %v562_v10  ;;  %v6149_v19 = vld [vmem:[%s8701_s6 + $0x78] sm:$0xff]  ;;  %v6912_v10 = vadd.f32 %v6621_v39, %v564_v17  ;;  %v6924_v49 = vadd.f32 %v6621_v39, %v533_v45 }
  0xb2   : > { %v535_v17 = vmul.f32 %v5502_v13, %v6616_v30  ;;  %v534_v41 = vmul.f32 %v5501_v1, %v6616_v30  ;;  %v6152_v1 = vld [vmem:[%s8701_s6 + $0x80] sm:$0xff] }
  0xb3   : > { %4533 = vperm.xlu1 %6074, %v6350_v6   ;;  %4528 = vperm.xlu0 %6073, %v6339_v3   ;;  %v5565_v6 = vunpack.c.l.bf16 %v6780_v54  ;;  %v5570_v3 = vunpack.c.h.bf16 %v5728_v14  ;;  %v6150_v14 = vld [vmem:[%s8701_s6 + $0x70] sm:$0xff] }
  0xb4   : > { %v6958_v13 = vadd.f32 %v6621_v39, %v535_v17 }
  0xb5   : > { %v566_v38 = vmul.f32 %v5565_v6, %v6616_v30  ;;  %v573_v6 = vmul.f32 %v5578_v60, %v6616_v30  ;;  %v6942_v60 = vadd.f32 %v6621_v39, %v532_v18  ;;  %v6961_v18 = vadd.f32 %v6621_v39, %v534_v41 }
  0xb7   : > { %4543 = vperm.xlu1 %6074, %v6149_v19   ;;  %4538 = vperm.xlu0 %6073, %v6150_v14   ;;  %v567_v19 = vmul.f32 %v5566_v31, %v6616_v30  ;;  %v569_v14 = vmul.f32 %v5570_v3, %v6616_v30  ;;  %v570_v31 = vmul.f32 %v5573_v40, %v6616_v30  ;;  %v5577_v3 = vunpack.c.l.bf16 %v5730_v11 }
  0xb8   : > { %v6948_v40 = vadd.f32 %v6621_v39, %v566_v38  ;;  %8714 = vst [vmem:[#allocation5_spill] sm:$0xff] %v6961_v18 }
  0xb9   : > { %v6945_v11 = vadd.f32 %v6621_v39, %v567_v19  ;;  %v6964_v19 = vadd.f32 %v6621_v39, %v571_v29  ;;  %v6969_v54 = vadd.f32 %v6621_v39, %v570_v31  ;;  %v572_v17 = vmul.f32 %v5577_v3, %v6616_v30  ;;  %v6154_v31 = vld [vmem:[%s8701_s6 + $0x90] sm:$0xff] }
  0xba   : > { %v803_v47 = vpop.permute.xlu1 %802  ;;  %v793_v35 = vpop.permute.xlu0 %792 }
  0xbb   : > { %4553 = vperm.xlu1 %6074, %v6151_v37   ;;  %4548 = vperm.xlu0 %6073, %v6152_v1   ;;  %v6951_v37 = vadd.f32 %v6621_v39, %v569_v14  ;;  %v6954_v1 = vadd.f32 %v6621_v39, %v568_v50  ;;  %8715 = vst [vmem:[#allocation6_spill] sm:$0xff] %v6964_v19  ;;  %8716 = vst [vmem:[#allocation7_spill] sm:$0xff] %v6969_v54 }
  0xbc   : > { %v984_v38 = vmul.f32 %v803_v47, %v648_v57  ;;  %v6972_v50 = vadd.f32 %v6621_v39, %v573_v6  ;;  %v982_v41 = vmul.f32 %v793_v35, %v646_v15  ;;  %v6153_v47 = vld [vmem:[%s8701_s6 + $0x98] sm:$0xff]  ;;  %v7000_v61 = vadd.f32 %v6621_v39, %v572_v17 }
  0xbd   : > { %v8719_v17 = vmax.f32 %v6808_v7, 0.0 }
  0xbe   : > { %v808_v45 = vpop.permute.xlu1 %807  ;;  %v798_v14 = vpop.permute.xlu0 %797  ;;  %8717 = vst [vmem:[#allocation8_spill] sm:$0xff] %v6972_v50 }
  0xbf   : > { %v985_v29 = vmul.f32 %v808_v45, %v649_v23  ;;  %v983_v57 = vmul.f32 %v798_v14, %v8718_v25  ;;  %4563 = vperm.xlu1 %6074, %v6153_v47   ;;  %4558 = vperm.xlu0 %6073, %v6154_v31  }
  0xc1   : > { %v1025_v23 = vpack.c.bf16 %v985_v29, %v984_v38  ;;  %v6992_v35 = vpack.c.bf16 %v983_v57, %v982_v41  ;;  %v6155_v29 = vld [vmem:[%s8701_s6 + $0xa8] sm:$0xff]  ;;  %v6156_v57 = vld [vmem:[%s8701_s6 + $0xa0] sm:$0xff] }
  0xc2   : > { %v818_v45 = vpop.permute.xlu1 %817  ;;  %v813_v14 = vpop.permute.xlu0 %812 }
  0xc3   : > { %v1106_v2 = vshrl.u32 %v1025_v23, 16  ;;  %v1109_v15 = vshll.u32 %v1025_v23, 16  ;;  %v1355_v38 = vrot.slane %v1025_v23, 4  ;;  %v1097_v41 = vshrl.u32 %v6992_v35, 16  ;;  %4573 = vperm.xlu1 %6074, %v6155_v29   ;;  %4568 = vperm.xlu0 %6073, %v6156_v57  }
  0xc4   : > { %v1100_v31 = vshll.u32 %v6992_v35, 16  ;;  %v8712_v39 = vrot.slane %v6992_v35, 4  ;;  %v987_v47 = vmul.f32 %v818_v45, %v8719_v17  ;;  %v8720_v23 = vmax.f32 %v6816_v58, 0.0  ;;  %v6157_v58 = vld [vmem:[%s8701_s6 + $0xb8] sm:$0xff] }
  0xc5   : > { %v1108_v3 = vrot.slane %v1106_v2, 3  ;;  %v1111_v6 = vrot.slane %v1109_v15, 4  ;;  %v1467_v48 = vrot.slane %v1106_v2, 4  ;;  %v1468_v30 = vrot.slane %v1109_v15, 5  ;;  %v6158_v2 = vld [vmem:[%s8701_s6 + $0xb0] sm:$0xff] }
  0xc6   : > { %v986_v25 = vmul.f32 %v813_v14, %v8720_v23  ;;  %v1099_v29 = vrot.slane %v1097_v41, 3  ;;  %v1102_v55 = vrot.slane %v1100_v31, 4  ;;  %v1356_v57 = vsel %vm1341_vm0, %v8712_v39, %v1355_v38  ;;  %v828_v43 = vpop.permute.xlu1 %827  ;;  %v823_v54 = vpop.permute.xlu0 %822 }
  0xc7   : > { %v1463_v50 = vrot.slane %v1097_v41, 4  ;;  %v1112_v19 = vor.u32 %v1111_v6, %v1108_v3  ;;  %v1469_v18 = vor.u32 %v1468_v30, %v1467_v48  ;;  %1421 = vst [vmem:[#allocation2 + $0xc8] sm:$0xff] %v1356_v57  ;;  %v1464_v7 = vrot.slane %v1100_v31, 5  ;;  %4583 = vperm.xlu1 %6074, %v6157_v58   ;;  %4578 = vperm.xlu0 %6073, %v6158_v2   ;;  %v6096_v6 = vld [vmem:[%s8700_s5 + $0xc0] sm:$0xff]  }
  0xc8   : > { %v1026_v45 = vpack.c.bf16 %v987_v47, %v986_v25  ;;  %v7024_v15 = vor.u32 %v1102_v55, %v1099_v29  ;;  %v8721_v14 = vmax.f32 %v6819_v46, 0.0  ;;  %v8722_v30 = vmax.f32 %v6825_v27, 0.0 }
  0xc9   : > { %v7031_v3 = vor.u32 %v1464_v7, %v1463_v50  ;;  %v6159_v7 = vld [vmem:[%s8701_s6 + $0xc8] sm:$0xff] }
  0xca   : > { %v989_v41 = vmul.f32 %v828_v43, %v8721_v14  ;;  %v988_v48 = vmul.f32 %v823_v54, %v8722_v30  ;;  %v1115_v25 = vshrl.u32 %v1026_v45, 16  ;;  %v1118_v47 = vshll.u32 %v1026_v45, 16  ;;  %v838_v55 = vpop.permute.xlu1 %837  ;;  %v833_v29 = vpop.permute.xlu0 %832 }
  0xcb   : > { %v1357_v31 = vrot.slane %v1026_v45, 4  ;;  %v1113_v17 = vsel %vm1042_vm1, %v7024_v15, %v1112_v19  ;;  %v1470_v27 = vsel %vm1439_vm2, %v7031_v3, %v1469_v18  ;;  %4593 = vperm.xlu1 %6074, %v6159_v7   ;;  %v6160_v45 = vld [vmem:[%s8701_s6 + $0xc0] sm:$0xff]  ;;  %v8724_v7 = vmax.f32 %v6831_v9, 0.0  ;;  %v6161_v9 = vld [vmem:[%s8701_s6 + $0xd8] sm:$0xff] }
  0xcc   : > { %v7035_v23 = vpack.c.bf16 %v989_v41, %v988_v48  ;;  %1295 = vst [vmem:[#allocation2 + $0xc0] sm:$0xff] %v1113_v17  ;;  %v1117_v54 = vrot.slane %v1115_v25, 3  ;;  %v1120_v50 = vrot.slane %v1118_v47, 4  ;;  %4588 = vperm.xlu0 %6073, %v6160_v45   ;;  %1572 = vst [vmem:[#allocation2 + $0xd0] sm:$0xff] %v1470_v27  ;;  %v1471_v58 = vrot.slane %v1115_v25, 4  ;;  %5885 = vmatprep.mubr.bf16.mxu1 %v1470_v27 }
  0xcd   : > { %v1358_v57 = vsel %vm1341_vm0, %v1355_v38, %v1357_v31  ;;  %v1472_v2 = vrot.slane %v1118_v47, 5  ;;  %v8723_v48 = vmax.f32 %v6828_v0, 0.0  ;;  %v990_v39 = vmul.f32 %v833_v29, %v8724_v7 }
  0xce   : > { %1422 = vst [vmem:[#allocation2 + $0xe0] sm:$0xff] %v1358_v57  ;;  %v1124_v14 = vshrl.u32 %v7035_v23, 16  ;;  %v1127_v41 = vshll.u32 %v7035_v23, 16  ;;  %v1121_v38 = vor.u32 %v1120_v50, %v1117_v54  ;;  %v1359_v30 = vrot.slane %v7035_v23, 4  ;;  %v848_v25 = vpop.permute.xlu1 %847  ;;  %v843_v47 = vpop.permute.xlu0 %842 }
  0xcf   : > { %v991_v17 = vmul.f32 %v838_v55, %v8723_v48  ;;  %v1473_v43 = vor.u32 %v1472_v2, %v1471_v58  ;;  %4603 = vperm.xlu1 %6074, %v6161_v9   ;;  %v6162_v55 = vld [vmem:[%s8701_s6 + $0xd0] sm:$0xff] }
  0xd0   : > { %v1126_v45 = vrot.slane %v1124_v14, 3  ;;  %v1129_v46 = vrot.slane %v1127_v41, 4  ;;  %v1475_v57 = vrot.slane %v1124_v14, 4  ;;  %v1122_v27 = vsel %vm1042_vm1, %v1112_v19, %v1121_v38  ;;  %4598 = vperm.xlu0 %6073, %v6162_v55  }
  0xd1   : > { %v1360_v23 = vsel %vm1341_vm0, %v1357_v31, %v1359_v30  ;;  %v1476_v54 = vrot.slane %v1127_v41, 5  ;;  %v1028_v0 = vpack.c.bf16 %v991_v17, %v990_v39  ;;  %1296 = vst [vmem:[#allocation2 + $0xd8] sm:$0xff] %v1122_v27  ;;  %v1474_v29 = vsel %vm1439_vm2, %v1469_v18, %v1473_v43 }
  0xd2   : > { %v1130_v50 = vor.u32 %v1129_v46, %v1126_v45  ;;  %1423 = vst [vmem:[#allocation2 + $0xf8] sm:$0xff] %v1360_v23  ;;  %v8725_v19 = vmax.f32 %v6834_v28, 0.0  ;;  %v8726_v39 = vmax.f32 %v6837_v34, 0.0  ;;  %1573 = vst [vmem:[#allocation2 + $0xe8] sm:$0xff] %v1474_v29  ;;  %5886 = vmatmul.mubr.bf16.vlgmr.msra.gmra.mrb[0].mxu1 %v1474_v29  ;;  %v858_v27 = vpop.permute.xlu1 %857  ;;  %v853_v18 = vpop.permute.xlu0 %852  ;;  %v6098_v28 = vld [vmem:[%s8700_s5 + $0xc8] sm:$0xff]   ;;  %v677_v34 = vmax.f32 %v6642_v53, 0.0 }
  0xd3   : > { %v1477_v2 = vor.u32 %v1476_v54, %v1475_v57  ;;  %v1133_v14 = vshrl.u32 %v1028_v0, 16  ;;  %v1136_v41 = vshll.u32 %v1028_v0, 16  ;;  %v1361_v48 = vrot.slane %v1028_v0, 4  ;;  %2966 = vmatpush1.bf16.msra.mxu1 %v6096_v6  ;;  %v6164_v6 = vld [vmem:[%s8701_s6 + $0xe0] sm:$0xff] }
  0xd4   : > { %v993_v31 = vmul.f32 %v848_v25, %v8725_v19  ;;  %v992_v58 = vmul.f32 %v843_v47, %v8726_v39  ;;  %v1131_v17 = vsel %vm1042_vm1, %v1121_v38, %v1130_v50  ;;  %v676_v46 = vmax.f32 %v6650_v56, 0.0  ;;  %v6163_v47 = vld [vmem:[%s8701_s6 + $0xe8] sm:$0xff]  ;;  %4608 = vperm.xlu0 %6073, %v6164_v6  }
  0xd5   : > { %1297 = vst [vmem:[#allocation2 + $0xf0] sm:$0xff] %v1131_v17  ;;  %v1478_v45 = vsel %vm1439_vm2, %v1473_v43, %v1477_v2  ;;  %v1135_v57 = vrot.slane %v1133_v14, 3  ;;  %v1138_v25 = vrot.slane %v1136_v41, 4  ;;  %v1362_v38 = vsel %vm1341_vm0, %v1359_v30, %v1361_v48  ;;  %4613 = vperm.xlu1 %6074, %v6163_v47  }
  0xd6   : > { %v7072_v7 = vpack.c.bf16 %v993_v31, %v992_v58  ;;  %1574 = vst [vmem:[#allocation2 + $0x100] sm:$0xff] %v1478_v45  ;;  %1424 = vst [vmem:[#allocation2 + $0x110] sm:$0xff] %v1362_v38  ;;  %v1479_v23 = vrot.slane %v1133_v14, 4  ;;  %v1480_v54 = vrot.slane %v1136_v41, 5  ;;  %5889 = vmatprep.mubr.bf16.mxu1 %v1478_v45  ;;  %v8727_v30 = vmov 0   ;;  %v868_v38 = vpop.permute.xlu1 %867  ;;  %v863_v47 = vpop.permute.xlu0 %862  ;;  %v6100_v45 = vld [vmem:[%s8700_s5 + $0xd0] sm:$0xff]  }
  0xd7   : > { %2967 = vmatprep.subr.bf16.mxu1 %v8727_v30  ;;  %v1139_v9 = vor.u32 %v1138_v25, %v1135_v57  ;;  %v8728_v29 = vmax.f32 %v6840_v36, 0.0  ;;  %v8729_v31 = vmax.f32 %v6844_v22, 0.0  ;;  %v6165_v22 = vld [vmem:[%s8701_s6 + $0xf8] sm:$0xff]  ;;  %v8731_v6 = vmax.f32 %v6855_v62, 0.0 }
  0xd8   : > { %v1142_v43 = vshrl.u32 %v7072_v7, 16  ;;  %v1145_v0 = vshll.u32 %v7072_v7, 16  ;;  %v1363_v55 = vrot.slane %v7072_v7, 4  ;;  %v1481_v58 = vor.u32 %v1480_v54, %v1479_v23  ;;  %2968 = vmatpush1.bf16.msra.mxu1 %v6098_v28 }
  0xd9   : > { %v995_v19 = vmul.f32 %v858_v27, %v8728_v29  ;;  %v994_v39 = vmul.f32 %v853_v18, %v8729_v31  ;;  %v1140_v57 = vsel %vm1042_vm1, %v1130_v50, %v1139_v9  ;;  %4623 = vperm.xlu1 %6074, %v6165_v22   ;;  %v6166_v18 = vld [vmem:[%s8701_s6 + $0xf0] sm:$0xff]  ;;  %v8730_v50 = vmax.f32 %v6847_v44, 0.0  ;;  %2969 = vmatprep.subr.bf16.mxu1 %v8727_v30  ;;  %v6102_v44 = vld [vmem:[%s8700_s5 + $0xd8] sm:$0xff]  }
  0xda   : > { %v1144_v17 = vrot.slane %v1142_v43, 3  ;;  %v1147_v14 = vrot.slane %v1145_v0, 4  ;;  %v1483_v41 = vrot.slane %v1142_v43, 4  ;;  %v1364_v7 = vsel %vm1341_vm0, %v1361_v48, %v1363_v55  ;;  %4618 = vperm.xlu0 %6073, %v6166_v18   ;;  %1298 = vst [vmem:[#allocation2 + $0x108] sm:$0xff] %v1140_v57 }
  0xdb   : > { %v1484_v36 = vrot.slane %v1145_v0, 5  ;;  %v1030_v27 = vpack.c.bf16 %v995_v19, %v994_v39  ;;  %v1482_v28 = vsel %vm1439_vm2, %v1477_v2, %v1481_v58  ;;  %1425 = vst [vmem:[#allocation2 + $0x128] sm:$0xff] %v1364_v7  ;;  %v997_v48 = vmul.f32 %v868_v38, %v8730_v50  ;;  %v878_v2 = vpop.permute.xlu1 %877  ;;  %v873_v39 = vpop.permute.xlu0 %872 }
  0xdc   : > { %v1148_v25 = vor.u32 %v1147_v14, %v1144_v17  ;;  %v996_v23 = vmul.f32 %v863_v47, %v8731_v6  ;;  %1575 = vst [vmem:[#allocation2 + $0x118] sm:$0xff] %v1482_v28  ;;  %5890 = vmatmul.mubr.bf16.gmra.mrb[4].mxu1 %v1482_v28  ;;  %v679_v62 = vmax.f32 %v6653_v59, 0.0  ;;  %v678_v17 = vmax.f32 %v6667_v5, 0.0  ;;  %v6167_v47 = vld [vmem:[%s8701_s6 + $0x108] sm:$0xff] }
  0xdd   : > { %v1485_v54 = vor.u32 %v1484_v36, %v1483_v41  ;;  %v1151_v43 = vshrl.u32 %v1030_v27, 16  ;;  %v1154_v0 = vshll.u32 %v1030_v27, 16  ;;  %v1365_v29 = vrot.slane %v1030_v27, 4  ;;  %2970 = vmatpush1.bf16.msra.mxu1 %v6100_v45  ;;  %4633 = vperm.xlu1 %6074, %v6167_v47   ;;  %v6168_v45 = vld [vmem:[%s8701_s6 + $0x100] sm:$0xff]  ;;  %v4452_v27 = vld [vmem:[%s8701_s6 + $0x110] sm:$0xff] }
  0xde   : > { %v1149_v19 = vsel %vm1042_vm1, %v1139_v9, %v1148_v25  ;;  %v7113_v31 = vpack.c.bf16 %v997_v48, %v996_v23  ;;  %4628 = vperm.xlu0 %6073, %v6168_v45   ;;  %2971 = vmatprep.subr.bf16.mxu1 %v8727_v30  ;;  %v8732_v28 = vmax.f32 %v6870_v63, 0.0  ;;  %v8733_v48 = vmax.f32 %v6881_v8, 0.0 }
  0xdf   : > { %1299 = vst [vmem:[#allocation2 + $0x120] sm:$0xff] %v1149_v19  ;;  %v1486_v14 = vsel %vm1439_vm2, %v1481_v58, %v1485_v54  ;;  %v1153_v41 = vrot.slane %v1151_v43, 3  ;;  %v1156_v38 = vrot.slane %v1154_v0, 4  ;;  %v1366_v9 = vsel %vm1341_vm0, %v1363_v55, %v1365_v29  ;;  %v4453_v55 = vld [vmem:[%s8701_s6 + $0x118] sm:$0xff]  ;;  %v883_v47 = vpop.permute.xlu0 %882 }
  0xe0   : > { %1576 = vst [vmem:[#allocation2 + $0x130] sm:$0xff] %v1486_v14  ;;  %1426 = vst [vmem:[#allocation2 + $0x140] sm:$0xff] %v1366_v9  ;;  %v1487_v57 = vrot.slane %v1151_v43, 4  ;;  %v1488_v7 = vrot.slane %v1154_v0, 5  ;;  %v1160_v58 = vshrl.u32 %v7113_v31, 16  ;;  %v1163_v36 = vshll.u32 %v7113_v31, 16  ;;  %5893 = vmatprep.mubr.bf16.mxu1 %v1486_v14  ;;  %v888_v9 = vpop.permute.xlu1 %887 }
  0xe1   : > { %v1157_v22 = vor.u32 %v1156_v38, %v1153_v41  ;;  %v1367_v18 = vrot.slane %v7113_v31, 4  ;;  %v999_v50 = vmul.f32 %v878_v2, %v8732_v28  ;;  %v998_v6 = vmul.f32 %v873_v39, %v8733_v48  ;;  %2972 = vmatpush1.bf16.msra.mxu1 %v6102_v44  ;;  %v6103_v14 = vld [vmem:[%s8700_s5 + $0xe0] sm:$0xff]   ;;  %4643 = vperm.xlu1 %6074, %v4453_v55   ;;  %v6104_v28 = vld [vmem:[%s8700_s5 + $0xe8] sm:$0xff]  }
  0xe2   : > { %v1489_v23 = vor.u32 %v1488_v7, %v1487_v57  ;;  %v1162_v43 = vrot.slane %v1160_v58, 3  ;;  %v1165_v0 = vrot.slane %v1163_v36, 4  ;;  %v1491_v19 = vrot.slane %v1160_v58, 4  ;;  %4638 = vperm.xlu0 %6073, %v4452_v27   ;;  %2973 = vmatprep.subr.bf16.mxu1 %v8727_v30 }
  0xe3   : > { %v1158_v41 = vsel %vm1042_vm1, %v1148_v25, %v1157_v22  ;;  %v1368_v31 = vsel %vm1341_vm0, %v1365_v29, %v1367_v18  ;;  %v1492_v63 = vrot.slane %v1163_v36, 5  ;;  %v1032_v2 = vpack.c.bf16 %v999_v50, %v998_v6  ;;  %v4455_v25 = vld [vmem:[%s8701_s6 + $0x128] sm:$0xff]  ;;  %v4454_v29 = vld [vmem:[%s8701_s6 + $0x120] sm:$0xff]  ;;  %v893_v27 = vpop.permute.xlu0 %892 }
  0xe4   : > { %1300 = vst [vmem:[#allocation2 + $0x138] sm:$0xff] %v1158_v41  ;;  %v1490_v8 = vsel %vm1439_vm2, %v1485_v54, %v1489_v23  ;;  %v1166_v39 = vor.u32 %v1165_v0, %v1162_v43  ;;  %1427 = vst [vmem:[#allocation2 + $0x158] sm:$0xff] %v1368_v31  ;;  %v8734_v38 = vmax.f32 %v6891_v4, 0.0  ;;  %v8735_v45 = vmax.f32 %v6899_v21, 0.0  ;;  %v898_v55 = vpop.permute.xlu1 %897 }
  0xe5   : > { %1577 = vst [vmem:[#allocation2 + $0x148] sm:$0xff] %v1490_v8  ;;  %v1493_v54 = vor.u32 %v1492_v63, %v1491_v19  ;;  %v1169_v7 = vshrl.u32 %v1032_v2, 16  ;;  %v1172_v58 = vshll.u32 %v1032_v2, 16  ;;  %v1369_v36 = vrot.slane %v1032_v2, 4  ;;  %5894 = vmatmul.mubr.bf16.gmra.mrb[8].mxu1 %v1490_v8  ;;  %4653 = vperm.xlu1 %6074, %v4455_v25  }
  0xe6   : > { %v1001_v44 = vmul.f32 %v888_v9, %v8734_v38  ;;  %v1000_v57 = vmul.f32 %v883_v47, %v8735_v45  ;;  %v1167_v4 = vsel %vm1042_vm1, %v1157_v22, %v1166_v39  ;;  %2974 = vmatpush1.bf16.msra.mxu1 %v6103_v14  ;;  %v641_v50 = vmax.f32 %v6675_v12, 0.0  ;;  %4648 = vperm.xlu0 %6073, %v4454_v29  }
  0xe7   : > { %v640_v48 = vmax.f32 %v6688_v20, 0.0  ;;  %1301 = vst [vmem:[#allocation2 + $0x150] sm:$0xff] %v1167_v4  ;;  %v1494_v6 = vsel %vm1439_vm2, %v1489_v23, %v1493_v54  ;;  %v1171_v43 = vrot.slane %v1169_v7, 3  ;;  %v1174_v0 = vrot.slane %v1172_v58, 4  ;;  %v4457_v23 = vld [vmem:[%s8701_s6 + $0x138] sm:$0xff]  ;;  %2975 = vmatprep.subr.bf16.mxu1 %v8727_v30 }
  0xe8   : > { %v7160_v21 = vpack.c.bf16 %v1001_v44, %v1000_v57  ;;  %v1370_v22 = vsel %vm1341_vm0, %v1367_v18, %v1369_v36  ;;  %1578 = vst [vmem:[#allocation2 + $0x160] sm:$0xff] %v1494_v6  ;;  %v1495_v19 = vrot.slane %v1169_v7, 4  ;;  %v1496_v9 = vrot.slane %v1172_v58, 5  ;;  %v4456_v18 = vld [vmem:[%s8701_s6 + $0x130] sm:$0xff]  ;;  %5897 = vmatprep.mubr.bf16.mxu1 %v1494_v6  ;;  %v738_v29 = vpop.permute.xlu1 %737  ;;  %v733_v7 = vpop.permute.xlu0 %732 }
  0xe9   : > { %1428 = vst [vmem:[#allocation2 + $0x170] sm:$0xff] %v1370_v22  ;;  %v1175_v41 = vor.u32 %v1174_v0, %v1171_v43  ;;  %v8736_v63 = vmax.f32 %v6909_v26, 0.0  ;;  %v8737_v8 = vmax.f32 %v6912_v10, 0.0  ;;  %v6105_v58 = vld [vmem:[%s8700_s5 + $0xf0] sm:$0xff]   ;;  %4663 = vperm.xlu1 %6074, %v4457_v23   ;;  %v8739_v43 = vmax.f32 %v6942_v60, 0.0  ;;  %v6106_v23 = vld [vmem:[%s8700_s5 + $0xf8] sm:$0xff]  }
  0xea   : > { %v1178_v47 = vshrl.u32 %v7160_v21, 16  ;;  %v1181_v14 = vshll.u32 %v7160_v21, 16  ;;  %v1371_v31 = vrot.slane %v7160_v21, 4  ;;  %v1497_v44 = vor.u32 %v1496_v9, %v1495_v19  ;;  %2976 = vmatpush1.bf16.msra.mxu1 %v6104_v28  ;;  %4658 = vperm.xlu0 %6073, %v4456_v18  }
  0xeb   : > { %v1003_v2 = vmul.f32 %v898_v55, %v8736_v63  ;;  %v1002_v38 = vmul.f32 %v893_v27, %v8737_v8  ;;  %v1176_v4 = vsel %vm1042_vm1, %v1166_v39, %v1175_v41  ;;  %v8738_v28 = vmax.f32 %v6924_v49, 0.0  ;;  %v4459_v39 = vld [vmem:[%s8701_s6 + $0x148] sm:$0xff]  ;;  %2977 = vmatprep.subr.bf16.mxu1 %v8727_v30 }
  0xec   : > { %v1180_v45 = vrot.slane %v1178_v47, 3  ;;  %v1183_v57 = vrot.slane %v1181_v14, 4  ;;  %v1499_v25 = vrot.slane %v1178_v47, 4  ;;  %v1372_v26 = vsel %vm1341_vm0, %v1369_v36, %v1371_v31  ;;  %1302 = vst [vmem:[#allocation2 + $0x168] sm:$0xff] %v1176_v4  ;;  %v4458_v36 = vld [vmem:[%s8701_s6 + $0x140] sm:$0xff]  ;;  %v908_v47 = vpop.permute.xlu1 %907 }
  0xed   : > { %v1500_v21 = vrot.slane %v1181_v14, 5  ;;  %v7188_v10 = vpack.c.bf16 %v1003_v2, %v1002_v38  ;;  %v1498_v55 = vsel %vm1439_vm2, %v1493_v54, %v1497_v44  ;;  %1429 = vst [vmem:[#allocation2 + $0x188] sm:$0xff] %v1372_v26  ;;  %v971_v6 = vmul.f32 %v738_v29, %v8738_v28  ;;  %v903_v14 = vpop.permute.xlu0 %902  ;;  %4673 = vperm.xlu1 %6074, %v4459_v39  }
  0xee   : > { %v1184_v27 = vor.u32 %v1183_v57, %v1180_v45  ;;  %v970_v0 = vmul.f32 %v733_v7, %v8739_v43  ;;  %1579 = vst [vmem:[#allocation2 + $0x178] sm:$0xff] %v1498_v55  ;;  %5898 = vmatmul.mubr.bf16.gmra.mrb[12].mxu1 %v1498_v55  ;;  %v643_v18 = vmax.f32 %v6694_v16, 0.0  ;;  %v642_v63 = vmax.f32 %v6697_v24, 0.0  ;;  %4668 = vperm.xlu0 %6073, %v4458_v36   ;;  %v4460_v7 = vld [vmem:[%s8701_s6 + $0x150] sm:$0xff] }
  0xef   : > { %v1501_v54 = vor.u32 %v1500_v21, %v1499_v25  ;;  %v1187_v22 = vshrl.u32 %v7188_v10, 16  ;;  %v1190_v49 = vshll.u32 %v7188_v10, 16  ;;  %v1373_v19 = vrot.slane %v7188_v10, 4  ;;  %2978 = vmatpush1.bf16.msra.mxu1 %v6105_v58 }
  0xf0   : > { %v1185_v60 = vsel %vm1042_vm1, %v1175_v41, %v1184_v27  ;;  %v7206_v9 = vpack.c.bf16 %v971_v6, %v970_v0  ;;  %2979 = vmatprep.subr.bf16.mxu1 %v8727_v30  ;;  %v8740_v4 = vmax.f32 %v6945_v11, 0.0  ;;  %v8741_v21 = vmax.f32 %v6948_v40, 0.0  ;;  %v918_v39 = vpop.permute.xlu1 %917  ;;  %v1286_v40 = vld [vmem:[#allocation2 + $0x18] sm:$0xf0] }
  0xf1   : > { %1303 = vst [vmem:[#allocation2 + $0x180] sm:$0xff] %v1185_v60  ;;  %v1502_v2 = vsel %vm1439_vm2, %v1497_v44, %v1501_v54  ;;  %v1189_v8 = vrot.slane %v1187_v22, 3  ;;  %v1192_v38 = vrot.slane %v1190_v49, 4  ;;  %v1374_v41 = vsel %vm1341_vm0, %v1371_v31, %v1373_v19  ;;  %v4461_v44 = vld [vmem:[%s8701_s6 + $0x158] sm:$0xff]  ;;  %v913_v36 = vpop.permute.xlu0 %912  ;;  %v1563_v60 = vld [vmem:[#allocation2 + $0x28] sm:$0xf8] }
  0xf2   : > { %1580 = vst [vmem:[#allocation2 + $0x190] sm:$0xff] %v1502_v2  ;;  %1430 = vst [vmem:[#allocation2 + $0x1a0] sm:$0xff] %v1374_v41  ;;  %v1503_v45 = vrot.slane %v1187_v22, 4  ;;  %v1504_v57 = vrot.slane %v1190_v49, 5  ;;  %v1044_v25 = vshrl.u32 %v7206_v9, 16  ;;  %v1047_v29 = vshll.u32 %v7206_v9, 16  ;;  %5901 = vmatprep.mubr.bf16.mxu1 %v1502_v2  ;;  %4683 = vperm.xlu1 %6074, %v4461_v44  }
  0xf3   : > { %v7226_v31 = vor.u32 %v1192_v38, %v1189_v8  ;;  %v1342_v58 = vrot.slane %v7206_v9, 4  ;;  %v1005_v26 = vmul.f32 %v908_v47, %v8740_v4  ;;  %v1004_v55 = vmul.f32 %v903_v14, %v8741_v21  ;;  %2980 = vmatpush1.bf16.msra.mxu1 %v6106_v23  ;;  %v6107_v22 = vld [vmem:[%s8700_s5 + $0x100] sm:$0xff]   ;;  %4678 = vperm.xlu0 %6073, %v4460_v7  }
  0xf4   : > { %v7233_v28 = vor.u32 %v1504_v57, %v1503_v45  ;;  %v1046_v6 = vrot.slane %v1044_v25, 3  ;;  %v1049_v43 = vrot.slane %v1047_v29, 4  ;;  %v1440_v0 = vrot.slane %v1044_v25, 4  ;;  %v4462_v57 = vld [vmem:[%s8701_s6 + $0x160] sm:$0xff]  ;;  %2981 = vmatprep.subr.bf16.mxu1 %v8727_v30 }
  0xf5   : > { %v1194_v49 = vsel %vm1042_vm1, %v1184_v27, %v7226_v31  ;;  %1414 = vst [vmem:[#allocation2 + $0x20] sm:$0xf0] %v1342_v58  ;;  %v1441_v47 = vrot.slane %v1047_v29, 5  ;;  %v1035_v14 = vpack.c.bf16 %v1005_v26, %v1004_v55  ;;  %v8744_v23 = vmax.f32 %v6951_v37, 0.0  ;;  %v4463_v37 = vld [vmem:[%s8701_s6 + $0x168] sm:$0xff]  ;;  %v748_v26 = vpop.permute.xlu1 %747  ;;  %v743_v21 = vpop.permute.xlu0 %742 }
  0xf6   : > { %1304 = vst [vmem:[#allocation2 + $0x198] sm:$0xff] %v1194_v49  ;;  %v1506_v27 = vsel %vm1439_vm2, %v1501_v54, %v7233_v28  ;;  %v7258_v38 = vor.u32 %v1049_v43, %v1046_v6  ;;  %v8747_v41 = vmax.f32 %v6954_v1, 0.0  ;;  %v645_v54 = vmax.f32 %v6709_v32, 0.0  ;;  %v6108_v55 = vld [vmem:[%s8700_s5 + $0x108] sm:$0xff]   ;;  %4693 = vperm.xlu1 %6074, %v4463_v37  }
  0xf7   : > { %v1007_v2 = vmul.f32 %v918_v39, %v8744_v23  ;;  %1581 = vst [vmem:[#allocation2 + $0x1a8] sm:$0xff] %v1506_v27  ;;  %v7270_v25 = vor.u32 %v1441_v47, %v1440_v0  ;;  %v1196_v29 = vshrl.u32 %v1035_v14, 16  ;;  %v1199_v44 = vshll.u32 %v1035_v14, 16  ;;  %5902 = vmatmul.mubr.bf16.gmra.mrb[16].mxu1 %v1506_v27  ;;  %4688 = vperm.xlu0 %6073, %v4462_v57  }
  0xf8   : > { %v1006_v45 = vmul.f32 %v913_v36, %v8747_v41  ;;  %v1375_v7 = vrot.slane %v1035_v14, 4  ;;  %v1287_v1 = vsel %vm7242_vm7, %v7258_v38, %v1286_v40  ;;  %2982 = vmatpush1.bf16.msra.mxu1 %v6107_v22  ;;  %v644_v6 = vmax.f32 %v6712_v33, 0.0  ;;  %v4464_v41 = vld [vmem:[%s8701_s6 + $0x170] sm:$0xff] }
  0xf9   : > { %1288 = vst [vmem:[#allocation2 + $0x18] sm:$0xf0] %v1287_v1  ;;  %v1564_v0 = vsel %vm7254_vm8, %v7270_v25, %v1563_v60  ;;  %v1198_v39 = vrot.slane %v1196_v29, 3  ;;  %v1201_v36 = vrot.slane %v1199_v44, 4  ;;  %v1507_v22 = vrot.slane %v1196_v29, 4  ;;  %v4465_v60 = vld [vmem:[%s8701_s6 + $0x178] sm:$0xff]  ;;  %2983 = vmatprep.subr.bf16.mxu1 %v8727_v30  ;;  %v928_v1 = vpop.permute.xlu1 %927 }
  0xfa   : > { %v7275_v4 = vpack.c.bf16 %v1007_v2, %v1006_v45  ;;  %v1376_v49 = vsel %vm1341_vm0, %v1373_v19, %v1375_v7  ;;  %1565 = vst [vmem:[#allocation2 + $0x28] sm:$0xf8] %v1564_v0  ;;  %v1508_v11 = vrot.slane %v1199_v44, 5  ;;  %v8748_v19 = vmax.f32 %v6958_v13, 0.0  ;;  %v8749_v2 = vld [vmem:[#allocation5_spill] sm:$0xff]  ;;  %v923_v0 = vpop.permute.xlu0 %922  ;;  %4703 = vperm.xlu1 %6074, %v4465_v60  }
  0xfb   : > { %1431 = vst [vmem:[#allocation2 + $0x1b8] sm:$0xff] %v1376_v49  ;;  %v1202_v14 = vor.u32 %v1201_v36, %v1198_v39  ;;  %v8750_v27 = vmax.f32 %v8749_v2, 0.0  ;;  %v6109_v13 = vld [vmem:[%s8700_s5 + $0x110] sm:$0xff]   ;;  %4698 = vperm.xlu0 %6073, %v4464_v41  }
  0xfc   : > { %v1205_v40 = vshrl.u32 %v7275_v4, 16  ;;  %v1208_v47 = vshll.u32 %v7275_v4, 16  ;;  %v1377_v10 = vrot.slane %v7275_v4, 4  ;;  %v973_v23 = vmul.f32 %v748_v26, %v8748_v19  ;;  %v1597_v44 = vld [vmem:[#allocation2 + $0x20] sm:$0xff]  ;;  %2984 = vmatpush1.bf16.msra.mxu1 %v6108_v55 }
  0xfd   : > { %v972_v8 = vmul.f32 %v743_v21, %v8750_v27  ;;  %v1509_v45 = vor.u32 %v1508_v11, %v1507_v22  ;;  %v1203_v26 = vsel %vm1042_vm1, %v7226_v31, %v1202_v14  ;;  %1897 = vmatprep.mubr.bf16.mxu0 %v1597_v44  ;;  %v7312_v49 = vld [vmem:[#allocation2 + $0x20] sm:$0xf0]  ;;  %v8751_v11 = vld [vmem:[#allocation6_spill] sm:$0xff]  ;;  %2985 = vmatprep.subr.bf16.mxu1 %v8727_v30  ;;  %v8755_v44 = vld [vmem:[#allocation4_spill] sm:$0xff]  ;;  %v8760_v4 = vmax.f32 %v6639_v52, 0.0 }
  0xfe   : > { %v1207_v37 = vrot.slane %v1205_v40, 3  ;;  %v1210_v57 = vrot.slane %v1208_v47, 4  ;;  %v1511_v29 = vrot.slane %v1205_v40, 4  ;;  %v1378_v21 = vsel %vm1341_vm0, %v1375_v7, %v1377_v10  ;;  %1305 = vst [vmem:[#allocation2 + $0x1b0] sm:$0xff] %v1203_v26  ;;  %v8753_v19 = vld [vmem:[#allocation7_spill] sm:$0xff] }
  0xff   : > { %v1512_v39 = vrot.slane %v1208_v47, 5  ;;  %v7310_v36 = vpack.c.bf16 %v973_v23, %v972_v8  ;;  %v1510_v55 = vsel %vm1439_vm2, %v7233_v28, %v1509_v45  ;;  %1432 = vst [vmem:[#allocation2 + $0x1d0] sm:$0xff] %v1378_v21  ;;  %v8752_v31 = vmax.f32 %v8751_v11, 0.0 }
 0x100   : > { %v7316_v22 = vor.u32 %v1210_v57, %v1207_v37  ;;  %v8754_v2 = vmax.f32 %v8753_v19, 0.0  ;;  %1582 = vst [vmem:[#allocation2 + $0x1c0] sm:$0xff] %v1510_v55  ;;  %5905 = vmatprep.mubr.bf16.mxu1 %v1510_v55  ;;  %v938_v37 = vpop.permute.xlu1 %937  ;;  %v933_v57 = vpop.permute.xlu0 %932  ;;  %v1596_v41 = vld [vmem:[#allocation2 + $0x18] sm:$0xff]  ;;  %2986 = vmatpush1.bf16.msra.mxu1 %v6109_v13 }
 0x101   : > { %v1009_v40 = vmul.f32 %v928_v1, %v8752_v31  ;;  %v7322_v47 = vor.u32 %v1512_v39, %v1511_v29  ;;  %v1052_v60 = vshrl.u32 %v7310_v36, 16  ;;  %v1055_v23 = vshll.u32 %v7310_v36, 16  ;;  %v6110_v29 = vld [vmem:[%s8700_s5 + $0x118] sm:$0xff]   ;;  %1898 = vmatmul.mubr.bf16.gmra.mrb[4].mxu0 %v1596_v41  ;;  %2987 = vmatprep.subr.bf16.mxu1 %v8727_v30 }
 0x102   : > { %v1008_v7 = vmul.f32 %v923_v0, %v8754_v2  ;;  %v1343_v27 = vrot.slane %v7310_v36, 4  ;;  %v1212_v28 = vsel %vm1042_vm1, %v1202_v14, %v7316_v22  ;;  %v2605_v0 = vrot.slane %v7312_v49, 4 }
 0x103   : > { %1306 = vst [vmem:[#allocation2 + $0x1c8] sm:$0xff] %v1212_v28  ;;  %v1514_v26 = vsel %vm1439_vm2, %v1509_v45, %v7322_v47  ;;  %v1054_v21 = vrot.slane %v1052_v60, 3  ;;  %v1057_v14 = vrot.slane %v1055_v23, 4  ;;  %v1443_v39 = vrot.slane %v1052_v60, 4 }
 0x104   : > { %v7330_v8 = vpack.c.bf16 %v1009_v40, %v1008_v7  ;;  %v7344_v13 = vsel %vm1341_vm0, %v1342_v58, %v1343_v27  ;;  %1583 = vst [vmem:[#allocation2 + $0x1d8] sm:$0xff] %v1514_v26  ;;  %v1444_v55 = vrot.slane %v1055_v23, 5  ;;  %5906 = vmatmul.mubr.bf16.gmra.mrb[20].mxu1 %v1514_v26  ;;  %v8756_v40 = vld [vmem:[#allocation8_spill] sm:$0xff]  ;;  %v8758_v2 = vmax.f32 %v7000_v61, 0.0  ;;  %v758_v1 = vpop.permute.xlu1 %757  ;;  %v753_v43 = vpop.permute.xlu0 %752  ;;  %v6111_v26 = vld [vmem:[%s8700_s5 + $0x120] sm:$0xff]  }
 0x105   : > { %1905 = vmatprep.mubr.bf16.mxu0 %v7344_v13  ;;  %v7350_v45 = vor.u32 %v1057_v14, %v1054_v21  ;;  %v8757_v58 = vmax.f32 %v8756_v40, 0.0  ;;  %2988 = vmatpush1.bf16.msra.mxu1 %v6110_v29  ;;  %v7373_v21 = vld [vmem:[#allocation2 + $0x18] sm:$0xf0]  ;;  %v2606_v52 = vrot.slane %v7344_v13, 4 }
 0x106   : > { %v1214_v11 = vshrl.u32 %v7330_v8, 16  ;;  %v1217_v31 = vshll.u32 %v7330_v8, 16  ;;  %v1379_v9 = vrot.slane %v7330_v8, 4  ;;  %v1010_v7 = vmul.f32 %v933_v57, %v8758_v2  ;;  %2989 = vmatprep.subr.bf16.mxu1 %v8727_v30 }
 0x107   : > { %v1011_v19 = vmul.f32 %v938_v37, %v8757_v58  ;;  %v7357_v28 = vor.u32 %v1444_v55, %v1443_v39  ;;  %v7365_v8 = vsel %vm1042_vm1, %v7258_v38, %v7350_v45  ;;  %v8759_v38 = vmax.f32 %v6636_v51, 0.0  ;;  %v6112_v51 = vld [vmem:[%s8700_s5 + $0x128] sm:$0xff]  }
 0x108   : > { %v1216_v60 = vrot.slane %v1214_v11, 3  ;;  %v1219_v23 = vrot.slane %v1217_v31, 4  ;;  %v1515_v41 = vrot.slane %v1214_v11, 4  ;;  %v1380_v61 = vsel %vm1341_vm0, %v1377_v10, %v1379_v9  ;;  %v943_v2 = vpop.permute.xlu0 %942 }
 0x109   : > { %v1516_v37 = vrot.slane %v1217_v31, 5  ;;  %v7370_v57 = vpack.c.bf16 %v1011_v19, %v1010_v7  ;;  %v1446_v29 = vsel %vm1439_vm2, %v7270_v25, %v7357_v28  ;;  %1433 = vst [vmem:[#allocation2 + $0x1e8] sm:$0xff] %v1380_v61  ;;  %v975_v39 = vmul.f32 %v758_v1, %v8759_v38  ;;  %v948_v19 = vpop.permute.xlu1 %947  ;;  %2990 = vmatpush1.bf16.msra.mxu1 %v6111_v26 }
 0x10a   : > { %v1220_v14 = vor.u32 %v1219_v23, %v1216_v60  ;;  %v974_v55 = vmul.f32 %v753_v43, %v8760_v4  ;;  %1566 = vst [vmem:[#allocation2 + $0x40] sm:$0xff] %v1446_v29  ;;  %v2602_v43 = vrot.slane %v7373_v21, 4  ;;  %1906 = vmatmul.mubr.bf16.gmra.mrb[8].mxu0 %v7365_v8  ;;  %2991 = vmatprep.subr.bf16.mxu1 %v8727_v30 }
 0x10b   : > { %v1517_v10 = vor.u32 %v1516_v37, %v1515_v41  ;;  %v1223_v11 = vshrl.u32 %v7370_v57, 16  ;;  %v1226_v31 = vshll.u32 %v7370_v57, 16  ;;  %v1381_v40 = vrot.slane %v7370_v57, 4 }
 0x10c   : > { %v1221_v58 = vsel %vm1042_vm1, %v7316_v22, %v1220_v14  ;;  %v7387_v25 = vpack.c.bf16 %v975_v39, %v974_v55  ;;  %v1012_v29 = vmul.f32 %v943_v2, %v676_v46  ;;  %v7449_v5 = vsel %vm1341_vm0, %v2605_v0, %v2606_v52 }
 0x10d   : > { %1307 = vst [vmem:[#allocation2 + $0x1e0] sm:$0xff] %v1221_v58  ;;  %v1518_v1 = vsel %vm1439_vm2, %v7322_v47, %v1517_v10  ;;  %v1225_v7 = vrot.slane %v1223_v11, 3  ;;  %v1228_v60 = vrot.slane %v1226_v31, 4  ;;  %v1382_v22 = vsel %vm1341_vm0, %v1379_v9, %v1381_v40  ;;  %2992 = vmatpush1.bf16.msra.mxu1 %v6112_v51  ;;  %v6113_v58 = vld [vmem:[%s8700_s5 + $0x130] sm:$0xff]  }
 0x10e   : > { %1584 = vst [vmem:[#allocation2 + $0x1f0] sm:$0xff] %v1518_v1  ;;  %1434 = vst [vmem:[#allocation2 + $0x200] sm:$0xff] %v1382_v22  ;;  %v1519_v23 = vrot.slane %v1223_v11, 4  ;;  %v1520_v41 = vrot.slane %v1226_v31, 5  ;;  %v1061_v26 = vshrl.u32 %v7387_v25, 16  ;;  %v1064_v61 = vshll.u32 %v7387_v25, 16  ;;  %5909 = vmatprep.mubr.bf16.mxu1 %v1518_v1  ;;  %v958_v11 = vpop.permute.xlu1 %957  ;;  %v953_v31 = vpop.permute.xlu0 %952  ;;  %2993 = vmatprep.subr.bf16.mxu1 %v8727_v30 }
 0x10f   : > { %v7403_v47 = vor.u32 %v1228_v60, %v1225_v7  ;;  %v1345_v37 = vrot.slane %v7387_v25, 4  ;;  %v1013_v9 = vmul.f32 %v948_v19, %v677_v34  ;;  %v1014_v36 = vmul.f32 %v953_v31, %v678_v17  ;;  %v6114_v17 = vld [vmem:[%s8700_s5 + $0x138] sm:$0xff]  }
 0x110   : > { %v7410_v38 = vor.u32 %v1520_v41, %v1519_v23  ;;  %v1063_v39 = vrot.slane %v1061_v26, 3  ;;  %v1066_v4 = vrot.slane %v1064_v61, 4  ;;  %v1447_v55 = vrot.slane %v1061_v26, 4 }
 0x111   : > { %v1230_v1 = vsel %vm1042_vm1, %v1220_v14, %v7403_v47  ;;  %v7422_v53 = vsel %vm1341_vm0, %v1343_v27, %v1345_v37  ;;  %v1448_v56 = vrot.slane %v1064_v61, 5  ;;  %v1039_v34 = vpack.c.bf16 %v1013_v9, %v1012_v29  ;;  %2994 = vmatpush1.bf16.msra.mxu1 %v6113_v58 }
 0x112   : > { %1308 = vst [vmem:[#allocation2 + $0x1f8] sm:$0xff] %v1230_v1  ;;  %v1522_v46 = vsel %vm1439_vm2, %v1517_v10, %v7410_v38  ;;  %v7427_v19 = vor.u32 %v1066_v4, %v1063_v39  ;;  %1416 = vst [vmem:[#allocation2 + $0x50] sm:$0xff] %v7422_v53  ;;  %v1015_v14 = vmul.f32 %v958_v11, %v679_v62  ;;  %1913 = vmatprep.mubr.bf16.mxu0 %v7422_v53  ;;  %v768_v59 = vpop.permute.xlu1 %767  ;;  %v763_v62 = vpop.permute.xlu0 %762 }
 0x113   : > { %1585 = vst [vmem:[#allocation2 + $0x208] sm:$0xff] %v1522_v46  ;;  %v7435_v27 = vor.u32 %v1448_v56, %v1447_v55  ;;  %v1232_v2 = vshrl.u32 %v1039_v34, 16  ;;  %v1235_v51 = vshll.u32 %v1039_v34, 16  ;;  %v1383_v7 = vrot.slane %v1039_v34, 4  ;;  %5910 = vmatmul.mubr.bf16.gmra.mrb[24].mxu1 %v1522_v46  ;;  %2995 = vmatprep.subr.bf16.mxu1 %v8727_v30 }
 0x114   : > { %v7440_v10 = vsel %vm1042_vm1, %v7350_v45, %v7427_v19  ;;  %v7442_v60 = vpack.c.bf16 %v1015_v14, %v1014_v36  ;;  %v2603_v22 = vrot.slane %v7365_v8, 4  ;;  %v977_v57 = vmul.f32 %v768_v59, %v641_v50 }
 0x115   : > { %1290 = vst [vmem:[#allocation2 + $0x48] sm:$0xff] %v7440_v10  ;;  %v1450_v45 = vsel %vm1439_vm2, %v7357_v28, %v7435_v27  ;;  %v1234_v23 = vrot.slane %v1232_v2, 3  ;;  %v1237_v41 = vrot.slane %v1235_v51, 4  ;;  %v1384_v49 = vsel %vm1341_vm0, %v1381_v40, %v1383_v7  ;;  %1914 = vmatmul.mubr.bf16.gmra.mrb[12].mxu0 %v7440_v10  ;;  %2996 = vmatpush1.bf16.msra.mxu1 %v6114_v17 }
 0x116   : > { %1567 = vst [vmem:[#allocation2 + $0x58] sm:$0xff] %v1450_v45  ;;  %1435 = vst [vmem:[#allocation2 + $0x218] sm:$0xff] %v1384_v49  ;;  %v1523_v0 = vrot.slane %v1232_v2, 4  ;;  %v1524_v26 = vrot.slane %v1235_v51, 5  ;;  %v1241_v61 = vshrl.u32 %v7442_v60, 16  ;;  %v1244_v9 = vshll.u32 %v7442_v60, 16  ;;  %v778_v31 = vpop.permute.xlu1 %777  ;;  %v773_v58 = vpop.permute.xlu0 %772  ;;  %3824 = vmatprep.subr.bf16.mxu1 %v8727_v30 }
 0x117   : > { %v1238_v29 = vor.u32 %v1237_v41, %v1234_v23  ;;  %v1385_v28 = vrot.slane %v7442_v60, 4  ;;  %v976_v40 = vmul.f32 %v763_v62, %v640_v48  ;;  %v979_v48 = vmul.f32 %v778_v31, %v643_v18 }
 0x118   : > { %v1525_v39 = vor.u32 %v1524_v26, %v1523_v0  ;;  %v1243_v4 = vrot.slane %v1241_v61, 3  ;;  %v1246_v55 = vrot.slane %v1244_v9, 4  ;;  %v1527_v11 = vrot.slane %v1241_v61, 4 }
 0x119   : > { %v1239_v1 = vsel %vm1042_vm1, %v7403_v47, %v1238_v29  ;;  %v1386_v56 = vsel %vm1341_vm0, %v1383_v7, %v1385_v28  ;;  %v1528_v34 = vrot.slane %v1244_v9, 5  ;;  %v1021_v12 = vpack.c.bf16 %v977_v57, %v976_v40 }
 0x11a   : > { %1309 = vst [vmem:[#allocation2 + $0x210] sm:$0xff] %v1239_v1  ;;  %v1526_v20 = vsel %vm1439_vm2, %v7410_v38, %v1525_v39  ;;  %v7479_v50 = vor.u32 %v1246_v55, %v1243_v4  ;;  %1436 = vst [vmem:[#allocation2 + $0x230] sm:$0xff] %v1386_v56  ;;  %v978_v47 = vmul.f32 %v773_v58, %v642_v63  ;;  %v788_v7 = vpop.permute.xlu1 %787  ;;  %v783_v59 = vpop.permute.xlu0 %782  ;;  %v2613_v24 = vrot.slane %v7422_v53, 4 }
 0x11b   : > { %1586 = vst [vmem:[#allocation2 + $0x220] sm:$0xff] %v1526_v20  ;;  %v7485_v46 = vor.u32 %v1528_v34, %v1527_v11  ;;  %v1070_v14 = vshrl.u32 %v1021_v12, 16  ;;  %v1073_v36 = vshll.u32 %v1021_v12, 16  ;;  %v1347_v2 = vrot.slane %v1021_v12, 4  ;;  %5913 = vmatprep.mubr.bf16.mxu1 %v1526_v20 }
 0x11c   : > { %v1248_v51 = vsel %vm1042_vm1, %v1238_v29, %v7479_v50  ;;  %v1022_v38 = vpack.c.bf16 %v979_v48, %v978_v47  ;;  %v2604_v16 = vsel %vm1341_vm0, %v2602_v43, %v2603_v22  ;;  %v981_v0 = vmul.f32 %v788_v7, %v645_v54  ;;  %v6116_v7 = vld [vmem:[%s8700_s5 + $0x188] sm:$0xff]  }
 0x11d   : > { %1310 = vst [vmem:[#allocation2 + $0x228] sm:$0xff] %v1248_v51  ;;  %v1530_v18 = vsel %vm1439_vm2, %v1525_v39, %v7485_v46  ;;  %v1072_v63 = vrot.slane %v1070_v14, 3  ;;  %v1075_v62 = vrot.slane %v1073_v36, 4  ;;  %v7500_v17 = vsel %vm1341_vm0, %v1345_v37, %v1347_v2 }
 0x11e   : > { %1587 = vst [vmem:[#allocation2 + $0x238] sm:$0xff] %v1530_v18  ;;  %1417 = vst [vmem:[#allocation2 + $0x68] sm:$0xff] %v7500_v17  ;;  %v1451_v45 = vrot.slane %v1070_v14, 4  ;;  %v1452_v21 = vrot.slane %v1073_v36, 5  ;;  %v1079_v23 = vshrl.u32 %v1022_v38, 16  ;;  %v1082_v43 = vshll.u32 %v1022_v38, 16  ;;  %1921 = vmatprep.mubr.bf16.mxu0 %v7500_v17  ;;  %5914 = vmatmul.mubr.bf16.gmra.mrb[28].mxu1 %v1530_v18  ;;  %v968_v29 = vpop.permute.xlu1 %967  ;;  %v963_v57 = vpop.permute.xlu0 %962 }
 0x11f   : > { %v1076_v41 = vor.u32 %v1075_v62, %v1072_v63  ;;  %v1349_v49 = vrot.slane %v1022_v38, 4  ;;  %v980_v25 = vmul.f32 %v783_v59, %v644_v6  ;;  %2997 = vmatprep.mubr.bf16.mxu1 %v7449_v5  ;;  %v8761_v5 = vmax.f32 %v6727_v42, 0.0 }
 0x120   : > { %v1453_v37 = vor.u32 %v1452_v21, %v1451_v45  ;;  %v1081_v26 = vrot.slane %v1079_v23, 3  ;;  %v1084_v61 = vrot.slane %v1082_v43, 4  ;;  %v1455_v9 = vrot.slane %v1079_v23, 4  ;;  %v1314_v23 = vld [vmem:[#allocation2 + $0x258] sm:$0x1f] }
 0x121   : > { %v7511_v40 = vsel %vm1042_vm1, %v7427_v19, %v1076_v41  ;;  %v7514_v39 = vsel %vm1341_vm0, %v1347_v2, %v1349_v49  ;;  %v1456_v32 = vrot.slane %v1082_v43, 5  ;;  %v1023_v54 = vpack.c.bf16 %v981_v0, %v980_v25  ;;  %v1590_v43 = vld [vmem:[#allocation2 + $0x268] sm:$0xf] }
 0x122   : > { %1291 = vst [vmem:[#allocation2 + $0x60] sm:$0xff] %v7511_v40  ;;  %v1454_v33 = vsel %vm1439_vm2, %v7435_v27, %v1453_v37  ;;  %v1085_v6 = vor.u32 %v1084_v61, %v1081_v26  ;;  %1418 = vst [vmem:[#allocation2 + $0x80] sm:$0xff] %v7514_v39  ;;  %v1017_v4 = vmul.f32 %v968_v29, %v8761_v5  ;;  %v8762_v55 = vmax.f32 %v8755_v44, 0.0  ;;  %v6115_v27 = vld [vmem:[%s8700_s5 + $0x180] sm:$0xff]  }
 0x123   : > { %1922 = vmatmul.mubr.bf16.gmra.mrb[16].mxu0 %v7511_v40  ;;  %1568 = vst [vmem:[#allocation2 + $0x70] sm:$0xff] %v1454_v33  ;;  %v1457_v11 = vor.u32 %v1456_v32, %v1455_v9  ;;  %v1088_v31 = vshrl.u32 %v1023_v54, 16  ;;  %v1091_v58 = vshll.u32 %v1023_v54, 16  ;;  %v1351_v1 = vrot.slane %v1023_v54, 4 }
 0x124   : > { %v1016_v19 = vmul.f32 %v963_v57, %v8762_v55  ;;  %1929 = vmatprep.mubr.bf16.mxu0 %v7514_v39  ;;  %v7530_v56 = vsel %vm1042_vm1, %v1076_v41, %v1085_v6  ;;  %v2614_v44 = vsel %vm1341_vm0, %v2606_v52, %v2613_v24  ;;  %v2611_v34 = vrot.slane %v7440_v10, 4  ;;  %v6119_v55 = vld [vmem:[%s8700_s5 + $0x1a0] sm:$0xff]  }
 0x125   : > { %1292 = vst [vmem:[#allocation2 + $0x78] sm:$0xff] %v7530_v56  ;;  %v1458_v12 = vsel %vm1439_vm2, %v1453_v37, %v1457_v11  ;;  %v1090_v20 = vrot.slane %v1088_v31, 3  ;;  %v1093_v48 = vrot.slane %v1091_v58, 4  ;;  %v7541_v47 = vsel %vm1341_vm0, %v1349_v49, %v1351_v1 }
 0x126   : > { %v1041_v42 = vpack.c.bf16 %v1017_v4, %v1016_v19  ;;  %1569 = vst [vmem:[#allocation2 + $0x88] sm:$0xff] %v1458_v12  ;;  %v8763_v14 = vrot.slane %v6992_v35, 4  ;;  %1419 = vst [vmem:[#allocation2 + $0x98] sm:$0xff] %v7541_v47  ;;  %v1459_v13 = vrot.slane %v1088_v31, 4  ;;  %v1460_v52 = vrot.slane %v1091_v58, 5  ;;  %2998 = vmatmul.mubr.bf16.vlgmr.msra.gmra.mrb[32].mxu1 %v2604_v16  ;;  %v6120_v19 = vld [vmem:[%s8700_s5 + $0x1a8] sm:$0xff]  }
 0x127   : > { %v1094_v2 = vor.u32 %v1093_v48, %v1090_v20  ;;  %3005 = vmatprep.mubr.bf16.mxu1 %v2614_v44  ;;  %3825 = vmatpush1.bf16.msra.mxu1 %v6115_v27  ;;  %v2612_v35 = vsel %vm1341_vm0, %v2603_v22, %v2611_v34  ;;  %v2619_v16 = vrot.slane %v7500_v17, 4  ;;  %v2617_v49 = vrot.slane %v7511_v40, 4  ;;  %v6121_v31 = vld [vmem:[%s8700_s5 + $0x1b0] sm:$0xff]   ;;  %v6122_v58 = vld [vmem:[%s8700_s5 + $0x1b8] sm:$0xff]   ;;  %v7645_v27 = vld [vmem:[%s8700_s5 + $0x140] sm:$0xff]  }
 0x128   : > { %v7546_v36 = vsel %vm1341_vm0, %v1351_v1, %v8763_v14  ;;  %v1250_v10 = vshrl.u32 %v1041_v42, 16  ;;  %v1253_v51 = vshll.u32 %v1041_v42, 16  ;;  %v1387_v38 = vrot.slane %v1041_v42, 4  ;;  %3826 = vmatprep.subr.bf16.mxu1 %v8727_v30  ;;  %v1617_v1 = vld [vmem:[#allocation2 + $0xc0] sm:$0xff]  ;;  %5917 = vmatprep.subr.bf16.mxu0 %v7645_v27  ;;  %v6124_v44 = vld [vmem:[%s8700_s5 + $0x1c8] sm:$0xff]   ;;  %v1624_v12 = vld [vmem:[#allocation2 + $0xf8] sm:$0xff] }
 0x129   : > { %1420 = vst [vmem:[#allocation2 + $0xb0] sm:$0xff] %v7546_v36  ;;  %v1461_v59 = vor.u32 %v1460_v52, %v1459_v13  ;;  %v1095_v62 = vsel %vm1042_vm1, %v1085_v6, %v1094_v2  ;;  %v7561_v45 = vsel %vm1042_vm1, %v1094_v2, %v7024_v15  ;;  %v2625_v0 = vrot.slane %v7514_v39, 4  ;;  %v6123_v42 = vld [vmem:[%s8700_s5 + $0x1c0] sm:$0xff]   ;;  %v6125_v20 = vld [vmem:[%s8700_s5 + $0x1d0] sm:$0xff]   ;;  %v6126_v14 = vld [vmem:[%s8700_s5 + $0x1d8] sm:$0xff]  }
 0x12a   : > { %v1252_v18 = vrot.slane %v1250_v10, 3  ;;  %v1531_v63 = vrot.slane %v1250_v10, 4  ;;  %v1255_v8 = vrot.slane %v1253_v51, 4  ;;  %v7566_v22 = vsel %vm1341_vm0, %v1385_v28, %v1387_v38  ;;  %1438 = vst [vmem:[#allocation2 + $0x260] sm:$0xf] %v1387_v38  ;;  %1293 = vst [vmem:[#allocation2 + $0x90] sm:$0xff] %v1095_v62 }
 0x12b   : > { %1294 = vst [vmem:[#allocation2 + $0xa8] sm:$0xff] %v7561_v45  ;;  %v1462_v17 = vsel %vm1439_vm2, %v1457_v11, %v1461_v59  ;;  %v1466_v21 = vsel %vm1439_vm2, %v1461_v59, %v7031_v3  ;;  %1437 = vst [vmem:[#allocation2 + $0x248] sm:$0xff] %v7566_v22  ;;  %v1532_v60 = vrot.slane %v1253_v51, 5  ;;  %1930 = vmatmul.mubr.bf16.gmra.mrb[20].mxu0 %v7530_v56  ;;  %3827 = vmatpush1.bf16.msra.mxu1 %v6116_v7  ;;  %v1618_v11 = vld [vmem:[#allocation2 + $0xc8] sm:$0xff]  ;;  %v1623_v13 = vld [vmem:[#allocation2 + $0xf0] sm:$0xff] }
 0x12c   : > { %v2620_v28 = vsel %vm1341_vm0, %v2613_v24, %v2619_v16  ;;  %1570 = vst [vmem:[#allocation2 + $0xa0] sm:$0xff] %v1462_v17  ;;  %1571 = vst [vmem:[#allocation2 + $0xb8] sm:$0xff] %v1466_v21  ;;  %v1256_v41 = vor.u32 %v1255_v8, %v1252_v18  ;;  %1937 = vmatprep.mubr.bf16.mxu0 %v7541_v47  ;;  %v2623_v53 = vrot.slane %v7530_v56, 4  ;;  %v6117_v24 = vld [vmem:[%s8700_s5 + $0x190] sm:$0xff]   ;;  %3828 = vmatprep.subr.bf16.mxu1 %v8727_v30  ;;  %v1621_v56 = vld [vmem:[#allocation2 + $0xe0] sm:$0xff] }
 0x12d   : > { %v1533_v25 = vor.u32 %v1532_v60, %v1531_v63  ;;  %v2631_v37 = vrot.slane %v7541_v47, 4  ;;  %v2629_v26 = vrot.slane %v1095_v62, 4  ;;  %v2637_v61 = vrot.slane %v7546_v36, 4  ;;  %v1627_v52 = vld [vmem:[#allocation2 + $0x110] sm:$0xff]  ;;  %v1626_v7 = vld [vmem:[#allocation2 + $0x108] sm:$0xff]  ;;  %v6137_v8 = vld [vmem:[%s8700_s5 + $0x1f8] sm:$0xff]  }
 0x12e   : > { %v7601_v9 = vsel %vm1042_vm1, %v7479_v50, %v1256_v41  ;;  %v1315_v29 = vsel %vm7574_vm10, %v1256_v41, %v1314_v23  ;;  %v2618_v57 = vsel %vm1341_vm0, %v2611_v34, %v2617_v49  ;;  %v2626_v40 = vsel %vm1341_vm0, %v2619_v16, %v2625_v0  ;;  %3006 = vmatmul.mubr.bf16.gmra.mrb[36].mxu1 %v2612_v35  ;;  %v1620_v34 = vld [vmem:[#allocation2 + $0xd8] sm:$0xff]  ;;  %v6129_v35 = vld [vmem:[%s8700_s5 + $0x1e8] sm:$0xff]   ;;  %v6133_v16 = vld [vmem:[%s8700_s5 + $0x1f0] sm:$0xff]  }
 0x12f   : > { %1311 = vst [vmem:[#allocation2 + $0x240] sm:$0xff] %v7601_v9  ;;  %1316 = vst [vmem:[#allocation2 + $0x258] sm:$0x1f] %v1315_v29  ;;  %v1534_v39 = vsel %vm1439_vm2, %v7485_v46, %v1533_v25  ;;  %v1591_v32 = vsel %vm7585_vm11, %v1533_v25, %v1590_v43  ;;  %v2624_v50 = vsel %vm1341_vm0, %v2617_v49, %v2623_v53  ;;  %3013 = vmatprep.mubr.bf16.mxu1 %v2620_v28  ;;  %v6118_v46 = vld [vmem:[%s8700_s5 + $0x198] sm:$0xff]   ;;  %v1630_v18 = vld [vmem:[#allocation2 + $0x128] sm:$0xff] }
 0x130   : > { %v2632_v54 = vsel %vm1341_vm0, %v2625_v0, %v2631_v37  ;;  %1588 = vst [vmem:[#allocation2 + $0x250] sm:$0xff] %v1534_v39  ;;  %1592 = vst [vmem:[#allocation2 + $0x268] sm:$0xf] %v1591_v32  ;;  %3829 = vmatpush1.bf16.msra.mxu1 %v6117_v24  ;;  %v2630_v33 = vsel %vm1341_vm0, %v2623_v53, %v2629_v26  ;;  %v2638_v6 = vsel %vm1341_vm0, %v2631_v37, %v2637_v61  ;;  %v1629_v17 = vld [vmem:[#allocation2 + $0x120] sm:$0xff]  ;;  %v1632_v3 = vld [vmem:[#allocation2 + $0x138] sm:$0xff] }
 0x131   : > { %v2635_v5 = vrot.slane %v7561_v45, 4  ;;  %3830 = vmatprep.subr.bf16.mxu1 %v8727_v30  ;;  %v2643_v48 = vrot.slane %v1618_v11, 4  ;;  %v2649_v10 = vrot.slane %v1621_v56, 4  ;;  %v2641_v2 = vrot.slane %v1617_v1, 4  ;;  %v1633_v15 = vld [vmem:[#allocation2 + $0x140] sm:$0xff]  ;;  %v1636_v49 = vld [vmem:[#allocation2 + $0x158] sm:$0xff] }
 0x132   : > { %v2647_v59 = vrot.slane %v1620_v34, 4  ;;  %v2655_v63 = vrot.slane %v1624_v12, 4  ;;  %v2653_v21 = vrot.slane %v1623_v13, 4  ;;  %v2661_v23 = vrot.slane %v1627_v52, 4  ;;  %v1639_v29 = vld [vmem:[#allocation2 + $0x170] sm:$0xff]  ;;  %v1638_v32 = vld [vmem:[#allocation2 + $0x168] sm:$0xff] }
 0x133   : > { %v2636_v4 = vsel %vm1341_vm0, %v2629_v26, %v2635_v5  ;;  %1938 = vmatmul.mubr.bf16.gmra.mrb[24].mxu0 %v1095_v62  ;;  %v2644_v47 = vsel %vm1341_vm0, %v2637_v61, %v2643_v48  ;;  %v2642_v51 = vsel %vm1341_vm0, %v2635_v5, %v2641_v2  ;;  %v2650_v38 = vsel %vm1341_vm0, %v2643_v48, %v2649_v10  ;;  %v1635_v26 = vld [vmem:[#allocation2 + $0x150] sm:$0xff]  ;;  %v1641_v5 = vld [vmem:[#allocation2 + $0x180] sm:$0xff] }
 0x134   : > { %1945 = vmatprep.mubr.bf16.mxu0 %v7546_v36  ;;  %3831 = vmatpush1.bf16.msra.mxu1 %v6118_v46  ;;  %v6127_v36 = vld [vmem:[%s8700_s5 + $0x1e0] sm:$0xff]   ;;  %v2648_v62 = vsel %vm1341_vm0, %v2641_v2, %v2647_v59  ;;  %v2654_v60 = vsel %vm1341_vm0, %v2647_v59, %v2653_v21  ;;  %v2662_v28 = vsel %vm1341_vm0, %v2655_v63, %v2661_v23  ;;  %v2659_v43 = vrot.slane %v1626_v7, 4  ;;  %v1651_v48 = vld [vmem:[#allocation2 + $0x1d0] sm:$0xff]  ;;  %v1654_v2 = vld [vmem:[#allocation2 + $0x1e8] sm:$0xff] }
 0x135   : > { %3832 = vmatprep.subr.bf16.mxu1 %v8727_v30  ;;  %v2665_v61 = vrot.slane %v1629_v17, 4  ;;  %v1657_v59 = vld [vmem:[#allocation2 + $0x200] sm:$0xff] }
 0x136   : > { %3014 = vmatmul.mubr.bf16.gmra.mrb[40].mxu1 %v2618_v57  ;;  %v2660_v24 = vsel %vm1341_vm0, %v2653_v21, %v2659_v43  ;;  %v2673_v57 = vrot.slane %v1633_v15, 4 }
 0x137   : > { %3021 = vmatprep.mubr.bf16.mxu1 %v2626_v40  ;;  %v2666_v40 = vsel %vm1341_vm0, %v2659_v43, %v2665_v61  ;;  %v1659_v43 = vld [vmem:[#allocation2 + $0x210] sm:$0xff] }
 0x138   : > { %3833 = vmatpush1.bf16.msra.mxu1 %v6119_v55  ;;  %v1645_v55 = vld [vmem:[#allocation2 + $0x1a0] sm:$0xff] }
 0x139   : > { %3834 = vmatprep.subr.bf16.mxu1 %v8727_v30 }
 0x13b   : > { %1946 = vmatmul.mubr.bf16.gmra.mrb[28].mxu0 %v7561_v45  ;;  %v2656_v45 = vsel %vm1341_vm0, %v2649_v10, %v2655_v63 }
 0x13c   : > { %1953 = vmatprep.mubr.bf16.mxu0 %v1618_v11  ;;  %3835 = vmatpush1.bf16.msra.mxu1 %v6120_v19  ;;  %v2685_v19 = vrot.slane %v1639_v29, 4 }
 0x13d   : > { %3836 = vmatprep.subr.bf16.mxu1 %v8727_v30 }
 0x13e   : > { %3022 = vmatmul.mubr.bf16.gmra.mrb[44].mxu1 %v2624_v50  ;;  %v2671_v50 = vrot.slane %v1632_v3, 4 }
 0x13f   : > { %3029 = vmatprep.mubr.bf16.mxu1 %v2632_v54  ;;  %v1642_v54 = vld [vmem:[#allocation2 + $0x188] sm:$0xff] }
 0x140   : > { %3837 = vmatpush1.bf16.msra.mxu1 %v6121_v31 }
 0x141   : > { %3838 = vmatprep.subr.bf16.mxu1 %v8727_v30 }
 0x143   : > { %1954 = vmatmul.mubr.bf16.gmra.mrb[32].mxu0 %v1617_v1  ;;  %v2683_v1 = vrot.slane %v1638_v32, 4 }
 0x144   : > { %1961 = vmatprep.mubr.bf16.mxu0 %v1621_v56  ;;  %3839 = vmatpush1.bf16.msra.mxu1 %v6122_v58  ;;  %v1644_v58 = vld [vmem:[#allocation2 + $0x198] sm:$0xff] }
 0x145   : > { %3840 = vmatprep.subr.bf16.mxu1 %v8727_v30  ;;  %v1648_v56 = vld [vmem:[#allocation2 + $0x1b8] sm:$0xff]  ;;  %v2695_v10 = vrot.slane %v1644_v58, 4 }
 0x146   : > { %3030 = vmatmul.mubr.bf16.gmra.mrb[48].mxu1 %v2630_v33  ;;  %v2679_v33 = vrot.slane %v1636_v49, 4 }
 0x147   : > { %3037 = vmatprep.mubr.bf16.mxu1 %v2638_v6  ;;  %v2672_v6 = vsel %vm1341_vm0, %v2665_v61, %v2671_v50 }
 0x148   : > { %3841 = vmatpush1.bf16.msra.mxu1 %v6123_v42  ;;  %v2680_v46 = vsel %vm1341_vm0, %v2673_v57, %v2679_v33  ;;  %v2686_v31 = vsel %vm1341_vm0, %v2679_v33, %v2685_v19  ;;  %v2691_v42 = vrot.slane %v1642_v54, 4 }
 0x149   : > { %3842 = vmatprep.subr.bf16.mxu1 %v8727_v30 }
 0x14b   : > { %1962 = vmatmul.mubr.bf16.gmra.mrb[36].mxu0 %v1620_v34  ;;  %v2692_v34 = vsel %vm1341_vm0, %v2685_v19, %v2691_v42  ;;  %v2725_v19 = vrot.slane %v1659_v43, 4 }
 0x14c   : > { %1969 = vmatprep.mubr.bf16.mxu0 %v1624_v12  ;;  %3843 = vmatpush1.bf16.msra.mxu1 %v6124_v44  ;;  %v1647_v12 = vld [vmem:[#allocation2 + $0x1b0] sm:$0xff] }
 0x14d   : > { %3844 = vmatprep.subr.bf16.mxu1 %v8727_v30 }
 0x14e   : > { %3038 = vmatmul.mubr.bf16.gmra.mrb[52].mxu1 %v2636_v4  ;;  %v2677_v4 = vrot.slane %v1635_v26, 4 }
 0x14f   : > { %3045 = vmatprep.mubr.bf16.mxu1 %v2644_v47  ;;  %v7689_v41 = vpop.f32.mrb[0].mxu0  ;;  %v2697_v47 = vrot.slane %v1645_v55, 4 }
 0x150   : > { %3845 = vmatpush1.bf16.msra.mxu1 %v6125_v20  ;;  %8768 = vst [vmem:[#allocation5_spill] sm:$0xff] %v7689_v41  ;;  %v1893_v0 = vpop.f32.mrb[1].mxu0  ;;  %v2678_v11 = vsel %vm1341_vm0, %v2671_v50, %v2677_v4  ;;  %v2684_v44 = vsel %vm1341_vm0, %v2677_v4, %v2683_v1  ;;  %v2689_v20 = vrot.slane %v1641_v5, 4  ;;  %v3589_v41 = vld [vmem:[#allocation2 + $0x138] sm:$0xff] }
 0x151   : > { %3846 = vmatprep.subr.bf16.mxu1 %v8727_v30  ;;  %v7691_v53 = vpop.f32.mrb[2].mxu0  ;;  %v2721_v0 = vrot.slane %v1657_v59, 4 }
 0x152   : > { %8769 = vst [vmem:[#allocation6_spill] sm:$0xff] %v7691_v53  ;;  %v1896_v25 = vpop.f32.mrb[3].mxu0 }
 0x153   : > { %1970 = vmatmul.mubr.bf16.gmra.mrb[40].mxu0 %v1623_v13  ;;  %v2698_v13 = vsel %vm1341_vm0, %v2691_v42, %v2697_v47 }
 0x154   : > { %1977 = vmatprep.mubr.bf16.mxu0 %v1627_v52  ;;  %3847 = vmatpush1.bf16.msra.mxu1 %v6126_v14  ;;  %v2690_v14 = vsel %vm1341_vm0, %v2683_v1, %v2689_v20  ;;  %v1650_v52 = vld [vmem:[#allocation2 + $0x1c8] sm:$0xff] }
 0x155   : > { %3848 = vmatprep.subr.bf16.mxu1 %v8727_v30 }
 0x156   : > { %3046 = vmatmul.mubr.bf16.gmra.mrb[56].mxu1 %v2642_v51  ;;  %v2696_v51 = vsel %vm1341_vm0, %v2689_v20, %v2695_v10  ;;  %v7765_v20 = vld [vmem:[#allocation2 + $0x58] sm:$0xff] }
 0x157   : > { %3053 = vmatprep.mubr.bf16.mxu1 %v2650_v38 }
 0x158   : > { %3849 = vmatpush1.bf16.msra.mxu1 %v6127_v36  ;;  %v2703_v36 = vrot.slane %v1648_v56, 4 }
 0x159   : > { %3850 = vmatprep.subr.bf16.mxu1 %v8727_v30 }
 0x15a   : > { %v2704_v38 = vsel %vm1341_vm0, %v2697_v47, %v2703_v36  ;;  %v7769_v47 = vld [vmem:[#allocation2 + $0x70] sm:$0xff] }
 0x15b   : > { %1978 = vmatmul.mubr.bf16.gmra.mrb[44].mxu0 %v1626_v7  ;;  %v2701_v7 = vrot.slane %v1647_v12, 4 }
 0x15c   : > { %1985 = vmatprep.mubr.bf16.mxu0 %v1630_v18  ;;  %3851 = vmatpush1.bf16.msra.mxu1 %v6129_v35  ;;  %v1653_v35 = vld [vmem:[#allocation2 + $0x1e0] sm:$0xff] }
 0x15d   : > { %3852 = vmatprep.subr.bf16.mxu1 %v8727_v30  ;;  %v2702_v63 = vsel %vm1341_vm0, %v2695_v10, %v2701_v7 }
 0x15e   : > { %3054 = vmatmul.mubr.bf16.gmra.mrb[60].mxu1 %v2648_v62  ;;  %v1656_v62 = vld [vmem:[#allocation2 + $0x1f8] sm:$0xff] }
 0x15f   : > { %3061 = vmatprep.mubr.bf16.mxu1 %v2656_v45  ;;  %v2707_v45 = vrot.slane %v1650_v52, 4 }
 0x160   : > { %3853 = vmatpush1.bf16.msra.mxu1 %v6133_v16 }
 0x161   : > { %3854 = vmatprep.subr.bf16.mxu1 %v8727_v30  ;;  %v2667_v30 = vrot.slane %v1630_v18, 4  ;;  %v2709_v18 = vrot.slane %v1651_v48, 4  ;;  %v2708_v21 = vsel %vm1341_vm0, %v2701_v7, %v2707_v45  ;;  %v7789_v7 = vld [vmem:[#allocation2 + $0x88] sm:$0xff] }
 0x163   : > { %1986 = vmatmul.mubr.bf16.gmra.mrb[48].mxu0 %v1629_v17  ;;  %v2668_v37 = vsel %vm1341_vm0, %v2661_v23, %v2667_v30  ;;  %v2674_v39 = vsel %vm1341_vm0, %v2667_v30, %v2673_v57  ;;  %v2710_v16 = vsel %vm1341_vm0, %v2703_v36, %v2709_v18  ;;  %v2715_v17 = vrot.slane %v1654_v2, 4  ;;  %v1663_v30 = vld [vmem:[#allocation2 + $0x230] sm:$0xff] }
 0x164   : > { %1993 = vmatprep.mubr.bf16.mxu0 %v1633_v15  ;;  %3855 = vmatpush1.bf16.msra.mxu1 %v6137_v8  ;;  %v1660_v8 = vld [vmem:[#allocation2 + $0x218] sm:$0xff] }
 0x165   : > { %v2716_v23 = vsel %vm1341_vm0, %v2709_v18, %v2715_v17  ;;  %v7793_v18 = vld [vmem:[#allocation2 + $0xa0] sm:$0xff] }
 0x166   : > { %3062 = vmatmul.mubr.bf16.gmra.mrb[64].mxu1 %v2654_v60 }
 0x167   : > { %3069 = vmatprep.mubr.bf16.mxu1 %v2662_v28 }
 0x16b   : > { %1994 = vmatmul.mubr.bf16.gmra.mrb[52].mxu0 %v1632_v3 }
 0x16c   : > { %2001 = vmatprep.mubr.bf16.mxu0 %v1636_v49  ;;  %v2713_v49 = vrot.slane %v1653_v35, 4 }
 0x16e   : > { %3070 = vmatmul.mubr.bf16.gmra.mrb[68].mxu1 %v2660_v24  ;;  %v2714_v24 = vsel %vm1341_vm0, %v2707_v45, %v2713_v49  ;;  %v2405_v45 = vld [vmem:[#allocation2 + $0x28] sm:$0xf0] }
 0x16f   : > { %3077 = vmatprep.mubr.bf16.mxu1 %v2668_v37  ;;  %v2722_v37 = vsel %vm1341_vm0, %v2715_v17, %v2721_v0  ;;  %v2475_v17 = vld [vmem:[#allocation2 + $0x258] sm:$0xf] }
 0x173   : > { %2002 = vmatmul.mubr.bf16.gmra.mrb[56].mxu0 %v1635_v26 }
 0x174   : > { %2009 = vmatprep.mubr.bf16.mxu0 %v1639_v29  ;;  %v1595_v29 = vld [vmem:[#allocation2 + $0x10] sm:$0xff] }
 0x176   : > { %3078 = vmatmul.mubr.bf16.gmra.mrb[72].mxu1 %v2666_v40  ;;  %v7729_v40 = vld [vmem:[#allocation2 + $0x228] sm:$0xff] }
 0x177   : > { %3085 = vmatprep.mubr.bf16.mxu1 %v2674_v39  ;;  %v2719_v39 = vrot.slane %v1656_v62, 4 }
 0x179   : > { %v2720_v50 = vsel %vm1341_vm0, %v2713_v49, %v2719_v39  ;;  %v2726_v1 = vsel %vm1341_vm0, %v2719_v39, %v2725_v19 }
 0x17b   : > { %2010 = vmatmul.mubr.bf16.gmra.mrb[60].mxu0 %v1638_v32  ;;  %v2727_v32 = vrot.slane %v1660_v8, 4 }
 0x17c   : > { %2017 = vmatprep.mubr.bf16.mxu0 %v1642_v54 }
 0x17d   : > { %v2728_v33 = vsel %vm1341_vm0, %v2721_v0, %v2727_v32  ;;  %v7809_v0 = vld [vmem:[#allocation2 + $0xb8] sm:$0xff] }
 0x17e   : > { %3086 = vmatmul.mubr.bf16.gmra.mrb[76].mxu1 %v2672_v6 }
 0x17f   : > { %3093 = vmatprep.mubr.bf16.mxu1 %v2680_v46 }
 0x183   : > { %2018 = vmatmul.mubr.bf16.gmra.mrb[64].mxu0 %v1641_v5  ;;  %v6130_v5 = vld [vmem:[%s8700_s5 + $0x148] sm:$0xff]  }
 0x184   : > { %2025 = vmatprep.mubr.bf16.mxu0 %v1645_v55  ;;  %v1598_v55 = vld [vmem:[#allocation2 + $0x28] sm:$0xff] }
 0x186   : > { %3094 = vmatmul.mubr.bf16.gmra.mrb[80].mxu1 %v2678_v11  ;;  %v7745_v11 = vld [vmem:[#allocation2 + $0x40] sm:$0xff] }
 0x187   : > { %3101 = vmatprep.mubr.bf16.mxu1 %v2686_v31  ;;  %v2733_v31 = vrot.slane %v1663_v30, 4 }
 0x189   : > { %v2734_v42 = vsel %vm1341_vm0, %v2727_v32, %v2733_v31 }
 0x18b   : > { %2026 = vmatmul.mubr.bf16.gmra.mrb[68].mxu0 %v1644_v58  ;;  %v6131_v58 = vld [vmem:[%s8700_s5 + $0x150] sm:$0xff]  }
 0x18c   : > { %2033 = vmatprep.mubr.bf16.mxu0 %v1648_v56 }
 0x18e   : > { %3102 = vmatmul.mubr.bf16.gmra.mrb[84].mxu1 %v2684_v44 }
 0x18f   : > { %3109 = vmatprep.mubr.bf16.mxu1 %v2692_v34 }
 0x193   : > { %2034 = vmatmul.mubr.bf16.gmra.mrb[72].mxu0 %v1647_v12 }
 0x194   : > { %2041 = vmatprep.mubr.bf16.mxu0 %v1651_v48  ;;  %v2731_v48 = vrot.slane %v7729_v40, 4 }
 0x196   : > { %3110 = vmatmul.mubr.bf16.gmra.mrb[88].mxu1 %v2690_v14  ;;  %v2739_v14 = vrot.slane %v7566_v22, 4  ;;  %v2476_v22 = vld [vmem:[#allocation2 + $0x260] sm:$0xf] }
 0x197   : > { %3117 = vmatprep.mubr.bf16.mxu1 %v2698_v13  ;;  %v6134_v13 = vld [vmem:[%s8700_s5 + $0x160] sm:$0xff]  }
 0x19b   : > { %2042 = vmatmul.mubr.bf16.gmra.mrb[76].mxu0 %v1650_v52  ;;  %v2732_v52 = vsel %vm1341_vm0, %v2725_v19, %v2731_v48  ;;  %v3560_v19 = vld [vmem:[#allocation2 + $0x50] sm:$0xff] }
 0x19c   : > { %2049 = vmatprep.mubr.bf16.mxu0 %v1654_v2  ;;  %v2740_v2 = vsel %vm1341_vm0, %v2733_v31, %v2739_v14 }
 0x19e   : > { %3118 = vmatmul.mubr.bf16.gmra.mrb[92].mxu1 %v2696_v51 }
 0x19f   : > { %3125 = vmatprep.mubr.bf16.mxu1 %v2704_v38  ;;  %v6135_v38 = vld [vmem:[%s8700_s5 + $0x168] sm:$0xff]  }
 0x1a3   : > { %2050 = vmatmul.mubr.bf16.gmra.mrb[80].mxu0 %v1653_v35 }
 0x1a4   : > { %2057 = vmatprep.mubr.bf16.mxu0 %v1657_v59  ;;  %v2737_v59 = vrot.slane %v7601_v9, 4  ;;  %v2609_v9 = vrot.slane %v7745_v11, 4 }
 0x1a5   : > { %v7710_v15 = vpop.f32.mrb[0].mxu1 }
 0x1a6   : > { %3126 = vmatmul.mubr.bf16.gmra.mrb[96].mxu1 %v2702_v63  ;;  %v7713_v60 = vpop.f32.mrb[1].mxu1  ;;  %v2745_v63 = vrot.slane %v2476_v22, 4 }
 0x1a7   : > { %3133 = vmatprep.mubr.bf16.mxu1 %v2710_v16  ;;  %v7715_v28 = vpop.f32.mrb[2].mxu1  ;;  %v6136_v16 = vld [vmem:[%s8700_s5 + $0x170] sm:$0xff]  }
 0x1a8   : > { %v7717_v3 = vpop.f32.mrb[3].mxu1 }
 0x1ab   : > { %2058 = vmatmul.mubr.bf16.gmra.mrb[84].mxu0 %v1656_v62  ;;  %v2738_v62 = vsel %vm1341_vm0, %v2731_v48, %v2737_v59 }
 0x1ac   : > { %2065 = vmatprep.mubr.bf16.mxu0 %v1660_v8  ;;  %v2746_v8 = vsel %vm1341_vm0, %v2739_v14, %v2745_v63 }
 0x1ae   : > { %3134 = vmatmul.mubr.bf16.gmra.mrb[100].mxu1 %v2708_v21 }
 0x1af   : > { %3141 = vmatprep.mubr.bf16.mxu1 %v2716_v23  ;;  %v7720_v25 = vpop.f32.mrb[4].mxu1  ;;  %v2608_v23 = vrot.slane %v2405_v45, 4  ;;  %v6142_v45 = vld [vmem:[%s8700_s5 + $0x218] sm:$0xff]  }
 0x1b0   : > { %v7723_v26 = vpop.f32.mrb[5].mxu1 }
 0x1b1   : > { %v7725_v61 = vpop.f32.mrb[6].mxu1 }
 0x1b2   : > { %v7727_v57 = vpop.f32.mrb[7].mxu1 }
 0x1b3   : > { %2066 = vmatmul.mubr.bf16.gmra.mrb[88].mxu0 %v1659_v43  ;;  %v6138_v43 = vld [vmem:[%s8700_s5 + $0x178] sm:$0xff]  }
 0x1b4   : > { %2073 = vmatprep.mubr.bf16.mxu0 %v1663_v30 }
 0x1b6   : > { %3142 = vmatmul.mubr.bf16.gmra.mrb[104].mxu1 %v2714_v24  ;;  %v2743_v24 = vrot.slane %v2475_v17, 4 }
 0x1b7   : > { %3149 = vmatprep.mubr.bf16.mxu1 %v2722_v37 }
 0x1b8   : > { %v7733_v54 = vpop.f32.mrb[8].mxu1 }
 0x1b9   : > { %v7736_v6 = vpop.f32.mrb[9].mxu1 }
 0x1ba   : > { %v7738_v46 = vpop.f32.mrb[10].mxu1 }
 0x1bb   : > { %2074 = vmatmul.mubr.bf16.gmra.mrb[92].mxu0 %v7729_v40  ;;  %v7743_v4 = vpop.f32.mrb[11].mxu1  ;;  %v2610_v40 = vsel %vm1341_vm0, %v2608_v23, %v2609_v9 }
 0x1bc   : > { %5869 = vmatprep.mubr.bf16.mxu0 %v1595_v29 }
 0x1be   : > { %3150 = vmatmul.mubr.bf16.gmra.mrb[108].mxu1 %v2720_v50 }
 0x1bf   : > { %3157 = vmatprep.mubr.bf16.mxu1 %v2728_v33  ;;  %v6139_v33 = vld [vmem:[%s8700_s5 + $0x200] sm:$0xff]  }
 0x1c1   : > { %v7753_v56 = vpop.f32.mrb[12].mxu1 }
 0x1c2   : > { %v7756_v44 = vpop.f32.mrb[13].mxu1 }
 0x1c3   : > { %5870 = vmatmul.mubr.bf16.vlgmr.msra.gmra.mrb[96].mxu0 %v1598_v55  ;;  %v7758_v34 = vpop.f32.mrb[14].mxu1  ;;  %v2615_v55 = vrot.slane %v7765_v20, 4 }
 0x1c4   : > { %5918 = vmatpush3.bf16.msra.mxu0 %v7645_v27  ;;  %5873 = vmatprep.mubr.bf16.mxu0 %v7745_v11  ;;  %v6132_v27 = vld [vmem:[%s8700_s5 + $0x158] sm:$0xff]   ;;  %v7763_v12 = vpop.f32.mrb[15].mxu1  ;;  %v2621_v11 = vrot.slane %v7769_v47, 4 }
 0x1c5   : > { %5919 = vmatprep.subr.bf16.mxu0 %v6130_v5 }
 0x1c6   : > { %3158 = vmatmul.mubr.bf16.gmra.mrb[112].mxu1 %v2726_v1  ;;  %v2622_v48 = vsel %vm1341_vm0, %v2615_v55, %v2621_v11 }
 0x1c7   : > { %3165 = vmatprep.mubr.bf16.mxu1 %v2734_v42  ;;  %v2616_v42 = vsel %vm1341_vm0, %v2609_v9, %v2615_v55 }
 0x1c8   : > { %5920 = vmatpush3.bf16.msra.mxu0 %v6130_v5  ;;  %v2744_v5 = vsel %vm1341_vm0, %v2737_v59, %v2743_v24  ;;  %v2633_v59 = vrot.slane %v7793_v18, 4  ;;  %v6143_v24 = vld [vmem:[%s8700_s5 + $0x220] sm:$0xff]  }
 0x1c9   : > { %5921 = vmatprep.subr.bf16.mxu0 %v6131_v58 }
 0x1ca   : > { %v7777_v10 = vpop.f32.mrb[16].mxu1 }
 0x1cb   : > { %5874 = vmatmul.mubr.bf16.gmra.mrb[100].mxu0 %v7765_v20  ;;  %v7780_v36 = vpop.f32.mrb[17].mxu1 }
 0x1cc   : > { %5922 = vmatpush3.bf16.msra.mxu0 %v6131_v58  ;;  %5877 = vmatprep.mubr.bf16.mxu0 %v7769_v47  ;;  %v7782_v51 = vpop.f32.mrb[18].mxu1  ;;  %v6140_v58 = vld [vmem:[%s8700_s5 + $0x208] sm:$0xff]  }
 0x1cd   : > { %5923 = vmatprep.subr.bf16.mxu0 %v6132_v27  ;;  %v7787_v35 = vpop.f32.mrb[19].mxu1 }
 0x1ce   : > { %3166 = vmatmul.mubr.bf16.gmra.mrb[116].mxu1 %v2732_v52  ;;  %v3559_v52 = vld [vmem:[#allocation2 + $0x48] sm:$0xff] }
 0x1cf   : > { %3173 = vmatprep.mubr.bf16.mxu1 %v2740_v2  ;;  %v2627_v2 = vrot.slane %v7789_v7, 4 }
 0x1d0   : > { %5924 = vmatpush3.bf16.msra.mxu0 %v6132_v27 }
 0x1d1   : > { %5925 = vmatprep.subr.bf16.mxu0 %v6134_v13  ;;  %v2628_v17 = vsel %vm1341_vm0, %v2621_v11, %v2627_v2 }
 0x1d3   : > { %5878 = vmatmul.mubr.bf16.gmra.mrb[104].mxu0 %v7789_v7 }
 0x1d4   : > { %5926 = vmatpush3.bf16.msra.mxu0 %v6134_v13  ;;  %5881 = vmatprep.mubr.bf16.mxu0 %v7793_v18  ;;  %v7802_v21 = vpop.f32.mrb[4].mxu0  ;;  %v6141_v13 = vld [vmem:[%s8700_s5 + $0x210] sm:$0xff]  }
 0x1d5   : > { %5927 = vmatprep.subr.bf16.mxu0 %v6135_v38  ;;  %v1901_v49 = vpop.f32.mrb[5].mxu0 }
 0x1d6   : > { %3174 = vmatmul.mubr.bf16.gmra.mrb[120].mxu1 %v2738_v62  ;;  %v7811_v37 = vpop.f32.mrb[6].mxu0 }
 0x1d7   : > { %3181 = vmatprep.mubr.bf16.mxu1 %v2746_v8  ;;  %v7807_v30 = vpop.f32.mrb[20].mxu1  ;;  %8770 = vst [vmem:[#allocation7_spill] sm:$0xff] %v7811_v37  ;;  %v1904_v39 = vpop.f32.mrb[7].mxu0 }
 0x1d8   : > { %5928 = vmatpush3.bf16.msra.mxu0 %v6135_v38  ;;  %v7814_v29 = vpop.f32.mrb[21].mxu1  ;;  %v3563_v38 = vld [vmem:[#allocation2 + $0x68] sm:$0xff]  ;;  %v2639_v39 = vrot.slane %v7809_v0, 4 }
 0x1d9   : > { %5929 = vmatprep.subr.bf16.mxu0 %v6136_v16  ;;  %v7817_v32 = vpop.f32.mrb[22].mxu1 }
 0x1da   : > { %v7819_v50 = vpop.f32.mrb[23].mxu1 }
 0x1db   : > { %5882 = vmatmul.mubr.bf16.gmra.mrb[108].mxu0 %v7809_v0 }
 0x1dc   : > { %5930 = vmatpush3.bf16.msra.mxu0 %v6136_v16  ;;  %5933 = vmatprep.mubr.bf16.mxu0 %v2610_v40  ;;  %v3562_v40 = vld [vmem:[#allocation2 + $0x60] sm:$0xff] }
 0x1dd   : > { %5931 = vmatprep.subr.bf16.mxu0 %v6138_v43  ;;  %v7827_v31 = vpop.f32.mrb[8].mxu0 }
 0x1de   : > { %3182 = vmatmul.mubr.bf16.gmra.mrb[124].mxu1 %v2744_v5  ;;  %8771 = vst [vmem:[#allocation4_spill] sm:$0xff] %v7827_v31  ;;  %v1909_v1 = vpop.f32.mrb[9].mxu0  ;;  %v3566_v5 = vld [vmem:[#allocation2 + $0x80] sm:$0xff] }
 0x1df   : > { %3856 = vmatprep.mubr.bf16.mxu1 %v3560_v19  ;;  %v7833_v27 = vpop.f32.mrb[10].mxu0  ;;  %v6144_v19 = vld [vmem:[%s8700_s5 + $0x228] sm:$0xff]  }
 0x1e0   : > { %5932 = vmatpush3.bf16.msra.mxu0 %v6138_v43  ;;  %8772 = vst [vmem:[#allocation8_spill] sm:$0xff] %v7833_v27  ;;  %v1912_v14 = vpop.f32.mrb[11].mxu0  ;;  %v2634_v43 = vsel %vm1341_vm0, %v2627_v2, %v2633_v59  ;;  %v6145_v2 = vld [vmem:[%s8700_s5 + $0x230] sm:$0xff]  }
 0x1e1   : > { %5981 = vmatprep.subr.bf16.mxu0 %v6139_v33 }
 0x1e3   : > { %5934 = vmatmul.mubr.bf16.vlgmr.msra.gmra.mrb[112].mxu0 %v2616_v42 }
 0x1e4   : > { %5982 = vmatpush3.bf16.msra.mxu0 %v6139_v33  ;;  %5937 = vmatprep.mubr.bf16.mxu0 %v2622_v48  ;;  %v7862_v33 = vld [vmem:[#allocation2 + $0xd0] sm:$0xff]  ;;  %v7874_v48 = vld [vmem:[#allocation2 + $0xe8] sm:$0xff] }
 0x1e5   : > { %5983 = vmatprep.subr.bf16.mxu0 %v6140_v58  ;;  %v2645_v55 = vrot.slane %v7862_v33, 4 }
 0x1e6   : > { %v7840_v22 = vpop.f32.mrb[24].mxu1  ;;  %3857 = vmatmul.mubr.bf16.vlgmr.msra.gmra.mrb[128].mxu1 %v3559_v52 }
 0x1e7   : > { %v7843_v63 = vpop.f32.mrb[25].mxu1  ;;  %3864 = vmatprep.mubr.bf16.mxu1 %v3563_v38  ;;  %v2646_v42 = vsel %vm1341_vm0, %v2639_v39, %v2645_v55 }
 0x1e8   : > { %5984 = vmatpush3.bf16.msra.mxu0 %v6140_v58  ;;  %v7845_v16 = vpop.f32.mrb[26].mxu1  ;;  %v7847_v62 = vpop.f32.mrb[12].mxu0  ;;  %v2640_v58 = vsel %vm1341_vm0, %v2633_v59, %v2639_v39  ;;  %v3565_v59 = vld [vmem:[#allocation2 + $0x78] sm:$0xff] }
 0x1e9   : > { %8773 = vst [vmem:[#allocation9_spill] sm:$0xff] %v7847_v62  ;;  %5985 = vmatprep.subr.bf16.mxu0 %v6141_v13  ;;  %v7852_v8 = vpop.f32.mrb[27].mxu1  ;;  %v1917_v9 = vpop.f32.mrb[13].mxu0 }
 0x1ea   : > { %v7855_v23 = vpop.f32.mrb[14].mxu0 }
 0x1eb   : > { %5938 = vmatmul.mubr.bf16.gmra.mrb[116].mxu0 %v2628_v17  ;;  %8774 = vst [vmem:[#allocation10_spill] sm:$0xff] %v7855_v23  ;;  %v1920_v49 = vpop.f32.mrb[15].mxu0  ;;  %v3569_v17 = vld [vmem:[#allocation2 + $0x98] sm:$0xff] }
 0x1ec   : > { %5941 = vmatprep.mubr.bf16.mxu0 %v2634_v43  ;;  %5986 = vmatpush3.bf16.msra.mxu0 %v6141_v13  ;;  %v7878_v13 = vld [vmem:[#allocation2 + $0x100] sm:$0xff] }
 0x1ed   : > { %5987 = vmatprep.subr.bf16.mxu0 %v6142_v45  ;;  %v2657_v43 = vrot.slane %v7878_v13, 4 }
 0x1ee   : > { %3865 = vmatmul.mubr.bf16.gmra.mrb[132].mxu1 %v3562_v40  ;;  %v6146_v40 = vld [vmem:[%s8700_s5 + $0x238] sm:$0xff]  }
 0x1ef   : > { %3872 = vmatprep.mubr.bf16.mxu1 %v3566_v5 }
 0x1f0   : > { %5988 = vmatpush3.bf16.msra.mxu0 %v6142_v45  ;;  %v2651_v45 = vrot.slane %v7874_v48, 4 }
 0x1f1   : > { %5989 = vmatprep.subr.bf16.mxu0 %v6143_v24  ;;  %v7868_v11 = vpop.f32.mrb[28].mxu1 }
 0x1f2   : > { %v7871_v1 = vpop.f32.mrb[29].mxu1  ;;  %v2652_v5 = vsel %vm1341_vm0, %v2645_v55, %v2651_v45 }
 0x1f3   : > { %5942 = vmatmul.mubr.bf16.gmra.mrb[120].mxu0 %v2640_v58  ;;  %v7876_v14 = vpop.f32.mrb[30].mxu1 }
 0x1f4   : > { %5945 = vmatprep.mubr.bf16.mxu0 %v2646_v42  ;;  %5990 = vmatpush3.bf16.msra.mxu0 %v6143_v24  ;;  %v7880_v52 = vpop.f32.mrb[31].mxu1  ;;  %v2658_v42 = vsel %vm1341_vm0, %v2651_v45, %v2657_v43 }
 0x1f5   : > { %5991 = vmatprep.subr.bf16.mxu0 %v6144_v19 }
 0x1f6   : > { %v7885_v38 = vpop.f32.mrb[16].mxu0  ;;  %3873 = vmatmul.mubr.bf16.gmra.mrb[136].mxu1 %v3565_v59  ;;  %v7898_v59 = vld [vmem:[#allocation2 + $0x118] sm:$0xff] }
 0x1f7   : > { %8775 = vst [vmem:[#allocation11_spill] sm:$0xff] %v7885_v38  ;;  %v1925_v9 = vpop.f32.mrb[17].mxu0  ;;  %3880 = vmatprep.mubr.bf16.mxu1 %v3569_v17 }
 0x1f8   : > { %v7889_v49 = vpop.f32.mrb[18].mxu0  ;;  %5992 = vmatpush3.bf16.msra.mxu0 %v6144_v19  ;;  %v7902_v19 = vld [vmem:[#allocation2 + $0x130] sm:$0xff] }
 0x1f9   : > { %8776 = vst [vmem:[#allocation12_spill] sm:$0xff] %v7889_v49  ;;  %v1928_v24 = vpop.f32.mrb[19].mxu0  ;;  %5993 = vmatprep.subr.bf16.mxu0 %v6145_v2  ;;  %v7894_v39 = vpop.f32.mrb[32].mxu1  ;;  %v3568_v49 = vld [vmem:[#allocation2 + $0x90] sm:$0xff]  ;;  %v2669_v45 = vrot.slane %v7902_v19, 4 }
 0x1fa   : > { %8777 = vst [vmem:[#allocation13_spill] sm:$0xff] %v7894_v39  ;;  %v3001_v58 = vpop.f32.mrb[33].mxu1  ;;  %v2663_v39 = vrot.slane %v7898_v59, 4 }
 0x1fb   : > { %5946 = vmatmul.mubr.bf16.gmra.mrb[124].mxu0 %v2652_v5  ;;  %v7900_v9 = vpop.f32.mrb[34].mxu1  ;;  %v3572_v5 = vld [vmem:[#allocation2 + $0xb0] sm:$0xff] }
 0x1fc   : > { %8778 = vst [vmem:[#allocation14_spill] sm:$0xff] %v7900_v9  ;;  %5949 = vmatprep.mubr.bf16.mxu0 %v2658_v42  ;;  %5994 = vmatpush3.bf16.msra.mxu0 %v6145_v2  ;;  %v3004_v17 = vpop.f32.mrb[35].mxu1  ;;  %v2664_v2 = vsel %vm1341_vm0, %v2657_v43, %v2663_v39  ;;  %v2670_v38 = vsel %vm1341_vm0, %v2663_v39, %v2669_v45  ;;  %v3575_v43 = vld [vmem:[#allocation2 + $0xc8] sm:$0xff] }
 0x1fd   : > { %5995 = vmatprep.subr.bf16.mxu0 %v6146_v40 }
 0x1fe   : > { %v7904_v24 = vpop.f32.mrb[20].mxu0  ;;  %3881 = vmatmul.mubr.bf16.gmra.mrb[140].mxu1 %v3568_v49  ;;  %v7918_v49 = vld [vmem:[#allocation2 + $0x160] sm:$0xff] }
 0x1ff   : > { %8779 = vst [vmem:[#allocation15_spill] sm:$0xff] %v7904_v24  ;;  %v1933_v55 = vpop.f32.mrb[21].mxu0  ;;  %3888 = vmatprep.mubr.bf16.mxu1 %v3572_v5  ;;  %v7914_v24 = vld [vmem:[#allocation2 + $0x148] sm:$0xff] }
 0x200   : > { %v7908_v58 = vpop.f32.mrb[22].mxu0  ;;  %5996 = vmatpush3.bf16.msra.mxu0 %v6146_v40  ;;  %v3571_v40 = vld [vmem:[#allocation2 + $0xa8] sm:$0xff]  ;;  %v2675_v5 = vrot.slane %v7914_v24, 4 }
 0x201   : > { %8780 = vst [vmem:[#allocation16_spill] sm:$0xff] %v7908_v58  ;;  %v1936_v42 = vpop.f32.mrb[23].mxu0  ;;  %v7910_v9 = vpop.f32.mrb[36].mxu1 }
 0x202   : > { %8781 = vst [vmem:[#allocation17_spill] sm:$0xff] %v7910_v9  ;;  %v3009_v17 = vpop.f32.mrb[37].mxu1 }
 0x203   : > { %5950 = vmatmul.mubr.bf16.gmra.mrb[128].mxu0 %v2664_v2  ;;  %v7916_v55 = vpop.f32.mrb[38].mxu1  ;;  %v2681_v2 = vrot.slane %v7918_v49, 4 }
 0x204   : > { %8782 = vst [vmem:[#allocation18_spill] sm:$0xff] %v7916_v55  ;;  %5953 = vmatprep.mubr.bf16.mxu0 %v2670_v38  ;;  %v3012_v27 = vpop.f32.mrb[39].mxu1  ;;  %v2676_v38 = vsel %vm1341_vm0, %v2669_v45, %v2675_v5  ;;  %v3578_v45 = vld [vmem:[#allocation2 + $0xe0] sm:$0xff] }
 0x205   : > { %v2682_v27 = vsel %vm1341_vm0, %v2675_v5, %v2681_v2 }
 0x206   : > { %v7920_v58 = vpop.f32.mrb[24].mxu0  ;;  %3889 = vmatmul.mubr.bf16.gmra.mrb[144].mxu1 %v3571_v40  ;;  %v7934_v40 = vld [vmem:[#allocation2 + $0x190] sm:$0xff] }
 0x207   : > { %8783 = vst [vmem:[#allocation19_spill] sm:$0xff] %v7920_v58  ;;  %v1941_v42 = vpop.f32.mrb[25].mxu0  ;;  %3896 = vmatprep.mubr.bf16.mxu1 %v3575_v43  ;;  %v7930_v58 = vld [vmem:[#allocation2 + $0x178] sm:$0xff]  ;;  %v3574_v43 = vld [vmem:[#allocation2 + $0xc0] sm:$0xff] }
 0x208   : > { %v7924_v17 = vpop.f32.mrb[26].mxu0 }
 0x209   : > { %8784 = vst [vmem:[#allocation20_spill] sm:$0xff] %v7924_v17  ;;  %v1944_v39 = vpop.f32.mrb[27].mxu0  ;;  %v7926_v9 = vpop.f32.mrb[40].mxu1 }
 0x20a   : > { %8785 = vst [vmem:[#allocation21_spill] sm:$0xff] %v7926_v9  ;;  %v3017_v55 = vpop.f32.mrb[41].mxu1  ;;  %v2687_v39 = vrot.slane %v7930_v58, 4 }
 0x20b   : > { %5954 = vmatmul.mubr.bf16.gmra.mrb[132].mxu0 %v2676_v38  ;;  %v7932_v23 = vpop.f32.mrb[42].mxu1  ;;  %v2693_v55 = vrot.slane %v7934_v40, 4 }
 0x20c   : > { %8786 = vst [vmem:[#allocation22_spill] sm:$0xff] %v7932_v23  ;;  %5957 = vmatprep.mubr.bf16.mxu0 %v2682_v27  ;;  %v3020_v42 = vpop.f32.mrb[43].mxu1  ;;  %v2688_v27 = vsel %vm1341_vm0, %v2681_v2, %v2687_v39 }
 0x20d   : > { %v2694_v42 = vsel %vm1341_vm0, %v2687_v39, %v2693_v55 }
 0x20e   : > { %v7936_v31 = vpop.f32.mrb[28].mxu0  ;;  %3897 = vmatmul.mubr.bf16.gmra.mrb[148].mxu1 %v3574_v43 }
 0x20f   : > { %8787 = vst [vmem:[#allocation23_spill] sm:$0xff] %v7936_v31  ;;  %v1949_v9 = vpop.f32.mrb[29].mxu0  ;;  %3904 = vmatprep.mubr.bf16.mxu1 %v3578_v45  ;;  %v7946_v31 = vld [vmem:[#allocation2 + $0x1a8] sm:$0xff] }
 0x210   : > { %v7940_v38 = vpop.f32.mrb[30].mxu0  ;;  %v7950_v9 = vld [vmem:[#allocation2 + $0x1c0] sm:$0xff]  ;;  %v2699_v45 = vrot.slane %v7946_v31, 4 }
 0x211   : > { %8788 = vst [vmem:[#allocation24_spill] sm:$0xff] %v7940_v38  ;;  %v1952_v5 = vpop.f32.mrb[31].mxu0  ;;  %v7942_v17 = vpop.f32.mrb[44].mxu1  ;;  %v3577_v38 = vld [vmem:[#allocation2 + $0xd8] sm:$0xff]  ;;  %v2705_v39 = vrot.slane %v7950_v9, 4 }
 0x212   : > { %8789 = vst [vmem:[#allocation25_spill] sm:$0xff] %v7942_v17  ;;  %v3025_v23 = vpop.f32.mrb[45].mxu1 }
 0x213   : > { %5958 = vmatmul.mubr.bf16.gmra.mrb[136].mxu0 %v2688_v27  ;;  %v7948_v62 = vpop.f32.mrb[46].mxu1  ;;  %v3581_v23 = vld [vmem:[#allocation2 + $0xf8] sm:$0xff] }
 0x214   : > { %8790 = vst [vmem:[#allocation26_spill] sm:$0xff] %v7948_v62  ;;  %5961 = vmatprep.mubr.bf16.mxu0 %v2694_v42  ;;  %v3028_v43 = vpop.f32.mrb[47].mxu1 }
 0x215   : > { %v2700_v43 = vsel %vm1341_vm0, %v2693_v55, %v2699_v45 }
 0x216   : > { %v1955_v53 = vpop.f32.mrb[32].mxu0  ;;  %3905 = vmatmul.mubr.bf16.gmra.mrb[152].mxu1 %v3577_v38 }
 0x217   : > { %v7954_v5 = vadd.f32 %v7713_v60, %v1955_v53  ;;  %v1957_v2 = vpop.f32.mrb[33].mxu0  ;;  %3912 = vmatprep.mubr.bf16.mxu1 %v3581_v23  ;;  %v2706_v53 = vsel %vm1341_vm0, %v2699_v45, %v2705_v39  ;;  %v7964_v60 = vld [vmem:[#allocation2 + $0x1d8] sm:$0xff] }
 0x218   : > { %v1958_v27 = vpop.f32.mrb[34].mxu0  ;;  %v7968_v2 = vld [vmem:[#allocation2 + $0x1f0] sm:$0xff] }
 0x219   : > { %8791 = vst [vmem:[#allocation27_spill] sm:$0xff] %v7954_v5  ;;  %v7958_v62 = vadd.f32 %v7717_v3, %v1958_v27  ;;  %v1960_v42 = vpop.f32.mrb[35].mxu0  ;;  %v7960_v17 = vpop.f32.mrb[48].mxu1  ;;  %v3580_v3 = vld [vmem:[#allocation2 + $0xf0] sm:$0xff]  ;;  %v2711_v27 = vrot.slane %v7964_v60, 4  ;;  %v2717_v45 = vrot.slane %v7968_v2, 4 }
 0x21a   : > { %8793 = vst [vmem:[#allocation29_spill] sm:$0xff] %v7960_v17  ;;  %v3033_v37 = vpop.f32.mrb[49].mxu1 }
 0x21b   : > { %8792 = vst [vmem:[#allocation28_spill] sm:$0xff] %v7958_v62  ;;  %5962 = vmatmul.mubr.bf16.gmra.mrb[140].mxu0 %v2700_v43  ;;  %v7966_v38 = vpop.f32.mrb[50].mxu1  ;;  %v3584_v37 = vld [vmem:[#allocation2 + $0x110] sm:$0xff] }
 0x21c   : > { %8794 = vst [vmem:[#allocation30_spill] sm:$0xff] %v7966_v38  ;;  %5965 = vmatprep.mubr.bf16.mxu0 %v2706_v53  ;;  %v3036_v23 = vpop.f32.mrb[51].mxu1 }
 0x21d   : > { %v2712_v23 = vsel %vm1341_vm0, %v2705_v39, %v2711_v27 }
 0x21e   : > { %v1963_v5 = vpop.f32.mrb[36].mxu0  ;;  %3913 = vmatmul.mubr.bf16.gmra.mrb[156].mxu1 %v3580_v3 }
 0x21f   : > { %v7972_v42 = vadd.f32 %v7710_v15, %v1963_v5  ;;  %v1965_v55 = vpop.f32.mrb[37].mxu0  ;;  %3920 = vmatprep.mubr.bf16.mxu1 %v3584_v37  ;;  %v2718_v15 = vsel %vm1341_vm0, %v2711_v27, %v2717_v45  ;;  %v7982_v5 = vld [vmem:[#allocation2 + $0x208] sm:$0xff] }
 0x220   : > { %v1966_v43 = vpop.f32.mrb[38].mxu0  ;;  %v7986_v55 = vld [vmem:[#allocation2 + $0x220] sm:$0xff] }
 0x221   : > { %8795 = vst [vmem:[#allocation31_spill] sm:$0xff] %v7972_v42  ;;  %v7976_v62 = vadd.f32 %v7715_v28, %v1966_v43  ;;  %v1968_v53 = vpop.f32.mrb[39].mxu0  ;;  %v7978_v38 = vpop.f32.mrb[52].mxu1  ;;  %v3583_v28 = vld [vmem:[#allocation2 + $0x108] sm:$0xff]  ;;  %v2723_v43 = vrot.slane %v7982_v5, 4  ;;  %v2729_v27 = vrot.slane %v7986_v55, 4 }
 0x222   : > { %8797 = vst [vmem:[#allocation33_spill] sm:$0xff] %v7978_v38  ;;  %v3041_v17 = vpop.f32.mrb[53].mxu1 }
 0x223   : > { %8796 = vst [vmem:[#allocation32_spill] sm:$0xff] %v7976_v62  ;;  %5966 = vmatmul.mubr.bf16.gmra.mrb[144].mxu0 %v2712_v23  ;;  %v7984_v3 = vpop.f32.mrb[54].mxu1  ;;  %v3587_v17 = vld [vmem:[#allocation2 + $0x128] sm:$0xff] }
 0x224   : > { %8798 = vst [vmem:[#allocation34_spill] sm:$0xff] %v7984_v3  ;;  %5969 = vmatprep.mubr.bf16.mxu0 %v2718_v15  ;;  %v3044_v37 = vpop.f32.mrb[55].mxu1 }
 0x225   : > { %v2724_v37 = vsel %vm1341_vm0, %v2717_v45, %v2723_v43 }
 0x226   : > { %v1971_v42 = vpop.f32.mrb[40].mxu0  ;;  %3921 = vmatmul.mubr.bf16.gmra.mrb[160].mxu1 %v3583_v28 }
 0x227   : > { %v7990_v53 = vadd.f32 %v7723_v26, %v1971_v42  ;;  %v1973_v39 = vpop.f32.mrb[41].mxu0  ;;  %3928 = vmatprep.mubr.bf16.mxu1 %v3587_v17  ;;  %v2730_v26 = vsel %vm1341_vm0, %v2723_v43, %v2729_v27  ;;  %v8000_v42 = vld [vmem:[#allocation2 + $0x238] sm:$0xff] }
 0x228   : > { %v1974_v23 = vpop.f32.mrb[42].mxu0  ;;  %v8004_v39 = vld [vmem:[#allocation2 + $0x250] sm:$0xff] }
 0x229   : > { %8799 = vst [vmem:[#allocation35_spill] sm:$0xff] %v7990_v53  ;;  %v7994_v62 = vadd.f32 %v7727_v57, %v1974_v23  ;;  %v1976_v15 = vpop.f32.mrb[43].mxu0  ;;  %v7996_v3 = vpop.f32.mrb[56].mxu1  ;;  %v3586_v57 = vld [vmem:[#allocation2 + $0x120] sm:$0xff]  ;;  %v2735_v23 = vrot.slane %v8000_v42, 4  ;;  %v2741_v43 = vrot.slane %v8004_v39, 4 }
 0x22a   : > { %8801 = vst [vmem:[#allocation37_spill] sm:$0xff] %v7996_v3  ;;  %v3049_v38 = vpop.f32.mrb[57].mxu1 }
 0x22b   : > { %8800 = vst [vmem:[#allocation36_spill] sm:$0xff] %v7994_v62  ;;  %5970 = vmatmul.mubr.bf16.gmra.mrb[148].mxu0 %v2724_v37  ;;  %v8002_v28 = vpop.f32.mrb[58].mxu1  ;;  %v3590_v38 = vld [vmem:[#allocation2 + $0x140] sm:$0xff] }
 0x22c   : > { %8802 = vst [vmem:[#allocation38_spill] sm:$0xff] %v8002_v28  ;;  %5973 = vmatprep.mubr.bf16.mxu0 %v2730_v26  ;;  %v3052_v17 = vpop.f32.mrb[59].mxu1 }
 0x22d   : > { %v2736_v17 = vsel %vm1341_vm0, %v2729_v27, %v2735_v23 }
 0x22e   : > { %v1979_v53 = vpop.f32.mrb[44].mxu0  ;;  %3929 = vmatmul.mubr.bf16.gmra.mrb[164].mxu1 %v3586_v57 }
 0x22f   : > { %v8008_v15 = vadd.f32 %v7720_v25, %v1979_v53  ;;  %v1981_v45 = vpop.f32.mrb[45].mxu0  ;;  %3936 = vmatprep.mubr.bf16.mxu1 %v3590_v38  ;;  %v2742_v25 = vsel %vm1341_vm0, %v2735_v23, %v2741_v43  ;;  %v2477_v53 = vld [vmem:[#allocation2 + $0x268] sm:$0xf] }
 0x230   : > { %v1982_v37 = vpop.f32.mrb[46].mxu0  ;;  %v2747_v38 = vrot.slane %v2477_v53, 4 }
 0x231   : > { %8803 = vst [vmem:[#allocation39_spill] sm:$0xff] %v8008_v15  ;;  %v8012_v62 = vadd.f32 %v7725_v61, %v1982_v37  ;;  %v1984_v26 = vpop.f32.mrb[47].mxu0  ;;  %v8014_v28 = vpop.f32.mrb[60].mxu1 }
 0x232   : > { %v3057_v3 = vpop.f32.mrb[61].mxu1  ;;  %v3593_v26 = vld [vmem:[#allocation2 + $0x158] sm:$0xff] }
 0x233   : > { %8804 = vst [vmem:[#allocation40_spill] sm:$0xff] %v8012_v62  ;;  %5974 = vmatmul.mubr.bf16.gmra.mrb[152].mxu0 %v2736_v17  ;;  %v8018_v45 = vpop.f32.mrb[62].mxu1  ;;  %v2748_v17 = vsel %vm1341_vm0, %v2741_v43, %v2747_v38 }
 0x234   : > { %5977 = vmatprep.mubr.bf16.mxu0 %v2742_v25  ;;  %v3060_v57 = vpop.f32.mrb[63].mxu1 }
 0x236   : > { %v1987_v15 = vpop.f32.mrb[48].mxu0  ;;  %3937 = vmatmul.mubr.bf16.gmra.mrb[168].mxu1 %v3589_v41  ;;  %v3592_v41 = vld [vmem:[#allocation2 + $0x150] sm:$0xff] }
 0x237   : > { %v8021_v61 = vadd.f32 %v7736_v6, %v1987_v15  ;;  %v1989_v37 = vpop.f32.mrb[49].mxu0  ;;  %3944 = vmatprep.mubr.bf16.mxu1 %v3593_v26 }
 0x238   : > { %v1990_v62 = vpop.f32.mrb[50].mxu0 }
 0x239   : > { %v8024_v3 = vadd.f32 %v7743_v4, %v1990_v62  ;;  %v1992_v27 = vpop.f32.mrb[51].mxu0  ;;  %v8026_v23 = vpop.f32.mrb[64].mxu1  ;;  %v3596_v4 = vld [vmem:[#allocation2 + $0x170] sm:$0xff] }
 0x23a   : > { %v3065_v25 = vpop.f32.mrb[65].mxu1 }
 0x23b   : > { %5978 = vmatmul.mubr.bf16.gmra.mrb[156].mxu0 %v2748_v17  ;;  %v8029_v57 = vpop.f32.mrb[66].mxu1  ;;  %v3595_v25 = vld [vmem:[#allocation2 + $0x168] sm:$0xff] }
 0x23c   : > { %5997 = vmatprep.mubr.bf16.mxu0 %v7765_v20  ;;  %v3068_v6 = vpop.f32.mrb[67].mxu1 }
 0x23e   : > { %v1995_v15 = vpop.f32.mrb[52].mxu0  ;;  %3945 = vmatmul.mubr.bf16.gmra.mrb[172].mxu1 %v3592_v41 }
 0x23f   : > { %v8033_v53 = vadd.f32 %v7733_v54, %v1995_v15  ;;  %v1997_v37 = vpop.f32.mrb[53].mxu0  ;;  %3952 = vmatprep.mubr.bf16.mxu1 %v3596_v4 }
 0x240   : > { %v1998_v62 = vpop.f32.mrb[54].mxu0 }
 0x241   : > { %v8036_v26 = vadd.f32 %v7738_v46, %v1998_v62  ;;  %v2000_v43 = vpop.f32.mrb[55].mxu0  ;;  %v8038_v38 = vpop.f32.mrb[68].mxu1  ;;  %v3599_v46 = vld [vmem:[#allocation2 + $0x188] sm:$0xff] }
 0x242   : > { %v3073_v27 = vpop.f32.mrb[69].mxu1 }
 0x243   : > { %5998 = vmatmul.mubr.bf16.vlgmr.msra.gmra.mrb[160].mxu0 %v7769_v47  ;;  %v8041_v20 = vpop.f32.mrb[70].mxu1  ;;  %v3598_v27 = vld [vmem:[#allocation2 + $0x180] sm:$0xff] }
 0x244   : > { %6001 = vmatprep.mubr.bf16.mxu0 %v7789_v7  ;;  %v3076_v54 = vpop.f32.mrb[71].mxu1 }
 0x246   : > { %v2003_v17 = vpop.f32.mrb[56].mxu0  ;;  %3953 = vmatmul.mubr.bf16.gmra.mrb[176].mxu1 %v3595_v25 }
 0x247   : > { %v8045_v6 = vadd.f32 %v7756_v44, %v2003_v17  ;;  %v2005_v15 = vpop.f32.mrb[57].mxu0  ;;  %3960 = vmatprep.mubr.bf16.mxu1 %v3599_v46 }
 0x248   : > { %v2006_v41 = vpop.f32.mrb[58].mxu0 }
 0x249   : > { %v8048_v37 = vadd.f32 %v7763_v12, %v2006_v41  ;;  %v2008_v4 = vpop.f32.mrb[59].mxu0  ;;  %v8050_v47 = vpop.f32.mrb[72].mxu1  ;;  %v3602_v12 = vld [vmem:[#allocation2 + $0x1a0] sm:$0xff] }
 0x24a   : > { %v3081_v62 = vpop.f32.mrb[73].mxu1 }
 0x24b   : > { %6002 = vmatmul.mubr.bf16.gmra.mrb[164].mxu0 %v7793_v18  ;;  %v8053_v7 = vpop.f32.mrb[74].mxu1  ;;  %v3601_v62 = vld [vmem:[#allocation2 + $0x198] sm:$0xff] }
 0x24c   : > { %6005 = vmatprep.mubr.bf16.mxu0 %v7809_v0  ;;  %v3084_v44 = vpop.f32.mrb[75].mxu1 }
 0x24e   : > { %v2011_v43 = vpop.f32.mrb[60].mxu0  ;;  %3961 = vmatmul.mubr.bf16.gmra.mrb[180].mxu1 %v3598_v27 }
 0x24f   : > { %v8057_v54 = vadd.f32 %v7753_v56, %v2011_v43  ;;  %v2013_v17 = vpop.f32.mrb[61].mxu0  ;;  %3968 = vmatprep.mubr.bf16.mxu1 %v3602_v12 }
 0x250   : > { %v2014_v25 = vpop.f32.mrb[62].mxu0 }
 0x251   : > { %v8060_v15 = vadd.f32 %v7758_v34, %v2014_v25  ;;  %v2016_v46 = vpop.f32.mrb[63].mxu0  ;;  %v8062_v18 = vpop.f32.mrb[76].mxu1  ;;  %v3605_v34 = vld [vmem:[#allocation2 + $0x1b8] sm:$0xff] }
 0x252   : > { %v3089_v41 = vpop.f32.mrb[77].mxu1 }
 0x253   : > { %6006 = vmatmul.mubr.bf16.gmra.mrb[168].mxu0 %v7862_v33  ;;  %v8065_v0 = vpop.f32.mrb[78].mxu1  ;;  %v3604_v41 = vld [vmem:[#allocation2 + $0x1b0] sm:$0xff] }
 0x254   : > { %6009 = vmatprep.mubr.bf16.mxu0 %v7874_v48  ;;  %v3092_v56 = vpop.f32.mrb[79].mxu1 }
 0x256   : > { %v2019_v4 = vpop.f32.mrb[64].mxu0  ;;  %3969 = vmatmul.mubr.bf16.gmra.mrb[184].mxu1 %v3601_v62 }
 0x257   : > { %v8069_v44 = vadd.f32 %v7780_v36, %v2019_v4  ;;  %v2021_v43 = vpop.f32.mrb[65].mxu0  ;;  %3976 = vmatprep.mubr.bf16.mxu1 %v3605_v34 }
 0x258   : > { %v2022_v27 = vpop.f32.mrb[66].mxu0 }
 0x259   : > { %8805 = vst [vmem:[#allocation41_spill] sm:$0xff] %v8069_v44  ;;  %v8072_v17 = vadd.f32 %v7787_v35, %v2022_v27  ;;  %v2024_v12 = vpop.f32.mrb[67].mxu0  ;;  %v8074_v33 = vpop.f32.mrb[80].mxu1  ;;  %v3608_v35 = vld [vmem:[#allocation2 + $0x1d0] sm:$0xff] }
 0x25a   : > { %v3097_v25 = vpop.f32.mrb[81].mxu1 }
 0x25b   : > { %8806 = vst [vmem:[#allocation42_spill] sm:$0xff] %v8072_v17  ;;  %6010 = vmatmul.mubr.bf16.gmra.mrb[172].mxu0 %v7878_v13  ;;  %v8077_v48 = vpop.f32.mrb[82].mxu1  ;;  %v3607_v25 = vld [vmem:[#allocation2 + $0x1c8] sm:$0xff] }
 0x25c   : > { %6013 = vmatprep.mubr.bf16.mxu0 %v7898_v59  ;;  %v3100_v36 = vpop.f32.mrb[83].mxu1 }
 0x25e   : > { %v2027_v46 = vpop.f32.mrb[68].mxu0  ;;  %3977 = vmatmul.mubr.bf16.gmra.mrb[188].mxu1 %v3604_v41 }
 0x25f   : > { %v8081_v56 = vadd.f32 %v7777_v10, %v2027_v46  ;;  %v2029_v4 = vpop.f32.mrb[69].mxu0  ;;  %3984 = vmatprep.mubr.bf16.mxu1 %v3608_v35 }
 0x260   : > { %v2030_v62 = vpop.f32.mrb[70].mxu0 }
 0x261   : > { %v8084_v43 = vadd.f32 %v7782_v51, %v2030_v62  ;;  %v2032_v34 = vpop.f32.mrb[71].mxu0  ;;  %v8086_v13 = vpop.f32.mrb[84].mxu1  ;;  %v3611_v51 = vld [vmem:[#allocation2 + $0x1e8] sm:$0xff] }
 0x262   : > { %v3105_v27 = vpop.f32.mrb[85].mxu1 }
 0x263   : > { %8807 = vst [vmem:[#allocation43_spill] sm:$0xff] %v8084_v43  ;;  %6014 = vmatmul.mubr.bf16.gmra.mrb[176].mxu0 %v7902_v19  ;;  %v8089_v59 = vpop.f32.mrb[86].mxu1  ;;  %v3610_v27 = vld [vmem:[#allocation2 + $0x1e0] sm:$0xff] }
 0x264   : > { %6017 = vmatprep.mubr.bf16.mxu0 %v7914_v24  ;;  %v3108_v10 = vpop.f32.mrb[87].mxu1 }
 0x266   : > { %v2035_v12 = vpop.f32.mrb[72].mxu0  ;;  %3985 = vmatmul.mubr.bf16.gmra.mrb[192].mxu1 %v3607_v25 }
 0x267   : > { %v8093_v36 = vadd.f32 %v7814_v29, %v2035_v12  ;;  %v2037_v46 = vpop.f32.mrb[73].mxu0  ;;  %3992 = vmatprep.mubr.bf16.mxu1 %v3611_v51 }
 0x268   : > { %v2038_v41 = vpop.f32.mrb[74].mxu0 }
 0x269   : > { %8808 = vst [vmem:[#allocation44_spill] sm:$0xff] %v8093_v36  ;;  %v8096_v4 = vadd.f32 %v7819_v50, %v2038_v41  ;;  %v2040_v35 = vpop.f32.mrb[75].mxu0  ;;  %v8098_v19 = vpop.f32.mrb[88].mxu1  ;;  %v3614_v50 = vld [vmem:[#allocation2 + $0x200] sm:$0xff] }
 0x26a   : > { %v3113_v62 = vpop.f32.mrb[89].mxu1 }
 0x26b   : > { %8809 = vst [vmem:[#allocation45_spill] sm:$0xff] %v8096_v4  ;;  %6018 = vmatmul.mubr.bf16.gmra.mrb[180].mxu0 %v7918_v49  ;;  %v8101_v24 = vpop.f32.mrb[90].mxu1  ;;  %v3613_v62 = vld [vmem:[#allocation2 + $0x1f8] sm:$0xff]  ;;  %v8836_v4 = vld [vmem:[#allocation15_spill] sm:$0xff] }
 0x26c   : > { %6021 = vmatprep.mubr.bf16.mxu0 %v7930_v58  ;;  %v3116_v29 = vpop.f32.mrb[91].mxu1 }
 0x26e   : > { %v2043_v34 = vpop.f32.mrb[76].mxu0  ;;  %3993 = vmatmul.mubr.bf16.gmra.mrb[196].mxu1 %v3610_v27 }
 0x26f   : > { %v8105_v10 = vadd.f32 %v7807_v30, %v2043_v34  ;;  %v2045_v12 = vpop.f32.mrb[77].mxu0  ;;  %4000 = vmatprep.mubr.bf16.mxu1 %v3614_v50 }
 0x270   : > { %v2046_v25 = vpop.f32.mrb[78].mxu0 }
 0x271   : > { %8810 = vst [vmem:[#allocation46_spill] sm:$0xff] %v8105_v10  ;;  %v8108_v46 = vadd.f32 %v7817_v32, %v2046_v25  ;;  %v2048_v51 = vpop.f32.mrb[79].mxu0  ;;  %v8110_v49 = vpop.f32.mrb[92].mxu1  ;;  %v3617_v32 = vld [vmem:[#allocation2 + $0x218] sm:$0xff] }
 0x272   : > { %v3121_v41 = vpop.f32.mrb[93].mxu1 }
 0x273   : > { %8811 = vst [vmem:[#allocation47_spill] sm:$0xff] %v8108_v46  ;;  %6022 = vmatmul.mubr.bf16.gmra.mrb[184].mxu0 %v7934_v40  ;;  %v8113_v58 = vpop.f32.mrb[94].mxu1  ;;  %v3616_v41 = vld [vmem:[#allocation2 + $0x210] sm:$0xff] }
 0x274   : > { %6025 = vmatprep.mubr.bf16.mxu0 %v7946_v31  ;;  %v3124_v30 = vpop.f32.mrb[95].mxu1 }
 0x276   : > { %v2051_v35 = vpop.f32.mrb[80].mxu0  ;;  %4001 = vmatmul.mubr.bf16.gmra.mrb[200].mxu1 %v3613_v62 }
 0x277   : > { %v8117_v29 = vadd.f32 %v7843_v63, %v2051_v35  ;;  %v2053_v34 = vpop.f32.mrb[81].mxu0  ;;  %4008 = vmatprep.mubr.bf16.mxu1 %v3617_v32 }
 0x278   : > { %v2054_v27 = vpop.f32.mrb[82].mxu0 }
 0x279   : > { %8812 = vst [vmem:[#allocation48_spill] sm:$0xff] %v8117_v29  ;;  %v8120_v12 = vadd.f32 %v7852_v8, %v2054_v27  ;;  %v2056_v50 = vpop.f32.mrb[83].mxu0  ;;  %v8122_v40 = vpop.f32.mrb[96].mxu1  ;;  %v3620_v8 = vld [vmem:[#allocation2 + $0x230] sm:$0xff] }
 0x27a   : > { %v3129_v25 = vpop.f32.mrb[97].mxu1 }
 0x27b   : > { %8813 = vst [vmem:[#allocation49_spill] sm:$0xff] %v8120_v12  ;;  %6026 = vmatmul.mubr.bf16.gmra.mrb[188].mxu0 %v7950_v9  ;;  %v8125_v31 = vpop.f32.mrb[98].mxu1  ;;  %v3619_v25 = vld [vmem:[#allocation2 + $0x228] sm:$0xff]  ;;  %v3628_v12 = vld [vmem:[#allocation2 + $0x270] sm:$0xff] }
 0x27c   : > { %8814 = vst [vmem:[#allocation50_spill] sm:$0xff] %v8125_v31  ;;  %6029 = vmatprep.mubr.bf16.mxu0 %v7964_v60  ;;  %v3132_v63 = vpop.f32.mrb[99].mxu1 }
 0x27e   : > { %v2059_v51 = vpop.f32.mrb[84].mxu0  ;;  %4009 = vmatmul.mubr.bf16.gmra.mrb[204].mxu1 %v3616_v41 }
 0x27f   : > { %v8129_v30 = vadd.f32 %v7840_v22, %v2059_v51  ;;  %v2061_v35 = vpop.f32.mrb[85].mxu0  ;;  %4016 = vmatprep.mubr.bf16.mxu1 %v3620_v8 }
 0x280   : > { %v2062_v62 = vpop.f32.mrb[86].mxu0 }
 0x281   : > { %8815 = vst [vmem:[#allocation51_spill] sm:$0xff] %v8129_v30  ;;  %v8132_v34 = vadd.f32 %v7845_v16, %v2062_v62  ;;  %v2064_v32 = vpop.f32.mrb[87].mxu0  ;;  %v8134_v9 = vpop.f32.mrb[100].mxu1  ;;  %v3623_v16 = vld [vmem:[#allocation2 + $0x248] sm:$0xff] }
 0x282   : > { %v3137_v27 = vpop.f32.mrb[101].mxu1 }
 0x283   : > { %8816 = vst [vmem:[#allocation52_spill] sm:$0xff] %v8132_v34  ;;  %6030 = vmatmul.mubr.bf16.gmra.mrb[192].mxu0 %v7968_v2  ;;  %v8137_v60 = vpop.f32.mrb[102].mxu1  ;;  %v3622_v27 = vld [vmem:[#allocation2 + $0x240] sm:$0xff] }
 0x284   : > { %6033 = vmatprep.mubr.bf16.mxu0 %v7982_v5  ;;  %v3140_v22 = vpop.f32.mrb[103].mxu1 }
 0x286   : > { %v2067_v50 = vpop.f32.mrb[88].mxu0  ;;  %4017 = vmatmul.mubr.bf16.gmra.mrb[208].mxu1 %v3619_v25 }
 0x287   : > { %v8141_v63 = vadd.f32 %v7871_v1, %v2067_v50  ;;  %v2069_v51 = vpop.f32.mrb[89].mxu0  ;;  %4024 = vmatprep.mubr.bf16.mxu1 %v3623_v16 }
 0x288   : > { %v2070_v41 = vpop.f32.mrb[90].mxu0 }
 0x289   : > { %8817 = vst [vmem:[#allocation53_spill] sm:$0xff] %v8141_v63  ;;  %v8144_v35 = vadd.f32 %v7880_v52, %v2070_v41  ;;  %v2072_v8 = vpop.f32.mrb[91].mxu0  ;;  %v8146_v2 = vpop.f32.mrb[104].mxu1  ;;  %v3626_v52 = vld [vmem:[#allocation2 + $0x260] sm:$0xff] }
 0x28a   : > { %8819 = vst [vmem:[#allocation55_spill] sm:$0xff] %v8146_v2  ;;  %v3145_v62 = vpop.f32.mrb[105].mxu1 }
 0x28b   : > { %8818 = vst [vmem:[#allocation54_spill] sm:$0xff] %v8144_v35  ;;  %6034 = vmatmul.mubr.bf16.gmra.mrb[196].mxu0 %v7986_v55  ;;  %v8149_v5 = vpop.f32.mrb[106].mxu1  ;;  %v3629_v62 = vld [vmem:[#allocation2 + $0x278] sm:$0xff] }
 0x28c   : > { %8820 = vst [vmem:[#allocation56_spill] sm:$0xff] %v8149_v5  ;;  %6037 = vmatprep.mubr.bf16.mxu0 %v8000_v42  ;;  %v3148_v1 = vpop.f32.mrb[107].mxu1  ;;  %v3627_v42 = vld [vmem:[#allocation2 + $0x268] sm:$0xff] }
 0x28e   : > { %v2075_v32 = vpop.f32.mrb[92].mxu0  ;;  %4025 = vmatmul.mubr.bf16.gmra.mrb[212].mxu1 %v3622_v27 }
 0x28f   : > { %v8153_v22 = vadd.f32 %v7868_v11, %v2075_v32  ;;  %v2077_v50 = vpop.f32.mrb[93].mxu0  ;;  %4032 = vmatprep.mubr.bf16.mxu1 %v3626_v52  ;;  %v3625_v32 = vld [vmem:[#allocation2 + $0x258] sm:$0xff] }
 0x290   : > { %v2078_v25 = vpop.f32.mrb[94].mxu0 }
 0x291   : > { %8821 = vst [vmem:[#allocation57_spill] sm:$0xff] %v8153_v22  ;;  %v8156_v51 = vadd.f32 %v7876_v14, %v2078_v25  ;;  %v2080_v16 = vpop.f32.mrb[95].mxu0  ;;  %v8158_v55 = vpop.f32.mrb[108].mxu1  ;;  %v8825_v14 = vld [vmem:[#allocation5_spill] sm:$0xff] }
 0x292   : > { %8823 = vst [vmem:[#allocation59_spill] sm:$0xff] %v8158_v55  ;;  %v3153_v41 = vpop.f32.mrb[109].mxu1  ;;  %v3630_v16 = vld [vmem:[#allocation2 + $0x280] sm:$0xff] }
 0x293   : > { %8822 = vst [vmem:[#allocation58_spill] sm:$0xff] %v8156_v51  ;;  %6038 = vmatmul.mubr.bf16.gmra.mrb[200].mxu0 %v8004_v39  ;;  %v8161_v8 = vpop.f32.mrb[110].mxu1  ;;  %v8826_v41 = vld [vmem:[#allocation7_spill] sm:$0xff]  ;;  %v8827_v51 = vld [vmem:[#allocation6_spill] sm:$0xff] }
 0x294   : > { %8824 = vst [vmem:[#allocation60_spill] sm:$0xff] %v8161_v8  ;;  %6041 = vmatprep.mubr.bf16.mxu0 %v3627_v42  ;;  %v3156_v11 = vpop.f32.mrb[111].mxu1 }
 0x296   : > { %v5871_v1 = vpop.f32.mrb[96].mxu0  ;;  %4033 = vmatmul.mubr.bf16.gmra.mrb[216].mxu1 %v3625_v32  ;;  %v8830_v32 = vld [vmem:[#allocation9_spill] sm:$0xff] }
 0x297   : > { %v2125_v27 = vadd.f32 %v5871_v1, %v7802_v21  ;;  %v2116_v50 = vpop.f32.mrb[97].mxu0  ;;  %4040 = vmatprep.mubr.bf16.mxu1 %v3629_v62 }
 0x298   : > { %v2117_v52 = vadd.f32 %v2116_v50, %v8825_v14  ;;  %v5872_v25 = vpop.f32.mrb[98].mxu0  ;;  %v8831_v14 = vld [vmem:[#allocation4_spill] sm:$0xff] }
 0x299   : > { %v2128_v35 = vadd.f32 %v5872_v25, %v8826_v41  ;;  %v2119_v39 = vpop.f32.mrb[99].mxu0  ;;  %v8167_v22 = vpop.f32.mrb[112].mxu1  ;;  %v8832_v25 = vld [vmem:[#allocation10_spill] sm:$0xff] }
 0x29a   : > { %v2120_v63 = vadd.f32 %v2119_v39, %v8827_v51  ;;  %8828 = vst [vmem:[#allocation5_spill] sm:$0xff] %v8167_v22  ;;  %v3161_v42 = vpop.f32.mrb[113].mxu1  ;;  %v8833_v51 = vld [vmem:[#allocation8_spill] sm:$0xff] }
 0x29b   : > { %6042 = vmatmul.mubr.bf16.gmra.mrb[204].mxu0 %v3630_v16  ;;  %v8169_v11 = vpop.f32.mrb[114].mxu1 }
 0x29c   : > { %8829 = vst [vmem:[#allocation7_spill] sm:$0xff] %v8169_v11  ;;  %v3164_v21 = vpop.f32.mrb[115].mxu1 }
 0x29e   : > { %v5875_v1 = vpop.f32.mrb[100].mxu0  ;;  %4041 = vmatmul.mubr.bf16.gmra.mrb[220].mxu1 %v3628_v12 }
 0x29f   : > { %v2141_v34 = vadd.f32 %v5875_v1, %v8830_v32  ;;  %v2132_v50 = vpop.f32.mrb[101].mxu0  ;;  %v8837_v32 = vld [vmem:[#allocation11_spill] sm:$0xff] }
 0x2a0   : > { %v2133_v62 = vadd.f32 %v2132_v50, %v8831_v14  ;;  %v5876_v29 = vpop.f32.mrb[102].mxu0  ;;  %v8838_v50 = vld [vmem:[#allocation16_spill] sm:$0xff] }
 0x2a1   : > { %v2144_v41 = vadd.f32 %v5876_v29, %v8832_v25  ;;  %v2135_v30 = vpop.f32.mrb[103].mxu0  ;;  %v8175_v22 = vpop.f32.mrb[116].mxu1  ;;  %v8839_v29 = vld [vmem:[#allocation12_spill] sm:$0xff] }
 0x2a2   : > { %v2136_v39 = vadd.f32 %v2135_v30, %v8833_v51  ;;  %8834 = vst [vmem:[#allocation6_spill] sm:$0xff] %v8175_v22  ;;  %v3169_v16 = vpop.f32.mrb[117].mxu1 }
 0x2a3   : > { %v8177_v42 = vpop.f32.mrb[118].mxu1 }
 0x2a4   : > { %8835 = vst [vmem:[#allocation9_spill] sm:$0xff] %v8177_v42  ;;  %v3172_v11 = vpop.f32.mrb[119].mxu1 }
 0x2a5   : > { %v8842_v11 = vld [vmem:[#allocation23_spill] sm:$0xff] }
 0x2a6   : > { %v5879_v21 = vpop.f32.mrb[104].mxu0 }
 0x2a7   : > { %v2157_v46 = vadd.f32 %v5879_v21, %v8836_v4  ;;  %v2148_v1 = vpop.f32.mrb[105].mxu0  ;;  %v8843_v21 = vld [vmem:[#allocation19_spill] sm:$0xff] }
 0x2a8   : > { %v2149_v12 = vadd.f32 %v2148_v1, %v8837_v32  ;;  %v5880_v5 = vpop.f32.mrb[106].mxu0  ;;  %v8844_v32 = vld [vmem:[#allocation24_spill] sm:$0xff] }
 0x2a9   : > { %v2160_v14 = vadd.f32 %v5880_v5, %v8838_v50  ;;  %v2151_v36 = vpop.f32.mrb[107].mxu0  ;;  %v8183_v8 = vpop.f32.mrb[120].mxu1 }
 0x2aa   : > { %v2152_v25 = vadd.f32 %v2151_v36, %v8839_v29  ;;  %8840 = vst [vmem:[#allocation4_spill] sm:$0xff] %v8183_v8  ;;  %v3177_v30 = vpop.f32.mrb[121].mxu1  ;;  %v8845_v36 = vld [vmem:[#allocation20_spill] sm:$0xff] }
 0x2ab   : > { %v8185_v51 = vpop.f32.mrb[122].mxu1 }
 0x2ac   : > { %8841 = vst [vmem:[#allocation10_spill] sm:$0xff] %v8185_v51  ;;  %v3180_v16 = vpop.f32.mrb[123].mxu1 }
 0x2ae   : > { %v5883_v42 = vpop.f32.mrb[108].mxu0 }
 0x2af   : > { %v8188_v22 = vadd.f32 %v5883_v42, %v8842_v11  ;;  %v2164_v4 = vpop.f32.mrb[109].mxu0  ;;  %v8848_v11 = vld [vmem:[#allocation17_spill] sm:$0xff] }
 0x2b0   : > { %v8191_v10 = vadd.f32 %v2164_v4, %v8843_v21  ;;  %v5884_v1 = vpop.f32.mrb[110].mxu0  ;;  %v8849_v4 = vld [vmem:[#allocation13_spill] sm:$0xff] }
 0x2b1   : > { %v8194_v5 = vadd.f32 %v5884_v1, %v8844_v32  ;;  %v2167_v50 = vpop.f32.mrb[111].mxu0  ;;  %v8199_v30 = vpop.f32.mrb[124].mxu1  ;;  %v8850_v1 = vld [vmem:[#allocation18_spill] sm:$0xff] }
 0x2b2   : > { %v8197_v29 = vadd.f32 %v2167_v50, %v8845_v36  ;;  %8846 = vst [vmem:[#allocation8_spill] sm:$0xff] %v8199_v30  ;;  %v3185_v51 = vpop.f32.mrb[125].mxu1  ;;  %v8852_v36 = vld [vmem:[#allocation14_spill] sm:$0xff] }
 0x2b3   : > { %v8201_v16 = vpop.f32.mrb[126].mxu1 }
 0x2b4   : > { %8847 = vst [vmem:[#allocation15_spill] sm:$0xff] %v8201_v16  ;;  %v3188_v8 = vpop.f32.mrb[127].mxu1 }
 0x2b6   : > { %v5935_v42 = vpop.f32.mrb[112].mxu0 }
 0x2b7   : > { %v3233_v2 = vadd.f32 %v5935_v42, %v8848_v11  ;;  %v3224_v55 = vpop.f32.mrb[113].mxu0 }
 0x2b8   : > { %v3225_v21 = vadd.f32 %v3224_v55, %v8849_v4  ;;  %v5936_v17 = vpop.f32.mrb[114].mxu0 }
 0x2b9   : > { %v8205_v43 = vadd.f32 %v3233_v2, %v2125_v27  ;;  %v3236_v32 = vadd.f32 %v5936_v17, %v8850_v1  ;;  %v3227_v31 = vpop.f32.mrb[115].mxu0  ;;  %v8211_v51 = vpop.f32.mrb[128].mxu1  ;;  %v8854_v2 = vld [vmem:[#allocation25_spill] sm:$0xff] }
 0x2ba   : > { %v8208_v50 = vadd.f32 %v3225_v21, %v2117_v52  ;;  %v3228_v30 = vadd.f32 %v3227_v31, %v8852_v36  ;;  %v3860_v8 = vpop.f32.mrb[129].mxu1  ;;  %v8855_v17 = vld [vmem:[#allocation21_spill] sm:$0xff]  ;;  %v8856_v31 = vld [vmem:[#allocation26_spill] sm:$0xff] }
 0x2bb   : > { %v8213_v16 = vadd.f32 %v3236_v32, %v2128_v35  ;;  %v8217_v42 = vpop.f32.mrb[130].mxu1  ;;  %v8858_v32 = vld [vmem:[#allocation22_spill] sm:$0xff] }
 0x2bc   : > { %8851 = vst [vmem:[#allocation11_spill] sm:$0xff] %v8208_v50  ;;  %v8215_v44 = vadd.f32 %v3228_v30, %v2120_v63  ;;  %v3863_v55 = vpop.f32.mrb[131].mxu1 }
 0x2be   : > { %8853 = vst [vmem:[#allocation16_spill] sm:$0xff] %v8215_v44  ;;  %v5939_v11 = vpop.f32.mrb[116].mxu0 }
 0x2bf   : > { %v3249_v27 = vadd.f32 %v5939_v11, %v8854_v2  ;;  %v3240_v4 = vpop.f32.mrb[117].mxu0 }
 0x2c0   : > { %v3241_v1 = vadd.f32 %v3240_v4, %v8855_v17  ;;  %v5940_v52 = vpop.f32.mrb[118].mxu0 }
 0x2c1   : > { %v8221_v21 = vadd.f32 %v3249_v27, %v2141_v34  ;;  %v3252_v36 = vadd.f32 %v5940_v52, %v8856_v31  ;;  %v3243_v50 = vpop.f32.mrb[119].mxu0  ;;  %v8227_v30 = vpop.f32.mrb[132].mxu1  ;;  %v8860_v34 = vld [vmem:[#allocation33_spill] sm:$0xff] }
 0x2c2   : > { %v8224_v35 = vadd.f32 %v3241_v1, %v2133_v62  ;;  %v3244_v63 = vadd.f32 %v3243_v50, %v8858_v32  ;;  %v3868_v55 = vpop.f32.mrb[133].mxu1  ;;  %v8861_v52 = vld [vmem:[#allocation29_spill] sm:$0xff]  ;;  %v8862_v50 = vld [vmem:[#allocation34_spill] sm:$0xff] }
 0x2c3   : > { %v8229_v8 = vadd.f32 %v3252_v36, %v2144_v41  ;;  %v8233_v11 = vpop.f32.mrb[134].mxu1  ;;  %v8863_v36 = vld [vmem:[#allocation30_spill] sm:$0xff] }
 0x2c4   : > { %8857 = vst [vmem:[#allocation12_spill] sm:$0xff] %v8224_v35  ;;  %v8231_v44 = vadd.f32 %v3244_v63, %v2136_v39  ;;  %v3871_v2 = vpop.f32.mrb[135].mxu1 }
 0x2c6   : > { %8859 = vst [vmem:[#allocation23_spill] sm:$0xff] %v8231_v44  ;;  %v5943_v4 = vpop.f32.mrb[120].mxu0 }
 0x2c7   : > { %v3265_v27 = vadd.f32 %v5943_v4, %v8860_v34  ;;  %v3256_v17 = vpop.f32.mrb[121].mxu0 }
 0x2c8   : > { %v3257_v31 = vadd.f32 %v3256_v17, %v8861_v52  ;;  %v5944_v62 = vpop.f32.mrb[122].mxu0  ;;  %v8864_v52 = vld [vmem:[#allocation37_spill] sm:$0xff] }
 0x2c9   : > { %v8237_v1 = vadd.f32 %v3265_v27, %v2157_v46  ;;  %v3268_v32 = vadd.f32 %v5944_v62, %v8862_v50  ;;  %v3259_v35 = vpop.f32.mrb[123].mxu0  ;;  %v8243_v63 = vpop.f32.mrb[136].mxu1 }
 0x2ca   : > { %v8240_v41 = vadd.f32 %v3257_v31, %v2149_v12  ;;  %v3260_v39 = vadd.f32 %v3259_v35, %v8863_v36  ;;  %v3876_v2 = vpop.f32.mrb[137].mxu1 }
 0x2cb   : > { %v8245_v55 = vadd.f32 %v3268_v32, %v2160_v14  ;;  %v8249_v4 = vpop.f32.mrb[138].mxu1 }
 0x2cc   : > { %v8247_v44 = vadd.f32 %v3260_v39, %v2152_v25  ;;  %v3879_v34 = vpop.f32.mrb[139].mxu1  ;;  %v8865_v25 = vld [vmem:[#allocation38_spill] sm:$0xff] }
 0x2ce   : > { %v5947_v17 = vpop.f32.mrb[124].mxu0 }
 0x2cf   : > { %v3281_v46 = vadd.f32 %v5947_v17, %v8014_v28  ;;  %v3272_v27 = vpop.f32.mrb[125].mxu0 }
 0x2d0   : > { %v3273_v62 = vadd.f32 %v3272_v27, %v8864_v52  ;;  %v5948_v12 = vpop.f32.mrb[126].mxu0  ;;  %v8866_v52 = vld [vmem:[#allocation31_spill] sm:$0xff] }
 0x2d1   : > { %v8254_v31 = vadd.f32 %v3281_v46, %v8188_v22  ;;  %v3284_v35 = vadd.f32 %v5948_v12, %v8018_v45  ;;  %v3275_v14 = vpop.f32.mrb[127].mxu0  ;;  %v8261_v36 = vpop.f32.mrb[140].mxu1 }
 0x2d2   : > { %v8258_v50 = vadd.f32 %v3273_v62, %v8191_v10  ;;  %v3276_v32 = vadd.f32 %v3275_v14, %v8865_v25  ;;  %v3884_v28 = vpop.f32.mrb[141].mxu1 }
 0x2d3   : > { %v8264_v39 = vadd.f32 %v3284_v35, %v8194_v5  ;;  %v8269_v34 = vpop.f32.mrb[142].mxu1  ;;  %v8867_v35 = vld [vmem:[#allocation27_spill] sm:$0xff] }
 0x2d4   : > { %v8267_v2 = vadd.f32 %v3276_v32, %v8197_v29  ;;  %v3887_v22 = vpop.f32.mrb[143].mxu1  ;;  %v8869_v32 = vld [vmem:[#allocation32_spill] sm:$0xff] }
 0x2d5   : > { %v8871_v22 = vld [vmem:[#allocation28_spill] sm:$0xff] }
 0x2d6   : > { %v5951_v17 = vpop.f32.mrb[128].mxu0 }
 0x2d7   : > { %v3297_v45 = vadd.f32 %v5951_v17, %v8038_v38  ;;  %v3288_v46 = vpop.f32.mrb[129].mxu0 }
 0x2d8   : > { %v3289_v10 = vadd.f32 %v3288_v46, %v8026_v23  ;;  %v5952_v27 = vpop.f32.mrb[130].mxu0 }
 0x2d9   : > { %v8274_v62 = vadd.f32 %v3297_v45, %v8866_v52  ;;  %v3300_v5 = vadd.f32 %v5952_v27, %v8041_v20  ;;  %v3291_v12 = vpop.f32.mrb[131].mxu0  ;;  %v8281_v25 = vpop.f32.mrb[144].mxu1 }
 0x2da   : > { %v8278_v14 = vadd.f32 %v3289_v10, %v8867_v35  ;;  %v3292_v29 = vadd.f32 %v3291_v12, %v8029_v57  ;;  %v3892_v38 = vpop.f32.mrb[145].mxu1  ;;  %v8873_v57 = vld [vmem:[#allocation39_spill] sm:$0xff] }
 0x2db   : > { %v8284_v28 = vadd.f32 %v3300_v5, %v8869_v32  ;;  %v8289_v17 = vpop.f32.mrb[146].mxu1  ;;  %v8875_v32 = vld [vmem:[#allocation35_spill] sm:$0xff] }
 0x2dc   : > { %8868 = vst [vmem:[#allocation19_spill] sm:$0xff] %v8278_v14  ;;  %v8287_v23 = vadd.f32 %v3292_v29, %v8871_v22  ;;  %v3895_v45 = vpop.f32.mrb[147].mxu1 }
 0x2dd   : > { %8870 = vst [vmem:[#allocation24_spill] sm:$0xff] %v8284_v28  ;;  %v8877_v45 = vld [vmem:[#allocation40_spill] sm:$0xff] }
 0x2de   : > { %8872 = vst [vmem:[#allocation20_spill] sm:$0xff] %v8287_v23  ;;  %v5955_v46 = vpop.f32.mrb[132].mxu0 }
 0x2df   : > { %v3313_v20 = vadd.f32 %v5955_v46, %v8062_v18  ;;  %v3304_v27 = vpop.f32.mrb[133].mxu0  ;;  %v8879_v46 = vld [vmem:[#allocation36_spill] sm:$0xff] }
 0x2e0   : > { %v3305_v10 = vadd.f32 %v3304_v27, %v8050_v47  ;;  %v5956_v52 = vpop.f32.mrb[134].mxu0 }
 0x2e1   : > { %v8294_v12 = vadd.f32 %v3313_v20, %v8873_v57  ;;  %v3316_v5 = vadd.f32 %v5956_v52, %v8065_v0  ;;  %v3307_v35 = vpop.f32.mrb[135].mxu0  ;;  %v8301_v22 = vpop.f32.mrb[148].mxu1 }
 0x2e2   : > { %v8298_v38 = vadd.f32 %v3305_v10, %v8875_v32  ;;  %v3308_v29 = vadd.f32 %v3307_v35, %v8053_v7  ;;  %v3900_v18 = vpop.f32.mrb[149].mxu1 }
 0x2e3   : > { %8874 = vst [vmem:[#allocation17_spill] sm:$0xff] %v8294_v12  ;;  %v8304_v23 = vadd.f32 %v3316_v5, %v8877_v45  ;;  %v8309_v27 = vpop.f32.mrb[150].mxu1  ;;  %v8924_v12 = vld [vmem:[#allocation8_spill] sm:$0xff] }
 0x2e4   : > { %8876 = vst [vmem:[#allocation13_spill] sm:$0xff] %v8298_v38  ;;  %v8307_v47 = vadd.f32 %v3308_v29, %v8879_v46  ;;  %v3903_v20 = vpop.f32.mrb[151].mxu1 }
 0x2e5   : > { %8878 = vst [vmem:[#allocation18_spill] sm:$0xff] %v8304_v23  ;;  %v8326_v20 = vpop.permute.xlu0 %4468 }
 0x2e6   : > { %8880 = vst [vmem:[#allocation14_spill] sm:$0xff] %v8307_v47  ;;  %v5959_v57 = vpop.f32.mrb[136].mxu0 }
 0x2e7   : > { %v3329_v0 = vadd.f32 %v5959_v57, %v8086_v13  ;;  %v3320_v52 = vpop.f32.mrb[137].mxu0  ;;  %v8333_v57 = vpop.permute.xlu1 %4473 }
 0x2e8   : > { %v3321_v10 = vadd.f32 %v3320_v52, %v8074_v33  ;;  %v5960_v32 = vpop.f32.mrb[138].mxu0 }
 0x2e9   : > { %v8314_v7 = vadd.f32 %v3329_v0, %v8033_v53  ;;  %v3332_v5 = vadd.f32 %v5960_v32, %v8089_v59  ;;  %v3323_v35 = vpop.f32.mrb[139].mxu0  ;;  %v8321_v18 = vpop.f32.mrb[152].mxu1 }
 0x2ea   : > { %v8318_v45 = vadd.f32 %v3321_v10, %v8021_v61  ;;  %v3324_v29 = vadd.f32 %v3323_v35, %v8077_v48  ;;  %v3908_v13 = vpop.f32.mrb[153].mxu1 }
 0x2eb   : > { %8881 = vst [vmem:[#allocation25_spill] sm:$0xff] %v8314_v7  ;;  %v8324_v46 = vadd.f32 %v3332_v5, %v8036_v26  ;;  %v8331_v53 = vpop.f32.mrb[154].mxu1 }
 0x2ec   : > { %8882 = vst [vmem:[#allocation21_spill] sm:$0xff] %v8318_v45  ;;  %v8329_v33 = vadd.f32 %v3324_v29, %v8024_v3  ;;  %v3911_v59 = vpop.f32.mrb[155].mxu1  ;;  %v8341_v3 = vpop.permute.xlu0 %4478 }
 0x2ed   : > { %8883 = vst [vmem:[#allocation26_spill] sm:$0xff] %v8324_v46  ;;  %v8352_v59 = vpop.permute.xlu1 %4483 }
 0x2ee   : > { %8884 = vst [vmem:[#allocation22_spill] sm:$0xff] %v8329_v33  ;;  %v5963_v61 = vpop.f32.mrb[140].mxu0 }
 0x2ef   : > { %v3345_v0 = vadd.f32 %v5963_v61, %v8110_v49  ;;  %v3336_v48 = vpop.f32.mrb[141].mxu0 }
 0x2f0   : > { %v3337_v52 = vadd.f32 %v3336_v48, %v8098_v19  ;;  %v5964_v10 = vpop.f32.mrb[142].mxu0 }
 0x2f1   : > { %v8338_v26 = vadd.f32 %v3345_v0, %v8057_v54  ;;  %v3348_v32 = vadd.f32 %v5964_v10, %v8113_v58  ;;  %v3339_v5 = vpop.f32.mrb[143].mxu0  ;;  %v8347_v13 = vpop.f32.mrb[156].mxu1 }
 0x2f2   : > { %v8344_v35 = vadd.f32 %v3337_v52, %v8045_v6  ;;  %v3340_v29 = vadd.f32 %v3339_v5, %v8101_v24  ;;  %v3916_v19 = vpop.f32.mrb[157].mxu1  ;;  %v8360_v52 = vpop.permute.xlu0 %4488 }
 0x2f3   : > { %8885 = vst [vmem:[#allocation33_spill] sm:$0xff] %v8338_v26  ;;  %v8350_v49 = vadd.f32 %v3348_v32, %v8060_v15  ;;  %v8357_v58 = vpop.f32.mrb[158].mxu1 }
 0x2f4   : > { %8886 = vst [vmem:[#allocation29_spill] sm:$0xff] %v8344_v35  ;;  %v8355_v54 = vadd.f32 %v3340_v29, %v8048_v37  ;;  %v3919_v61 = vpop.f32.mrb[159].mxu1  ;;  %v8367_v37 = vpop.permute.xlu1 %4493  ;;  %v8890_v29 = vld [vmem:[#allocation41_spill] sm:$0xff] }
 0x2f5   : > { %8887 = vst [vmem:[#allocation34_spill] sm:$0xff] %v8350_v49  ;;  %v8892_v61 = vld [vmem:[#allocation50_spill] sm:$0xff] }
 0x2f6   : > { %8888 = vst [vmem:[#allocation30_spill] sm:$0xff] %v8355_v54  ;;  %v5967_v0 = vpop.f32.mrb[144].mxu0 }
 0x2f7   : > { %v3361_v6 = vadd.f32 %v5967_v0, %v8134_v9  ;;  %v3352_v48 = vpop.f32.mrb[145].mxu0  ;;  %v8893_v0 = vld [vmem:[#allocation43_spill] sm:$0xff] }
 0x2f8   : > { %v3353_v24 = vadd.f32 %v3352_v48, %v8122_v40  ;;  %v5968_v10 = vpop.f32.mrb[146].mxu0  ;;  %v8895_v48 = vld [vmem:[#allocation42_spill] sm:$0xff] }
 0x2f9   : > { %v8364_v15 = vadd.f32 %v3361_v6, %v8081_v56  ;;  %v3364_v32 = vadd.f32 %v5968_v10, %v8137_v60  ;;  %v3355_v5 = vpop.f32.mrb[147].mxu0  ;;  %v8373_v9 = vpop.f32.mrb[160].mxu1 }
 0x2fa   : > { %v8370_v19 = vadd.f32 %v3353_v24, %v8890_v29  ;;  %v3356_v54 = vadd.f32 %v3355_v5, %v8892_v61  ;;  %v3924_v40 = vpop.f32.mrb[161].mxu1  ;;  %v8383_v6 = vpop.permute.xlu0 %4498  ;;  %v8899_v5 = vld [vmem:[#allocation55_spill] sm:$0xff] }
 0x2fb   : > { %8889 = vst [vmem:[#allocation37_spill] sm:$0xff] %v8364_v15  ;;  %v8376_v49 = vadd.f32 %v3364_v32, %v8893_v0  ;;  %v8381_v56 = vpop.f32.mrb[162].mxu1  ;;  %v8898_v15 = vld [vmem:[#allocation59_spill] sm:$0xff]  ;;  %v8900_v32 = vld [vmem:[#allocation46_spill] sm:$0xff]  ;;  %v8902_v40 = vld [vmem:[#allocation60_spill] sm:$0xff] }
 0x2fc   : > { %8891 = vst [vmem:[#allocation38_spill] sm:$0xff] %v8370_v19  ;;  %v8379_v35 = vadd.f32 %v3356_v54, %v8895_v48  ;;  %8897 = vst [vmem:[#allocation32_spill] sm:$0xff] %v8381_v56  ;;  %v3927_v60 = vpop.f32.mrb[163].mxu1  ;;  %v8386_v19 = vpop.permute.xlu1 %4503 }
 0x2fd   : > { %8894 = vst [vmem:[#allocation31_spill] sm:$0xff] %v8376_v49  ;;  %v8905_v60 = vld [vmem:[#allocation56_spill] sm:$0xff] }
 0x2fe   : > { %8896 = vst [vmem:[#allocation27_spill] sm:$0xff] %v8379_v35  ;;  %v5971_v10 = vpop.f32.mrb[148].mxu0  ;;  %v8903_v35 = vld [vmem:[#allocation44_spill] sm:$0xff]  ;;  %v8402_v7 = vpop.permute.xlu0 %4508 }
 0x2ff   : > { %v3377_v24 = vadd.f32 %v5971_v10, %v8898_v15  ;;  %v3368_v29 = vpop.f32.mrb[149].mxu0  ;;  %v8906_v15 = vld [vmem:[#allocation47_spill] sm:$0xff] }
 0x300   : > { %v3369_v61 = vadd.f32 %v3368_v29, %v8899_v5  ;;  %v5972_v26 = vpop.f32.mrb[150].mxu0  ;;  %v8908_v29 = vld [vmem:[#allocation45_spill] sm:$0xff] }
 0x301   : > { %v8390_v0 = vadd.f32 %v3377_v24, %v8900_v32  ;;  %v3380_v54 = vadd.f32 %v5972_v26, %v8902_v40  ;;  %v3371_v48 = vpop.f32.mrb[151].mxu0  ;;  %v8397_v46 = vpop.f32.mrb[164].mxu1 }
 0x302   : > { %v8394_v49 = vadd.f32 %v3369_v61, %v8903_v35  ;;  %v3372_v33 = vadd.f32 %v3371_v48, %v8905_v60  ;;  %v3932_v45 = vpop.f32.mrb[165].mxu1  ;;  %v8409_v32 = vpop.permute.xlu1 %4513  ;;  %v8910_v61 = vld [vmem:[#allocation6_spill] sm:$0xff]  ;;  %v8911_v60 = vld [vmem:[#allocation5_spill] sm:$0xff] }
 0x303   : > { %8901 = vst [vmem:[#allocation28_spill] sm:$0xff] %v8390_v0  ;;  %v8400_v10 = vadd.f32 %v3380_v54, %v8906_v15  ;;  %v8407_v24 = vpop.f32.mrb[166].mxu1  ;;  %v8912_v54 = vld [vmem:[#allocation51_spill] sm:$0xff]  ;;  %v8914_v45 = vld [vmem:[#allocation9_spill] sm:$0xff] }
 0x304   : > { %8904 = vst [vmem:[#allocation39_spill] sm:$0xff] %v8394_v49  ;;  %v8405_v5 = vadd.f32 %v3372_v33, %v8908_v29  ;;  %v3935_v26 = vpop.f32.mrb[167].mxu1  ;;  %v8417_v33 = vpop.permute.xlu0 %4518  ;;  %v8915_v29 = vld [vmem:[#allocation48_spill] sm:$0xff] }
 0x305   : > { %8907 = vst [vmem:[#allocation35_spill] sm:$0xff] %v8400_v10  ;;  %v8917_v26 = vld [vmem:[#allocation7_spill] sm:$0xff] }
 0x306   : > { %8909 = vst [vmem:[#allocation40_spill] sm:$0xff] %v8405_v5  ;;  %v5975_v35 = vpop.f32.mrb[152].mxu0 }
 0x307   : > { %v3393_v40 = vadd.f32 %v5975_v35, %v8910_v61  ;;  %v3384_v48 = vpop.f32.mrb[153].mxu0  ;;  %v8919_v35 = vld [vmem:[#allocation52_spill] sm:$0xff] }
 0x308   : > { %v3385_v49 = vadd.f32 %v3384_v48, %v8911_v60  ;;  %v5976_v0 = vpop.f32.mrb[154].mxu0  ;;  %v8428_v60 = vpop.permute.xlu1 %4523 }
 0x309   : > { %v8414_v15 = vadd.f32 %v3393_v40, %v8912_v54  ;;  %v3396_v10 = vadd.f32 %v5976_v0, %v8914_v45  ;;  %v3387_v47 = vpop.f32.mrb[155].mxu0  ;;  %v8423_v38 = vpop.f32.mrb[168].mxu1  ;;  %v8921_v40 = vld [vmem:[#allocation49_spill] sm:$0xff] }
 0x30a   : > { %v8420_v5 = vadd.f32 %v3385_v49, %v8915_v29  ;;  %v3388_v23 = vadd.f32 %v3387_v47, %v8917_v26  ;;  %8918 = vst [vmem:[#allocation50_spill] sm:$0xff] %v8423_v38  ;;  %v3940_v48 = vpop.f32.mrb[169].mxu1  ;;  %v8925_v47 = vld [vmem:[#allocation4_spill] sm:$0xff] }
 0x30b   : > { %8913 = vst [vmem:[#allocation36_spill] sm:$0xff] %v8414_v15  ;;  %v8426_v61 = vadd.f32 %v3396_v10, %v8919_v35  ;;  %v8433_v0 = vpop.f32.mrb[170].mxu1  ;;  %v8926_v10 = vld [vmem:[#allocation57_spill] sm:$0xff]  ;;  %v8928_v48 = vld [vmem:[#allocation15_spill] sm:$0xff] }
 0x30c   : > { %8916 = vst [vmem:[#allocation41_spill] sm:$0xff] %v8420_v5  ;;  %v8431_v54 = vadd.f32 %v3388_v23, %v8921_v40  ;;  %8923 = vst [vmem:[#allocation59_spill] sm:$0xff] %v8433_v0  ;;  %v3943_v45 = vpop.f32.mrb[171].mxu1  ;;  %v8436_v5 = vpop.permute.xlu0 %4528  ;;  %v8929_v40 = vld [vmem:[#allocation53_spill] sm:$0xff] }
 0x30d   : > { %8920 = vst [vmem:[#allocation43_spill] sm:$0xff] %v8426_v61  ;;  %v8443_v23 = vpop.permute.xlu1 %4533  ;;  %v8931_v45 = vld [vmem:[#allocation10_spill] sm:$0xff] }
 0x30e   : > { %8922 = vst [vmem:[#allocation42_spill] sm:$0xff] %v8431_v54  ;;  %v5979_v15 = vpop.f32.mrb[156].mxu0 }
 0x30f   : > { %v3409_v49 = vadd.f32 %v5979_v15, %v8924_v12  ;;  %v3400_v29 = vpop.f32.mrb[157].mxu0  ;;  %v8932_v15 = vld [vmem:[#allocation58_spill] sm:$0xff] }
 0x310   : > { %v3401_v26 = vadd.f32 %v3400_v29, %v8925_v47  ;;  %v5980_v38 = vpop.f32.mrb[158].mxu0  ;;  %v8934_v47 = vld [vmem:[#allocation54_spill] sm:$0xff] }
 0x311   : > { %v8440_v35 = vadd.f32 %v3409_v49, %v8926_v10  ;;  %v3412_v61 = vadd.f32 %v5980_v38, %v8928_v48  ;;  %v3403_v28 = vpop.f32.mrb[159].mxu0  ;;  %v8449_v12 = vpop.f32.mrb[172].mxu1 }
 0x312   : > { %v8446_v54 = vadd.f32 %v3401_v26, %v8929_v40  ;;  %v3404_v0 = vadd.f32 %v3403_v28, %v8931_v45  ;;  %v3948_v29 = vpop.f32.mrb[173].mxu1  ;;  %v8459_v10 = vpop.permute.xlu0 %4538 }
 0x313   : > { %8927 = vst [vmem:[#allocation55_spill] sm:$0xff] %v8440_v35  ;;  %v8452_v56 = vadd.f32 %v3412_v61, %v8932_v15  ;;  %v8457_v49 = vpop.f32.mrb[174].mxu1  ;;  %v8462_v35 = vpop.permute.xlu1 %4543  ;;  %v8937_v29 = vld [vmem:[#allocation11_spill] sm:$0xff] }
 0x314   : > { %8930 = vst [vmem:[#allocation46_spill] sm:$0xff] %v8446_v54  ;;  %v8455_v14 = vadd.f32 %v3404_v0, %v8934_v47  ;;  %8936 = vst [vmem:[#allocation56_spill] sm:$0xff] %v8457_v49  ;;  %v3951_v38 = vpop.f32.mrb[175].mxu1 }
 0x315   : > { %8933 = vst [vmem:[#allocation60_spill] sm:$0xff] %v8452_v56 }
 0x316   : > { %8935 = vst [vmem:[#allocation44_spill] sm:$0xff] %v8455_v14  ;;  %v5999_v48 = vpop.f32.mrb[160].mxu0 }
 0x317   : > { %v4092_v26 = vadd.f32 %v5999_v48, %v8227_v30  ;;  %v4083_v40 = vpop.f32.mrb[161].mxu0  ;;  %v8472_v48 = vpop.permute.xlu0 %4548 }
 0x318   : > { %v4084_v28 = vadd.f32 %v4083_v40, %v8211_v51  ;;  %v6000_v45 = vpop.f32.mrb[162].mxu0  ;;  %v8938_v51 = vld [vmem:[#allocation16_spill] sm:$0xff] }
 0x319   : > { %v4276_v61 = vadd.f32 %v4092_v26, %v8205_v43  ;;  %v4095_v15 = vadd.f32 %v6000_v45, %v8233_v11  ;;  %v4086_v0 = vpop.f32.mrb[163].mxu0  ;;  %v8469_v56 = vpop.f32.mrb[176].mxu1 }
 0x31a   : > { %v4274_v47 = vadd.f32 %v4084_v28, %v8937_v29  ;;  %v4087_v38 = vadd.f32 %v4086_v0, %v8217_v42  ;;  %v3956_v30 = vpop.f32.mrb[177].mxu1  ;;  %v8480_v42 = vpop.permute.xlu1 %4553 }
 0x31b   : > { %v4277_v14 = vadd.f32 %v4095_v15, %v8213_v16  ;;  %v8476_v49 = vpop.f32.mrb[178].mxu1  ;;  %v4708_v43 = vmul.f32 %v8341_v3, %v4276_v61 }
 0x31c   : > { %v4706_v54 = vmul.f32 %v8326_v20, %v4274_v47  ;;  %v4275_v40 = vadd.f32 %v4087_v38, %v8938_v51  ;;  %8939 = vst [vmem:[#allocation47_spill] sm:$0xff] %v8476_v49  ;;  %v3959_v26 = vpop.f32.mrb[179].mxu1  ;;  %v8488_v51 = vpop.permute.xlu0 %4558 }
 0x31d   : > { %v4709_v11 = vmul.f32 %v8352_v59, %v4277_v14  ;;  %v5053_v30 = vmul.f32 %v4708_v43, %v4708_v43 }
 0x31e   : > { %v4707_v28 = vmul.f32 %v8333_v57, %v4275_v40  ;;  %v6003_v16 = vpop.f32.mrb[164].mxu0  ;;  %v5051_v45 = vmul.f32 %v4706_v54, %v4706_v54  ;;  %v8496_v49 = vpop.permute.xlu1 %4563 }
 0x31f   : > { %v5599_v15 = vpack.c.bf16 %v4709_v11, %v4708_v43  ;;  %v4108_v20 = vadd.f32 %v6003_v16, %v8261_v36  ;;  %v4099_v0 = vpop.f32.mrb[165].mxu0  ;;  %v8940_v36 = vld [vmem:[#allocation12_spill] sm:$0xff] }
 0x320   : > { %v5594_v29 = vpack.c.bf16 %v4707_v28, %v4706_v54  ;;  %v4995_v47 = vadd.f32 %v4707_v28, %v4706_v54  ;;  %v5052_v38 = vmul.f32 %v4707_v28, %v4707_v28  ;;  %v4100_v3 = vadd.f32 %v4099_v0, %v8243_v63  ;;  %v6004_v61 = vpop.f32.mrb[166].mxu0 }
 0x321   : > { %5734 = vst [vmem:[%s6246_s18 + $0x8] sm:$0xff] %v5599_v15   ;;  %v4280_v14 = vadd.f32 %v4108_v20, %v8221_v21  ;;  %v4111_v59 = vadd.f32 %v6004_v61, %v8269_v34  ;;  %v4102_v57 = vpop.f32.mrb[167].mxu0  ;;  %v8493_v28 = vpop.f32.mrb[180].mxu1  ;;  %v5054_v63 = vmul.f32 %v4709_v11, %v4709_v11  ;;  %v8941_v61 = vld [vmem:[#allocation23_spill] sm:$0xff] }
 0x322   : > { %5595 = vst [vmem:[%s6246_s18] sm:$0xff] %v5594_v29   ;;  %v4996_v40 = vadd.f32 %v4995_v47, %v4708_v43  ;;  %v5099_v26 = vadd.f32 %v5052_v38, %v5051_v45  ;;  %v4278_v16 = vadd.f32 %v4100_v3, %v8940_v36  ;;  %v4103_v54 = vadd.f32 %v4102_v57, %v8249_v4  ;;  %v3964_v15 = vpop.f32.mrb[181].mxu1 }
 0x323   : > { %v4281_v0 = vadd.f32 %v4111_v59, %v8229_v8  ;;  %v8500_v43 = vpop.f32.mrb[182].mxu1  ;;  %v4712_v45 = vmul.f32 %v8383_v6, %v4280_v14 }
 0x324   : > { %v5100_v21 = vadd.f32 %v5099_v26, %v5053_v30  ;;  %v4710_v34 = vmul.f32 %v8360_v52, %v4278_v16  ;;  %v4997_v20 = vadd.f32 %v4996_v40, %v4709_v11  ;;  %v4279_v29 = vadd.f32 %v4103_v54, %v8941_v61  ;;  %v3967_v47 = vpop.f32.mrb[183].mxu1  ;;  %v8506_v40 = vpop.permute.xlu0 %4568 }
 0x325   : > { %v4713_v4 = vmul.f32 %v8386_v19, %v4281_v0  ;;  %v8512_v0 = vpop.permute.xlu1 %4573  ;;  %v5057_v15 = vmul.f32 %v4712_v45, %v4712_v45 }
 0x326   : > { %v4998_v38 = vadd.f32 %v4997_v20, %v4710_v34  ;;  %v5055_v3 = vmul.f32 %v4710_v34, %v4710_v34  ;;  %v5101_v8 = vadd.f32 %v5100_v21, %v5054_v63  ;;  %v4711_v59 = vmul.f32 %v8367_v37, %v4279_v29  ;;  %v6007_v57 = vpop.f32.mrb[168].mxu0 }
 0x327   : > { %v5609_v30 = vpack.c.bf16 %v4713_v4, %v4712_v45  ;;  %v4124_v52 = vadd.f32 %v6007_v57, %v8301_v22  ;;  %v4115_v11 = vpop.f32.mrb[169].mxu0  ;;  %v5058_v47 = vmul.f32 %v4713_v4, %v4713_v4 }
 0x328   : > { %v5102_v26 = vadd.f32 %v5101_v8, %v5055_v3  ;;  %v5604_v36 = vpack.c.bf16 %v4711_v59, %v4710_v34  ;;  %v4999_v6 = vadd.f32 %v4998_v38, %v4711_v59  ;;  %v5056_v14 = vmul.f32 %v4711_v59, %v4711_v59  ;;  %v6008_v19 = vpop.f32.mrb[170].mxu0  ;;  %v8526_v57 = vpop.permute.xlu0 %4578 }
 0x329   : > { %5736 = vst [vmem:[%s6246_s18 + $0x18] sm:$0xff] %v5609_v30   ;;  %v4284_v16 = vadd.f32 %v4124_v52, %v8237_v1  ;;  %v4116_v54 = vadd.f32 %v4115_v11, %v8281_v25  ;;  %v4127_v37 = vadd.f32 %v6008_v19, %v8309_v27  ;;  %v4118_v63 = vpop.f32.mrb[171].mxu0  ;;  %v8516_v34 = vpop.f32.mrb[184].mxu1 }
 0x32a   : > { %5735 = vst [vmem:[%s6246_s18 + $0x10] sm:$0xff] %v5604_v36   ;;  %v5000_v22 = vadd.f32 %v4999_v6, %v4712_v45  ;;  %v5103_v21 = vadd.f32 %v5102_v26, %v5056_v14  ;;  %v4119_v20 = vadd.f32 %v4118_v63, %v8289_v17  ;;  %v3972_v1 = vpop.f32.mrb[185].mxu1  ;;  %v8529_v26 = vpop.permute.xlu1 %4583 }
 0x32b   : > { %v4282_v61 = vadd.f32 %v4116_v54, %v8240_v41  ;;  %v4285_v29 = vadd.f32 %v4127_v37, %v8245_v55  ;;  %v8521_v3 = vpop.f32.mrb[186].mxu1  ;;  %v4716_v8 = vmul.f32 %v8417_v33, %v4284_v16 }
 0x32c   : > { %v5104_v25 = vadd.f32 %v5103_v21, %v5057_v15  ;;  %v5001_v38 = vadd.f32 %v5000_v22, %v4713_v4  ;;  %v4283_v27 = vadd.f32 %v4119_v20, %v8247_v44  ;;  %v3975_v59 = vpop.f32.mrb[187].mxu1 }
 0x32d   : > { %v4714_v45 = vmul.f32 %v8402_v7, %v4282_v61  ;;  %v4717_v17 = vmul.f32 %v8428_v60, %v4285_v29  ;;  %v5061_v22 = vmul.f32 %v4716_v8, %v4716_v8  ;;  %v8542_v61 = vpop.permute.xlu0 %4588 }
 0x32e   : > { %v5105_v41 = vadd.f32 %v5104_v25, %v5058_v47  ;;  %v4715_v55 = vmul.f32 %v8409_v32, %v4283_v27  ;;  %v6011_v30 = vpop.f32.mrb[172].mxu0  ;;  %v8550_v27 = vpop.permute.xlu1 %4593 }
 0x32f   : > { %v5002_v4 = vadd.f32 %v5001_v38, %v4714_v45  ;;  %v5059_v52 = vmul.f32 %v4714_v45, %v4714_v45  ;;  %v5619_v44 = vpack.c.bf16 %v4717_v17, %v4716_v8  ;;  %v4131_v11 = vpop.f32.mrb[173].mxu0  ;;  %v4140_v7 = vadd.f32 %v6011_v30, %v8347_v13 }
 0x330   : > { %v5614_v33 = vpack.c.bf16 %v4715_v55, %v4714_v45  ;;  %v5060_v36 = vmul.f32 %v4715_v55, %v4715_v55  ;;  %v4132_v60 = vadd.f32 %v4131_v11, %v8321_v18  ;;  %v6012_v6 = vpop.f32.mrb[174].mxu0  ;;  %v5062_v29 = vmul.f32 %v4717_v17, %v4717_v17 }
 0x331   : > { %v5106_v14 = vadd.f32 %v5105_v41, %v5059_v52  ;;  %5738 = vst [vmem:[%s6246_s18 + $0x28] sm:$0xff] %v5619_v44   ;;  %v5003_v19 = vadd.f32 %v5002_v4, %v4715_v55  ;;  %v4143_v32 = vadd.f32 %v6012_v6, %v8357_v58  ;;  %v4134_v16 = vpop.f32.mrb[175].mxu0  ;;  %v4288_v54 = vadd.f32 %v4140_v7, %v8254_v31  ;;  %v8539_v15 = vpop.f32.mrb[188].mxu1 }
 0x332   : > { %5737 = vst [vmem:[%s6246_s18 + $0x20] sm:$0xff] %v5614_v33   ;;  %v4286_v37 = vadd.f32 %v4132_v60, %v8258_v50  ;;  %v4135_v63 = vadd.f32 %v4134_v16, %v8331_v53  ;;  %v3980_v20 = vpop.f32.mrb[189].mxu1  ;;  %v8943_v60 = vld [vmem:[#allocation32_spill] sm:$0xff] }
 0x333   : > { %v5004_v13 = vadd.f32 %v5003_v19, %v4716_v8  ;;  %v5107_v21 = vadd.f32 %v5106_v14, %v5060_v36  ;;  %v4289_v18 = vadd.f32 %v4143_v32, %v8264_v39  ;;  %v8546_v31 = vpop.f32.mrb[190].mxu1  ;;  %v4720_v53 = vmul.f32 %v8459_v10, %v4288_v54  ;;  %v8942_v36 = vld [vmem:[#allocation19_spill] sm:$0xff]  ;;  %v8944_v32 = vld [vmem:[#allocation24_spill] sm:$0xff] }
 0x334   : > { %v4718_v58 = vmul.f32 %v8436_v5, %v4286_v37  ;;  %v4287_v1 = vadd.f32 %v4135_v63, %v8267_v2  ;;  %v3983_v38 = vpop.f32.mrb[191].mxu1  ;;  %v8566_v37 = vpop.permute.xlu1 %4603 }
 0x335   : > { %v5108_v50 = vadd.f32 %v5107_v21, %v5061_v22  ;;  %v5005_v47 = vadd.f32 %v5004_v13, %v4717_v17  ;;  %v4721_v25 = vmul.f32 %v8462_v35, %v4289_v18  ;;  %v8945_v22 = vld [vmem:[#allocation20_spill] sm:$0xff] }
 0x336   : > { %v5063_v39 = vmul.f32 %v4718_v58, %v4718_v58  ;;  %v4719_v8 = vmul.f32 %v8443_v23, %v4287_v1  ;;  %v6015_v45 = vpop.f32.mrb[176].mxu0  ;;  %v8557_v23 = vpop.permute.xlu0 %4598 }
 0x337   : > { %v5006_v5 = vadd.f32 %v5005_v47, %v4718_v58  ;;  %v5109_v59 = vadd.f32 %v5108_v50, %v5062_v29  ;;  %v5629_v2 = vpack.c.bf16 %v4721_v25, %v4720_v53  ;;  %v4147_v41 = vpop.f32.mrb[177].mxu0  ;;  %v4156_v10 = vadd.f32 %v6015_v45, %v8397_v46 }
 0x338   : > { %v5624_v55 = vpack.c.bf16 %v4719_v8, %v4718_v58  ;;  %v5064_v30 = vmul.f32 %v4719_v8, %v4719_v8  ;;  %v4148_v17 = vadd.f32 %v4147_v41, %v8373_v9  ;;  %v6016_v35 = vpop.f32.mrb[178].mxu0  ;;  %v5065_v46 = vmul.f32 %v4720_v53, %v4720_v53 }
 0x339   : > { %v5110_v4 = vadd.f32 %v5109_v59, %v5063_v39  ;;  %5740 = vst [vmem:[%s6246_s18 + $0x38] sm:$0xff] %v5629_v2   ;;  %v5007_v52 = vadd.f32 %v5006_v5, %v4719_v8  ;;  %v4159_v44 = vadd.f32 %v6016_v35, %v8407_v24  ;;  %v4150_v11 = vpop.f32.mrb[179].mxu0  ;;  %v4292_v33 = vadd.f32 %v4156_v10, %v8274_v62  ;;  %v8563_v14 = vpop.f32.mrb[192].mxu1 }
 0x33a   : > { %5739 = vst [vmem:[%s6246_s18 + $0x30] sm:$0xff] %v5624_v55   ;;  %v4290_v7 = vadd.f32 %v4148_v17, %v8942_v36  ;;  %v4151_v6 = vadd.f32 %v4150_v11, %v8943_v60  ;;  %v3988_v54 = vpop.f32.mrb[193].mxu1  ;;  %v5066_v24 = vmul.f32 %v4721_v25, %v4721_v25  ;;  %v8575_v8 = vpop.permute.xlu0 %4608  ;;  %v8947_v55 = vld [vmem:[#allocation56_spill] sm:$0xff]  ;;  %v8948_v17 = vld [vmem:[#allocation17_spill] sm:$0xff]  ;;  %v8951_v60 = vld [vmem:[#allocation18_spill] sm:$0xff] }
 0x33b   : > { %v5008_v9 = vadd.f32 %v5007_v52, %v4720_v53  ;;  %v5111_v19 = vadd.f32 %v5110_v4, %v5064_v30  ;;  %v4293_v16 = vadd.f32 %v4159_v44, %v8944_v32  ;;  %v8570_v62 = vpop.f32.mrb[194].mxu1  ;;  %v4724_v18 = vmul.f32 %v8488_v51, %v4292_v33  ;;  %v8581_v10 = vpop.permute.xlu1 %4613  ;;  %v8949_v4 = vld [vmem:[#allocation13_spill] sm:$0xff]  ;;  %v8950_v44 = vld [vmem:[#allocation59_spill] sm:$0xff]  ;;  %v8952_v32 = vld [vmem:[#allocation14_spill] sm:$0xff] }
 0x33c   : > { %v4722_v63 = vmul.f32 %v8472_v48, %v4290_v7  ;;  %v4291_v13 = vadd.f32 %v4151_v6, %v8945_v22  ;;  %v3991_v58 = vpop.f32.mrb[195].mxu1 }
 0x33d   : > { %v5112_v21 = vadd.f32 %v5111_v19, %v5065_v46  ;;  %v5009_v20 = vadd.f32 %v5008_v9, %v4721_v25  ;;  %v4725_v29 = vmul.f32 %v8496_v49, %v4293_v16  ;;  %v8946_v25 = vld [vmem:[#allocation50_spill] sm:$0xff] }
 0x33e   : > { %v5067_v1 = vmul.f32 %v4722_v63, %v4722_v63  ;;  %v4723_v50 = vmul.f32 %v8480_v42, %v4291_v13  ;;  %v6019_v53 = vpop.f32.mrb[180].mxu0 }
 0x33f   : > { %v5010_v47 = vadd.f32 %v5009_v20, %v4722_v63  ;;  %v5113_v38 = vadd.f32 %v5112_v21, %v5066_v24  ;;  %v5639_v48 = vpack.c.bf16 %v4725_v29, %v4724_v18  ;;  %v4163_v39 = vpop.f32.mrb[181].mxu0  ;;  %v4172_v51 = vadd.f32 %v6019_v53, %v8449_v12 }
 0x340   : > { %v5634_v45 = vpack.c.bf16 %v4723_v50, %v4722_v63  ;;  %v5068_v5 = vmul.f32 %v4723_v50, %v4723_v50  ;;  %v4164_v59 = vadd.f32 %v4163_v39, %v8946_v25  ;;  %v6020_v49 = vpop.f32.mrb[182].mxu0  ;;  %v5069_v12 = vmul.f32 %v4724_v18, %v4724_v18  ;;  %v8953_v25 = vld [vmem:[#allocation25_spill] sm:$0xff] }
 0x341   : > { %v5114_v2 = vadd.f32 %v5113_v38, %v5067_v1  ;;  %5742 = vst [vmem:[%s6246_s18 + $0x48] sm:$0xff] %v5639_v48   ;;  %v5011_v41 = vadd.f32 %v5010_v47, %v4723_v50  ;;  %v4175_v42 = vadd.f32 %v6020_v49, %v8947_v55  ;;  %v4166_v30 = vpop.f32.mrb[183].mxu0  ;;  %v4296_v35 = vadd.f32 %v4172_v51, %v8948_v17  ;;  %v8587_v33 = vpop.f32.mrb[196].mxu1  ;;  %v8954_v49 = vld [vmem:[#allocation21_spill] sm:$0xff] }
 0x342   : > { %5741 = vst [vmem:[%s6246_s18 + $0x40] sm:$0xff] %v5634_v45   ;;  %v4294_v52 = vadd.f32 %v4164_v59, %v8949_v4  ;;  %v4167_v11 = vadd.f32 %v4166_v30, %v8950_v44  ;;  %v3996_v46 = vpop.f32.mrb[197].mxu1  ;;  %v5070_v9 = vmul.f32 %v4725_v29, %v4725_v29  ;;  %v8599_v38 = vpop.permute.xlu1 %4623 }
 0x343   : > { %v5012_v36 = vadd.f32 %v5011_v41, %v4724_v18  ;;  %v5115_v7 = vadd.f32 %v5114_v2, %v5068_v5  ;;  %v4297_v6 = vadd.f32 %v4175_v42, %v8951_v60  ;;  %v8592_v54 = vpop.f32.mrb[198].mxu1  ;;  %v4728_v63 = vmul.f32 %v8526_v57, %v4296_v35  ;;  %v8596_v18 = vpop.permute.xlu0 %4618  ;;  %v8955_v41 = vld [vmem:[#allocation47_spill] sm:$0xff] }
 0x344   : > { %v4726_v19 = vmul.f32 %v8506_v40, %v4294_v52  ;;  %v4295_v16 = vadd.f32 %v4167_v11, %v8952_v32  ;;  %v3999_v21 = vpop.f32.mrb[199].mxu1  ;;  %v8957_v11 = vld [vmem:[#allocation22_spill] sm:$0xff] }
 0x345   : > { %v5116_v24 = vadd.f32 %v5115_v7, %v5069_v12  ;;  %v5013_v22 = vadd.f32 %v5012_v36, %v4725_v29  ;;  %v4729_v13 = vmul.f32 %v8529_v26, %v4297_v6  ;;  %v5073_v30 = vmul.f32 %v4728_v63, %v4728_v63 }
 0x346   : > { %v5071_v20 = vmul.f32 %v4726_v19, %v4726_v19  ;;  %v4727_v58 = vmul.f32 %v8512_v0, %v4295_v16  ;;  %v6023_v1 = vpop.f32.mrb[184].mxu0 }
 0x347   : > { %v5014_v40 = vadd.f32 %v5013_v22, %v4726_v19  ;;  %v5117_v50 = vadd.f32 %v5116_v24, %v5070_v9  ;;  %v5649_v53 = vpack.c.bf16 %v4729_v13, %v4728_v63  ;;  %v4179_v47 = vpop.f32.mrb[185].mxu0  ;;  %v4188_v29 = vadd.f32 %v6023_v1, %v8493_v28  ;;  %v8612_v52 = vpop.permute.xlu0 %4628 }
 0x348   : > { %v5644_v48 = vpack.c.bf16 %v4727_v58, %v4726_v19  ;;  %v5072_v57 = vmul.f32 %v4727_v58, %v4727_v58  ;;  %v4180_v26 = vadd.f32 %v4179_v47, %v8469_v56  ;;  %v6024_v39 = vpop.f32.mrb[186].mxu0  ;;  %v8956_v56 = vld [vmem:[#allocation26_spill] sm:$0xff]  ;;  %v5074_v44 = vmul.f32 %v4729_v13, %v4729_v13  ;;  %v8620_v19 = vpop.permute.xlu1 %4633  ;;  %v8958_v47 = vld [vmem:[#allocation33_spill] sm:$0xff] }
 0x349   : > { %v5118_v45 = vadd.f32 %v5117_v50, %v5071_v20  ;;  %5744 = vst [vmem:[%s6246_s18 + $0x58] sm:$0xff] %v5649_v53   ;;  %v5015_v5 = vadd.f32 %v5014_v40, %v4727_v58  ;;  %v4191_v0 = vadd.f32 %v6024_v39, %v8500_v43  ;;  %v4182_v51 = vpop.f32.mrb[187].mxu0  ;;  %v4300_v59 = vadd.f32 %v4188_v29, %v8953_v25  ;;  %v8609_v42 = vpop.f32.mrb[200].mxu1 }
 0x34a   : > { %5743 = vst [vmem:[%s6246_s18 + $0x50] sm:$0xff] %v5644_v48   ;;  %v4298_v2 = vadd.f32 %v4180_v26, %v8954_v49  ;;  %v4183_v55 = vadd.f32 %v4182_v51, %v8955_v41  ;;  %v4004_v4 = vpop.f32.mrb[201].mxu1  ;;  %v8961_v49 = vld [vmem:[#allocation30_spill] sm:$0xff] }
 0x34b   : > { %v5016_v28 = vadd.f32 %v5015_v5, %v4728_v63  ;;  %v5119_v17 = vadd.f32 %v5118_v45, %v5072_v57  ;;  %v4301_v35 = vadd.f32 %v4191_v0, %v8956_v56  ;;  %v8616_v36 = vpop.f32.mrb[202].mxu1  ;;  %v4732_v60 = vmul.f32 %v8557_v23, %v4300_v59  ;;  %v8959_v57 = vld [vmem:[#allocation29_spill] sm:$0xff]  ;;  %v8960_v5 = vld [vmem:[#allocation34_spill] sm:$0xff] }
 0x34c   : > { %v4730_v43 = vmul.f32 %v8542_v61, %v4298_v2  ;;  %v4299_v12 = vadd.f32 %v4183_v55, %v8957_v11  ;;  %v4007_v9 = vpop.f32.mrb[203].mxu1  ;;  %v4644_v25 = vpop.permute.xlu1 %4643 }
 0x34d   : > { %v5120_v7 = vadd.f32 %v5119_v17, %v5073_v30  ;;  %v5017_v6 = vadd.f32 %v5016_v28, %v4729_v13  ;;  %v4733_v46 = vmul.f32 %v8566_v37, %v4301_v35 }
 0x34e   : > { %v5075_v32 = vmul.f32 %v4730_v43, %v4730_v43  ;;  %v4731_v16 = vmul.f32 %v8550_v27, %v4299_v12  ;;  %v6027_v24 = vpop.f32.mrb[188].mxu0  ;;  %v4639_v27 = vpop.permute.xlu0 %4638 }
 0x34f   : > { %v5018_v61 = vadd.f32 %v5017_v6, %v4730_v43  ;;  %v5121_v63 = vadd.f32 %v5120_v7, %v5074_v44  ;;  %v5659_v22 = vpack.c.bf16 %v4733_v46, %v4732_v60  ;;  %v4195_v21 = vpop.f32.mrb[189].mxu0  ;;  %v4204_v23 = vadd.f32 %v6027_v24, %v8539_v15  ;;  %v8962_v24 = vld [vmem:[#allocation37_spill] sm:$0xff] }
 0x350   : > { %v5654_v20 = vpack.c.bf16 %v4731_v16, %v4730_v43  ;;  %v5076_v58 = vmul.f32 %v4731_v16, %v4731_v16  ;;  %v4196_v13 = vadd.f32 %v4195_v21, %v8516_v34  ;;  %v6028_v37 = vpop.f32.mrb[190].mxu0  ;;  %v5077_v15 = vmul.f32 %v4732_v60, %v4732_v60 }
 0x351   : > { %v5122_v1 = vadd.f32 %v5121_v63, %v5075_v32  ;;  %5746 = vst [vmem:[%s6246_s18 + $0x68] sm:$0xff] %v5659_v22   ;;  %v5019_v40 = vadd.f32 %v5018_v61, %v4731_v16  ;;  %v4207_v50 = vadd.f32 %v6028_v37, %v8546_v31  ;;  %v4198_v53 = vpop.f32.mrb[191].mxu0  ;;  %v4304_v48 = vadd.f32 %v4204_v23, %v8958_v47  ;;  %v8631_v39 = vpop.f32.mrb[204].mxu1  ;;  %v8963_v63 = vld [vmem:[#allocation38_spill] sm:$0xff]  ;;  %v8964_v23 = vld [vmem:[#allocation31_spill] sm:$0xff] }
 0x352   : > { %5745 = vst [vmem:[%s6246_s18 + $0x60] sm:$0xff] %v5654_v20   ;;  %v4302_v29 = vadd.f32 %v4196_v13, %v8959_v57  ;;  %v4199_v26 = vadd.f32 %v4198_v53, %v8521_v3  ;;  %v4012_v51 = vpop.f32.mrb[205].mxu1  ;;  %v5078_v59 = vmul.f32 %v4733_v46, %v4733_v46  ;;  %v4649_v12 = vpop.permute.xlu0 %4648 }
 0x353   : > { %v5020_v45 = vadd.f32 %v5019_v40, %v4732_v60  ;;  %v5123_v34 = vadd.f32 %v5122_v1, %v5076_v58  ;;  %v4305_v0 = vadd.f32 %v4207_v50, %v8960_v5  ;;  %v4013_v41 = vpop.f32.mrb[206].mxu1  ;;  %v4736_v30 = vmul.f32 %v8596_v18, %v4304_v48  ;;  %v4654_v16 = vpop.permute.xlu1 %4653  ;;  %v8965_v40 = vld [vmem:[#allocation27_spill] sm:$0xff] }
 0x354   : > { %v4734_v31 = vmul.f32 %v8575_v8, %v4302_v29  ;;  %v4303_v2 = vadd.f32 %v4199_v26, %v8961_v49  ;;  %v4015_v17 = vpop.f32.mrb[207].mxu1 }
 0x355   : > { %v5124_v55 = vadd.f32 %v5123_v34, %v5077_v15  ;;  %v5021_v28 = vadd.f32 %v5020_v45, %v4733_v46  ;;  %v4737_v3 = vmul.f32 %v8599_v38, %v4305_v0 }
 0x356   : > { %v5079_v56 = vmul.f32 %v4734_v31, %v4734_v31  ;;  %v4735_v35 = vmul.f32 %v8581_v10, %v4303_v2  ;;  %v6031_v4 = vpop.f32.mrb[192].mxu0  ;;  %v4659_v26 = vpop.permute.xlu0 %4658 }
 0x357   : > { %v5022_v44 = vadd.f32 %v5021_v28, %v4734_v31  ;;  %v5125_v43 = vadd.f32 %v5124_v55, %v5078_v59  ;;  %v5669_v11 = vpack.c.bf16 %v4737_v3, %v4736_v30  ;;  %v4211_v8 = vpop.f32.mrb[193].mxu0  ;;  %v4220_v6 = vadd.f32 %v6031_v4, %v8587_v33  ;;  %v4664_v59 = vpop.permute.xlu1 %4663 }
 0x358   : > { %v5664_v7 = vpack.c.bf16 %v4735_v35, %v4734_v31  ;;  %v5080_v60 = vmul.f32 %v4735_v35, %v4735_v35  ;;  %v4212_v18 = vadd.f32 %v4211_v8, %v8563_v14  ;;  %v6032_v46 = vpop.f32.mrb[194].mxu0  ;;  %v5081_v33 = vmul.f32 %v4736_v30, %v4736_v30 }
 0x359   : > { %v5126_v38 = vadd.f32 %v5125_v43, %v5079_v56  ;;  %5748 = vst [vmem:[%s6246_s18 + $0x78] sm:$0xff] %v5669_v11   ;;  %v5023_v9 = vadd.f32 %v5022_v44, %v4735_v35  ;;  %v4223_v32 = vadd.f32 %v6032_v46, %v8592_v54  ;;  %v4214_v10 = vpop.f32.mrb[195].mxu0  ;;  %v4308_v61 = vadd.f32 %v4220_v6, %v8962_v24  ;;  %v8647_v20 = vpop.f32.mrb[208].mxu1  ;;  %v8967_v56 = vld [vmem:[#allocation39_spill] sm:$0xff]  ;;  %v8969_v46 = vld [vmem:[#allocation40_spill] sm:$0xff] }
 0x35a   : > { %5747 = vst [vmem:[%s6246_s18 + $0x70] sm:$0xff] %v5664_v7   ;;  %v4306_v22 = vadd.f32 %v4212_v18, %v8963_v63  ;;  %v4215_v21 = vadd.f32 %v4214_v10, %v8570_v62  ;;  %v4020_v37 = vpop.f32.mrb[209].mxu1  ;;  %v5082_v1 = vmul.f32 %v4737_v3, %v4737_v3 }
 0x35b   : > { %v5024_v58 = vadd.f32 %v5023_v9, %v4736_v30  ;;  %v5127_v14 = vadd.f32 %v5126_v38, %v5080_v60  ;;  %v4309_v13 = vadd.f32 %v4223_v32, %v8964_v23  ;;  %v8652_v53 = vpop.f32.mrb[210].mxu1  ;;  %v4740_v48 = vmul.f32 %v4639_v27, %v4308_v61  ;;  %v4669_v60 = vpop.permute.xlu0 %4668 }
 0x35c   : > { %v4738_v54 = vmul.f32 %v8612_v52, %v4306_v22  ;;  %v4307_v50 = vadd.f32 %v4215_v21, %v8965_v40  ;;  %v4023_v62 = vpop.f32.mrb[211].mxu1 }
 0x35d   : > { %v5128_v47 = vadd.f32 %v5127_v14, %v5081_v33  ;;  %v5025_v57 = vadd.f32 %v5024_v58, %v4737_v3  ;;  %v4741_v29 = vmul.f32 %v4644_v25, %v4309_v13  ;;  %v5085_v43 = vmul.f32 %v4740_v48, %v4740_v48  ;;  %v8971_v62 = vld [vmem:[#allocation41_spill] sm:$0xff] }
 0x35e   : > { %v5083_v15 = vmul.f32 %v4738_v54, %v4738_v54  ;;  %v4739_v45 = vmul.f32 %v8620_v19, %v4307_v50  ;;  %v6035_v34 = vpop.f32.mrb[196].mxu0  ;;  %v8966_v19 = vld [vmem:[#allocation28_spill] sm:$0xff] }
 0x35f   : > { %v5026_v5 = vadd.f32 %v5025_v57, %v4738_v54  ;;  %v5129_v0 = vadd.f32 %v5128_v47, %v5082_v1  ;;  %v5679_v51 = vpack.c.bf16 %v4741_v29, %v4740_v48  ;;  %v4227_v52 = vpop.f32.mrb[197].mxu0  ;;  %v4236_v2 = vadd.f32 %v6035_v34, %v8631_v39  ;;  %v8968_v39 = vld [vmem:[#allocation35_spill] sm:$0xff]  ;;  %v4679_v57 = vpop.permute.xlu0 %4678 }
 0x360   : > { %v5674_v31 = vpack.c.bf16 %v4739_v45, %v4738_v54  ;;  %v5084_v49 = vmul.f32 %v4739_v45, %v4739_v45  ;;  %v4228_v27 = vadd.f32 %v4227_v52, %v8609_v42  ;;  %v6036_v25 = vpop.f32.mrb[198].mxu0  ;;  %v5086_v6 = vmul.f32 %v4741_v29, %v4741_v29 }
 0x361   : > { %v5130_v55 = vadd.f32 %v5129_v0, %v5083_v15  ;;  %5750 = vst [vmem:[%s6246_s18 + $0x88] sm:$0xff] %v5679_v51   ;;  %v5027_v30 = vadd.f32 %v5026_v5, %v4739_v45  ;;  %v4239_v28 = vadd.f32 %v6036_v25, %v4013_v41  ;;  %v4230_v3 = vpop.f32.mrb[199].mxu0  ;;  %v4312_v17 = vadd.f32 %v4236_v2, %v8966_v19  ;;  %v4026_v44 = vpop.f32.mrb[212].mxu1  ;;  %v8972_v51 = vld [vmem:[#allocation43_spill] sm:$0xff]  ;;  %v8973_v2 = vld [vmem:[#allocation42_spill] sm:$0xff] }
 0x362   : > { %5749 = vst [vmem:[%s6246_s18 + $0x80] sm:$0xff] %v5674_v31   ;;  %v4310_v35 = vadd.f32 %v4228_v27, %v8967_v56  ;;  %v4231_v4 = vadd.f32 %v4230_v3, %v8616_v36  ;;  %v4028_v42 = vpop.f32.mrb[213].mxu1  ;;  %v4674_v36 = vpop.permute.xlu1 %4673 }
 0x363   : > { %v5028_v11 = vadd.f32 %v5027_v30, %v4740_v48  ;;  %v5131_v8 = vadd.f32 %v5130_v55, %v5084_v49  ;;  %v4313_v7 = vadd.f32 %v4239_v28, %v8968_v39  ;;  %v4029_v38 = vpop.f32.mrb[214].mxu1  ;;  %v4744_v32 = vmul.f32 %v4659_v26, %v4312_v17 }
 0x364   : > { %v4742_v18 = vmul.f32 %v4649_v12, %v4310_v35  ;;  %v4311_v41 = vadd.f32 %v4231_v4, %v8969_v46  ;;  %v4031_v61 = vpop.f32.mrb[215].mxu1 }
 0x365   : > { %v5132_v9 = vadd.f32 %v5131_v8, %v5085_v43  ;;  %v5029_v10 = vadd.f32 %v5028_v11, %v4741_v29  ;;  %v4745_v24 = vmul.f32 %v4664_v59, %v4313_v7  ;;  %v5089_v34 = vmul.f32 %v4744_v32, %v4744_v32  ;;  %v4689_v11 = vpop.permute.xlu0 %4688 }
 0x366   : > { %v5087_v63 = vmul.f32 %v4742_v18, %v4742_v18  ;;  %v4743_v22 = vmul.f32 %v4654_v16, %v4311_v41  ;;  %v6039_v21 = vpop.f32.mrb[200].mxu0  ;;  %v8970_v16 = vld [vmem:[#allocation36_spill] sm:$0xff]  ;;  %v4684_v59 = vpop.permute.xlu1 %4683  ;;  %v8974_v41 = vld [vmem:[#allocation46_spill] sm:$0xff] }
 0x367   : > { %v5030_v33 = vadd.f32 %v5029_v10, %v4742_v18  ;;  %v5133_v58 = vadd.f32 %v5132_v9, %v5086_v6  ;;  %v5689_v14 = vpack.c.bf16 %v4745_v24, %v4744_v32  ;;  %v4243_v23 = vpop.f32.mrb[201].mxu0  ;;  %v4252_v37 = vadd.f32 %v6039_v21, %v4026_v44 }
 0x368   : > { %v5684_v13 = vpack.c.bf16 %v4743_v22, %v4742_v18  ;;  %v5088_v12 = vmul.f32 %v4743_v22, %v4743_v22  ;;  %v4244_v1 = vadd.f32 %v4243_v23, %v8647_v20  ;;  %v6040_v54 = vpop.f32.mrb[202].mxu0  ;;  %v5090_v31 = vmul.f32 %v4745_v24, %v4745_v24 }
 0x369   : > { %v5134_v40 = vadd.f32 %v5133_v58, %v5087_v63  ;;  %5752 = vst [vmem:[%s6246_s18 + $0x98] sm:$0xff] %v5689_v14   ;;  %v5031_v50 = vadd.f32 %v5030_v33, %v4743_v22  ;;  %v4255_v47 = vadd.f32 %v6040_v54, %v4029_v38  ;;  %v4246_v48 = vpop.f32.mrb[203].mxu0  ;;  %v4316_v29 = vadd.f32 %v4252_v37, %v8970_v16  ;;  %v4034_v45 = vpop.f32.mrb[216].mxu1  ;;  %v8975_v33 = vld [vmem:[#allocation44_spill] sm:$0xff] }
 0x36a   : > { %5751 = vst [vmem:[%s6246_s18 + $0x90] sm:$0xff] %v5684_v13   ;;  %v4314_v26 = vadd.f32 %v4244_v1, %v8971_v62  ;;  %v4247_v15 = vadd.f32 %v4246_v48, %v8652_v53  ;;  %v4036_v52 = vpop.f32.mrb[217].mxu1  ;;  %v4694_v46 = vpop.permute.xlu1 %4693 }
 0x36b   : > { %v5032_v5 = vadd.f32 %v5031_v50, %v4744_v32  ;;  %v5135_v0 = vadd.f32 %v5134_v40, %v5088_v12  ;;  %v4317_v20 = vadd.f32 %v4255_v47, %v8972_v51  ;;  %v4037_v25 = vpop.f32.mrb[218].mxu1  ;;  %v4748_v30 = vmul.f32 %v4679_v57, %v4316_v29  ;;  %v8976_v12 = vld [vmem:[#allocation55_spill] sm:$0xff]  ;;  %v4699_v40 = vpop.permute.xlu0 %4698  ;;  %v8977_v29 = vld [vmem:[#allocation60_spill] sm:$0xff] }
 0x36c   : > { %v4746_v49 = vmul.f32 %v4669_v60, %v4314_v26  ;;  %v4315_v27 = vadd.f32 %v4247_v15, %v8973_v2  ;;  %v4039_v19 = vpop.f32.mrb[219].mxu1 }
 0x36d   : > { %v5136_v55 = vadd.f32 %v5135_v0, %v5089_v34  ;;  %v5033_v28 = vadd.f32 %v5032_v5, %v4745_v24  ;;  %v4749_v3 = vmul.f32 %v4684_v59, %v4317_v20  ;;  %v5093_v10 = vmul.f32 %v4748_v30, %v4748_v30 }
 0x36e   : > { %v5091_v53 = vmul.f32 %v4746_v49, %v4746_v49  ;;  %v4747_v17 = vmul.f32 %v4674_v36, %v4315_v27  ;;  %v6043_v56 = vpop.f32.mrb[204].mxu0  ;;  %v4704_v26 = vpop.permute.xlu1 %4703 }
 0x36f   : > { %v5034_v35 = vadd.f32 %v5033_v28, %v4746_v49  ;;  %v5137_v4 = vadd.f32 %v5136_v55, %v5090_v31  ;;  %v5699_v44 = vpack.c.bf16 %v4749_v3, %v4748_v30  ;;  %v4259_v43 = vpop.f32.mrb[205].mxu0  ;;  %v5094_v22 = vmul.f32 %v4749_v3, %v4749_v3 }
 0x370   : > { %v5694_v8 = vpack.c.bf16 %v4747_v17, %v4746_v49  ;;  %v5092_v39 = vmul.f32 %v4747_v17, %v4747_v17  ;;  %v4260_v7 = vadd.f32 %v4259_v43, %v4034_v45  ;;  %v6044_v42 = vpop.f32.mrb[206].mxu0  ;;  %v5050_v43 = vld [vmem:[%s8704_s9] sm:$0x1] }
 0x371   : > { %v5138_v60 = vadd.f32 %v5137_v4, %v5091_v53  ;;  %5754 = vst [vmem:[%s6246_s18 + $0xa8] sm:$0xff] %v5699_v44   ;;  %v5035_v6 = vadd.f32 %v5034_v35, %v4747_v17  ;;  %v4262_v18 = vpop.f32.mrb[207].mxu0  ;;  %v4042_v32 = vpop.f32.mrb[220].mxu1  ;;  %v4994_v35 = vld [vmem:[%s8703_s8] sm:$0x1] }
 0x372   : > { %5753 = vst [vmem:[%s6246_s18 + $0xa0] sm:$0xff] %v5694_v8   ;;  %v4318_v38 = vadd.f32 %v4260_v7, %v8974_v41  ;;  %v4263_v9 = vadd.f32 %v4262_v18, %v4037_v25  ;;  %v4268_v36 = vadd.f32 %v6043_v56, %v4042_v32  ;;  %v4044_v63 = vpop.f32.mrb[221].mxu1 }
 0x373   : > { %v5036_v24 = vadd.f32 %v5035_v6, %v4748_v30  ;;  %v5139_v61 = vadd.f32 %v5138_v60, %v5092_v39  ;;  %v4045_v14 = vpop.f32.mrb[222].mxu1 }
 0x374   : > { %v4750_v21 = vmul.f32 %v4689_v11, %v4318_v38  ;;  %v4319_v58 = vadd.f32 %v4263_v9, %v8975_v33  ;;  %v4320_v37 = vadd.f32 %v4268_v36, %v8976_v12  ;;  %v4271_v1 = vadd.f32 %v6044_v42, %v4045_v14  ;;  %v4047_v54 = vpop.f32.mrb[223].mxu1 }
 0x375   : > { %v5140_v23 = vadd.f32 %v5139_v61, %v5093_v10  ;;  %v5037_v13 = vadd.f32 %v5036_v24, %v4749_v3 }
 0x376   : > { %v5095_v50 = vmul.f32 %v4750_v21, %v4750_v21  ;;  %v4751_v47 = vmul.f32 %v4694_v46, %v4319_v58  ;;  %v4752_v16 = vmul.f32 %v4699_v40, %v4320_v37  ;;  %v4321_v62 = vadd.f32 %v4271_v1, %v8977_v29 }
 0x377   : > { %v5038_v48 = vadd.f32 %v5037_v13, %v4750_v21  ;;  %v5141_v57 = vadd.f32 %v5140_v23, %v5094_v22 }
 0x378   : > { %v5704_v15 = vpack.c.bf16 %v4751_v47, %v4750_v21  ;;  %v5096_v45 = vmul.f32 %v4751_v47, %v4751_v47  ;;  %v5097_v0 = vmul.f32 %v4752_v16, %v4752_v16  ;;  %v4753_v51 = vmul.f32 %v4704_v26, %v4321_v62 }
 0x379   : > { %v5142_v34 = vadd.f32 %v5141_v57, %v5095_v50  ;;  %v5039_v5 = vadd.f32 %v5038_v48, %v4751_v47 }
 0x37a   : > { %5755 = vst [vmem:[%s6246_s18 + $0xb0] sm:$0xff] %v5704_v15   ;;  %v5709_v59 = vpack.c.bf16 %v4753_v51, %v4752_v16  ;;  %v5098_v31 = vmul.f32 %v4753_v51, %v4753_v51 }
 0x37b   : > { %v5143_v20 = vadd.f32 %v5142_v34, %v5096_v45  ;;  %v5040_v52 = vadd.f32 %v5039_v5, %v4752_v16 }
 0x37c   : > { %5756 = vst [vmem:[%s6246_s18 + $0xb8] sm:$0xff] %v5709_v59  }
 0x37d   : > { %v5144_v49 = vadd.f32 %v5143_v20, %v5097_v0  ;;  %v5041_v2 = vadd.f32 %v5040_v52, %v4753_v51 }
 0x37f   : > { %v5042_v27 = vrot.slane %v5041_v2, 4  ;;  %v5145_v25 = vadd.f32 %v5144_v49, %v5098_v31 }
 0x381   : > { %v5043_v55 = vadd.f32 %v5042_v27, %v5041_v2  ;;  %v5146_v30 = vrot.slane %v5145_v25, 4 }
 0x383   : > { %v5044_v28 = vrot.slane %v5043_v55, 2  ;;  %v5147_v3 = vadd.f32 %v5146_v30, %v5145_v25 }
 0x385   : > { %v5045_v19 = vadd.f32 %v5044_v28, %v5043_v55  ;;  %v5148_v53 = vrot.slane %v5147_v3, 2 }
 0x387   : > { %v5046_v17 = vrot.slane %v5045_v19, 1  ;;  %v5149_v56 = vadd.f32 %v5148_v53, %v5147_v3 }
 0x389   : > { %v5047_v4 = vadd.f32 %v5046_v17, %v5045_v19  ;;  %v5150_v44 = vrot.slane %v5149_v56, 1 }
 0x38b   : > { %v5048_v11 = vadd.f32 %v5047_v4, %v4994_v35  ;;  %v5151_v8 = vadd.f32 %v5150_v44, %v5149_v56 }
 0x38d   : > { %5049 = vst [vmem:[%s8703_s8] sm:$0x1] %v5048_v11  ;;  %v5152_v39 = vadd.f32 %v5151_v8, %v5050_v43 }
 0x38f   : > { %5153 = vst [vmem:[%s8704_s9] sm:$0x1] %v5152_v39 }
 0x390 PF: > { %s20_s30 = sadd.s32 1, %s6175_s30  }
 0x391   : > { %p17_p5 = scmp.ge.s32.totalorder %s20_s30, 4  }
 0x393   :  { %19 = sbr.rel (!%p17_p5) target bundleno = 1 (0x1), region = 100 }

</bundles_post_ra>
